<compile_context>
chip_gen: v7x
topology: tpu7x:2x2x1
jax: 0.10.0
libtpu: 0.0.40
codegen_flags: <defaults>
</compile_context>

<pallas_src>
import functools

import numpy as np
import jax
import jax.numpy as jnp
from jax.experimental import pallas as pl
from jax.experimental.pallas import tpu as pltpu

_WOFF = 8       # sublane-aligned column offset of activations inside scratch
_COUT_PAD = 8   # 1x1-conv output channels padded to one sublane tile


# ---------------------------------------------------------------------------
# trace-time constant: 1-D bilinear (align_corners=True) interpolation matrix
# ---------------------------------------------------------------------------
def _interp_matrix(in_size, out_size):
    m = np.zeros((out_size, in_size), np.float32)
    for o in range(out_size):
        c = 0.0 if out_size == 1 else o * (in_size - 1) / (out_size - 1)
        i0 = min(int(np.floor(c)), in_size - 1)
        i1 = min(i0 + 1, in_size - 1)
        f = np.float32(c - i0)
        m[o, i0] += 1.0 - f
        m[o, i1] += f
    return m


# ---------------------------------------------------------------------------
# fused Pallas kernel: whole batch in one invocation (batch folded into M)
# ---------------------------------------------------------------------------
def _unet_kernel(xpad_ref, w1_ref, b1_ref, w2_ref, b2_ref, w3_ref, b3_ref,
                 upT_ref, w4_ref, b4_ref, o_ref, pad2_ref, pad3_ref,
                 *, n, h, w, cin, c, cout):
    hp, wp = h // 2, w // 2
    m1 = n * h * w            # batch folded into the matmul M dimension
    m2 = n * hp * wp

    def conv3x3_relu(tap_of, w_ref, b_ref, rows, k):
        """'SAME' 3x3 conv as the sum of 9 shifted (rows,k)x(k,c) MXU dots."""
        acc = None
        for dy in range(3):
            for dx in range(3):
                tap = tap_of(dy, dx).reshape(rows, k)
                d = jnp.dot(tap, w_ref[dy, dx],
                            preferred_element_type=jnp.float32)
                acc = d if acc is None else acc + d
        return jnp.maximum(acc + b_ref[...], 0.0)

    # ---- encoder conv1 (cin -> c): taps straight off the halo-padded input --
    a1 = conv3x3_relu(
        lambda dy, dx: xpad_ref[:, pl.ds(dy, h), pl.ds(dx, w), :],
        w1_ref, b1_ref, m1, cin)                                   # (m1, c)

    # ---- encoder conv2 (c -> c): zero-bordered VMEM scratch, 9 shifted dots -
    pad2_ref[...] = jnp.zeros_like(pad2_ref)      # once per call (single step)
    pad2_ref[:, pl.ds(1, h), pl.ds(_WOFF, w), :] = a1.reshape(n, h, w, c)
    a2 = conv3x3_relu(
        lambda dy, dx: pad2_ref[:, pl.ds(dy, h), pl.ds(_WOFF - 1 + dx, w), :],
        w2_ref, b2_ref, m1, c)                                     # (m1, c)

    # ---- 2x2 maxpool on the VPU: park a2 in the scratch interior, read the
    # four stride-2 corner views and take the elementwise max (no MXU dots,
    # no quadratic gather constants) -------------------------------------------
    pad2_ref[:, pl.ds(1, h), pl.ds(_WOFF, w), :] = a2.reshape(n, h, w, c)
    pooled = None
    for dy in range(2):
        for dx in range(2):
            corner = pad2_ref[:, pl.ds(1 + dy, hp, stride=2),
                              pl.ds(_WOFF + dx, wp, stride=2), :]
            pooled = corner if pooled is None else jnp.maximum(pooled, corner)
    # pooled: (n, hp, wp, c)

    # ---- decoder conv3 (c -> c) ---------------------------------------------
    pad3_ref[...] = jnp.zeros_like(pad3_ref)
    pad3_ref[:, pl.ds(1, hp), pl.ds(_WOFF, wp), :] = pooled
    a3 = conv3x3_relu(
        lambda dy, dx: pad3_ref[:, pl.ds(dy, hp), pl.ds(_WOFF - 1 + dx, wp), :],
        w3_ref, b3_ref, m2, c)                                     # (m2, c)

    # ---- 1x1 conv at LOW resolution, then bilinear-2x upsample --------------
    # 1x1 conv (channel mix) and bilinear upsample (spatial mix) commute, so
    # applying the 1x1 first shrinks the upsample dot 8x and yields a
    # channel-major (cout, h*w) tile per image -> lane-dense NCHW-style store.
    z = jnp.dot(a3, w4_ref[...], preferred_element_type=jnp.float32)  # (m2, 8)
    for i in range(n):
        z_i = z[i * hp * wp:(i + 1) * hp * wp]                     # (hp*wp, 8)
        out_t = jnp.dot(jnp.transpose(z_i), upT_ref[...],
                        preferred_element_type=jnp.float32) + b4_ref[...]
        o_ref[i] = out_t[:cout].astype(o_ref.dtype)                # (cout, h*w)


# ---------------------------------------------------------------------------
# public forward (NCHW in / NCHW out, matching the PyTorch module)
# ---------------------------------------------------------------------------
def simple_unet_forward(x_nchw, params):
    n, cin, h, w = x_nchw.shape
    assert h % 2 == 0 and w % 2 == 0, "MaxPool2d(2) needs even spatial dims"
    hp, wp = h // 2, w // 2
    c = params["w1"].shape[-1]        # 64
    cout = params["w4"].shape[-1]     # 3

    # The only host-side layout work on the input: NCHW->NHWC + 1px halo pad
    # (one tiny fused XLA op, ~6 KB).  The kernel's output is already
    # channel-major, so the wrapper only reshapes it to NCHW.
    x = jnp.transpose(x_nchw, (0, 2, 3, 1)).astype(jnp.float32)
    xpad = jnp.pad(x, ((0, 0), (1, 1), (1, 1), (0, 0)))            # (n,h+2,w+2,cin)

    # trace-time constants
    up_t = jnp.asarray(
        np.kron(_interp_matrix(hp, h), _interp_matrix(wp, w)).T)   # (hp*wp, h*w)
    w4p = jnp.zeros((c, _COUT_PAD), jnp.float32).at[:, :cout].set(params["w4"])
    b4p = jnp.zeros((_COUT_PAD, 1), jnp.float32).at[:cout, 0].set(params["b4"])
    b1 = params["b1"].reshape(1, c)
    b2 = params["b2"].reshape(1, c)
    b3 = params["b3"].reshape(1, c)

    kernel = functools.partial(_unet_kernel, n=n, h=h, w=w,
                               cin=cin, c=c, cout=cout)

    m1, m2 = n * h * w, n * hp * wp
    flops = 2 * (m1 * 9 * cin * c            # conv1
                 + m1 * 9 * c * c            # conv2
                 + m2 * 9 * c * c            # conv3
                 + m2 * c * _COUT_PAD        # 1x1 conv (low res)
                 + n * _COUT_PAD * hp * wp * h * w)   # upsample
    bytes_accessed = 4 * (xpad.size + 9 * cin * c + 2 * 9 * c * c + 3 * c
                          + hp * wp * h * w + c * _COUT_PAD + _COUT_PAD
                          + n * cout * h * w)

    out = pl.pallas_call(
        kernel,
        out_shape=jax.ShapeDtypeStruct((n, cout, h * w), jnp.float32),
        grid=(1,),
        in_specs=[
            pl.BlockSpec((n, h + 2, w + 2, cin), lambda i: (0, 0, 0, 0)),  # padded x
            pl.BlockSpec((3, 3, cin, c), lambda i: (0, 0, 0, 0)),          # w1
            pl.BlockSpec((1, c), lambda i: (0, 0)),                        # b1
            pl.BlockSpec((3, 3, c, c), lambda i: (0, 0, 0, 0)),            # w2
            pl.BlockSpec((1, c), lambda i: (0, 0)),                        # b2
            pl.BlockSpec((3, 3, c, c), lambda i: (0, 0, 0, 0)),            # w3
            pl.BlockSpec((1, c), lambda i: (0, 0)),                        # b3
            pl.BlockSpec((hp * wp, h * w), lambda i: (0, 0)),              # up_m^T
            pl.BlockSpec((c, _COUT_PAD), lambda i: (0, 0)),                # w4 (padded)
            pl.BlockSpec((_COUT_PAD, 1), lambda i: (0, 0)),                # b4 (padded, col)
        ],
        out_specs=pl.BlockSpec((n, cout, h * w), lambda i: (0, 0, 0)),
        scratch_shapes=[
            pltpu.VMEM((n, h + 2, 2 * _WOFF + w, c), jnp.float32),    # conv2 pad
            pltpu.VMEM((n, hp + 2, 2 * _WOFF + wp, c), jnp.float32),  # conv3 pad
        ],
        compiler_params=pltpu.CompilerParams(
            dimension_semantics=("arbitrary",)),
        cost_estimate=pl.CostEstimate(flops=flops, transcendentals=0,
                                      bytes_accessed=bytes_accessed),
    )(xpad, params["w1"], b1, params["w2"], b2, params["w3"], b3,
      up_t, w4p, b4p)

    return out.reshape(n, cout, h, w)                              # already NCHW


def init_params(key):
    """Deterministic PyTorch-default-style init (uniform +-1/sqrt(fan_in))."""
    ks = jax.random.split(key, 8)

    def u(k, shape, fan_in):
        bound = 1.0 / np.sqrt(fan_in)
        return jax.random.uniform(k, shape, jnp.float32, -bound, bound)

    return dict(
        w1=u(ks[0], (3, 3, 3, 64), 3 * 9),   b1=u(ks[1], (64,), 3 * 9),
        w2=u(ks[2], (3, 3, 64, 64), 64 * 9), b2=u(ks[3], (64,), 64 * 9),
        w3=u(ks[4], (3, 3, 64, 64), 64 * 9), b3=u(ks[5], (64,), 64 * 9),
        w4=u(ks[6], (64, 3), 64),            b4=u(ks[7], (3,), 64),
    )


# ---------------------------------------------------------------------------
# pure-JAX reference (sanity check of the fused Pallas kernel)
# ---------------------------------------------------------------------------
def reference_forward(x_nchw, params):
    x = jnp.transpose(x_nchw, (0, 2, 3, 1))
    dn = ("NHWC", "HWIO", "NHWC")

    def conv(x, w, b):
        return jax.lax.conv_general_dilated(x, w, (1, 1), "SAME",
                                            dimension_numbers=dn) + b

    x = jax.nn.relu(conv(x, params["w1"], params["b1"]))
    x = jax.nn.relu(conv(x, params["w2"], params["b2"]))
    x = jax.lax.reduce_window(x, -jnp.inf, jax.lax.max,
                              (1, 2, 2, 1), (1, 2, 2, 1), "VALID")
    x = jax.nn.relu(conv(x, params["w3"], params["b3"]))
    ah = jnp.asarray(_interp_matrix(x.shape[1], 2 * x.shape[1]))
    aw = jnp.asarray(_interp_matrix(x.shape[2], 2 * x.shape[2]))
    x = jnp.einsum("oh,nhwc->nowc", ah, x)
    x = jnp.einsum("pw,nowc->nopc", aw, x)
    x = jnp.einsum("nhwc,cd->nhwd", x, params["w4"]) + params["b4"]
    return jnp.transpose(x, (0, 3, 1, 2))


# ---------------------------------------------------------------------------
if __name__ == "__main__":
    key = jax.random.PRNGKey(0)
    k_in, k_par = jax.random.split(key)
    x = jax.random.normal(k_in, (2, 3, 16, 16), jnp.float32)   # NCHW like PyTorch
    params = init_params(k_par)

    fwd = jax.jit(simple_unet_forward)
    out = jax.block_until_ready(fwd(x, params))
    assert out.shape == (2, 3, 16, 16), out.shape

    ref = jax.block_until_ready(reference_forward(x, params))
    max_diff = float(jnp.max(jnp.abs(out - ref)))
    if max_diff > 5e-2:   # loose: default MXU precision (bf16 passes) vs XLA conv
        raise AssertionError(f"Pallas output mismatch, max|diff|={max_diff}")

    print("KERNEL_OK")
</pallas_src>

<mosaic_0001>
module attributes {stable_mosaic.version = 11 : i64} {
  func.func @_unet_kernel(%arg0: i32, %arg1: memref<2x18x18x3xf32, #tpu.memory_space<vmem>>, %arg2: memref<3x3x3x64xf32, #tpu.memory_space<vmem>>, %arg3: memref<1x64xf32, #tpu.memory_space<vmem>>, %arg4: memref<3x3x64x64xf32, #tpu.memory_space<vmem>>, %arg5: memref<1x64xf32, #tpu.memory_space<vmem>>, %arg6: memref<3x3x64x64xf32, #tpu.memory_space<vmem>>, %arg7: memref<1x64xf32, #tpu.memory_space<vmem>>, %arg8: memref<64x256xf32, #tpu.memory_space<vmem>>, %arg9: memref<64x8xf32, #tpu.memory_space<vmem>>, %arg10: memref<8x1xf32, #tpu.memory_space<vmem>>, %arg11: memref<2x3x256xf32, #tpu.memory_space<vmem>>, %arg12: memref<2x18x32x64xf32, #tpu.memory_space<vmem>>, %arg13: memref<2x10x24x64xf32, #tpu.memory_space<vmem>>) attributes {dimension_semantics = [#tpu.dimension_semantics<arbitrary>], iteration_bounds = array<i64: 1>, scalar_prefetch = 0 : i64, scratch_operands = 2 : i64, tpu.core_type = #tpu.core_type<tc>, window_params = [{pipeline_mode = #tpu.pipeline_mode<synchronous>, transform_indices = @transform_0, window_bounds = array<i64: 2, 18, 18, 3>}, {pipeline_mode = #tpu.pipeline_mode<synchronous>, transform_indices = @transform_1, window_bounds = array<i64: 3, 3, 3, 64>}, {pipeline_mode = #tpu.pipeline_mode<synchronous>, transform_indices = @transform_2, window_bounds = array<i64: 1, 64>}, {pipeline_mode = #tpu.pipeline_mode<synchronous>, transform_indices = @transform_3, window_bounds = array<i64: 3, 3, 64, 64>}, {pipeline_mode = #tpu.pipeline_mode<synchronous>, transform_indices = @transform_4, window_bounds = array<i64: 1, 64>}, {pipeline_mode = #tpu.pipeline_mode<synchronous>, transform_indices = @transform_5, window_bounds = array<i64: 3, 3, 64, 64>}, {pipeline_mode = #tpu.pipeline_mode<synchronous>, transform_indices = @transform_6, window_bounds = array<i64: 1, 64>}, {pipeline_mode = #tpu.pipeline_mode<synchronous>, transform_indices = @transform_7, window_bounds = array<i64: 64, 256>}, {pipeline_mode = #tpu.pipeline_mode<synchronous>, transform_indices = @transform_8, window_bounds = array<i64: 64, 8>}, {pipeline_mode = #tpu.pipeline_mode<synchronous>, transform_indices = @transform_9, window_bounds = array<i64: 8, 1>}, {pipeline_mode = #tpu.pipeline_mode<synchronous>, transform_indices = @transform_10, window_bounds = array<i64: 2, 3, 256>}]} {
    %c0 = arith.constant 0 : index
    %c0_0 = arith.constant 0 : index
    %c0_1 = arith.constant 0 : index
    %c0_2 = arith.constant 0 : index
    %0 = vector.load %arg1[%c0, %c0_0, %c0_1, %c0_2] : memref<2x18x18x3xf32, #tpu.memory_space<vmem>>, vector<2x16x16x3xf32>
    %1 = vector.shape_cast %0 : vector<2x16x16x3xf32> to vector<512x3xf32>
    %c0_3 = arith.constant 0 : index
    %c0_4 = arith.constant 0 : index
    %c0_5 = arith.constant 0 : index
    %c0_6 = arith.constant 0 : index
    %2 = vector.load %arg2[%c0_3, %c0_4, %c0_5, %c0_6] : memref<3x3x3x64xf32, #tpu.memory_space<vmem>>, vector<1x1x3x64xf32>
    %3 = vector.shape_cast %2 : vector<1x1x3x64xf32> to vector<3x64xf32>
    %cst = arith.constant dense<0.000000e+00> : vector<512x64xf32>
    %4 = tpu.matmul %1, %3, %cst {dimension_numbers = #tpu.dot_dimension_numbers<[1], [0], [0], [1], [0, 0, 1, 1], [], []>} : vector<512x3xf32>, vector<3x64xf32>, vector<512x64xf32> -> vector<512x64xf32>
    %c0_7 = arith.constant 0 : index
    %c0_8 = arith.constant 0 : index
    %c1 = arith.constant 1 : index
    %c0_9 = arith.constant 0 : index
    %5 = vector.load %arg1[%c0_7, %c0_8, %c1, %c0_9] : memref<2x18x18x3xf32, #tpu.memory_space<vmem>>, vector<2x16x16x3xf32>
    %6 = vector.shape_cast %5 : vector<2x16x16x3xf32> to vector<512x3xf32>
    %c0_10 = arith.constant 0 : index
    %c1_11 = arith.constant 1 : index
    %c0_12 = arith.constant 0 : index
    %c0_13 = arith.constant 0 : index
    %7 = vector.load %arg2[%c0_10, %c1_11, %c0_12, %c0_13] : memref<3x3x3x64xf32, #tpu.memory_space<vmem>>, vector<1x1x3x64xf32>
    %8 = vector.shape_cast %7 : vector<1x1x3x64xf32> to vector<3x64xf32>
    %cst_14 = arith.constant dense<0.000000e+00> : vector<512x64xf32>
    %9 = tpu.matmul %6, %8, %cst_14 {dimension_numbers = #tpu.dot_dimension_numbers<[1], [0], [0], [1], [0, 0, 1, 1], [], []>} : vector<512x3xf32>, vector<3x64xf32>, vector<512x64xf32> -> vector<512x64xf32>
    %10 = arith.addf %4, %9 : vector<512x64xf32>
    %c0_15 = arith.constant 0 : index
    %c0_16 = arith.constant 0 : index
    %c2 = arith.constant 2 : index
    %c0_17 = arith.constant 0 : index
    %11 = vector.load %arg1[%c0_15, %c0_16, %c2, %c0_17] : memref<2x18x18x3xf32, #tpu.memory_space<vmem>>, vector<2x16x16x3xf32>
    %12 = vector.shape_cast %11 : vector<2x16x16x3xf32> to vector<512x3xf32>
    %c0_18 = arith.constant 0 : index
    %c2_19 = arith.constant 2 : index
    %c0_20 = arith.constant 0 : index
    %c0_21 = arith.constant 0 : index
    %13 = vector.load %arg2[%c0_18, %c2_19, %c0_20, %c0_21] : memref<3x3x3x64xf32, #tpu.memory_space<vmem>>, vector<1x1x3x64xf32>
    %14 = vector.shape_cast %13 : vector<1x1x3x64xf32> to vector<3x64xf32>
    %cst_22 = arith.constant dense<0.000000e+00> : vector<512x64xf32>
    %15 = tpu.matmul %12, %14, %cst_22 {dimension_numbers = #tpu.dot_dimension_numbers<[1], [0], [0], [1], [0, 0, 1, 1], [], []>} : vector<512x3xf32>, vector<3x64xf32>, vector<512x64xf32> -> vector<512x64xf32>
    %16 = arith.addf %10, %15 : vector<512x64xf32>
    %c0_23 = arith.constant 0 : index
    %c1_24 = arith.constant 1 : index
    %c0_25 = arith.constant 0 : index
    %c0_26 = arith.constant 0 : index
    %17 = vector.load %arg1[%c0_23, %c1_24, %c0_25, %c0_26] : memref<2x18x18x3xf32, #tpu.memory_space<vmem>>, vector<2x16x16x3xf32>
    %18 = vector.shape_cast %17 : vector<2x16x16x3xf32> to vector<512x3xf32>
    %c1_27 = arith.constant 1 : index
    %c0_28 = arith.constant 0 : index
    %c0_29 = arith.constant 0 : index
    %c0_30 = arith.constant 0 : index
    %19 = vector.load %arg2[%c1_27, %c0_28, %c0_29, %c0_30] : memref<3x3x3x64xf32, #tpu.memory_space<vmem>>, vector<1x1x3x64xf32>
    %20 = vector.shape_cast %19 : vector<1x1x3x64xf32> to vector<3x64xf32>
    %cst_31 = arith.constant dense<0.000000e+00> : vector<512x64xf32>
    %21 = tpu.matmul %18, %20, %cst_31 {dimension_numbers = #tpu.dot_dimension_numbers<[1], [0], [0], [1], [0, 0, 1, 1], [], []>} : vector<512x3xf32>, vector<3x64xf32>, vector<512x64xf32> -> vector<512x64xf32>
    %22 = arith.addf %16, %21 : vector<512x64xf32>
    %c0_32 = arith.constant 0 : index
    %c1_33 = arith.constant 1 : index
    %c1_34 = arith.constant 1 : index
    %c0_35 = arith.constant 0 : index
    %23 = vector.load %arg1[%c0_32, %c1_33, %c1_34, %c0_35] : memref<2x18x18x3xf32, #tpu.memory_space<vmem>>, vector<2x16x16x3xf32>
    %24 = vector.shape_cast %23 : vector<2x16x16x3xf32> to vector<512x3xf32>
    %c1_36 = arith.constant 1 : index
    %c1_37 = arith.constant 1 : index
    %c0_38 = arith.constant 0 : index
    %c0_39 = arith.constant 0 : index
    %25 = vector.load %arg2[%c1_36, %c1_37, %c0_38, %c0_39] : memref<3x3x3x64xf32, #tpu.memory_space<vmem>>, vector<1x1x3x64xf32>
    %26 = vector.shape_cast %25 : vector<1x1x3x64xf32> to vector<3x64xf32>
    %cst_40 = arith.constant dense<0.000000e+00> : vector<512x64xf32>
    %27 = tpu.matmul %24, %26, %cst_40 {dimension_numbers = #tpu.dot_dimension_numbers<[1], [0], [0], [1], [0, 0, 1, 1], [], []>} : vector<512x3xf32>, vector<3x64xf32>, vector<512x64xf32> -> vector<512x64xf32>
    %28 = arith.addf %22, %27 : vector<512x64xf32>
    %c0_41 = arith.constant 0 : index
    %c1_42 = arith.constant 1 : index
    %c2_43 = arith.constant 2 : index
    %c0_44 = arith.constant 0 : index
    %29 = vector.load %arg1[%c0_41, %c1_42, %c2_43, %c0_44] : memref<2x18x18x3xf32, #tpu.memory_space<vmem>>, vector<2x16x16x3xf32>
    %30 = vector.shape_cast %29 : vector<2x16x16x3xf32> to vector<512x3xf32>
    %c1_45 = arith.constant 1 : index
    %c2_46 = arith.constant 2 : index
    %c0_47 = arith.constant 0 : index
    %c0_48 = arith.constant 0 : index
    %31 = vector.load %arg2[%c1_45, %c2_46, %c0_47, %c0_48] : memref<3x3x3x64xf32, #tpu.memory_space<vmem>>, vector<1x1x3x64xf32>
    %32 = vector.shape_cast %31 : vector<1x1x3x64xf32> to vector<3x64xf32>
    %cst_49 = arith.constant dense<0.000000e+00> : vector<512x64xf32>
    %33 = tpu.matmul %30, %32, %cst_49 {dimension_numbers = #tpu.dot_dimension_numbers<[1], [0], [0], [1], [0, 0, 1, 1], [], []>} : vector<512x3xf32>, vector<3x64xf32>, vector<512x64xf32> -> vector<512x64xf32>
    %34 = arith.addf %28, %33 : vector<512x64xf32>
    %c0_50 = arith.constant 0 : index
    %c2_51 = arith.constant 2 : index
    %c0_52 = arith.constant 0 : index
    %c0_53 = arith.constant 0 : index
    %35 = vector.load %arg1[%c0_50, %c2_51, %c0_52, %c0_53] : memref<2x18x18x3xf32, #tpu.memory_space<vmem>>, vector<2x16x16x3xf32>
    %36 = vector.shape_cast %35 : vector<2x16x16x3xf32> to vector<512x3xf32>
    %c2_54 = arith.constant 2 : index
    %c0_55 = arith.constant 0 : index
    %c0_56 = arith.constant 0 : index
    %c0_57 = arith.constant 0 : index
    %37 = vector.load %arg2[%c2_54, %c0_55, %c0_56, %c0_57] : memref<3x3x3x64xf32, #tpu.memory_space<vmem>>, vector<1x1x3x64xf32>
    %38 = vector.shape_cast %37 : vector<1x1x3x64xf32> to vector<3x64xf32>
    %cst_58 = arith.constant dense<0.000000e+00> : vector<512x64xf32>
    %39 = tpu.matmul %36, %38, %cst_58 {dimension_numbers = #tpu.dot_dimension_numbers<[1], [0], [0], [1], [0, 0, 1, 1], [], []>} : vector<512x3xf32>, vector<3x64xf32>, vector<512x64xf32> -> vector<512x64xf32>
    %40 = arith.addf %34, %39 : vector<512x64xf32>
    %c0_59 = arith.constant 0 : index
    %c2_60 = arith.constant 2 : index
    %c1_61 = arith.constant 1 : index
    %c0_62 = arith.constant 0 : index
    %41 = vector.load %arg1[%c0_59, %c2_60, %c1_61, %c0_62] : memref<2x18x18x3xf32, #tpu.memory_space<vmem>>, vector<2x16x16x3xf32>
    %42 = vector.shape_cast %41 : vector<2x16x16x3xf32> to vector<512x3xf32>
    %c2_63 = arith.constant 2 : index
    %c1_64 = arith.constant 1 : index
    %c0_65 = arith.constant 0 : index
    %c0_66 = arith.constant 0 : index
    %43 = vector.load %arg2[%c2_63, %c1_64, %c0_65, %c0_66] : memref<3x3x3x64xf32, #tpu.memory_space<vmem>>, vector<1x1x3x64xf32>
    %44 = vector.shape_cast %43 : vector<1x1x3x64xf32> to vector<3x64xf32>
    %cst_67 = arith.constant dense<0.000000e+00> : vector<512x64xf32>
    %45 = tpu.matmul %42, %44, %cst_67 {dimension_numbers = #tpu.dot_dimension_numbers<[1], [0], [0], [1], [0, 0, 1, 1], [], []>} : vector<512x3xf32>, vector<3x64xf32>, vector<512x64xf32> -> vector<512x64xf32>
    %46 = arith.addf %40, %45 : vector<512x64xf32>
    %c0_68 = arith.constant 0 : index
    %c2_69 = arith.constant 2 : index
    %c2_70 = arith.constant 2 : index
    %c0_71 = arith.constant 0 : index
    %47 = vector.load %arg1[%c0_68, %c2_69, %c2_70, %c0_71] : memref<2x18x18x3xf32, #tpu.memory_space<vmem>>, vector<2x16x16x3xf32>
    %48 = vector.shape_cast %47 : vector<2x16x16x3xf32> to vector<512x3xf32>
    %c2_72 = arith.constant 2 : index
    %c2_73 = arith.constant 2 : index
    %c0_74 = arith.constant 0 : index
    %c0_75 = arith.constant 0 : index
    %49 = vector.load %arg2[%c2_72, %c2_73, %c0_74, %c0_75] : memref<3x3x3x64xf32, #tpu.memory_space<vmem>>, vector<1x1x3x64xf32>
    %50 = vector.shape_cast %49 : vector<1x1x3x64xf32> to vector<3x64xf32>
    %cst_76 = arith.constant dense<0.000000e+00> : vector<512x64xf32>
    %51 = tpu.matmul %48, %50, %cst_76 {dimension_numbers = #tpu.dot_dimension_numbers<[1], [0], [0], [1], [0, 0, 1, 1], [], []>} : vector<512x3xf32>, vector<3x64xf32>, vector<512x64xf32> -> vector<512x64xf32>
    %52 = arith.addf %46, %51 : vector<512x64xf32>
    %c0_77 = arith.constant 0 : index
    %c0_78 = arith.constant 0 : index
    %53 = vector.load %arg3[%c0_77, %c0_78] : memref<1x64xf32, #tpu.memory_space<vmem>>, vector<1x64xf32>
    %54 = vector.broadcast %53 : vector<1x64xf32> to vector<512x64xf32>
    %55 = arith.addf %52, %54 : vector<512x64xf32>
    %cst_79 = arith.constant 0.000000e+00 : f32
    %56 = vector.broadcast %cst_79 : f32 to vector<512x64xf32>
    %57 = arith.maximumf %55, %56 : vector<512x64xf32>
    %cst_80 = arith.constant 0.000000e+00 : f32
    %58 = vector.broadcast %cst_80 : f32 to vector<2x18x32x64xf32>
    %c0_81 = arith.constant 0 : index
    %c0_82 = arith.constant 0 : index
    %c0_83 = arith.constant 0 : index
    %c0_84 = arith.constant 0 : index
    %59 = vector.load %arg12[%c0_81, %c0_82, %c0_83, %c0_84] : memref<2x18x32x64xf32, #tpu.memory_space<vmem>>, vector<2x18x32x64xf32>
    tpu.vector_store %arg12[%c0_81, %c0_82, %c0_83, %c0_84], %58 {strides = array<i32>} : memref<2x18x32x64xf32, #tpu.memory_space<vmem>>, vector<2x18x32x64xf32>,
    %60 = vector.shape_cast %57 : vector<512x64xf32> to vector<2x16x16x64xf32>
    %c0_85 = arith.constant 0 : index
    %c1_86 = arith.constant 1 : index
    %c8 = arith.constant 8 : index
    %c0_87 = arith.constant 0 : index
    %61 = vector.load %arg12[%c0_85, %c1_86, %c8, %c0_87] : memref<2x18x32x64xf32, #tpu.memory_space<vmem>>, vector<2x16x16x64xf32>
    tpu.vector_store %arg12[%c0_85, %c1_86, %c8, %c0_87], %60 {strides = array<i32>} : memref<2x18x32x64xf32, #tpu.memory_space<vmem>>, vector<2x16x16x64xf32>,
    %c0_88 = arith.constant 0 : index
    %c0_89 = arith.constant 0 : index
    %c7 = arith.constant 7 : index
    %c0_90 = arith.constant 0 : index
    %62 = vector.load %arg12[%c0_88, %c0_89, %c7, %c0_90] : memref<2x18x32x64xf32, #tpu.memory_space<vmem>>, vector<2x16x16x64xf32>
    %63 = vector.shape_cast %62 : vector<2x16x16x64xf32> to vector<512x64xf32>
    %c0_91 = arith.constant 0 : index
    %c0_92 = arith.constant 0 : index
    %c0_93 = arith.constant 0 : index
    %c0_94 = arith.constant 0 : index
    %64 = vector.load %arg4[%c0_91, %c0_92, %c0_93, %c0_94] : memref<3x3x64x64xf32, #tpu.memory_space<vmem>>, vector<1x1x64x64xf32>
    %65 = vector.shape_cast %64 : vector<1x1x64x64xf32> to vector<64x64xf32>
    %cst_95 = arith.constant dense<0.000000e+00> : vector<512x64xf32>
    %66 = tpu.matmul %63, %65, %cst_95 {dimension_numbers = #tpu.dot_dimension_numbers<[1], [0], [0], [1], [0, 0, 1, 1], [], []>} : vector<512x64xf32>, vector<64x64xf32>, vector<512x64xf32> -> vector<512x64xf32>
    %c0_96 = arith.constant 0 : index
    %c0_97 = arith.constant 0 : index
    %c8_98 = arith.constant 8 : index
    %c0_99 = arith.constant 0 : index
    %67 = vector.load %arg12[%c0_96, %c0_97, %c8_98, %c0_99] : memref<2x18x32x64xf32, #tpu.memory_space<vmem>>, vector<2x16x16x64xf32>
    %68 = vector.shape_cast %67 : vector<2x16x16x64xf32> to vector<512x64xf32>
    %c0_100 = arith.constant 0 : index
    %c1_101 = arith.constant 1 : index
    %c0_102 = arith.constant 0 : index
    %c0_103 = arith.constant 0 : index
    %69 = vector.load %arg4[%c0_100, %c1_101, %c0_102, %c0_103] : memref<3x3x64x64xf32, #tpu.memory_space<vmem>>, vector<1x1x64x64xf32>
    %70 = vector.shape_cast %69 : vector<1x1x64x64xf32> to vector<64x64xf32>
    %cst_104 = arith.constant dense<0.000000e+00> : vector<512x64xf32>
    %71 = tpu.matmul %68, %70, %cst_104 {dimension_numbers = #tpu.dot_dimension_numbers<[1], [0], [0], [1], [0, 0, 1, 1], [], []>} : vector<512x64xf32>, vector<64x64xf32>, vector<512x64xf32> -> vector<512x64xf32>
    %72 = arith.addf %66, %71 : vector<512x64xf32>
    %c0_105 = arith.constant 0 : index
    %c0_106 = arith.constant 0 : index
    %c9 = arith.constant 9 : index
    %c0_107 = arith.constant 0 : index
    %73 = vector.load %arg12[%c0_105, %c0_106, %c9, %c0_107] : memref<2x18x32x64xf32, #tpu.memory_space<vmem>>, vector<2x16x16x64xf32>
    %74 = vector.shape_cast %73 : vector<2x16x16x64xf32> to vector<512x64xf32>
    %c0_108 = arith.constant 0 : index
    %c2_109 = arith.constant 2 : index
    %c0_110 = arith.constant 0 : index
    %c0_111 = arith.constant 0 : index
    %75 = vector.load %arg4[%c0_108, %c2_109, %c0_110, %c0_111] : memref<3x3x64x64xf32, #tpu.memory_space<vmem>>, vector<1x1x64x64xf32>
    %76 = vector.shape_cast %75 : vector<1x1x64x64xf32> to vector<64x64xf32>
    %cst_112 = arith.constant dense<0.000000e+00> : vector<512x64xf32>
    %77 = tpu.matmul %74, %76, %cst_112 {dimension_numbers = #tpu.dot_dimension_numbers<[1], [0], [0], [1], [0, 0, 1, 1], [], []>} : vector<512x64xf32>, vector<64x64xf32>, vector<512x64xf32> -> vector<512x64xf32>
    %78 = arith.addf %72, %77 : vector<512x64xf32>
    %c0_113 = arith.constant 0 : index
    %c1_114 = arith.constant 1 : index
    %c7_115 = arith.constant 7 : index
    %c0_116 = arith.constant 0 : index
    %79 = vector.load %arg12[%c0_113, %c1_114, %c7_115, %c0_116] : memref<2x18x32x64xf32, #tpu.memory_space<vmem>>, vector<2x16x16x64xf32>
    %80 = vector.shape_cast %79 : vector<2x16x16x64xf32> to vector<512x64xf32>
    %c1_117 = arith.constant 1 : index
    %c0_118 = arith.constant 0 : index
    %c0_119 = arith.constant 0 : index
    %c0_120 = arith.constant 0 : index
    %81 = vector.load %arg4[%c1_117, %c0_118, %c0_119, %c0_120] : memref<3x3x64x64xf32, #tpu.memory_space<vmem>>, vector<1x1x64x64xf32>
    %82 = vector.shape_cast %81 : vector<1x1x64x64xf32> to vector<64x64xf32>
    %cst_121 = arith.constant dense<0.000000e+00> : vector<512x64xf32>
    %83 = tpu.matmul %80, %82, %cst_121 {dimension_numbers = #tpu.dot_dimension_numbers<[1], [0], [0], [1], [0, 0, 1, 1], [], []>} : vector<512x64xf32>, vector<64x64xf32>, vector<512x64xf32> -> vector<512x64xf32>
    %84 = arith.addf %78, %83 : vector<512x64xf32>
    %c0_122 = arith.constant 0 : index
    %c1_123 = arith.constant 1 : index
    %c8_124 = arith.constant 8 : index
    %c0_125 = arith.constant 0 : index
    %85 = vector.load %arg12[%c0_122, %c1_123, %c8_124, %c0_125] : memref<2x18x32x64xf32, #tpu.memory_space<vmem>>, vector<2x16x16x64xf32>
    %86 = vector.shape_cast %85 : vector<2x16x16x64xf32> to vector<512x64xf32>
    %c1_126 = arith.constant 1 : index
    %c1_127 = arith.constant 1 : index
    %c0_128 = arith.constant 0 : index
    %c0_129 = arith.constant 0 : index
    %87 = vector.load %arg4[%c1_126, %c1_127, %c0_128, %c0_129] : memref<3x3x64x64xf32, #tpu.memory_space<vmem>>, vector<1x1x64x64xf32>
    %88 = vector.shape_cast %87 : vector<1x1x64x64xf32> to vector<64x64xf32>
    %cst_130 = arith.constant dense<0.000000e+00> : vector<512x64xf32>
    %89 = tpu.matmul %86, %88, %cst_130 {dimension_numbers = #tpu.dot_dimension_numbers<[1], [0], [0], [1], [0, 0, 1, 1], [], []>} : vector<512x64xf32>, vector<64x64xf32>, vector<512x64xf32> -> vector<512x64xf32>
    %90 = arith.addf %84, %89 : vector<512x64xf32>
    %c0_131 = arith.constant 0 : index
    %c1_132 = arith.constant 1 : index
    %c9_133 = arith.constant 9 : index
    %c0_134 = arith.constant 0 : index
    %91 = vector.load %arg12[%c0_131, %c1_132, %c9_133, %c0_134] : memref<2x18x32x64xf32, #tpu.memory_space<vmem>>, vector<2x16x16x64xf32>
    %92 = vector.shape_cast %91 : vector<2x16x16x64xf32> to vector<512x64xf32>
    %c1_135 = arith.constant 1 : index
    %c2_136 = arith.constant 2 : index
    %c0_137 = arith.constant 0 : index
    %c0_138 = arith.constant 0 : index
    %93 = vector.load %arg4[%c1_135, %c2_136, %c0_137, %c0_138] : memref<3x3x64x64xf32, #tpu.memory_space<vmem>>, vector<1x1x64x64xf32>
    %94 = vector.shape_cast %93 : vector<1x1x64x64xf32> to vector<64x64xf32>
    %cst_139 = arith.constant dense<0.000000e+00> : vector<512x64xf32>
    %95 = tpu.matmul %92, %94, %cst_139 {dimension_numbers = #tpu.dot_dimension_numbers<[1], [0], [0], [1], [0, 0, 1, 1], [], []>} : vector<512x64xf32>, vector<64x64xf32>, vector<512x64xf32> -> vector<512x64xf32>
    %96 = arith.addf %90, %95 : vector<512x64xf32>
    %c0_140 = arith.constant 0 : index
    %c2_141 = arith.constant 2 : index
    %c7_142 = arith.constant 7 : index
    %c0_143 = arith.constant 0 : index
    %97 = vector.load %arg12[%c0_140, %c2_141, %c7_142, %c0_143] : memref<2x18x32x64xf32, #tpu.memory_space<vmem>>, vector<2x16x16x64xf32>
    %98 = vector.shape_cast %97 : vector<2x16x16x64xf32> to vector<512x64xf32>
    %c2_144 = arith.constant 2 : index
    %c0_145 = arith.constant 0 : index
    %c0_146 = arith.constant 0 : index
    %c0_147 = arith.constant 0 : index
    %99 = vector.load %arg4[%c2_144, %c0_145, %c0_146, %c0_147] : memref<3x3x64x64xf32, #tpu.memory_space<vmem>>, vector<1x1x64x64xf32>
    %100 = vector.shape_cast %99 : vector<1x1x64x64xf32> to vector<64x64xf32>
    %cst_148 = arith.constant dense<0.000000e+00> : vector<512x64xf32>
    %101 = tpu.matmul %98, %100, %cst_148 {dimension_numbers = #tpu.dot_dimension_numbers<[1], [0], [0], [1], [0, 0, 1, 1], [], []>} : vector<512x64xf32>, vector<64x64xf32>, vector<512x64xf32> -> vector<512x64xf32>
    %102 = arith.addf %96, %101 : vector<512x64xf32>
    %c0_149 = arith.constant 0 : index
    %c2_150 = arith.constant 2 : index
    %c8_151 = arith.constant 8 : index
    %c0_152 = arith.constant 0 : index
    %103 = vector.load %arg12[%c0_149, %c2_150, %c8_151, %c0_152] : memref<2x18x32x64xf32, #tpu.memory_space<vmem>>, vector<2x16x16x64xf32>
    %104 = vector.shape_cast %103 : vector<2x16x16x64xf32> to vector<512x64xf32>
    %c2_153 = arith.constant 2 : index
    %c1_154 = arith.constant 1 : index
    %c0_155 = arith.constant 0 : index
    %c0_156 = arith.constant 0 : index
    %105 = vector.load %arg4[%c2_153, %c1_154, %c0_155, %c0_156] : memref<3x3x64x64xf32, #tpu.memory_space<vmem>>, vector<1x1x64x64xf32>
    %106 = vector.shape_cast %105 : vector<1x1x64x64xf32> to vector<64x64xf32>
    %cst_157 = arith.constant dense<0.000000e+00> : vector<512x64xf32>
    %107 = tpu.matmul %104, %106, %cst_157 {dimension_numbers = #tpu.dot_dimension_numbers<[1], [0], [0], [1], [0, 0, 1, 1], [], []>} : vector<512x64xf32>, vector<64x64xf32>, vector<512x64xf32> -> vector<512x64xf32>
    %108 = arith.addf %102, %107 : vector<512x64xf32>
    %c0_158 = arith.constant 0 : index
    %c2_159 = arith.constant 2 : index
    %c9_160 = arith.constant 9 : index
    %c0_161 = arith.constant 0 : index
    %109 = vector.load %arg12[%c0_158, %c2_159, %c9_160, %c0_161] : memref<2x18x32x64xf32, #tpu.memory_space<vmem>>, vector<2x16x16x64xf32>
    %110 = vector.shape_cast %109 : vector<2x16x16x64xf32> to vector<512x64xf32>
    %c2_162 = arith.constant 2 : index
    %c2_163 = arith.constant 2 : index
    %c0_164 = arith.constant 0 : index
    %c0_165 = arith.constant 0 : index
    %111 = vector.load %arg4[%c2_162, %c2_163, %c0_164, %c0_165] : memref<3x3x64x64xf32, #tpu.memory_space<vmem>>, vector<1x1x64x64xf32>
    %112 = vector.shape_cast %111 : vector<1x1x64x64xf32> to vector<64x64xf32>
    %cst_166 = arith.constant dense<0.000000e+00> : vector<512x64xf32>
    %113 = tpu.matmul %110, %112, %cst_166 {dimension_numbers = #tpu.dot_dimension_numbers<[1], [0], [0], [1], [0, 0, 1, 1], [], []>} : vector<512x64xf32>, vector<64x64xf32>, vector<512x64xf32> -> vector<512x64xf32>
    %114 = arith.addf %108, %113 : vector<512x64xf32>
    %c0_167 = arith.constant 0 : index
    %c0_168 = arith.constant 0 : index
    %115 = vector.load %arg5[%c0_167, %c0_168] : memref<1x64xf32, #tpu.memory_space<vmem>>, vector<1x64xf32>
    %116 = vector.broadcast %115 : vector<1x64xf32> to vector<512x64xf32>
    %117 = arith.addf %114, %116 : vector<512x64xf32>
    %cst_169 = arith.constant 0.000000e+00 : f32
    %118 = vector.broadcast %cst_169 : f32 to vector<512x64xf32>
    %119 = arith.maximumf %117, %118 : vector<512x64xf32>
    %120 = vector.shape_cast %119 : vector<512x64xf32> to vector<2x16x16x64xf32>
    %c0_170 = arith.constant 0 : index
    %c1_171 = arith.constant 1 : index
    %c8_172 = arith.constant 8 : index
    %c0_173 = arith.constant 0 : index
    %121 = vector.load %arg12[%c0_170, %c1_171, %c8_172, %c0_173] : memref<2x18x32x64xf32, #tpu.memory_space<vmem>>, vector<2x16x16x64xf32>
    tpu.vector_store %arg12[%c0_170, %c1_171, %c8_172, %c0_173], %120 {strides = array<i32>} : memref<2x18x32x64xf32, #tpu.memory_space<vmem>>, vector<2x16x16x64xf32>,
    %c0_174 = arith.constant 0 : index
    %c1_175 = arith.constant 1 : index
    %c8_176 = arith.constant 8 : index
    %c0_177 = arith.constant 0 : index
    %122 = tpu.strided_load %arg12[%c0_174, %c1_175, %c8_176, %c0_177] {strides = array<i32: 1, 2, 2, 1>} : memref<2x18x32x64xf32, #tpu.memory_space<vmem>>, vector<2x8x8x64xf32>
    %c0_178 = arith.constant 0 : index
    %c1_179 = arith.constant 1 : index
    %c9_180 = arith.constant 9 : index
    %c0_181 = arith.constant 0 : index
    %123 = tpu.strided_load %arg12[%c0_178, %c1_179, %c9_180, %c0_181] {strides = array<i32: 1, 2, 2, 1>} : memref<2x18x32x64xf32, #tpu.memory_space<vmem>>, vector<2x8x8x64xf32>
    %124 = arith.maximumf %122, %123 : vector<2x8x8x64xf32>
    %c0_182 = arith.constant 0 : index
    %c2_183 = arith.constant 2 : index
    %c8_184 = arith.constant 8 : index
    %c0_185 = arith.constant 0 : index
    %125 = tpu.strided_load %arg12[%c0_182, %c2_183, %c8_184, %c0_185] {strides = array<i32: 1, 2, 2, 1>} : memref<2x18x32x64xf32, #tpu.memory_space<vmem>>, vector<2x8x8x64xf32>
    %126 = arith.maximumf %124, %125 : vector<2x8x8x64xf32>
    %c0_186 = arith.constant 0 : index
    %c2_187 = arith.constant 2 : index
    %c9_188 = arith.constant 9 : index
    %c0_189 = arith.constant 0 : index
    %127 = tpu.strided_load %arg12[%c0_186, %c2_187, %c9_188, %c0_189] {strides = array<i32: 1, 2, 2, 1>} : memref<2x18x32x64xf32, #tpu.memory_space<vmem>>, vector<2x8x8x64xf32>
    %128 = arith.maximumf %126, %127 : vector<2x8x8x64xf32>
    %cst_190 = arith.constant 0.000000e+00 : f32
    %129 = vector.broadcast %cst_190 : f32 to vector<2x10x24x64xf32>
    %c0_191 = arith.constant 0 : index
    %c0_192 = arith.constant 0 : index
    %c0_193 = arith.constant 0 : index
    %c0_194 = arith.constant 0 : index
    %130 = vector.load %arg13[%c0_191, %c0_192, %c0_193, %c0_194] : memref<2x10x24x64xf32, #tpu.memory_space<vmem>>, vector<2x10x24x64xf32>
    tpu.vector_store %arg13[%c0_191, %c0_192, %c0_193, %c0_194], %129 {strides = array<i32>} : memref<2x10x24x64xf32, #tpu.memory_space<vmem>>, vector<2x10x24x64xf32>,
    %c0_195 = arith.constant 0 : index
    %c1_196 = arith.constant 1 : index
    %c8_197 = arith.constant 8 : index
    %c0_198 = arith.constant 0 : index
    %131 = vector.load %arg13[%c0_195, %c1_196, %c8_197, %c0_198] : memref<2x10x24x64xf32, #tpu.memory_space<vmem>>, vector<2x8x8x64xf32>
    tpu.vector_store %arg13[%c0_195, %c1_196, %c8_197, %c0_198], %128 {strides = array<i32>} : memref<2x10x24x64xf32, #tpu.memory_space<vmem>>, vector<2x8x8x64xf32>,
    %c0_199 = arith.constant 0 : index
    %c0_200 = arith.constant 0 : index
    %c7_201 = arith.constant 7 : index
    %c0_202 = arith.constant 0 : index
    %132 = vector.load %arg13[%c0_199, %c0_200, %c7_201, %c0_202] : memref<2x10x24x64xf32, #tpu.memory_space<vmem>>, vector<2x8x8x64xf32>
    %133 = vector.shape_cast %132 : vector<2x8x8x64xf32> to vector<128x64xf32>
    %c0_203 = arith.constant 0 : index
    %c0_204 = arith.constant 0 : index
    %c0_205 = arith.constant 0 : index
    %c0_206 = arith.constant 0 : index
    %134 = vector.load %arg6[%c0_203, %c0_204, %c0_205, %c0_206] : memref<3x3x64x64xf32, #tpu.memory_space<vmem>>, vector<1x1x64x64xf32>
    %135 = vector.shape_cast %134 : vector<1x1x64x64xf32> to vector<64x64xf32>
    %cst_207 = arith.constant dense<0.000000e+00> : vector<128x64xf32>
    %136 = tpu.matmul %133, %135, %cst_207 {dimension_numbers = #tpu.dot_dimension_numbers<[1], [0], [0], [1], [0, 0, 1, 1], [], []>} : vector<128x64xf32>, vector<64x64xf32>, vector<128x64xf32> -> vector<128x64xf32>
    %c0_208 = arith.constant 0 : index
    %c0_209 = arith.constant 0 : index
    %c8_210 = arith.constant 8 : index
    %c0_211 = arith.constant 0 : index
    %137 = vector.load %arg13[%c0_208, %c0_209, %c8_210, %c0_211] : memref<2x10x24x64xf32, #tpu.memory_space<vmem>>, vector<2x8x8x64xf32>
    %138 = vector.shape_cast %137 : vector<2x8x8x64xf32> to vector<128x64xf32>
    %c0_212 = arith.constant 0 : index
    %c1_213 = arith.constant 1 : index
    %c0_214 = arith.constant 0 : index
    %c0_215 = arith.constant 0 : index
    %139 = vector.load %arg6[%c0_212, %c1_213, %c0_214, %c0_215] : memref<3x3x64x64xf32, #tpu.memory_space<vmem>>, vector<1x1x64x64xf32>
    %140 = vector.shape_cast %139 : vector<1x1x64x64xf32> to vector<64x64xf32>
    %cst_216 = arith.constant dense<0.000000e+00> : vector<128x64xf32>
    %141 = tpu.matmul %138, %140, %cst_216 {dimension_numbers = #tpu.dot_dimension_numbers<[1], [0], [0], [1], [0, 0, 1, 1], [], []>} : vector<128x64xf32>, vector<64x64xf32>, vector<128x64xf32> -> vector<128x64xf32>
    %142 = arith.addf %136, %141 : vector<128x64xf32>
    %c0_217 = arith.constant 0 : index
    %c0_218 = arith.constant 0 : index
    %c9_219 = arith.constant 9 : index
    %c0_220 = arith.constant 0 : index
    %143 = vector.load %arg13[%c0_217, %c0_218, %c9_219, %c0_220] : memref<2x10x24x64xf32, #tpu.memory_space<vmem>>, vector<2x8x8x64xf32>
    %144 = vector.shape_cast %143 : vector<2x8x8x64xf32> to vector<128x64xf32>
    %c0_221 = arith.constant 0 : index
    %c2_222 = arith.constant 2 : index
    %c0_223 = arith.constant 0 : index
    %c0_224 = arith.constant 0 : index
    %145 = vector.load %arg6[%c0_221, %c2_222, %c0_223, %c0_224] : memref<3x3x64x64xf32, #tpu.memory_space<vmem>>, vector<1x1x64x64xf32>
    %146 = vector.shape_cast %145 : vector<1x1x64x64xf32> to vector<64x64xf32>
    %cst_225 = arith.constant dense<0.000000e+00> : vector<128x64xf32>
    %147 = tpu.matmul %144, %146, %cst_225 {dimension_numbers = #tpu.dot_dimension_numbers<[1], [0], [0], [1], [0, 0, 1, 1], [], []>} : vector<128x64xf32>, vector<64x64xf32>, vector<128x64xf32> -> vector<128x64xf32>
    %148 = arith.addf %142, %147 : vector<128x64xf32>
    %c0_226 = arith.constant 0 : index
    %c1_227 = arith.constant 1 : index
    %c7_228 = arith.constant 7 : index
    %c0_229 = arith.constant 0 : index
    %149 = vector.load %arg13[%c0_226, %c1_227, %c7_228, %c0_229] : memref<2x10x24x64xf32, #tpu.memory_space<vmem>>, vector<2x8x8x64xf32>
    %150 = vector.shape_cast %149 : vector<2x8x8x64xf32> to vector<128x64xf32>
    %c1_230 = arith.constant 1 : index
    %c0_231 = arith.constant 0 : index
    %c0_232 = arith.constant 0 : index
    %c0_233 = arith.constant 0 : index
    %151 = vector.load %arg6[%c1_230, %c0_231, %c0_232, %c0_233] : memref<3x3x64x64xf32, #tpu.memory_space<vmem>>, vector<1x1x64x64xf32>
    %152 = vector.shape_cast %151 : vector<1x1x64x64xf32> to vector<64x64xf32>
    %cst_234 = arith.constant dense<0.000000e+00> : vector<128x64xf32>
    %153 = tpu.matmul %150, %152, %cst_234 {dimension_numbers = #tpu.dot_dimension_numbers<[1], [0], [0], [1], [0, 0, 1, 1], [], []>} : vector<128x64xf32>, vector<64x64xf32>, vector<128x64xf32> -> vector<128x64xf32>
    %154 = arith.addf %148, %153 : vector<128x64xf32>
    %c0_235 = arith.constant 0 : index
    %c1_236 = arith.constant 1 : index
    %c8_237 = arith.constant 8 : index
    %c0_238 = arith.constant 0 : index
    %155 = vector.load %arg13[%c0_235, %c1_236, %c8_237, %c0_238] : memref<2x10x24x64xf32, #tpu.memory_space<vmem>>, vector<2x8x8x64xf32>
    %156 = vector.shape_cast %155 : vector<2x8x8x64xf32> to vector<128x64xf32>
    %c1_239 = arith.constant 1 : index
    %c1_240 = arith.constant 1 : index
    %c0_241 = arith.constant 0 : index
    %c0_242 = arith.constant 0 : index
    %157 = vector.load %arg6[%c1_239, %c1_240, %c0_241, %c0_242] : memref<3x3x64x64xf32, #tpu.memory_space<vmem>>, vector<1x1x64x64xf32>
    %158 = vector.shape_cast %157 : vector<1x1x64x64xf32> to vector<64x64xf32>
    %cst_243 = arith.constant dense<0.000000e+00> : vector<128x64xf32>
    %159 = tpu.matmul %156, %158, %cst_243 {dimension_numbers = #tpu.dot_dimension_numbers<[1], [0], [0], [1], [0, 0, 1, 1], [], []>} : vector<128x64xf32>, vector<64x64xf32>, vector<128x64xf32> -> vector<128x64xf32>
    %160 = arith.addf %154, %159 : vector<128x64xf32>
    %c0_244 = arith.constant 0 : index
    %c1_245 = arith.constant 1 : index
    %c9_246 = arith.constant 9 : index
    %c0_247 = arith.constant 0 : index
    %161 = vector.load %arg13[%c0_244, %c1_245, %c9_246, %c0_247] : memref<2x10x24x64xf32, #tpu.memory_space<vmem>>, vector<2x8x8x64xf32>
    %162 = vector.shape_cast %161 : vector<2x8x8x64xf32> to vector<128x64xf32>
    %c1_248 = arith.constant 1 : index
    %c2_249 = arith.constant 2 : index
    %c0_250 = arith.constant 0 : index
    %c0_251 = arith.constant 0 : index
    %163 = vector.load %arg6[%c1_248, %c2_249, %c0_250, %c0_251] : memref<3x3x64x64xf32, #tpu.memory_space<vmem>>, vector<1x1x64x64xf32>
    %164 = vector.shape_cast %163 : vector<1x1x64x64xf32> to vector<64x64xf32>
    %cst_252 = arith.constant dense<0.000000e+00> : vector<128x64xf32>
    %165 = tpu.matmul %162, %164, %cst_252 {dimension_numbers = #tpu.dot_dimension_numbers<[1], [0], [0], [1], [0, 0, 1, 1], [], []>} : vector<128x64xf32>, vector<64x64xf32>, vector<128x64xf32> -> vector<128x64xf32>
    %166 = arith.addf %160, %165 : vector<128x64xf32>
    %c0_253 = arith.constant 0 : index
    %c2_254 = arith.constant 2 : index
    %c7_255 = arith.constant 7 : index
    %c0_256 = arith.constant 0 : index
    %167 = vector.load %arg13[%c0_253, %c2_254, %c7_255, %c0_256] : memref<2x10x24x64xf32, #tpu.memory_space<vmem>>, vector<2x8x8x64xf32>
    %168 = vector.shape_cast %167 : vector<2x8x8x64xf32> to vector<128x64xf32>
    %c2_257 = arith.constant 2 : index
    %c0_258 = arith.constant 0 : index
    %c0_259 = arith.constant 0 : index
    %c0_260 = arith.constant 0 : index
    %169 = vector.load %arg6[%c2_257, %c0_258, %c0_259, %c0_260] : memref<3x3x64x64xf32, #tpu.memory_space<vmem>>, vector<1x1x64x64xf32>
    %170 = vector.shape_cast %169 : vector<1x1x64x64xf32> to vector<64x64xf32>
    %cst_261 = arith.constant dense<0.000000e+00> : vector<128x64xf32>
    %171 = tpu.matmul %168, %170, %cst_261 {dimension_numbers = #tpu.dot_dimension_numbers<[1], [0], [0], [1], [0, 0, 1, 1], [], []>} : vector<128x64xf32>, vector<64x64xf32>, vector<128x64xf32> -> vector<128x64xf32>
    %172 = arith.addf %166, %171 : vector<128x64xf32>
    %c0_262 = arith.constant 0 : index
    %c2_263 = arith.constant 2 : index
    %c8_264 = arith.constant 8 : index
    %c0_265 = arith.constant 0 : index
    %173 = vector.load %arg13[%c0_262, %c2_263, %c8_264, %c0_265] : memref<2x10x24x64xf32, #tpu.memory_space<vmem>>, vector<2x8x8x64xf32>
    %174 = vector.shape_cast %173 : vector<2x8x8x64xf32> to vector<128x64xf32>
    %c2_266 = arith.constant 2 : index
    %c1_267 = arith.constant 1 : index
    %c0_268 = arith.constant 0 : index
    %c0_269 = arith.constant 0 : index
    %175 = vector.load %arg6[%c2_266, %c1_267, %c0_268, %c0_269] : memref<3x3x64x64xf32, #tpu.memory_space<vmem>>, vector<1x1x64x64xf32>
    %176 = vector.shape_cast %175 : vector<1x1x64x64xf32> to vector<64x64xf32>
    %cst_270 = arith.constant dense<0.000000e+00> : vector<128x64xf32>
    %177 = tpu.matmul %174, %176, %cst_270 {dimension_numbers = #tpu.dot_dimension_numbers<[1], [0], [0], [1], [0, 0, 1, 1], [], []>} : vector<128x64xf32>, vector<64x64xf32>, vector<128x64xf32> -> vector<128x64xf32>
    %178 = arith.addf %172, %177 : vector<128x64xf32>
    %c0_271 = arith.constant 0 : index
    %c2_272 = arith.constant 2 : index
    %c9_273 = arith.constant 9 : index
    %c0_274 = arith.constant 0 : index
    %179 = vector.load %arg13[%c0_271, %c2_272, %c9_273, %c0_274] : memref<2x10x24x64xf32, #tpu.memory_space<vmem>>, vector<2x8x8x64xf32>
    %180 = vector.shape_cast %179 : vector<2x8x8x64xf32> to vector<128x64xf32>
    %c2_275 = arith.constant 2 : index
    %c2_276 = arith.constant 2 : index
    %c0_277 = arith.constant 0 : index
    %c0_278 = arith.constant 0 : index
    %181 = vector.load %arg6[%c2_275, %c2_276, %c0_277, %c0_278] : memref<3x3x64x64xf32, #tpu.memory_space<vmem>>, vector<1x1x64x64xf32>
    %182 = vector.shape_cast %181 : vector<1x1x64x64xf32> to vector<64x64xf32>
    %cst_279 = arith.constant dense<0.000000e+00> : vector<128x64xf32>
    %183 = tpu.matmul %180, %182, %cst_279 {dimension_numbers = #tpu.dot_dimension_numbers<[1], [0], [0], [1], [0, 0, 1, 1], [], []>} : vector<128x64xf32>, vector<64x64xf32>, vector<128x64xf32> -> vector<128x64xf32>
    %184 = arith.addf %178, %183 : vector<128x64xf32>
    %c0_280 = arith.constant 0 : index
    %c0_281 = arith.constant 0 : index
    %185 = vector.load %arg7[%c0_280, %c0_281] : memref<1x64xf32, #tpu.memory_space<vmem>>, vector<1x64xf32>
    %186 = vector.broadcast %185 : vector<1x64xf32> to vector<128x64xf32>
    %187 = arith.addf %184, %186 : vector<128x64xf32>
    %cst_282 = arith.constant 0.000000e+00 : f32
    %188 = vector.broadcast %cst_282 : f32 to vector<128x64xf32>
    %189 = arith.maximumf %187, %188 : vector<128x64xf32>
    %c0_283 = arith.constant 0 : index
    %c0_284 = arith.constant 0 : index
    %190 = vector.load %arg9[%c0_283, %c0_284] : memref<64x8xf32, #tpu.memory_space<vmem>>, vector<64x8xf32>
    %cst_285 = arith.constant dense<0.000000e+00> : vector<128x8xf32>
    %191 = tpu.matmul %189, %190, %cst_285 {dimension_numbers = #tpu.dot_dimension_numbers<[1], [0], [0], [1], [0, 0, 1, 1], [], []>} : vector<128x64xf32>, vector<64x8xf32>, vector<128x8xf32> -> vector<128x8xf32>
    %192 = vector.extract_strided_slice %191 {offsets = [0, 0], sizes = [64, 8], strides = [1, 1]} : vector<128x8xf32> to vector<64x8xf32>
    %193 = tpu.transpose %192, [1, 0] : vector<64x8xf32> -> vector<8x64xf32>
    %c0_286 = arith.constant 0 : index
    %c0_287 = arith.constant 0 : index
    %194 = vector.load %arg8[%c0_286, %c0_287] : memref<64x256xf32, #tpu.memory_space<vmem>>, vector<64x256xf32>
    %cst_288 = arith.constant dense<0.000000e+00> : vector<8x256xf32>
    %195 = tpu.matmul %193, %194, %cst_288 {dimension_numbers = #tpu.dot_dimension_numbers<[1], [0], [0], [1], [0, 0, 1, 1], [], []>} : vector<8x64xf32>, vector<64x256xf32>, vector<8x256xf32> -> vector<8x256xf32>
    %c0_289 = arith.constant 0 : index
    %c0_290 = arith.constant 0 : index
    %196 = vector.load %arg10[%c0_289, %c0_290] : memref<8x1xf32, #tpu.memory_space<vmem>>, vector<8x1xf32>
    %197 = vector.broadcast %196 : vector<8x1xf32> to vector<8x256xf32>
    %198 = arith.addf %195, %197 : vector<8x256xf32>
    %199 = vector.extract_strided_slice %198 {offsets = [0, 0], sizes = [3, 256], strides = [1, 1]} : vector<8x256xf32> to vector<3x256xf32>
    %c0_291 = arith.constant 0 : index
    %c0_292 = arith.constant 0 : index
    %c0_293 = arith.constant 0 : index
    %200 = vector.load %arg11[%c0_291, %c0_292, %c0_293] : memref<2x3x256xf32, #tpu.memory_space<vmem>>, vector<1x3x256xf32>
    %201 = vector.shape_cast %200 : vector<1x3x256xf32> to vector<3x256xf32>
    %202 = vector.shape_cast %199 : vector<3x256xf32> to vector<1x3x256xf32>
    tpu.vector_store %arg11[%c0_291, %c0_292, %c0_293], %202 {strides = array<i32>} : memref<2x3x256xf32, #tpu.memory_space<vmem>>, vector<1x3x256xf32>,
    %203 = vector.extract_strided_slice %191 {offsets = [64, 0], sizes = [64, 8], strides = [1, 1]} : vector<128x8xf32> to vector<64x8xf32>
    %204 = tpu.transpose %203, [1, 0] : vector<64x8xf32> -> vector<8x64xf32>
    %c0_294 = arith.constant 0 : index
    %c0_295 = arith.constant 0 : index
    %205 = vector.load %arg8[%c0_294, %c0_295] : memref<64x256xf32, #tpu.memory_space<vmem>>, vector<64x256xf32>
    %cst_296 = arith.constant dense<0.000000e+00> : vector<8x256xf32>
    %206 = tpu.matmul %204, %205, %cst_296 {dimension_numbers = #tpu.dot_dimension_numbers<[1], [0], [0], [1], [0, 0, 1, 1], [], []>} : vector<8x64xf32>, vector<64x256xf32>, vector<8x256xf32> -> vector<8x256xf32>
    %c0_297 = arith.constant 0 : index
    %c0_298 = arith.constant 0 : index
    %207 = vector.load %arg10[%c0_297, %c0_298] : memref<8x1xf32, #tpu.memory_space<vmem>>, vector<8x1xf32>
    %208 = vector.broadcast %207 : vector<8x1xf32> to vector<8x256xf32>
    %209 = arith.addf %206, %208 : vector<8x256xf32>
    %210 = vector.extract_strided_slice %209 {offsets = [0, 0], sizes = [3, 256], strides = [1, 1]} : vector<8x256xf32> to vector<3x256xf32>
    %c1_299 = arith.constant 1 : index
    %c0_300 = arith.constant 0 : index
    %c0_301 = arith.constant 0 : index
    %211 = vector.load %arg11[%c1_299, %c0_300, %c0_301] : memref<2x3x256xf32, #tpu.memory_space<vmem>>, vector<1x3x256xf32>
    %212 = vector.shape_cast %211 : vector<1x3x256xf32> to vector<3x256xf32>
    %213 = vector.shape_cast %210 : vector<3x256xf32> to vector<1x3x256xf32>
    tpu.vector_store %arg11[%c1_299, %c0_300, %c0_301], %213 {strides = array<i32>} : memref<2x3x256xf32, #tpu.memory_space<vmem>>, vector<1x3x256xf32>,
    return
  }
  func.func @transform_0(%arg0: i32) -> (i32, i32, i32, i32) {
    %c0_i32 = arith.constant 0 : i32
    %c0_i32_0 = arith.constant 0 : i32
    %c0_i32_1 = arith.constant 0 : i32
    %c0_i32_2 = arith.constant 0 : i32
    %c0_i32_3 = arith.constant 0 : i32
    return %c0_i32, %c0_i32_0, %c0_i32_1, %c0_i32_2 : i32, i32, i32, i32
  }
  func.func @transform_1(%arg0: i32) -> (i32, i32, i32, i32) {
    %c0_i32 = arith.constant 0 : i32
    %c0_i32_0 = arith.constant 0 : i32
    %c0_i32_1 = arith.constant 0 : i32
    %c0_i32_2 = arith.constant 0 : i32
    %c0_i32_3 = arith.constant 0 : i32
    return %c0_i32, %c0_i32_0, %c0_i32_1, %c0_i32_2 : i32, i32, i32, i32
  }
  func.func @transform_2(%arg0: i32) -> (i32, i32) {
    %c0_i32 = arith.constant 0 : i32
    %c0_i32_0 = arith.constant 0 : i32
    %c0_i32_1 = arith.constant 0 : i32
    return %c0_i32, %c0_i32_0 : i32, i32
  }
  func.func @transform_3(%arg0: i32) -> (i32, i32, i32, i32) {
    %c0_i32 = arith.constant 0 : i32
    %c0_i32_0 = arith.constant 0 : i32
    %c0_i32_1 = arith.constant 0 : i32
    %c0_i32_2 = arith.constant 0 : i32
    %c0_i32_3 = arith.constant 0 : i32
    return %c0_i32, %c0_i32_0, %c0_i32_1, %c0_i32_2 : i32, i32, i32, i32
  }
  func.func @transform_4(%arg0: i32) -> (i32, i32) {
    %c0_i32 = arith.constant 0 : i32
    %c0_i32_0 = arith.constant 0 : i32
    %c0_i32_1 = arith.constant 0 : i32
    return %c0_i32, %c0_i32_0 : i32, i32
  }
  func.func @transform_5(%arg0: i32) -> (i32, i32, i32, i32) {
    %c0_i32 = arith.constant 0 : i32
    %c0_i32_0 = arith.constant 0 : i32
    %c0_i32_1 = arith.constant 0 : i32
    %c0_i32_2 = arith.constant 0 : i32
    %c0_i32_3 = arith.constant 0 : i32
    return %c0_i32, %c0_i32_0, %c0_i32_1, %c0_i32_2 : i32, i32, i32, i32
  }
  func.func @transform_6(%arg0: i32) -> (i32, i32) {
    %c0_i32 = arith.constant 0 : i32
    %c0_i32_0 = arith.constant 0 : i32
    %c0_i32_1 = arith.constant 0 : i32
    return %c0_i32, %c0_i32_0 : i32, i32
  }
  func.func @transform_7(%arg0: i32) -> (i32, i32) {
    %c0_i32 = arith.constant 0 : i32
    %c0_i32_0 = arith.constant 0 : i32
    %c0_i32_1 = arith.constant 0 : i32
    return %c0_i32, %c0_i32_0 : i32, i32
  }
  func.func @transform_8(%arg0: i32) -> (i32, i32) {
    %c0_i32 = arith.constant 0 : i32
    %c0_i32_0 = arith.constant 0 : i32
    %c0_i32_1 = arith.constant 0 : i32
    return %c0_i32, %c0_i32_0 : i32, i32
  }
  func.func @transform_9(%arg0: i32) -> (i32, i32) {
    %c0_i32 = arith.constant 0 : i32
    %c0_i32_0 = arith.constant 0 : i32
    %c0_i32_1 = arith.constant 0 : i32
    return %c0_i32, %c0_i32_0 : i32, i32
  }
  func.func @transform_10(%arg0: i32) -> (i32, i32, i32) {
    %c0_i32 = arith.constant 0 : i32
    %c0_i32_0 = arith.constant 0 : i32
    %c0_i32_1 = arith.constant 0 : i32
    %c0_i32_2 = arith.constant 0 : i32
    return %c0_i32, %c0_i32_0, %c0_i32_1 : i32, i32, i32
  }
}

</mosaic_0001>

<bundles_post_ra>
// kernel: simple_unet_forward.1
= control target key start
LH: loop header
LB: loop body
LE: loop exit
PB: predicated region body
PF: predicated region fallthrough
CT: control target
= control target key end

     0   :  { %vm359_vm0 = vcmask 1042432   ;;  %vm166_vm1 = vcmask 23552   ;;  %vm6435_vm2 = vcmask 523264   ;;  %s28907_s1 = inlined_call_operand.vmem [shape: f32[3,3,3,64], index: 1, kind: input, shape index: {}]   ;;  %s28908_s0 = inlined_call_operand.vmem [shape: f32[2,18,18,3], index: 0, kind: input, shape index: {}]   ;;  %s28909_s3 = inlined_call_operand.vmem [shape: f32[3,3,64,64], index: 3, kind: input, shape index: {}]   ;;  %s28910_s2 = inlined_call_operand.vmem [shape: f32[1,64], index: 2, kind: input, shape index: {}]   ;;  %s28911_s5 = inlined_call_operand.vmem [shape: f32[3,3,64,64], index: 5, kind: input, shape index: {}]   ;;  %s28912_s4 = inlined_call_operand.vmem [shape: f32[1,64], index: 4, kind: input, shape index: {}]   ;;  %s28913_s8 = inlined_call_operand.vmem [shape: f32[64,8], index: 8, kind: input, shape index: {}]   ;;  %s28914_s6 = inlined_call_operand.vmem [shape: f32[1,64], index: 6, kind: input, shape index: {}]   ;;  %s28915_s7 = inlined_call_operand.vmem [shape: f32[64,256], index: 7, kind: input, shape index: {}]   ;;  %s28916_s9 = inlined_call_operand.vmem [shape: f32[8,1], index: 9, kind: input, shape index: {}]   ;;  %s28917_s10 = inlined_call_operand.vmem [shape: f32[2,3,256], index: 10, kind: output, shape index: {}]  }
   0x1   :  { %v16044_v0 = vld [vmem:[%s28907_s1 + $0x4] sm:$0x7]  ;;  %v101_v2 = vld [vmem:[%s28908_s0 + $0x9] sm:$0xff]  ;;  %v99_v3 = vld [vmem:[%s28907_s1] sm:$0x7] }
   0x2   :  { %v100_v1 = vld [vmem:[%s28908_s0 + $0x1] sm:$0xff]  ;;  %19364 = vmatprep.subr.msk.mxu0 %vm359_vm0, %v16044_v0  ;;  %v23224_v4 = vld [vmem:[%s28908_s0 + $0x19] sm:$0xff]  ;;  %21990 = vmatprep.subr.msk.mxu1 %vm359_vm0, %v16044_v0  ;;  %v23244_v7 = vld [vmem:[%s28908_s0 + $0x31] sm:$0xff] }
   0x3   :  { %19366 = vmatprep.mubr.msk.f32.mxu0 %vm166_vm1, %v100_v1  ;;  %29072 = vst [vmem:[#allocation4_spill] sm:$0xff] %v23224_v4  ;;  %19365 = vmatpush3.msk.msra.mxu0 %vm359_vm0, %v16044_v0  ;;  %v16175_v5 = vld [vmem:[%s28907_s1 + $0x8] sm:$0x7]  ;;  %29074 = vst [vmem:[#allocation6_spill] sm:$0xff] %v23244_v7  ;;  %v23255_v8 = vld [vmem:[%s28908_s0 + $0x39] sm:$0xff] }
   0x4   :  { %19367 = vmatmul.mubr.msk.f32.vlgmr.msra.gmra.mrb[0].mxu0 %vm166_vm1, %v101_v2  ;;  %19462 = vmatprep.subr.msk.mxu0 %vm359_vm0, %v99_v3  ;;  %v23239_v6 = vld [vmem:[%s28908_s0 + $0x21] sm:$0xff]  ;;  %29075 = vst [vmem:[#allocation7_spill] sm:$0xff] %v23255_v8  ;;  %v23269_v11 = vld [vmem:[%s28908_s0 + $0x18] sm:$0xff]  ;;  %v23283_v13 = vld [vmem:[%s28908_s0 + $0x30] sm:$0xff] }
   0x5   :  { %19463 = vmatpush3.msk.msra.mxu0 %vm359_vm0, %v99_v3  ;;  %19369 = vmatprep.mubr.msk.f32.mxu0 %vm166_vm1, %v23224_v4  ;;  %29073 = vst [vmem:[#allocation5_spill] sm:$0xff] %v23239_v6  ;;  %v35_v9 = vld [vmem:[%s28908_s0] sm:$0xff]  ;;  %v36_v10 = vld [vmem:[%s28908_s0 + $0x8] sm:$0xff]  ;;  %v23292_v14 = vld [vmem:[%s28908_s0 + $0x38] sm:$0xff] }
   0x6   :  { %19560 = vmatprep.subr.msk.mxu0 %vm359_vm0, %v16175_v5  ;;  %21991 = vmatpush3.msk.msra.mxu1 %vm359_vm0, %v16044_v0  ;;  %v23278_v12 = vld [vmem:[%s28908_s0 + $0x20] sm:$0xff]  ;;  %v23297_v15 = vld [vmem:[%s28908_s0 + $0x48] sm:$0xff]  ;;  %v23306_v16 = vld [vmem:[%s28908_s0 + $0x50] sm:$0xff] }
   0x7   :  { %v23311_v17 = vld [vmem:[%s28908_s0 + $0x60] sm:$0xff]  ;;  %v23316_v18 = vld [vmem:[%s28907_s1 + $0xc] sm:$0x7]  ;;  %v23332_v20 = vld [vmem:[%s28908_s0 + $0x78] sm:$0xff] }
   0x8   :  { %19370 = vmatmul.mubr.msk.f32.gmra.mrb[2].mxu0 %vm166_vm1, %v23239_v6  ;;  %v23327_v19 = vld [vmem:[%s28908_s0 + $0x68] sm:$0xff]  ;;  %v23341_v21 = vld [vmem:[%s28908_s0 + $0x80] sm:$0xff]  ;;  %v23346_v22 = vld [vmem:[%s28908_s0 + $0x90] sm:$0xff] }
   0x9   :  { %19372 = vmatprep.mubr.msk.f32.mxu0 %vm166_vm1, %v23244_v7  ;;  %v23355_v23 = vld [vmem:[%s28908_s0 + $0x98] sm:$0xff]  ;;  %v23360_v24 = vld [vmem:[%s28908_s0 + $0xa8] sm:$0xff]  ;;  %v23369_v25 = vld [vmem:[%s28908_s0 + $0xb0] sm:$0xff] }
   0xa   :  { %v23374_v26 = vld [vmem:[%s28908_s0 + $0xc0] sm:$0xff]  ;;  %v23383_v27 = vld [vmem:[%s28908_s0 + $0xc8] sm:$0xff]  ;;  %v23388_v28 = vld [vmem:[%s28908_s0 + $0xd8] sm:$0xff] }
   0xb   :  { %v23397_v29 = vld [vmem:[%s28908_s0 + $0xe0] sm:$0xff]  ;;  %v23402_v30 = vld [vmem:[%s28908_s0 + $0xf0] sm:$0xff]  ;;  %v23411_v31 = vld [vmem:[%s28908_s0 + $0xf8] sm:$0xff] }
   0xc   :  { %19373 = vmatmul.mubr.msk.f32.gmra.mrb[4].mxu0 %vm166_vm1, %v23255_v8  ;;  %v23416_v32 = vld [vmem:[%s28908_s0 + $0x108] sm:$0xff]  ;;  %v23425_v33 = vld [vmem:[%s28908_s0 + $0x110] sm:$0xff]  ;;  %v23430_v34 = vld [vmem:[%s28908_s0 + $0x120] sm:$0xff] }
   0xd   :  { %19464 = vmatprep.mubr.msk.f32.mxu0 %vm166_vm1, %v35_v9  ;;  %v23439_v35 = vld [vmem:[%s28908_s0 + $0x128] sm:$0xff]  ;;  %v23444_v36 = vld [vmem:[%s28908_s0 + $0x138] sm:$0xff]  ;;  %v23453_v37 = vld [vmem:[%s28908_s0 + $0x140] sm:$0xff] }
   0xe   :  { %v23458_v38 = vld [vmem:[%s28908_s0 + $0x150] sm:$0xff]  ;;  %v23467_v39 = vld [vmem:[%s28908_s0 + $0x158] sm:$0xff]  ;;  %v23472_v40 = vld [vmem:[%s28908_s0 + $0x168] sm:$0xff] }
   0xf   :  { %v23481_v41 = vld [vmem:[%s28908_s0 + $0x170] sm:$0xff]  ;;  %v68_v43 = vld [vmem:[%s28908_s0 + $0x1b8] sm:$0xff]  ;;  %v23495_v44 = vld [vmem:[%s28908_s0 + $0x1c8] sm:$0xff] }
  0x10   :  { %19465 = vmatmul.mubr.msk.f32.vlgmr.msra.gmra.mrb[0].mxu0 %vm166_vm1, %v36_v10  ;;  %v67_v42 = vld [vmem:[%s28908_s0 + $0x1b0] sm:$0xff]  ;;  %v23508_v46 = vld [vmem:[%s28908_s0 + $0x1e0] sm:$0xff]  ;;  %v23517_v47 = vld [vmem:[%s28908_s0 + $0x1e8] sm:$0xff] }
  0x11   :  { %19561 = vmatpush3.msk.msra.mxu0 %vm359_vm0, %v16175_v5  ;;  %19467 = vmatprep.mubr.msk.f32.mxu0 %vm166_vm1, %v23269_v11  ;;  %v23503_v45 = vld [vmem:[%s28908_s0 + $0x1d0] sm:$0xff]  ;;  %v23522_v48 = vld [vmem:[%s28908_s0 + $0x1f8] sm:$0xff]  ;;  %v23531_v49 = vld [vmem:[%s28908_s0 + $0x200] sm:$0xff] }
  0x12   :  { %19658 = vmatprep.subr.msk.mxu0 %vm359_vm0, %v23316_v18  ;;  %v23536_v50 = vld [vmem:[%s28908_s0 + $0x210] sm:$0xff]  ;;  %v23545_v51 = vld [vmem:[%s28908_s0 + $0x218] sm:$0xff]  ;;  %v23550_v52 = vld [vmem:[%s28908_s0 + $0x228] sm:$0xff] }
  0x13   :  { %v23559_v53 = vld [vmem:[%s28908_s0 + $0x230] sm:$0xff]  ;;  %v23564_v54 = vld [vmem:[%s28908_s0 + $0x240] sm:$0xff]  ;;  %v23573_v55 = vld [vmem:[%s28908_s0 + $0x248] sm:$0xff] }
  0x14   :  { %19468 = vmatmul.mubr.msk.f32.gmra.mrb[2].mxu0 %vm166_vm1, %v23278_v12  ;;  %v23578_v56 = vld [vmem:[%s28908_s0 + $0x258] sm:$0xff]  ;;  %v23587_v57 = vld [vmem:[%s28908_s0 + $0x260] sm:$0xff]  ;;  %v23592_v58 = vld [vmem:[%s28908_s0 + $0x270] sm:$0xff] }
  0x15   :  { %19470 = vmatprep.mubr.msk.f32.mxu0 %vm166_vm1, %v23283_v13  ;;  %v23601_v59 = vld [vmem:[%s28908_s0 + $0x278] sm:$0xff]  ;;  %v23606_v60 = vld [vmem:[%s28908_s0 + $0x288] sm:$0xff]  ;;  %v23615_v61 = vld [vmem:[%s28908_s0 + $0x290] sm:$0xff] }
  0x16   :  { %v23620_v62 = vld [vmem:[%s28908_s0 + $0x2a0] sm:$0xff]  ;;  %v23629_v63 = vld [vmem:[%s28908_s0 + $0x2a8] sm:$0xff]  ;;  %v23634_v0 = vld [vmem:[%s28908_s0 + $0x2b8] sm:$0xff] }
  0x17   :  { %v23643_v1 = vld [vmem:[%s28908_s0 + $0x2c0] sm:$0xff]  ;;  %v23648_v2 = vld [vmem:[%s28908_s0 + $0x2d0] sm:$0xff]  ;;  %v23657_v3 = vld [vmem:[%s28908_s0 + $0x2d8] sm:$0xff] }
  0x18   :  { %19471 = vmatmul.mubr.msk.f32.gmra.mrb[4].mxu0 %vm166_vm1, %v23292_v14  ;;  %v23662_v5 = vld [vmem:[%s28908_s0 + $0x2e8] sm:$0xff]  ;;  %v23671_v9 = vld [vmem:[%s28908_s0 + $0x2f0] sm:$0xff]  ;;  %v23676_v10 = vld [vmem:[%s28908_s0 + $0x300] sm:$0xff] }
  0x19   :  { %19473 = vmatprep.mubr.msk.f32.mxu0 %vm166_vm1, %v23297_v15  ;;  %v23699_v8 = vld [vmem:[%s28908_s0 + $0x320] sm:$0xff]  ;;  %v1329_v6 = vld [vmem:[%s28908_s0 + $0xa] sm:$0xff] }
  0x1a   :  { %v1328_v7 = vld [vmem:[%s28908_s0 + $0x2] sm:$0xff]  ;;  %v23713_v4 = vld [vmem:[%s28908_s0 + $0x1a] sm:$0xff] }
  0x1b   :  { %29077 = vst [vmem:[#allocation9_spill] sm:$0xff] %v23713_v4 }
  0x1c   :  { %19474 = vmatmul.mubr.msk.f32.gmra.mrb[6].mxu0 %vm166_vm1, %v23306_v16 }
  0x1d   :  { %19476 = vmatprep.mubr.msk.f32.mxu0 %vm166_vm1, %v23311_v17 }
  0x20   :  { %19477 = vmatmul.mubr.msk.f32.gmra.mrb[8].mxu0 %vm166_vm1, %v23327_v19 }
  0x21   :  { %19479 = vmatprep.mubr.msk.f32.mxu0 %vm166_vm1, %v23332_v20 }
  0x24   :  { %19480 = vmatmul.mubr.msk.f32.gmra.mrb[10].mxu0 %vm166_vm1, %v23341_v21 }
  0x25   :  { %19482 = vmatprep.mubr.msk.f32.mxu0 %vm166_vm1, %v23346_v22 }
  0x28   :  { %19483 = vmatmul.mubr.msk.f32.gmra.mrb[12].mxu0 %vm166_vm1, %v23355_v23 }
  0x29   :  { %19485 = vmatprep.mubr.msk.f32.mxu0 %vm166_vm1, %v23360_v24 }
  0x2c   :  { %19486 = vmatmul.mubr.msk.f32.gmra.mrb[14].mxu0 %vm166_vm1, %v23369_v25 }
  0x2d   :  { %19488 = vmatprep.mubr.msk.f32.mxu0 %vm166_vm1, %v23374_v26 }
  0x30   :  { %19489 = vmatmul.mubr.msk.f32.gmra.mrb[16].mxu0 %vm166_vm1, %v23383_v27 }
  0x31   :  { %19491 = vmatprep.mubr.msk.f32.mxu0 %vm166_vm1, %v23388_v28 }
  0x34   :  { %19492 = vmatmul.mubr.msk.f32.gmra.mrb[18].mxu0 %vm166_vm1, %v23397_v29 }
  0x35   :  { %19494 = vmatprep.mubr.msk.f32.mxu0 %vm166_vm1, %v23402_v30 }
  0x38   :  { %19495 = vmatmul.mubr.msk.f32.gmra.mrb[20].mxu0 %vm166_vm1, %v23411_v31 }
  0x39   :  { %19497 = vmatprep.mubr.msk.f32.mxu0 %vm166_vm1, %v23416_v32 }
  0x3c   :  { %19498 = vmatmul.mubr.msk.f32.gmra.mrb[22].mxu0 %vm166_vm1, %v23425_v33 }
  0x3d   :  { %19500 = vmatprep.mubr.msk.f32.mxu0 %vm166_vm1, %v23430_v34 }
  0x40   :  { %19501 = vmatmul.mubr.msk.f32.gmra.mrb[24].mxu0 %vm166_vm1, %v23439_v35 }
  0x41   :  { %19503 = vmatprep.mubr.msk.f32.mxu0 %vm166_vm1, %v23444_v36 }
  0x44   :  { %19504 = vmatmul.mubr.msk.f32.gmra.mrb[26].mxu0 %vm166_vm1, %v23453_v37 }
  0x45   :  { %19506 = vmatprep.mubr.msk.f32.mxu0 %vm166_vm1, %v23458_v38 }
  0x48   :  { %19507 = vmatmul.mubr.msk.f32.gmra.mrb[28].mxu0 %vm166_vm1, %v23467_v39 }
  0x49   :  { %19509 = vmatprep.mubr.msk.f32.mxu0 %vm166_vm1, %v23472_v40 }
  0x4c   :  { %19510 = vmatmul.mubr.msk.f32.gmra.mrb[30].mxu0 %vm166_vm1, %v23481_v41 }
  0x4d   :  { %19512 = vmatprep.mubr.msk.f32.mxu0 %vm166_vm1, %v67_v42  ;;  %v23685_v42 = vld [vmem:[%s28908_s0 + $0x308] sm:$0xff] }
  0x50   :  { %19513 = vmatmul.mubr.msk.f32.gmra.mrb[32].mxu0 %vm166_vm1, %v68_v43  ;;  %v23690_v43 = vld [vmem:[%s28908_s0 + $0x318] sm:$0xff] }
  0x51   :  { %19515 = vmatprep.mubr.msk.f32.mxu0 %vm166_vm1, %v23495_v44  ;;  %29076 = vst [vmem:[#allocation8_spill] sm:$0xff] %v23690_v43 }
  0x54   :  { %19516 = vmatmul.mubr.msk.f32.gmra.mrb[34].mxu0 %vm166_vm1, %v23503_v45 }
  0x55   :  { %19518 = vmatprep.mubr.msk.f32.mxu0 %vm166_vm1, %v23508_v46 }
  0x58   :  { %19519 = vmatmul.mubr.msk.f32.gmra.mrb[36].mxu0 %vm166_vm1, %v23517_v47 }
  0x59   :  { %19521 = vmatprep.mubr.msk.f32.mxu0 %vm166_vm1, %v23522_v48 }
  0x5c   :  { %19522 = vmatmul.mubr.msk.f32.gmra.mrb[38].mxu0 %vm166_vm1, %v23531_v49 }
  0x5d   :  { %19524 = vmatprep.mubr.msk.f32.mxu0 %vm166_vm1, %v23536_v50 }
  0x60   :  { %19525 = vmatmul.mubr.msk.f32.gmra.mrb[40].mxu0 %vm166_vm1, %v23545_v51 }
  0x61   :  { %19527 = vmatprep.mubr.msk.f32.mxu0 %vm166_vm1, %v23550_v52 }
  0x64   :  { %19528 = vmatmul.mubr.msk.f32.gmra.mrb[42].mxu0 %vm166_vm1, %v23559_v53 }
  0x65   :  { %19530 = vmatprep.mubr.msk.f32.mxu0 %vm166_vm1, %v23564_v54 }
  0x68   :  { %19531 = vmatmul.mubr.msk.f32.gmra.mrb[44].mxu0 %vm166_vm1, %v23573_v55 }
  0x69   :  { %19533 = vmatprep.mubr.msk.f32.mxu0 %vm166_vm1, %v23578_v56 }
  0x6c   :  { %19534 = vmatmul.mubr.msk.f32.gmra.mrb[46].mxu0 %vm166_vm1, %v23587_v57 }
  0x6d   :  { %19536 = vmatprep.mubr.msk.f32.mxu0 %vm166_vm1, %v23592_v58 }
  0x70   :  { %19537 = vmatmul.mubr.msk.f32.gmra.mrb[48].mxu0 %vm166_vm1, %v23601_v59 }
  0x71   :  { %19539 = vmatprep.mubr.msk.f32.mxu0 %vm166_vm1, %v23606_v60 }
  0x74   :  { %19540 = vmatmul.mubr.msk.f32.gmra.mrb[50].mxu0 %vm166_vm1, %v23615_v61 }
  0x75   :  { %19542 = vmatprep.mubr.msk.f32.mxu0 %vm166_vm1, %v23620_v62 }
  0x78   :  { %19543 = vmatmul.mubr.msk.f32.gmra.mrb[52].mxu0 %vm166_vm1, %v23629_v63 }
  0x79   :  { %19545 = vmatprep.mubr.msk.f32.mxu0 %vm166_vm1, %v23634_v0 }
  0x7c   :  { %19546 = vmatmul.mubr.msk.f32.gmra.mrb[54].mxu0 %vm166_vm1, %v23643_v1 }
  0x7d   :  { %19548 = vmatprep.mubr.msk.f32.mxu0 %vm166_vm1, %v23648_v2 }
  0x80   :  { %19549 = vmatmul.mubr.msk.f32.gmra.mrb[56].mxu0 %vm166_vm1, %v23657_v3 }
  0x81   :  { %19551 = vmatprep.mubr.msk.f32.mxu0 %vm166_vm1, %v23662_v5 }
  0x84   :  { %19552 = vmatmul.mubr.msk.f32.gmra.mrb[58].mxu0 %vm166_vm1, %v23671_v9 }
  0x85   :  { %19554 = vmatprep.mubr.msk.f32.mxu0 %vm166_vm1, %v23676_v10 }
  0x88   :  { %19555 = vmatmul.mubr.msk.f32.gmra.mrb[60].mxu0 %vm166_vm1, %v23685_v42 }
  0x89   :  { %19557 = vmatprep.mubr.msk.f32.mxu0 %vm166_vm1, %v23690_v43  ;;  %v23719_v43 = vld [vmem:[%s28907_s1 + $0x10] sm:$0x7] }
  0x8c   :  { %19558 = vmatmul.mubr.msk.f32.gmra.mrb[62].mxu0 %vm166_vm1, %v23699_v8 }
  0x8d   :  { %19562 = vmatprep.mubr.msk.f32.mxu0 %vm166_vm1, %v1328_v7  ;;  %v23728_v7 = vld [vmem:[%s28908_s0 + $0x22] sm:$0xff] }
  0x8e   :  { %29078 = vst [vmem:[#allocation10_spill] sm:$0xff] %v23728_v7 }
  0x90   :  { %19563 = vmatmul.mubr.msk.f32.vlgmr.msra.gmra.mrb[0].mxu0 %vm166_vm1, %v1329_v6  ;;  %v23733_v6 = vld [vmem:[%s28908_s0 + $0x32] sm:$0xff] }
  0x91   :  { %19659 = vmatpush3.msk.msra.mxu0 %vm359_vm0, %v23316_v18  ;;  %19565 = vmatprep.mubr.msk.f32.mxu0 %vm166_vm1, %v23713_v4  ;;  %29079 = vst [vmem:[#allocation11_spill] sm:$0xff] %v23733_v6  ;;  %v23744_v18 = vld [vmem:[%s28908_s0 + $0x3a] sm:$0xff]  ;;  %v23749_v4 = vld [vmem:[%s28908_s0 + $0x4a] sm:$0xff] }
  0x92   :  { %19756 = vmatprep.subr.msk.mxu0 %vm359_vm0, %v23719_v43  ;;  %29080 = vst [vmem:[#allocation12_spill] sm:$0xff] %v23744_v18  ;;  %29081 = vst [vmem:[#allocation13_spill] sm:$0xff] %v23749_v4 }
  0x94   :  { %19566 = vmatmul.mubr.msk.f32.gmra.mrb[2].mxu0 %vm166_vm1, %v23728_v7  ;;  %v23763_v7 = vld [vmem:[%s28908_s0 + $0x62] sm:$0xff] }
  0x95   :  { %19568 = vmatprep.mubr.msk.f32.mxu0 %vm166_vm1, %v23733_v6  ;;  %v23758_v6 = vld [vmem:[%s28908_s0 + $0x52] sm:$0xff]  ;;  %29083 = vst [vmem:[#allocation15_spill] sm:$0xff] %v23763_v7 }
  0x96   :  { %29082 = vst [vmem:[#allocation14_spill] sm:$0xff] %v23758_v6 }
  0x98   :  { %19569 = vmatmul.mubr.msk.f32.gmra.mrb[4].mxu0 %vm166_vm1, %v23744_v18  ;;  %v23777_v18 = vld [vmem:[%s28908_s0 + $0x7a] sm:$0xff] }
  0x99   :  { %19571 = vmatprep.mubr.msk.f32.mxu0 %vm166_vm1, %v23749_v4  ;;  %v23772_v4 = vld [vmem:[%s28908_s0 + $0x6a] sm:$0xff]  ;;  %29085 = vst [vmem:[#allocation17_spill] sm:$0xff] %v23777_v18 }
  0x9a   :  { %29084 = vst [vmem:[#allocation16_spill] sm:$0xff] %v23772_v4 }
  0x9c   :  { %19572 = vmatmul.mubr.msk.f32.gmra.mrb[6].mxu0 %vm166_vm1, %v23758_v6  ;;  %v23791_v6 = vld [vmem:[%s28908_s0 + $0x92] sm:$0xff] }
  0x9d   :  { %19574 = vmatprep.mubr.msk.f32.mxu0 %vm166_vm1, %v23763_v7  ;;  %v23786_v7 = vld [vmem:[%s28908_s0 + $0x82] sm:$0xff]  ;;  %29087 = vst [vmem:[#allocation19_spill] sm:$0xff] %v23791_v6 }
  0x9e   :  { %29086 = vst [vmem:[#allocation18_spill] sm:$0xff] %v23786_v7 }
  0xa0   :  { %19575 = vmatmul.mubr.msk.f32.gmra.mrb[8].mxu0 %vm166_vm1, %v23772_v4  ;;  %v23805_v4 = vld [vmem:[%s28908_s0 + $0xaa] sm:$0xff] }
  0xa1   :  { %19577 = vmatprep.mubr.msk.f32.mxu0 %vm166_vm1, %v23777_v18  ;;  %v23800_v18 = vld [vmem:[%s28908_s0 + $0x9a] sm:$0xff]  ;;  %29089 = vst [vmem:[#allocation21_spill] sm:$0xff] %v23805_v4 }
  0xa2   :  { %29088 = vst [vmem:[#allocation20_spill] sm:$0xff] %v23800_v18 }
  0xa4   :  { %19578 = vmatmul.mubr.msk.f32.gmra.mrb[10].mxu0 %vm166_vm1, %v23786_v7  ;;  %v23819_v7 = vld [vmem:[%s28908_s0 + $0xc2] sm:$0xff] }
  0xa5   :  { %19580 = vmatprep.mubr.msk.f32.mxu0 %vm166_vm1, %v23791_v6  ;;  %v23814_v6 = vld [vmem:[%s28908_s0 + $0xb2] sm:$0xff]  ;;  %29091 = vst [vmem:[#allocation23_spill] sm:$0xff] %v23819_v7 }
  0xa6   :  { %29090 = vst [vmem:[#allocation22_spill] sm:$0xff] %v23814_v6 }
  0xa8   :  { %19581 = vmatmul.mubr.msk.f32.gmra.mrb[12].mxu0 %vm166_vm1, %v23800_v18  ;;  %v23833_v18 = vld [vmem:[%s28908_s0 + $0xda] sm:$0xff] }
  0xa9   :  { %19583 = vmatprep.mubr.msk.f32.mxu0 %vm166_vm1, %v23805_v4  ;;  %v23828_v4 = vld [vmem:[%s28908_s0 + $0xca] sm:$0xff]  ;;  %29093 = vst [vmem:[#allocation25_spill] sm:$0xff] %v23833_v18 }
  0xaa   :  { %29092 = vst [vmem:[#allocation24_spill] sm:$0xff] %v23828_v4 }
  0xac   :  { %19584 = vmatmul.mubr.msk.f32.gmra.mrb[14].mxu0 %vm166_vm1, %v23814_v6  ;;  %v23847_v6 = vld [vmem:[%s28908_s0 + $0xf2] sm:$0xff] }
  0xad   :  { %19586 = vmatprep.mubr.msk.f32.mxu0 %vm166_vm1, %v23819_v7  ;;  %v23842_v7 = vld [vmem:[%s28908_s0 + $0xe2] sm:$0xff]  ;;  %29095 = vst [vmem:[#allocation27_spill] sm:$0xff] %v23847_v6 }
  0xae   :  { %29094 = vst [vmem:[#allocation26_spill] sm:$0xff] %v23842_v7 }
  0xb0   :  { %19587 = vmatmul.mubr.msk.f32.gmra.mrb[16].mxu0 %vm166_vm1, %v23828_v4  ;;  %v23861_v4 = vld [vmem:[%s28908_s0 + $0x10a] sm:$0xff] }
  0xb1   :  { %19589 = vmatprep.mubr.msk.f32.mxu0 %vm166_vm1, %v23833_v18  ;;  %v23856_v18 = vld [vmem:[%s28908_s0 + $0xfa] sm:$0xff]  ;;  %29097 = vst [vmem:[#allocation29_spill] sm:$0xff] %v23861_v4 }
  0xb2   :  { %29096 = vst [vmem:[#allocation28_spill] sm:$0xff] %v23856_v18 }
  0xb4   :  { %19590 = vmatmul.mubr.msk.f32.gmra.mrb[18].mxu0 %vm166_vm1, %v23842_v7  ;;  %v23875_v7 = vld [vmem:[%s28908_s0 + $0x122] sm:$0xff] }
  0xb5   :  { %19592 = vmatprep.mubr.msk.f32.mxu0 %vm166_vm1, %v23847_v6  ;;  %v23870_v6 = vld [vmem:[%s28908_s0 + $0x112] sm:$0xff]  ;;  %29099 = vst [vmem:[#allocation31_spill] sm:$0xff] %v23875_v7 }
  0xb6   :  { %29098 = vst [vmem:[#allocation30_spill] sm:$0xff] %v23870_v6 }
  0xb8   :  { %19593 = vmatmul.mubr.msk.f32.gmra.mrb[20].mxu0 %vm166_vm1, %v23856_v18  ;;  %v23889_v18 = vld [vmem:[%s28908_s0 + $0x13a] sm:$0xff] }
  0xb9   :  { %19595 = vmatprep.mubr.msk.f32.mxu0 %vm166_vm1, %v23861_v4  ;;  %v23884_v4 = vld [vmem:[%s28908_s0 + $0x12a] sm:$0xff]  ;;  %29101 = vst [vmem:[#allocation33_spill] sm:$0xff] %v23889_v18 }
  0xba   :  { %29100 = vst [vmem:[#allocation32_spill] sm:$0xff] %v23884_v4 }
  0xbc   :  { %19596 = vmatmul.mubr.msk.f32.gmra.mrb[22].mxu0 %vm166_vm1, %v23870_v6  ;;  %v23903_v6 = vld [vmem:[%s28908_s0 + $0x152] sm:$0xff] }
  0xbd   :  { %19598 = vmatprep.mubr.msk.f32.mxu0 %vm166_vm1, %v23875_v7  ;;  %v23898_v7 = vld [vmem:[%s28908_s0 + $0x142] sm:$0xff]  ;;  %29103 = vst [vmem:[#allocation35_spill] sm:$0xff] %v23903_v6 }
  0xbe   :  { %29102 = vst [vmem:[#allocation34_spill] sm:$0xff] %v23898_v7 }
  0xc0   :  { %19599 = vmatmul.mubr.msk.f32.gmra.mrb[24].mxu0 %vm166_vm1, %v23884_v4  ;;  %v23917_v4 = vld [vmem:[%s28908_s0 + $0x16a] sm:$0xff] }
  0xc1   :  { %19601 = vmatprep.mubr.msk.f32.mxu0 %vm166_vm1, %v23889_v18  ;;  %v23912_v18 = vld [vmem:[%s28908_s0 + $0x15a] sm:$0xff]  ;;  %29105 = vst [vmem:[#allocation37_spill] sm:$0xff] %v23917_v4 }
  0xc2   :  { %29104 = vst [vmem:[#allocation36_spill] sm:$0xff] %v23912_v18 }
  0xc4   :  { %19602 = vmatmul.mubr.msk.f32.gmra.mrb[26].mxu0 %vm166_vm1, %v23898_v7  ;;  %v1360_v7 = vld [vmem:[%s28908_s0 + $0x1b2] sm:$0xff] }
  0xc5   :  { %19604 = vmatprep.mubr.msk.f32.mxu0 %vm166_vm1, %v23903_v6  ;;  %v23926_v6 = vld [vmem:[%s28908_s0 + $0x172] sm:$0xff] }
  0xc6   :  { %29106 = vst [vmem:[#allocation38_spill] sm:$0xff] %v23926_v6 }
  0xc8   :  { %19605 = vmatmul.mubr.msk.f32.gmra.mrb[28].mxu0 %vm166_vm1, %v23912_v18  ;;  %v1361_v18 = vld [vmem:[%s28908_s0 + $0x1ba] sm:$0xff] }
  0xc9   :  { %19607 = vmatprep.mubr.msk.f32.mxu0 %vm166_vm1, %v23917_v4  ;;  %v23940_v4 = vld [vmem:[%s28908_s0 + $0x1ca] sm:$0xff] }
  0xca   :  { %29107 = vst [vmem:[#allocation39_spill] sm:$0xff] %v23940_v4 }
  0xcc   :  { %19608 = vmatmul.mubr.msk.f32.gmra.mrb[30].mxu0 %vm166_vm1, %v23926_v6  ;;  %v23948_v6 = vld [vmem:[%s28908_s0 + $0x1d2] sm:$0xff] }
  0xcd   :  { %19610 = vmatprep.mubr.msk.f32.mxu0 %vm166_vm1, %v1360_v7  ;;  %29108 = vst [vmem:[#allocation40_spill] sm:$0xff] %v23948_v6  ;;  %v23953_v7 = vld [vmem:[%s28908_s0 + $0x1e2] sm:$0xff] }
  0xce   :  { %29109 = vst [vmem:[#allocation41_spill] sm:$0xff] %v23953_v7 }
  0xd0   :  { %19611 = vmatmul.mubr.msk.f32.gmra.mrb[32].mxu0 %vm166_vm1, %v1361_v18  ;;  %v23962_v18 = vld [vmem:[%s28908_s0 + $0x1ea] sm:$0xff] }
  0xd1   :  { %19613 = vmatprep.mubr.msk.f32.mxu0 %vm166_vm1, %v23940_v4  ;;  %29110 = vst [vmem:[#allocation42_spill] sm:$0xff] %v23962_v18  ;;  %v23967_v4 = vld [vmem:[%s28908_s0 + $0x1fa] sm:$0xff] }
  0xd2   :  { %29111 = vst [vmem:[#allocation43_spill] sm:$0xff] %v23967_v4 }
  0xd4   :  { %19614 = vmatmul.mubr.msk.f32.gmra.mrb[34].mxu0 %vm166_vm1, %v23948_v6  ;;  %v23981_v6 = vld [vmem:[%s28908_s0 + $0x212] sm:$0xff] }
  0xd5   :  { %19616 = vmatprep.mubr.msk.f32.mxu0 %vm166_vm1, %v23953_v7  ;;  %v23976_v7 = vld [vmem:[%s28908_s0 + $0x202] sm:$0xff]  ;;  %29113 = vst [vmem:[#allocation45_spill] sm:$0xff] %v23981_v6 }
  0xd6   :  { %29112 = vst [vmem:[#allocation44_spill] sm:$0xff] %v23976_v7 }
  0xd8   :  { %19617 = vmatmul.mubr.msk.f32.gmra.mrb[36].mxu0 %vm166_vm1, %v23962_v18  ;;  %v23995_v18 = vld [vmem:[%s28908_s0 + $0x22a] sm:$0xff] }
  0xd9   :  { %19619 = vmatprep.mubr.msk.f32.mxu0 %vm166_vm1, %v23967_v4  ;;  %v23990_v4 = vld [vmem:[%s28908_s0 + $0x21a] sm:$0xff]  ;;  %29115 = vst [vmem:[#allocation47_spill] sm:$0xff] %v23995_v18 }
  0xda   :  { %29114 = vst [vmem:[#allocation46_spill] sm:$0xff] %v23990_v4 }
  0xdc   :  { %19620 = vmatmul.mubr.msk.f32.gmra.mrb[38].mxu0 %vm166_vm1, %v23976_v7  ;;  %v24009_v7 = vld [vmem:[%s28908_s0 + $0x242] sm:$0xff] }
  0xdd   :  { %19622 = vmatprep.mubr.msk.f32.mxu0 %vm166_vm1, %v23981_v6  ;;  %v24004_v6 = vld [vmem:[%s28908_s0 + $0x232] sm:$0xff]  ;;  %29117 = vst [vmem:[#allocation49_spill] sm:$0xff] %v24009_v7 }
  0xde   :  { %29116 = vst [vmem:[#allocation48_spill] sm:$0xff] %v24004_v6 }
  0xe0   :  { %19623 = vmatmul.mubr.msk.f32.gmra.mrb[40].mxu0 %vm166_vm1, %v23990_v4  ;;  %v24023_v4 = vld [vmem:[%s28908_s0 + $0x25a] sm:$0xff] }
  0xe1   :  { %19625 = vmatprep.mubr.msk.f32.mxu0 %vm166_vm1, %v23995_v18  ;;  %v24018_v18 = vld [vmem:[%s28908_s0 + $0x24a] sm:$0xff]  ;;  %29119 = vst [vmem:[#allocation51_spill] sm:$0xff] %v24023_v4 }
  0xe2   :  { %29118 = vst [vmem:[#allocation50_spill] sm:$0xff] %v24018_v18 }
  0xe4   :  { %19626 = vmatmul.mubr.msk.f32.gmra.mrb[42].mxu0 %vm166_vm1, %v24004_v6  ;;  %v24037_v6 = vld [vmem:[%s28908_s0 + $0x272] sm:$0xff] }
  0xe5   :  { %19628 = vmatprep.mubr.msk.f32.mxu0 %vm166_vm1, %v24009_v7  ;;  %v24032_v7 = vld [vmem:[%s28908_s0 + $0x262] sm:$0xff]  ;;  %29121 = vst [vmem:[#allocation53_spill] sm:$0xff] %v24037_v6 }
  0xe6   :  { %29120 = vst [vmem:[#allocation52_spill] sm:$0xff] %v24032_v7 }
  0xe8   :  { %19629 = vmatmul.mubr.msk.f32.gmra.mrb[44].mxu0 %vm166_vm1, %v24018_v18  ;;  %v24051_v18 = vld [vmem:[%s28908_s0 + $0x28a] sm:$0xff] }
  0xe9   :  { %19631 = vmatprep.mubr.msk.f32.mxu0 %vm166_vm1, %v24023_v4  ;;  %v24046_v4 = vld [vmem:[%s28908_s0 + $0x27a] sm:$0xff]  ;;  %29123 = vst [vmem:[#allocation55_spill] sm:$0xff] %v24051_v18 }
  0xea   :  { %29122 = vst [vmem:[#allocation54_spill] sm:$0xff] %v24046_v4 }
  0xec   :  { %19632 = vmatmul.mubr.msk.f32.gmra.mrb[46].mxu0 %vm166_vm1, %v24032_v7  ;;  %v24065_v7 = vld [vmem:[%s28908_s0 + $0x2a2] sm:$0xff] }
  0xed   :  { %19634 = vmatprep.mubr.msk.f32.mxu0 %vm166_vm1, %v24037_v6  ;;  %v24060_v6 = vld [vmem:[%s28908_s0 + $0x292] sm:$0xff]  ;;  %29125 = vst [vmem:[#allocation57_spill] sm:$0xff] %v24065_v7 }
  0xee   :  { %29124 = vst [vmem:[#allocation56_spill] sm:$0xff] %v24060_v6 }
  0xf0   :  { %19635 = vmatmul.mubr.msk.f32.gmra.mrb[48].mxu0 %vm166_vm1, %v24046_v4  ;;  %v24079_v4 = vld [vmem:[%s28908_s0 + $0x2ba] sm:$0xff] }
  0xf1   :  { %19637 = vmatprep.mubr.msk.f32.mxu0 %vm166_vm1, %v24051_v18  ;;  %v24074_v18 = vld [vmem:[%s28908_s0 + $0x2aa] sm:$0xff]  ;;  %29127 = vst [vmem:[#allocation59_spill] sm:$0xff] %v24079_v4 }
  0xf2   :  { %29126 = vst [vmem:[#allocation58_spill] sm:$0xff] %v24074_v18 }
  0xf4   :  { %19638 = vmatmul.mubr.msk.f32.gmra.mrb[50].mxu0 %vm166_vm1, %v24060_v6  ;;  %v24093_v6 = vld [vmem:[%s28908_s0 + $0x2d2] sm:$0xff] }
  0xf5   :  { %19640 = vmatprep.mubr.msk.f32.mxu0 %vm166_vm1, %v24065_v7  ;;  %v24088_v7 = vld [vmem:[%s28908_s0 + $0x2c2] sm:$0xff]  ;;  %29129 = vst [vmem:[#allocation61_spill] sm:$0xff] %v24093_v6 }
  0xf6   :  { %29128 = vst [vmem:[#allocation60_spill] sm:$0xff] %v24088_v7 }
  0xf8   :  { %19641 = vmatmul.mubr.msk.f32.gmra.mrb[52].mxu0 %vm166_vm1, %v24074_v18  ;;  %v24107_v18 = vld [vmem:[%s28908_s0 + $0x2ea] sm:$0xff] }
  0xf9   :  { %19643 = vmatprep.mubr.msk.f32.mxu0 %vm166_vm1, %v24079_v4  ;;  %v24102_v4 = vld [vmem:[%s28908_s0 + $0x2da] sm:$0xff]  ;;  %29131 = vst [vmem:[#allocation63_spill] sm:$0xff] %v24107_v18 }
  0xfa   :  { %29130 = vst [vmem:[#allocation62_spill] sm:$0xff] %v24102_v4 }
  0xfc   :  { %19644 = vmatmul.mubr.msk.f32.gmra.mrb[54].mxu0 %vm166_vm1, %v24088_v7  ;;  %v24121_v7 = vld [vmem:[%s28908_s0 + $0x302] sm:$0xff] }
  0xfd   :  { %19646 = vmatprep.mubr.msk.f32.mxu0 %vm166_vm1, %v24093_v6  ;;  %v24116_v6 = vld [vmem:[%s28908_s0 + $0x2f2] sm:$0xff]  ;;  %29132 = vst [vmem:[#allocation64_spill] sm:$0xff] %v24121_v7 }
 0x100   :  { %19647 = vmatmul.mubr.msk.f32.gmra.mrb[56].mxu0 %vm166_vm1, %v24102_v4  ;;  %v24135_v4 = vld [vmem:[%s28908_s0 + $0x31a] sm:$0xff] }
 0x101   :  { %19649 = vmatprep.mubr.msk.f32.mxu0 %vm166_vm1, %v24107_v18  ;;  %v24130_v18 = vld [vmem:[%s28908_s0 + $0x30a] sm:$0xff] }
 0x102   :  { %29133 = vst [vmem:[#allocation65_spill] sm:$0xff] %v24130_v18 }
 0x104   :  { %19650 = vmatmul.mubr.msk.f32.gmra.mrb[58].mxu0 %vm166_vm1, %v24116_v6 }
 0x105   :  { %19652 = vmatprep.mubr.msk.f32.mxu0 %vm166_vm1, %v24121_v7  ;;  %v24144_v7 = vld [vmem:[%s28908_s0 + $0x322] sm:$0xff] }
 0x108   :  { %19653 = vmatmul.mubr.msk.f32.gmra.mrb[60].mxu0 %vm166_vm1, %v24130_v18  ;;  %v24155_v18 = vld [vmem:[%s28907_s1 + $0x14] sm:$0x7] }
 0x109   :  { %19655 = vmatprep.mubr.msk.f32.mxu0 %vm166_vm1, %v24135_v4 }
 0x10c   :  { %19656 = vmatmul.mubr.msk.f32.gmra.mrb[62].mxu0 %vm166_vm1, %v24144_v7 }
 0x10d   :  { %19660 = vmatprep.mubr.msk.f32.mxu0 %vm166_vm1, %v23269_v11  ;;  %v24218_v11 = vld [vmem:[%s28908_s0 + $0x180] sm:$0xff] }
 0x110   :  { %19661 = vmatmul.mubr.msk.f32.vlgmr.msra.gmra.mrb[0].mxu0 %vm166_vm1, %v23278_v12  ;;  %v24227_v12 = vld [vmem:[%s28908_s0 + $0x188] sm:$0xff] }
 0x111   :  { %19757 = vmatpush3.msk.msra.mxu0 %vm359_vm0, %v23719_v43  ;;  %19663 = vmatprep.mubr.msk.f32.mxu0 %vm166_vm1, %v23283_v13  ;;  %v29134_v13 = vld [vmem:[#allocation8_spill] sm:$0xff] }
 0x112   :  { %19854 = vmatprep.subr.msk.mxu0 %vm359_vm0, %v24155_v18  ;;  %v24662_v43 = vld [vmem:[%s28908_s0 + $0x2c1] sm:$0xff] }
 0x114   :  { %19664 = vmatmul.mubr.msk.f32.gmra.mrb[2].mxu0 %vm166_vm1, %v23292_v14  ;;  %v24292_v14 = vld [vmem:[%s28908_s0 + $0x330] sm:$0xff] }
 0x115   :  { %19666 = vmatprep.mubr.msk.f32.mxu0 %vm166_vm1, %v23297_v15  ;;  %v24301_v15 = vld [vmem:[%s28908_s0 + $0x338] sm:$0xff] }
 0x118   :  { %19667 = vmatmul.mubr.msk.f32.gmra.mrb[4].mxu0 %vm166_vm1, %v23306_v16  ;;  %v29135_v16 = vld [vmem:[#allocation4_spill] sm:$0xff] }
 0x119   :  { %19669 = vmatprep.mubr.msk.f32.mxu0 %vm166_vm1, %v23311_v17  ;;  %v29136_v17 = vld [vmem:[#allocation5_spill] sm:$0xff] }
 0x11c   :  { %19670 = vmatmul.mubr.msk.f32.gmra.mrb[6].mxu0 %vm166_vm1, %v23327_v19  ;;  %v29137_v19 = vld [vmem:[#allocation6_spill] sm:$0xff] }
 0x11d   :  { %19672 = vmatprep.mubr.msk.f32.mxu0 %vm166_vm1, %v23332_v20  ;;  %v24321_v20 = vld [vmem:[%s28908_s0 + $0x49] sm:$0xff] }
 0x120   :  { %19673 = vmatmul.mubr.msk.f32.gmra.mrb[8].mxu0 %vm166_vm1, %v23341_v21  ;;  %v29138_v21 = vld [vmem:[#allocation7_spill] sm:$0xff] }
 0x121   :  { %19675 = vmatprep.mubr.msk.f32.mxu0 %vm166_vm1, %v23346_v22  ;;  %v24332_v22 = vld [vmem:[%s28908_s0 + $0x51] sm:$0xff] }
 0x124   :  { %19676 = vmatmul.mubr.msk.f32.gmra.mrb[10].mxu0 %vm166_vm1, %v23355_v23  ;;  %v24337_v23 = vld [vmem:[%s28908_s0 + $0x61] sm:$0xff] }
 0x125   :  { %19678 = vmatprep.mubr.msk.f32.mxu0 %vm166_vm1, %v23360_v24  ;;  %v24346_v24 = vld [vmem:[%s28908_s0 + $0x69] sm:$0xff] }
 0x128   :  { %19679 = vmatmul.mubr.msk.f32.gmra.mrb[12].mxu0 %vm166_vm1, %v23369_v25  ;;  %v24351_v25 = vld [vmem:[%s28908_s0 + $0x79] sm:$0xff] }
 0x129   :  { %19681 = vmatprep.mubr.msk.f32.mxu0 %vm166_vm1, %v23374_v26  ;;  %v24360_v26 = vld [vmem:[%s28908_s0 + $0x81] sm:$0xff] }
 0x12c   :  { %19682 = vmatmul.mubr.msk.f32.gmra.mrb[14].mxu0 %vm166_vm1, %v23383_v27  ;;  %v24365_v27 = vld [vmem:[%s28908_s0 + $0x91] sm:$0xff] }
 0x12d   :  { %19684 = vmatprep.mubr.msk.f32.mxu0 %vm166_vm1, %v23388_v28  ;;  %v24374_v28 = vld [vmem:[%s28908_s0 + $0x99] sm:$0xff] }
 0x130   :  { %19685 = vmatmul.mubr.msk.f32.gmra.mrb[16].mxu0 %vm166_vm1, %v23397_v29  ;;  %v24379_v29 = vld [vmem:[%s28908_s0 + $0xa9] sm:$0xff] }
 0x131   :  { %19687 = vmatprep.mubr.msk.f32.mxu0 %vm166_vm1, %v23402_v30  ;;  %v24388_v30 = vld [vmem:[%s28908_s0 + $0xb1] sm:$0xff] }
 0x134   :  { %19688 = vmatmul.mubr.msk.f32.gmra.mrb[18].mxu0 %vm166_vm1, %v23411_v31  ;;  %v24393_v31 = vld [vmem:[%s28908_s0 + $0xc1] sm:$0xff] }
 0x135   :  { %19690 = vmatprep.mubr.msk.f32.mxu0 %vm166_vm1, %v23416_v32  ;;  %v24402_v32 = vld [vmem:[%s28908_s0 + $0xc9] sm:$0xff] }
 0x138   :  { %19691 = vmatmul.mubr.msk.f32.gmra.mrb[20].mxu0 %vm166_vm1, %v23425_v33  ;;  %v24407_v33 = vld [vmem:[%s28908_s0 + $0xd9] sm:$0xff] }
 0x139   :  { %19693 = vmatprep.mubr.msk.f32.mxu0 %vm166_vm1, %v23430_v34  ;;  %v24416_v34 = vld [vmem:[%s28908_s0 + $0xe1] sm:$0xff] }
 0x13c   :  { %19694 = vmatmul.mubr.msk.f32.gmra.mrb[22].mxu0 %vm166_vm1, %v23439_v35  ;;  %v24421_v35 = vld [vmem:[%s28908_s0 + $0xf1] sm:$0xff] }
 0x13d   :  { %19696 = vmatprep.mubr.msk.f32.mxu0 %vm166_vm1, %v23444_v36  ;;  %v24430_v36 = vld [vmem:[%s28908_s0 + $0xf9] sm:$0xff] }
 0x140   :  { %19697 = vmatmul.mubr.msk.f32.gmra.mrb[24].mxu0 %vm166_vm1, %v23453_v37  ;;  %v24435_v37 = vld [vmem:[%s28908_s0 + $0x109] sm:$0xff] }
 0x141   :  { %19699 = vmatprep.mubr.msk.f32.mxu0 %vm166_vm1, %v23458_v38  ;;  %v24444_v38 = vld [vmem:[%s28908_s0 + $0x111] sm:$0xff] }
 0x144   :  { %19700 = vmatmul.mubr.msk.f32.gmra.mrb[26].mxu0 %vm166_vm1, %v23467_v39  ;;  %v24449_v39 = vld [vmem:[%s28908_s0 + $0x121] sm:$0xff] }
 0x145   :  { %19702 = vmatprep.mubr.msk.f32.mxu0 %vm166_vm1, %v23472_v40  ;;  %v24458_v40 = vld [vmem:[%s28908_s0 + $0x129] sm:$0xff] }
 0x148   :  { %19703 = vmatmul.mubr.msk.f32.gmra.mrb[28].mxu0 %vm166_vm1, %v23481_v41  ;;  %v24463_v41 = vld [vmem:[%s28908_s0 + $0x139] sm:$0xff] }
 0x149   :  { %19705 = vmatprep.mubr.msk.f32.mxu0 %vm166_vm1, %v24218_v11 }
 0x14c   :  { %19706 = vmatmul.mubr.msk.f32.gmra.mrb[30].mxu0 %vm166_vm1, %v24227_v12 }
 0x14d   :  { %19708 = vmatprep.mubr.msk.f32.mxu0 %vm166_vm1, %v23495_v44  ;;  %v24472_v44 = vld [vmem:[%s28908_s0 + $0x141] sm:$0xff] }
 0x150   :  { %19709 = vmatmul.mubr.msk.f32.gmra.mrb[32].mxu0 %vm166_vm1, %v23503_v45  ;;  %v24477_v45 = vld [vmem:[%s28908_s0 + $0x151] sm:$0xff] }
 0x151   :  { %19711 = vmatprep.mubr.msk.f32.mxu0 %vm166_vm1, %v23508_v46  ;;  %v24486_v46 = vld [vmem:[%s28908_s0 + $0x159] sm:$0xff] }
 0x154   :  { %19712 = vmatmul.mubr.msk.f32.gmra.mrb[34].mxu0 %vm166_vm1, %v23517_v47  ;;  %v24491_v47 = vld [vmem:[%s28908_s0 + $0x169] sm:$0xff] }
 0x155   :  { %19714 = vmatprep.mubr.msk.f32.mxu0 %vm166_vm1, %v23522_v48  ;;  %v24500_v48 = vld [vmem:[%s28908_s0 + $0x171] sm:$0xff] }
 0x158   :  { %19715 = vmatmul.mubr.msk.f32.gmra.mrb[36].mxu0 %vm166_vm1, %v23531_v49  ;;  %v24505_v49 = vld [vmem:[%s28908_s0 + $0x181] sm:$0xff] }
 0x159   :  { %19717 = vmatprep.mubr.msk.f32.mxu0 %vm166_vm1, %v23536_v50  ;;  %v24514_v50 = vld [vmem:[%s28908_s0 + $0x189] sm:$0xff] }
 0x15c   :  { %19718 = vmatmul.mubr.msk.f32.gmra.mrb[38].mxu0 %vm166_vm1, %v23545_v51  ;;  %v16403_v51 = vld [vmem:[%s28908_s0 + $0x1c9] sm:$0xff] }
 0x15d   :  { %19720 = vmatprep.mubr.msk.f32.mxu0 %vm166_vm1, %v23550_v52  ;;  %v16404_v52 = vld [vmem:[%s28908_s0 + $0x1d1] sm:$0xff] }
 0x160   :  { %19721 = vmatmul.mubr.msk.f32.gmra.mrb[40].mxu0 %vm166_vm1, %v23559_v53  ;;  %v24528_v53 = vld [vmem:[%s28908_s0 + $0x1e1] sm:$0xff] }
 0x161   :  { %19723 = vmatprep.mubr.msk.f32.mxu0 %vm166_vm1, %v23564_v54  ;;  %v24536_v54 = vld [vmem:[%s28908_s0 + $0x1e9] sm:$0xff] }
 0x164   :  { %19724 = vmatmul.mubr.msk.f32.gmra.mrb[42].mxu0 %vm166_vm1, %v23573_v55  ;;  %v24541_v55 = vld [vmem:[%s28908_s0 + $0x1f9] sm:$0xff] }
 0x165   :  { %19726 = vmatprep.mubr.msk.f32.mxu0 %vm166_vm1, %v23578_v56  ;;  %v24550_v56 = vld [vmem:[%s28908_s0 + $0x201] sm:$0xff] }
 0x168   :  { %19727 = vmatmul.mubr.msk.f32.gmra.mrb[44].mxu0 %vm166_vm1, %v23587_v57  ;;  %v24555_v57 = vld [vmem:[%s28908_s0 + $0x211] sm:$0xff] }
 0x169   :  { %19729 = vmatprep.mubr.msk.f32.mxu0 %vm166_vm1, %v23592_v58  ;;  %v24564_v58 = vld [vmem:[%s28908_s0 + $0x219] sm:$0xff] }
 0x16c   :  { %19730 = vmatmul.mubr.msk.f32.gmra.mrb[46].mxu0 %vm166_vm1, %v23601_v59  ;;  %v24569_v59 = vld [vmem:[%s28908_s0 + $0x229] sm:$0xff] }
 0x16d   :  { %19732 = vmatprep.mubr.msk.f32.mxu0 %vm166_vm1, %v23606_v60  ;;  %v24578_v60 = vld [vmem:[%s28908_s0 + $0x231] sm:$0xff] }
 0x170   :  { %19733 = vmatmul.mubr.msk.f32.gmra.mrb[48].mxu0 %vm166_vm1, %v23615_v61  ;;  %v24583_v61 = vld [vmem:[%s28908_s0 + $0x241] sm:$0xff] }
 0x171   :  { %19735 = vmatprep.mubr.msk.f32.mxu0 %vm166_vm1, %v23620_v62  ;;  %v24592_v62 = vld [vmem:[%s28908_s0 + $0x249] sm:$0xff] }
 0x174   :  { %19736 = vmatmul.mubr.msk.f32.gmra.mrb[50].mxu0 %vm166_vm1, %v23629_v63  ;;  %v24597_v63 = vld [vmem:[%s28908_s0 + $0x259] sm:$0xff] }
 0x175   :  { %19738 = vmatprep.mubr.msk.f32.mxu0 %vm166_vm1, %v23634_v0  ;;  %v24606_v0 = vld [vmem:[%s28908_s0 + $0x261] sm:$0xff] }
 0x178   :  { %19739 = vmatmul.mubr.msk.f32.gmra.mrb[52].mxu0 %vm166_vm1, %v23643_v1  ;;  %v24611_v1 = vld [vmem:[%s28908_s0 + $0x271] sm:$0xff] }
 0x179   :  { %19741 = vmatprep.mubr.msk.f32.mxu0 %vm166_vm1, %v23648_v2  ;;  %v24620_v2 = vld [vmem:[%s28908_s0 + $0x279] sm:$0xff] }
 0x17c   :  { %19742 = vmatmul.mubr.msk.f32.gmra.mrb[54].mxu0 %vm166_vm1, %v23657_v3  ;;  %v24625_v3 = vld [vmem:[%s28908_s0 + $0x289] sm:$0xff] }
 0x17d   :  { %19744 = vmatprep.mubr.msk.f32.mxu0 %vm166_vm1, %v23662_v5  ;;  %v24634_v5 = vld [vmem:[%s28908_s0 + $0x291] sm:$0xff] }
 0x180   :  { %19745 = vmatmul.mubr.msk.f32.gmra.mrb[56].mxu0 %vm166_vm1, %v23671_v9  ;;  %v24639_v9 = vld [vmem:[%s28908_s0 + $0x2a1] sm:$0xff] }
 0x181   :  { %19747 = vmatprep.mubr.msk.f32.mxu0 %vm166_vm1, %v23676_v10  ;;  %v24648_v10 = vld [vmem:[%s28908_s0 + $0x2a9] sm:$0xff] }
 0x184   :  { %19748 = vmatmul.mubr.msk.f32.gmra.mrb[58].mxu0 %vm166_vm1, %v23685_v42  ;;  %v24653_v42 = vld [vmem:[%s28908_s0 + $0x2b9] sm:$0xff] }
 0x185   :  { %19750 = vmatprep.mubr.msk.f32.mxu0 %vm166_vm1, %v29134_v13  ;;  %v24676_v13 = vld [vmem:[%s28908_s0 + $0x2d9] sm:$0xff] }
 0x186   :  { %29140 = vst [vmem:[#allocation4_spill] sm:$0xff] %v24676_v13 }
 0x188   :  { %19751 = vmatmul.mubr.msk.f32.gmra.mrb[60].mxu0 %vm166_vm1, %v23699_v8  ;;  %v24312_v8 = vld [vmem:[%s28907_s1 + $0x18] sm:$0x7] }
 0x189   :  { %19753 = vmatprep.mubr.msk.f32.mxu0 %vm166_vm1, %v24292_v14 }
 0x18c   :  { %19754 = vmatmul.mubr.msk.f32.gmra.mrb[62].mxu0 %vm166_vm1, %v24301_v15 }
 0x18d   :  { %19758 = vmatprep.mubr.msk.f32.mxu0 %vm166_vm1, %v29135_v16  ;;  %v24681_v16 = vld [vmem:[%s28908_s0 + $0x2e9] sm:$0xff] }
 0x18e   :  { %29141 = vst [vmem:[#allocation5_spill] sm:$0xff] %v24681_v16 }
 0x190   :  { %19759 = vmatmul.mubr.msk.f32.vlgmr.msra.gmra.mrb[0].mxu0 %vm166_vm1, %v29136_v17  ;;  %v24690_v17 = vld [vmem:[%s28908_s0 + $0x2f1] sm:$0xff] }
 0x191   :  { %19855 = vmatpush3.msk.msra.mxu0 %vm359_vm0, %v24155_v18  ;;  %19761 = vmatprep.mubr.msk.f32.mxu0 %vm166_vm1, %v29137_v19  ;;  %v24667_v18 = vld [vmem:[%s28908_s0 + $0x2d1] sm:$0xff]  ;;  %29142 = vst [vmem:[#allocation6_spill] sm:$0xff] %v24690_v17  ;;  %v24695_v19 = vld [vmem:[%s28908_s0 + $0x301] sm:$0xff] }
 0x192   :  { %19952 = vmatprep.subr.msk.mxu0 %vm359_vm0, %v24312_v8  ;;  %29139 = vst [vmem:[#allocation8_spill] sm:$0xff] %v24667_v18  ;;  %29143 = vst [vmem:[#allocation7_spill] sm:$0xff] %v24695_v19 }
 0x194   :  { %19762 = vmatmul.mubr.msk.f32.gmra.mrb[2].mxu0 %vm166_vm1, %v29138_v21  ;;  %v24704_v21 = vld [vmem:[%s28908_s0 + $0x309] sm:$0xff] }
 0x195   :  { %19764 = vmatprep.mubr.msk.f32.mxu0 %vm166_vm1, %v24321_v20  ;;  %29144 = vst [vmem:[#allocation66_spill] sm:$0xff] %v24704_v21 }
 0x198   :  { %19765 = vmatmul.mubr.msk.f32.gmra.mrb[4].mxu0 %vm166_vm1, %v24332_v22 }
 0x199   :  { %19767 = vmatprep.mubr.msk.f32.mxu0 %vm166_vm1, %v24337_v23 }
 0x19c   :  { %19768 = vmatmul.mubr.msk.f32.gmra.mrb[6].mxu0 %vm166_vm1, %v24346_v24 }
 0x19d   :  { %19770 = vmatprep.mubr.msk.f32.mxu0 %vm166_vm1, %v24351_v25 }
 0x1a0   :  { %19771 = vmatmul.mubr.msk.f32.gmra.mrb[8].mxu0 %vm166_vm1, %v24360_v26 }
 0x1a1   :  { %19773 = vmatprep.mubr.msk.f32.mxu0 %vm166_vm1, %v24365_v27 }
 0x1a4   :  { %19774 = vmatmul.mubr.msk.f32.gmra.mrb[10].mxu0 %vm166_vm1, %v24374_v28 }
 0x1a5   :  { %19776 = vmatprep.mubr.msk.f32.mxu0 %vm166_vm1, %v24379_v29 }
 0x1a8   :  { %19777 = vmatmul.mubr.msk.f32.gmra.mrb[12].mxu0 %vm166_vm1, %v24388_v30 }
 0x1a9   :  { %19779 = vmatprep.mubr.msk.f32.mxu0 %vm166_vm1, %v24393_v31 }
 0x1ac   :  { %19780 = vmatmul.mubr.msk.f32.gmra.mrb[14].mxu0 %vm166_vm1, %v24402_v32 }
 0x1ad   :  { %19782 = vmatprep.mubr.msk.f32.mxu0 %vm166_vm1, %v24407_v33 }
 0x1b0   :  { %19783 = vmatmul.mubr.msk.f32.gmra.mrb[16].mxu0 %vm166_vm1, %v24416_v34 }
 0x1b1   :  { %19785 = vmatprep.mubr.msk.f32.mxu0 %vm166_vm1, %v24421_v35 }
 0x1b4   :  { %19786 = vmatmul.mubr.msk.f32.gmra.mrb[18].mxu0 %vm166_vm1, %v24430_v36 }
 0x1b5   :  { %19788 = vmatprep.mubr.msk.f32.mxu0 %vm166_vm1, %v24435_v37 }
 0x1b8   :  { %19789 = vmatmul.mubr.msk.f32.gmra.mrb[20].mxu0 %vm166_vm1, %v24444_v38 }
 0x1b9   :  { %19791 = vmatprep.mubr.msk.f32.mxu0 %vm166_vm1, %v24449_v39 }
 0x1bc   :  { %19792 = vmatmul.mubr.msk.f32.gmra.mrb[22].mxu0 %vm166_vm1, %v24458_v40 }
 0x1bd   :  { %19794 = vmatprep.mubr.msk.f32.mxu0 %vm166_vm1, %v24463_v41 }
 0x1c0   :  { %19795 = vmatmul.mubr.msk.f32.gmra.mrb[24].mxu0 %vm166_vm1, %v24472_v44 }
 0x1c1   :  { %19797 = vmatprep.mubr.msk.f32.mxu0 %vm166_vm1, %v24477_v45 }
 0x1c4   :  { %19798 = vmatmul.mubr.msk.f32.gmra.mrb[26].mxu0 %vm166_vm1, %v24486_v46 }
 0x1c5   :  { %19800 = vmatprep.mubr.msk.f32.mxu0 %vm166_vm1, %v24491_v47 }
 0x1c8   :  { %19801 = vmatmul.mubr.msk.f32.gmra.mrb[28].mxu0 %vm166_vm1, %v24500_v48 }
 0x1c9   :  { %19803 = vmatprep.mubr.msk.f32.mxu0 %vm166_vm1, %v24505_v49 }
 0x1cc   :  { %19804 = vmatmul.mubr.msk.f32.gmra.mrb[30].mxu0 %vm166_vm1, %v24514_v50 }
 0x1cd   :  { %19806 = vmatprep.mubr.msk.f32.mxu0 %vm166_vm1, %v16403_v51  ;;  %v24709_v51 = vld [vmem:[%s28908_s0 + $0x319] sm:$0xff] }
 0x1ce   :  { %29145 = vst [vmem:[#allocation67_spill] sm:$0xff] %v24709_v51 }
 0x1d0   :  { %19807 = vmatmul.mubr.msk.f32.gmra.mrb[32].mxu0 %vm166_vm1, %v16404_v52  ;;  %v24718_v52 = vld [vmem:[%s28908_s0 + $0x321] sm:$0xff] }
 0x1d1   :  { %19809 = vmatprep.mubr.msk.f32.mxu0 %vm166_vm1, %v24528_v53  ;;  %29146 = vst [vmem:[#allocation68_spill] sm:$0xff] %v24718_v52 }
 0x1d4   :  { %19810 = vmatmul.mubr.msk.f32.gmra.mrb[34].mxu0 %vm166_vm1, %v24536_v54 }
 0x1d5   :  { %19812 = vmatprep.mubr.msk.f32.mxu0 %vm166_vm1, %v24541_v55 }
 0x1d8   :  { %19813 = vmatmul.mubr.msk.f32.gmra.mrb[36].mxu0 %vm166_vm1, %v24550_v56 }
 0x1d9   :  { %19815 = vmatprep.mubr.msk.f32.mxu0 %vm166_vm1, %v24555_v57 }
 0x1dc   :  { %19816 = vmatmul.mubr.msk.f32.gmra.mrb[38].mxu0 %vm166_vm1, %v24564_v58 }
 0x1dd   :  { %19818 = vmatprep.mubr.msk.f32.mxu0 %vm166_vm1, %v24569_v59 }
 0x1e0   :  { %19819 = vmatmul.mubr.msk.f32.gmra.mrb[40].mxu0 %vm166_vm1, %v24578_v60 }
 0x1e1   :  { %19821 = vmatprep.mubr.msk.f32.mxu0 %vm166_vm1, %v24583_v61 }
 0x1e4   :  { %19822 = vmatmul.mubr.msk.f32.gmra.mrb[42].mxu0 %vm166_vm1, %v24592_v62 }
 0x1e5   :  { %19824 = vmatprep.mubr.msk.f32.mxu0 %vm166_vm1, %v24597_v63 }
 0x1e8   :  { %19825 = vmatmul.mubr.msk.f32.gmra.mrb[44].mxu0 %vm166_vm1, %v24606_v0 }
 0x1e9   :  { %19827 = vmatprep.mubr.msk.f32.mxu0 %vm166_vm1, %v24611_v1 }
 0x1ec   :  { %19828 = vmatmul.mubr.msk.f32.gmra.mrb[46].mxu0 %vm166_vm1, %v24620_v2 }
 0x1ed   :  { %19830 = vmatprep.mubr.msk.f32.mxu0 %vm166_vm1, %v24625_v3 }
 0x1f0   :  { %19831 = vmatmul.mubr.msk.f32.gmra.mrb[48].mxu0 %vm166_vm1, %v24634_v5 }
 0x1f1   :  { %19833 = vmatprep.mubr.msk.f32.mxu0 %vm166_vm1, %v24639_v9 }
 0x1f4   :  { %19834 = vmatmul.mubr.msk.f32.gmra.mrb[50].mxu0 %vm166_vm1, %v24648_v10 }
 0x1f5   :  { %19836 = vmatprep.mubr.msk.f32.mxu0 %vm166_vm1, %v24653_v42 }
 0x1f8   :  { %19837 = vmatmul.mubr.msk.f32.gmra.mrb[52].mxu0 %vm166_vm1, %v24662_v43 }
 0x1f9   :  { %19839 = vmatprep.mubr.msk.f32.mxu0 %vm166_vm1, %v24667_v18  ;;  %v29159_v18 = vld [vmem:[#allocation19_spill] sm:$0xff] }
 0x1fc   :  { %19840 = vmatmul.mubr.msk.f32.gmra.mrb[54].mxu0 %vm166_vm1, %v24676_v13  ;;  %v29156_v13 = vld [vmem:[#allocation16_spill] sm:$0xff] }
 0x1fd   :  { %19842 = vmatprep.mubr.msk.f32.mxu0 %vm166_vm1, %v24681_v16  ;;  %v29155_v16 = vld [vmem:[#allocation15_spill] sm:$0xff] }
 0x200   :  { %19843 = vmatmul.mubr.msk.f32.gmra.mrb[56].mxu0 %vm166_vm1, %v24690_v17  ;;  %v29150_v17 = vld [vmem:[#allocation10_spill] sm:$0xff] }
 0x201   :  { %19845 = vmatprep.mubr.msk.f32.mxu0 %vm166_vm1, %v24695_v19  ;;  %v24723_v19 = vld [vmem:[%s28908_s0 + $0x331] sm:$0xff] }
 0x202   :  { %29147 = vst [vmem:[#allocation69_spill] sm:$0xff] %v24723_v19 }
 0x204   :  { %19846 = vmatmul.mubr.msk.f32.gmra.mrb[58].mxu0 %vm166_vm1, %v24704_v21  ;;  %v29149_v21 = vld [vmem:[#allocation9_spill] sm:$0xff] }
 0x205   :  { %19848 = vmatprep.mubr.msk.f32.mxu0 %vm166_vm1, %v24709_v51  ;;  %v24732_v51 = vld [vmem:[%s28908_s0 + $0x339] sm:$0xff] }
 0x206   :  { %29148 = vst [vmem:[#allocation70_spill] sm:$0xff] %v24732_v51 }
 0x208   :  { %19849 = vmatmul.mubr.msk.f32.gmra.mrb[60].mxu0 %vm166_vm1, %v24718_v52  ;;  %v24743_v52 = vld [vmem:[%s28907_s1 + $0x1c] sm:$0x7] }
 0x209   :  { %19851 = vmatprep.mubr.msk.f32.mxu0 %vm166_vm1, %v24723_v19  ;;  %v29151_v19 = vld [vmem:[#allocation11_spill] sm:$0xff] }
 0x20c   :  { %19852 = vmatmul.mubr.msk.f32.gmra.mrb[62].mxu0 %vm166_vm1, %v24732_v51  ;;  %v29152_v51 = vld [vmem:[#allocation12_spill] sm:$0xff] }
 0x20d   :  { %19856 = vmatprep.mubr.msk.f32.mxu0 %vm166_vm1, %v29149_v21  ;;  %v29153_v21 = vld [vmem:[#allocation13_spill] sm:$0xff] }
 0x210   :  { %19857 = vmatmul.mubr.msk.f32.vlgmr.msra.gmra.mrb[0].mxu0 %vm166_vm1, %v29150_v17  ;;  %v29154_v17 = vld [vmem:[#allocation14_spill] sm:$0xff] }
 0x211   :  { %19953 = vmatpush3.msk.msra.mxu0 %vm359_vm0, %v24312_v8  ;;  %19859 = vmatprep.mubr.msk.f32.mxu0 %vm166_vm1, %v29151_v19  ;;  %v29157_v8 = vld [vmem:[#allocation17_spill] sm:$0xff]  ;;  %v29158_v19 = vld [vmem:[#allocation18_spill] sm:$0xff] }
 0x212   :  { %20050 = vmatprep.subr.msk.mxu0 %vm359_vm0, %v24743_v52 }
 0x214   :  { %19860 = vmatmul.mubr.msk.f32.gmra.mrb[2].mxu0 %vm166_vm1, %v29152_v51  ;;  %v29160_v51 = vld [vmem:[#allocation20_spill] sm:$0xff] }
 0x215   :  { %19862 = vmatprep.mubr.msk.f32.mxu0 %vm166_vm1, %v29153_v21  ;;  %v29161_v21 = vld [vmem:[#allocation21_spill] sm:$0xff] }
 0x218   :  { %19863 = vmatmul.mubr.msk.f32.gmra.mrb[4].mxu0 %vm166_vm1, %v29154_v17  ;;  %v29162_v17 = vld [vmem:[#allocation22_spill] sm:$0xff] }
 0x219   :  { %19865 = vmatprep.mubr.msk.f32.mxu0 %vm166_vm1, %v29155_v16  ;;  %v29163_v16 = vld [vmem:[#allocation23_spill] sm:$0xff] }
 0x21c   :  { %19866 = vmatmul.mubr.msk.f32.gmra.mrb[6].mxu0 %vm166_vm1, %v29156_v13  ;;  %v29164_v13 = vld [vmem:[#allocation24_spill] sm:$0xff] }
 0x21d   :  { %19868 = vmatprep.mubr.msk.f32.mxu0 %vm166_vm1, %v29157_v8  ;;  %v29165_v8 = vld [vmem:[#allocation25_spill] sm:$0xff] }
 0x220   :  { %19869 = vmatmul.mubr.msk.f32.gmra.mrb[8].mxu0 %vm166_vm1, %v29158_v19  ;;  %v29166_v19 = vld [vmem:[#allocation26_spill] sm:$0xff] }
 0x221   :  { %19871 = vmatprep.mubr.msk.f32.mxu0 %vm166_vm1, %v29159_v18  ;;  %v29167_v18 = vld [vmem:[#allocation27_spill] sm:$0xff] }
 0x224   :  { %19872 = vmatmul.mubr.msk.f32.gmra.mrb[10].mxu0 %vm166_vm1, %v29160_v51  ;;  %v29168_v51 = vld [vmem:[#allocation28_spill] sm:$0xff] }
 0x225   :  { %19874 = vmatprep.mubr.msk.f32.mxu0 %vm166_vm1, %v29161_v21  ;;  %v29169_v21 = vld [vmem:[#allocation29_spill] sm:$0xff] }
 0x228   :  { %19875 = vmatmul.mubr.msk.f32.gmra.mrb[12].mxu0 %vm166_vm1, %v29162_v17  ;;  %v29170_v17 = vld [vmem:[#allocation30_spill] sm:$0xff] }
 0x229   :  { %19877 = vmatprep.mubr.msk.f32.mxu0 %vm166_vm1, %v29163_v16  ;;  %v29171_v16 = vld [vmem:[#allocation31_spill] sm:$0xff] }
 0x22c   :  { %19878 = vmatmul.mubr.msk.f32.gmra.mrb[14].mxu0 %vm166_vm1, %v29164_v13  ;;  %v29172_v13 = vld [vmem:[#allocation32_spill] sm:$0xff] }
 0x22d   :  { %19880 = vmatprep.mubr.msk.f32.mxu0 %vm166_vm1, %v29165_v8  ;;  %v29173_v8 = vld [vmem:[#allocation33_spill] sm:$0xff] }
 0x230   :  { %19881 = vmatmul.mubr.msk.f32.gmra.mrb[16].mxu0 %vm166_vm1, %v29166_v19  ;;  %v29174_v19 = vld [vmem:[#allocation34_spill] sm:$0xff] }
 0x231   :  { %19883 = vmatprep.mubr.msk.f32.mxu0 %vm166_vm1, %v29167_v18  ;;  %v29175_v18 = vld [vmem:[#allocation35_spill] sm:$0xff] }
 0x234   :  { %19884 = vmatmul.mubr.msk.f32.gmra.mrb[18].mxu0 %vm166_vm1, %v29168_v51  ;;  %v29176_v51 = vld [vmem:[#allocation36_spill] sm:$0xff] }
 0x235   :  { %19886 = vmatprep.mubr.msk.f32.mxu0 %vm166_vm1, %v29169_v21  ;;  %v29177_v21 = vld [vmem:[#allocation37_spill] sm:$0xff] }
 0x238   :  { %19887 = vmatmul.mubr.msk.f32.gmra.mrb[20].mxu0 %vm166_vm1, %v29170_v17  ;;  %v24806_v17 = vld [vmem:[%s28908_s0 + $0x182] sm:$0xff] }
 0x239   :  { %19889 = vmatprep.mubr.msk.f32.mxu0 %vm166_vm1, %v29171_v16  ;;  %29178 = vst [vmem:[#allocation9_spill] sm:$0xff] %v24806_v17  ;;  %v29179_v16 = vld [vmem:[#allocation38_spill] sm:$0xff] }
 0x23c   :  { %19890 = vmatmul.mubr.msk.f32.gmra.mrb[22].mxu0 %vm166_vm1, %v29172_v13  ;;  %v24815_v13 = vld [vmem:[%s28908_s0 + $0x18a] sm:$0xff] }
 0x23d   :  { %19892 = vmatprep.mubr.msk.f32.mxu0 %vm166_vm1, %v29173_v8  ;;  %29180 = vst [vmem:[#allocation10_spill] sm:$0xff] %v24815_v13  ;;  %v29181_v8 = vld [vmem:[#allocation39_spill] sm:$0xff] }
 0x240   :  { %19893 = vmatmul.mubr.msk.f32.gmra.mrb[24].mxu0 %vm166_vm1, %v29174_v19  ;;  %v29182_v19 = vld [vmem:[#allocation40_spill] sm:$0xff] }
 0x241   :  { %19895 = vmatprep.mubr.msk.f32.mxu0 %vm166_vm1, %v29175_v18  ;;  %v29183_v18 = vld [vmem:[#allocation41_spill] sm:$0xff] }
 0x244   :  { %19896 = vmatmul.mubr.msk.f32.gmra.mrb[26].mxu0 %vm166_vm1, %v29176_v51  ;;  %v29184_v51 = vld [vmem:[#allocation42_spill] sm:$0xff] }
 0x245   :  { %19898 = vmatprep.mubr.msk.f32.mxu0 %vm166_vm1, %v29177_v21  ;;  %v29185_v21 = vld [vmem:[#allocation43_spill] sm:$0xff] }
 0x248   :  { %19899 = vmatmul.mubr.msk.f32.gmra.mrb[28].mxu0 %vm166_vm1, %v29179_v16  ;;  %v29186_v16 = vld [vmem:[#allocation44_spill] sm:$0xff] }
 0x249   :  { %19901 = vmatprep.mubr.msk.f32.mxu0 %vm166_vm1, %v24806_v17  ;;  %v29187_v17 = vld [vmem:[#allocation45_spill] sm:$0xff] }
 0x24c   :  { %19902 = vmatmul.mubr.msk.f32.gmra.mrb[30].mxu0 %vm166_vm1, %v24815_v13  ;;  %v29188_v13 = vld [vmem:[#allocation46_spill] sm:$0xff] }
 0x24d   :  { %19904 = vmatprep.mubr.msk.f32.mxu0 %vm166_vm1, %v29181_v8  ;;  %v29189_v8 = vld [vmem:[#allocation47_spill] sm:$0xff] }
 0x250   :  { %19905 = vmatmul.mubr.msk.f32.gmra.mrb[32].mxu0 %vm166_vm1, %v29182_v19  ;;  %v29190_v19 = vld [vmem:[#allocation48_spill] sm:$0xff] }
 0x251   :  { %19907 = vmatprep.mubr.msk.f32.mxu0 %vm166_vm1, %v29183_v18  ;;  %v29191_v18 = vld [vmem:[#allocation49_spill] sm:$0xff] }
 0x254   :  { %19908 = vmatmul.mubr.msk.f32.gmra.mrb[34].mxu0 %vm166_vm1, %v29184_v51  ;;  %v29192_v51 = vld [vmem:[#allocation50_spill] sm:$0xff] }
 0x255   :  { %19910 = vmatprep.mubr.msk.f32.mxu0 %vm166_vm1, %v29185_v21  ;;  %v29193_v21 = vld [vmem:[#allocation51_spill] sm:$0xff] }
 0x258   :  { %19911 = vmatmul.mubr.msk.f32.gmra.mrb[36].mxu0 %vm166_vm1, %v29186_v16  ;;  %v29194_v16 = vld [vmem:[#allocation52_spill] sm:$0xff] }
 0x259   :  { %19913 = vmatprep.mubr.msk.f32.mxu0 %vm166_vm1, %v29187_v17  ;;  %v29195_v17 = vld [vmem:[#allocation53_spill] sm:$0xff] }
 0x25c   :  { %19914 = vmatmul.mubr.msk.f32.gmra.mrb[38].mxu0 %vm166_vm1, %v29188_v13  ;;  %v29196_v13 = vld [vmem:[#allocation54_spill] sm:$0xff] }
 0x25d   :  { %19916 = vmatprep.mubr.msk.f32.mxu0 %vm166_vm1, %v29189_v8  ;;  %v29197_v8 = vld [vmem:[#allocation55_spill] sm:$0xff] }
 0x260   :  { %19917 = vmatmul.mubr.msk.f32.gmra.mrb[40].mxu0 %vm166_vm1, %v29190_v19  ;;  %v29198_v19 = vld [vmem:[#allocation56_spill] sm:$0xff] }
 0x261   :  { %19919 = vmatprep.mubr.msk.f32.mxu0 %vm166_vm1, %v29191_v18  ;;  %v29199_v18 = vld [vmem:[#allocation57_spill] sm:$0xff] }
 0x264   :  { %19920 = vmatmul.mubr.msk.f32.gmra.mrb[42].mxu0 %vm166_vm1, %v29192_v51  ;;  %v29200_v51 = vld [vmem:[#allocation58_spill] sm:$0xff] }
 0x265   :  { %19922 = vmatprep.mubr.msk.f32.mxu0 %vm166_vm1, %v29193_v21  ;;  %v29201_v21 = vld [vmem:[#allocation59_spill] sm:$0xff] }
 0x268   :  { %19923 = vmatmul.mubr.msk.f32.gmra.mrb[44].mxu0 %vm166_vm1, %v29194_v16  ;;  %v29202_v16 = vld [vmem:[#allocation60_spill] sm:$0xff] }
 0x269   :  { %19925 = vmatprep.mubr.msk.f32.mxu0 %vm166_vm1, %v29195_v17  ;;  %v29203_v17 = vld [vmem:[#allocation61_spill] sm:$0xff] }
 0x26c   :  { %19926 = vmatmul.mubr.msk.f32.gmra.mrb[46].mxu0 %vm166_vm1, %v29196_v13  ;;  %v29204_v13 = vld [vmem:[#allocation62_spill] sm:$0xff] }
 0x26d   :  { %19928 = vmatprep.mubr.msk.f32.mxu0 %vm166_vm1, %v29197_v8  ;;  %v29205_v8 = vld [vmem:[#allocation63_spill] sm:$0xff] }
 0x270   :  { %19929 = vmatmul.mubr.msk.f32.gmra.mrb[48].mxu0 %vm166_vm1, %v29198_v19  ;;  %v29206_v19 = vld [vmem:[#allocation64_spill] sm:$0xff] }
 0x271   :  { %19931 = vmatprep.mubr.msk.f32.mxu0 %vm166_vm1, %v29199_v18  ;;  %v29207_v18 = vld [vmem:[#allocation65_spill] sm:$0xff] }
 0x274   :  { %19932 = vmatmul.mubr.msk.f32.gmra.mrb[50].mxu0 %vm166_vm1, %v29200_v51  ;;  %v16563_v51 = vld [vmem:[%s28908_s0 + $0x332] sm:$0xff] }
 0x275   :  { %19934 = vmatprep.mubr.msk.f32.mxu0 %vm166_vm1, %v29201_v21  ;;  %v16631_v21 = vld [vmem:[%s28908_s0 + $0x30] sm:$0xff] }
 0x278   :  { %19935 = vmatmul.mubr.msk.f32.gmra.mrb[52].mxu0 %vm166_vm1, %v29202_v16  ;;  %v24901_v16 = vld [vmem:[%s28907_s1 + $0x20] sm:$0x7] }
 0x279   :  { %19937 = vmatprep.mubr.msk.f32.mxu0 %vm166_vm1, %v29203_v17  ;;  %v16634_v17 = vld [vmem:[%s28908_s0 + $0x50] sm:$0xff] }
 0x27c   :  { %19938 = vmatmul.mubr.msk.f32.gmra.mrb[54].mxu0 %vm166_vm1, %v29204_v13  ;;  %v16635_v13 = vld [vmem:[%s28908_s0 + $0x60] sm:$0xff] }
 0x27d   :  { %19940 = vmatprep.mubr.msk.f32.mxu0 %vm166_vm1, %v29205_v8  ;;  %v16637_v8 = vld [vmem:[%s28908_s0 + $0x78] sm:$0xff] }
 0x280   :  { %19941 = vmatmul.mubr.msk.f32.gmra.mrb[56].mxu0 %vm166_vm1, %v24116_v6  ;;  %v16564_v6 = vld [vmem:[%s28908_s0 + $0x33a] sm:$0xff] }
 0x281   :  { %19943 = vmatprep.mubr.msk.f32.mxu0 %vm166_vm1, %v29206_v19  ;;  %v16638_v19 = vld [vmem:[%s28908_s0 + $0x80] sm:$0xff] }
 0x284   :  { %19944 = vmatmul.mubr.msk.f32.gmra.mrb[58].mxu0 %vm166_vm1, %v29207_v18  ;;  %v16639_v18 = vld [vmem:[%s28908_s0 + $0x90] sm:$0xff] }
 0x285   :  { %19946 = vmatprep.mubr.msk.f32.mxu0 %vm166_vm1, %v24135_v4  ;;  %v16632_v4 = vld [vmem:[%s28908_s0 + $0x38] sm:$0xff] }
 0x288   :  { %19947 = vmatmul.mubr.msk.f32.gmra.mrb[60].mxu0 %vm166_vm1, %v24144_v7  ;;  %v16633_v7 = vld [vmem:[%s28908_s0 + $0x48] sm:$0xff] }
 0x289   :  { %19949 = vmatprep.mubr.msk.f32.mxu0 %vm166_vm1, %v16563_v51  ;;  %v16640_v51 = vld [vmem:[%s28908_s0 + $0x98] sm:$0xff] }
 0x28c   :  { %19950 = vmatmul.mubr.msk.f32.gmra.mrb[62].mxu0 %vm166_vm1, %v16564_v6  ;;  %v16641_v6 = vld [vmem:[%s28908_s0 + $0xa8] sm:$0xff] }
 0x28d   :  { %19954 = vmatprep.mubr.msk.f32.mxu0 %vm166_vm1, %v16631_v21  ;;  %v16642_v21 = vld [vmem:[%s28908_s0 + $0xb0] sm:$0xff] }
 0x290   :  { %19955 = vmatmul.mubr.msk.f32.vlgmr.msra.gmra.mrb[0].mxu0 %vm166_vm1, %v16632_v4  ;;  %v16643_v4 = vld [vmem:[%s28908_s0 + $0xc0] sm:$0xff] }
 0x291   :  { %20051 = vmatpush3.msk.msra.mxu0 %vm359_vm0, %v24743_v52  ;;  %19957 = vmatprep.mubr.msk.f32.mxu0 %vm166_vm1, %v16633_v7  ;;  %v16636_v52 = vld [vmem:[%s28908_s0 + $0x68] sm:$0xff] }
 0x292   :  { %20148 = vmatprep.subr.msk.mxu0 %vm359_vm0, %v24901_v16  ;;  %v16644_v7 = vld [vmem:[%s28908_s0 + $0xc8] sm:$0xff] }
 0x294   :  { %19958 = vmatmul.mubr.msk.f32.gmra.mrb[2].mxu0 %vm166_vm1, %v16634_v17  ;;  %v16645_v17 = vld [vmem:[%s28908_s0 + $0xd8] sm:$0xff] }
 0x295   :  { %19960 = vmatprep.mubr.msk.f32.mxu0 %vm166_vm1, %v16635_v13  ;;  %v16646_v13 = vld [vmem:[%s28908_s0 + $0xe0] sm:$0xff] }
 0x298   :  { %19961 = vmatmul.mubr.msk.f32.gmra.mrb[4].mxu0 %vm166_vm1, %v16636_v52  ;;  %v16647_v52 = vld [vmem:[%s28908_s0 + $0xf0] sm:$0xff] }
 0x299   :  { %19963 = vmatprep.mubr.msk.f32.mxu0 %vm166_vm1, %v16637_v8  ;;  %v16648_v8 = vld [vmem:[%s28908_s0 + $0xf8] sm:$0xff] }
 0x29c   :  { %19964 = vmatmul.mubr.msk.f32.gmra.mrb[6].mxu0 %vm166_vm1, %v16638_v19  ;;  %v16649_v19 = vld [vmem:[%s28908_s0 + $0x108] sm:$0xff] }
 0x29d   :  { %19966 = vmatprep.mubr.msk.f32.mxu0 %vm166_vm1, %v16639_v18  ;;  %v16650_v18 = vld [vmem:[%s28908_s0 + $0x110] sm:$0xff] }
 0x2a0   :  { %19967 = vmatmul.mubr.msk.f32.gmra.mrb[8].mxu0 %vm166_vm1, %v16640_v51  ;;  %v16651_v51 = vld [vmem:[%s28908_s0 + $0x120] sm:$0xff] }
 0x2a1   :  { %19969 = vmatprep.mubr.msk.f32.mxu0 %vm166_vm1, %v16641_v6  ;;  %v16652_v6 = vld [vmem:[%s28908_s0 + $0x128] sm:$0xff] }
 0x2a4   :  { %19970 = vmatmul.mubr.msk.f32.gmra.mrb[10].mxu0 %vm166_vm1, %v16642_v21  ;;  %v16653_v21 = vld [vmem:[%s28908_s0 + $0x138] sm:$0xff] }
 0x2a5   :  { %19972 = vmatprep.mubr.msk.f32.mxu0 %vm166_vm1, %v16643_v4  ;;  %v16654_v4 = vld [vmem:[%s28908_s0 + $0x140] sm:$0xff] }
 0x2a8   :  { %19973 = vmatmul.mubr.msk.f32.gmra.mrb[12].mxu0 %vm166_vm1, %v16644_v7  ;;  %v16655_v7 = vld [vmem:[%s28908_s0 + $0x150] sm:$0xff] }
 0x2a9   :  { %19975 = vmatprep.mubr.msk.f32.mxu0 %vm166_vm1, %v16645_v17  ;;  %v16656_v17 = vld [vmem:[%s28908_s0 + $0x158] sm:$0xff] }
 0x2ac   :  { %19976 = vmatmul.mubr.msk.f32.gmra.mrb[14].mxu0 %vm166_vm1, %v16646_v13  ;;  %v16657_v13 = vld [vmem:[%s28908_s0 + $0x168] sm:$0xff] }
 0x2ad   :  { %19978 = vmatprep.mubr.msk.f32.mxu0 %vm166_vm1, %v16647_v52  ;;  %v16658_v52 = vld [vmem:[%s28908_s0 + $0x170] sm:$0xff] }
 0x2b0   :  { %19979 = vmatmul.mubr.msk.f32.gmra.mrb[16].mxu0 %vm166_vm1, %v16648_v8  ;;  %v16661_v8 = vld [vmem:[%s28908_s0 + $0x198] sm:$0xff] }
 0x2b1   :  { %19981 = vmatprep.mubr.msk.f32.mxu0 %vm166_vm1, %v16649_v19  ;;  %v16662_v19 = vld [vmem:[%s28908_s0 + $0x1a0] sm:$0xff] }
 0x2b4   :  { %19982 = vmatmul.mubr.msk.f32.gmra.mrb[18].mxu0 %vm166_vm1, %v16650_v18  ;;  %v16663_v18 = vld [vmem:[%s28908_s0 + $0x1e0] sm:$0xff] }
 0x2b5   :  { %19984 = vmatprep.mubr.msk.f32.mxu0 %vm166_vm1, %v16651_v51  ;;  %v16666_v51 = vld [vmem:[%s28908_s0 + $0x200] sm:$0xff] }
 0x2b8   :  { %19985 = vmatmul.mubr.msk.f32.gmra.mrb[20].mxu0 %vm166_vm1, %v16652_v6  ;;  %v16667_v6 = vld [vmem:[%s28908_s0 + $0x210] sm:$0xff] }
 0x2b9   :  { %19987 = vmatprep.mubr.msk.f32.mxu0 %vm166_vm1, %v16653_v21  ;;  %v16668_v21 = vld [vmem:[%s28908_s0 + $0x218] sm:$0xff] }
 0x2bc   :  { %19988 = vmatmul.mubr.msk.f32.gmra.mrb[22].mxu0 %vm166_vm1, %v16654_v4  ;;  %v16669_v4 = vld [vmem:[%s28908_s0 + $0x228] sm:$0xff] }
 0x2bd   :  { %19990 = vmatprep.mubr.msk.f32.mxu0 %vm166_vm1, %v16655_v7  ;;  %v16670_v7 = vld [vmem:[%s28908_s0 + $0x230] sm:$0xff] }
 0x2c0   :  { %19991 = vmatmul.mubr.msk.f32.gmra.mrb[24].mxu0 %vm166_vm1, %v16656_v17  ;;  %v16671_v17 = vld [vmem:[%s28908_s0 + $0x240] sm:$0xff] }
 0x2c1   :  { %19993 = vmatprep.mubr.msk.f32.mxu0 %vm166_vm1, %v16657_v13  ;;  %v16672_v13 = vld [vmem:[%s28908_s0 + $0x248] sm:$0xff] }
 0x2c4   :  { %19994 = vmatmul.mubr.msk.f32.gmra.mrb[26].mxu0 %vm166_vm1, %v16658_v52  ;;  %v16673_v52 = vld [vmem:[%s28908_s0 + $0x258] sm:$0xff] }
 0x2c5   :  { %19996 = vmatprep.mubr.msk.f32.mxu0 %vm166_vm1, %v24218_v11  ;;  %v16664_v11 = vld [vmem:[%s28908_s0 + $0x1e8] sm:$0xff] }
 0x2c8   :  { %19997 = vmatmul.mubr.msk.f32.gmra.mrb[28].mxu0 %vm166_vm1, %v24227_v12  ;;  %v16665_v12 = vld [vmem:[%s28908_s0 + $0x1f8] sm:$0xff] }
 0x2c9   :  { %19999 = vmatprep.mubr.msk.f32.mxu0 %vm166_vm1, %v16661_v8  ;;  %v16674_v8 = vld [vmem:[%s28908_s0 + $0x260] sm:$0xff] }
 0x2cc   :  { %20000 = vmatmul.mubr.msk.f32.gmra.mrb[30].mxu0 %vm166_vm1, %v16662_v19  ;;  %v16675_v19 = vld [vmem:[%s28908_s0 + $0x270] sm:$0xff] }
 0x2cd   :  { %20002 = vmatprep.mubr.msk.f32.mxu0 %vm166_vm1, %v16663_v18  ;;  %v16676_v18 = vld [vmem:[%s28908_s0 + $0x278] sm:$0xff] }
 0x2d0   :  { %20003 = vmatmul.mubr.msk.f32.gmra.mrb[32].mxu0 %vm166_vm1, %v16664_v11  ;;  %v16677_v11 = vld [vmem:[%s28908_s0 + $0x288] sm:$0xff] }
 0x2d1   :  { %20005 = vmatprep.mubr.msk.f32.mxu0 %vm166_vm1, %v16665_v12  ;;  %v16678_v12 = vld [vmem:[%s28908_s0 + $0x290] sm:$0xff] }
 0x2d4   :  { %20006 = vmatmul.mubr.msk.f32.gmra.mrb[34].mxu0 %vm166_vm1, %v16666_v51  ;;  %v16679_v51 = vld [vmem:[%s28908_s0 + $0x2a0] sm:$0xff] }
 0x2d5   :  { %20008 = vmatprep.mubr.msk.f32.mxu0 %vm166_vm1, %v16667_v6  ;;  %v16680_v6 = vld [vmem:[%s28908_s0 + $0x2a8] sm:$0xff] }
 0x2d8   :  { %20009 = vmatmul.mubr.msk.f32.gmra.mrb[36].mxu0 %vm166_vm1, %v16668_v21  ;;  %v16681_v21 = vld [vmem:[%s28908_s0 + $0x2b8] sm:$0xff] }
 0x2d9   :  { %20011 = vmatprep.mubr.msk.f32.mxu0 %vm166_vm1, %v16669_v4  ;;  %v16682_v4 = vld [vmem:[%s28908_s0 + $0x2c0] sm:$0xff] }
 0x2dc   :  { %20012 = vmatmul.mubr.msk.f32.gmra.mrb[38].mxu0 %vm166_vm1, %v16670_v7  ;;  %v16683_v7 = vld [vmem:[%s28908_s0 + $0x2d0] sm:$0xff] }
 0x2dd   :  { %20014 = vmatprep.mubr.msk.f32.mxu0 %vm166_vm1, %v16671_v17  ;;  %v16684_v17 = vld [vmem:[%s28908_s0 + $0x2d8] sm:$0xff] }
 0x2e0   :  { %20015 = vmatmul.mubr.msk.f32.gmra.mrb[40].mxu0 %vm166_vm1, %v16672_v13  ;;  %v16685_v13 = vld [vmem:[%s28908_s0 + $0x2e8] sm:$0xff] }
 0x2e1   :  { %20017 = vmatprep.mubr.msk.f32.mxu0 %vm166_vm1, %v16673_v52  ;;  %v16686_v52 = vld [vmem:[%s28908_s0 + $0x2f0] sm:$0xff] }
 0x2e4   :  { %20018 = vmatmul.mubr.msk.f32.gmra.mrb[42].mxu0 %vm166_vm1, %v16674_v8  ;;  %v16687_v8 = vld [vmem:[%s28908_s0 + $0x300] sm:$0xff] }
 0x2e5   :  { %20020 = vmatprep.mubr.msk.f32.mxu0 %vm166_vm1, %v16675_v19  ;;  %v16688_v19 = vld [vmem:[%s28908_s0 + $0x308] sm:$0xff] }
 0x2e8   :  { %20021 = vmatmul.mubr.msk.f32.gmra.mrb[44].mxu0 %vm166_vm1, %v16676_v18  ;;  %v16689_v18 = vld [vmem:[%s28908_s0 + $0x318] sm:$0xff] }
 0x2e9   :  { %20023 = vmatprep.mubr.msk.f32.mxu0 %vm166_vm1, %v16677_v11  ;;  %v16690_v11 = vld [vmem:[%s28908_s0 + $0x320] sm:$0xff] }
 0x2ec   :  { %20024 = vmatmul.mubr.msk.f32.gmra.mrb[46].mxu0 %vm166_vm1, %v16678_v12  ;;  %v16693_v12 = vld [vmem:[%s28908_s0 + $0x348] sm:$0xff] }
 0x2ed   :  { %20026 = vmatprep.mubr.msk.f32.mxu0 %vm166_vm1, %v16679_v51  ;;  %v16694_v51 = vld [vmem:[%s28908_s0 + $0x350] sm:$0xff] }
 0x2f0   :  { %20027 = vmatmul.mubr.msk.f32.gmra.mrb[48].mxu0 %vm166_vm1, %v16680_v6  ;;  %v16761_v6 = vld [vmem:[%s28908_s0 + $0x31] sm:$0xff] }
 0x2f1   :  { %20029 = vmatprep.mubr.msk.f32.mxu0 %vm166_vm1, %v16681_v21  ;;  %v134_v21 = vld [vmem:[%s28908_s0 + $0x1c9] sm:$0xff] }
 0x2f4   :  { %20030 = vmatmul.mubr.msk.f32.gmra.mrb[50].mxu0 %vm166_vm1, %v16682_v4  ;;  %v29208_v4 = vld [vmem:[#allocation8_spill] sm:$0xff] }
 0x2f5   :  { %20032 = vmatprep.mubr.msk.f32.mxu0 %vm166_vm1, %v16683_v7  ;;  %v29209_v7 = vld [vmem:[#allocation4_spill] sm:$0xff] }
 0x2f8   :  { %20033 = vmatmul.mubr.msk.f32.gmra.mrb[52].mxu0 %vm166_vm1, %v16684_v17  ;;  %v29210_v17 = vld [vmem:[#allocation5_spill] sm:$0xff] }
 0x2f9   :  { %20035 = vmatprep.mubr.msk.f32.mxu0 %vm166_vm1, %v16685_v13  ;;  %v155_v13 = vld [vmem:[%s28908_s0 + $0x2c1] sm:$0xff] }
 0x2fc   :  { %20036 = vmatmul.mubr.msk.f32.gmra.mrb[54].mxu0 %vm166_vm1, %v16686_v52  ;;  %v29211_v52 = vld [vmem:[#allocation6_spill] sm:$0xff] }
 0x2fd   :  { %20038 = vmatprep.mubr.msk.f32.mxu0 %vm166_vm1, %v16687_v8  ;;  %v156_v8 = vld [vmem:[%s28908_s0 + $0x2d1] sm:$0xff] }
 0x300   :  { %20039 = vmatmul.mubr.msk.f32.gmra.mrb[56].mxu0 %vm166_vm1, %v16688_v19  ;;  %v29212_v19 = vld [vmem:[#allocation7_spill] sm:$0xff] }
 0x301   :  { %20041 = vmatprep.mubr.msk.f32.mxu0 %vm166_vm1, %v16689_v18  ;;  %v17022_v18 = vld [vmem:[%s28909_s3 + $0x40] sm:$0xff] }
 0x304   :  { %20042 = vmatmul.mubr.msk.f32.gmra.mrb[58].mxu0 %vm166_vm1, %v16690_v11  ;;  %v17023_v11 = vld [vmem:[%s28909_s3 + $0x48] sm:$0xff] }
 0x305   :  { %20044 = vmatprep.mubr.msk.f32.mxu0 %vm166_vm1, %v24292_v14  ;;  %v16762_v14 = vld [vmem:[%s28908_s0 + $0x39] sm:$0xff] }
 0x308   :  { %20045 = vmatmul.mubr.msk.f32.gmra.mrb[60].mxu0 %vm166_vm1, %v24301_v15  ;;  %v106_v15 = vld [vmem:[%s28908_s0 + $0x49] sm:$0xff] }
 0x309   :  { %20047 = vmatprep.mubr.msk.f32.mxu0 %vm166_vm1, %v16693_v12  ;;  %19375 = vmatprep.mubr.msk.f32.mxu1 %vm166_vm1, %v106_v15  ;;  %v157_v12 = vld [vmem:[%s28908_s0 + $0x2d9] sm:$0xff] }
 0x30a   :  { %v29214_v15 = vld [vmem:[#allocation67_spill] sm:$0xff] }
 0x30c   :  { %20048 = vmatmul.mubr.msk.f32.gmra.mrb[62].mxu0 %vm166_vm1, %v16694_v51  ;;  %v21654_v51 = vpack.c.bf16 %v17023_v11, %v17022_v18  ;;  %v16929_v18 = vld [vmem:[%s28908_s0 + $0x22a] sm:$0xff]  ;;  %v16930_v11 = vld [vmem:[%s28908_s0 + $0x232] sm:$0xff] }
 0x30d   :  { %20052 = vmatprep.mubr.msk.f32.mxu0 %vm166_vm1, %v16761_v6  ;;  %v29213_v6 = vld [vmem:[#allocation66_spill] sm:$0xff] }
 0x30e   :  { %21655 = vmatprep.subr.bf16.mxu1 %v21654_v51 }
 0x310   :  { %20053 = vmatmul.mubr.msk.f32.vlgmr.msra.gmra.mrb[0].mxu0 %vm166_vm1, %v16762_v14  ;;  %v158_v14 = vld [vmem:[%s28908_s0 + $0x2e9] sm:$0xff] }
 0x311   :  { %20149 = vmatpush3.msk.msra.mxu0 %vm359_vm0, %v24901_v16  ;;  %20055 = vmatprep.mubr.msk.f32.mxu0 %vm166_vm1, %v24321_v20  ;;  %v107_v20 = vld [vmem:[%s28908_s0 + $0x51] sm:$0xff]  ;;  %v133_v16 = vld [vmem:[%s28908_s0 + $0x1b9] sm:$0xff] }
 0x312   :  { %19376 = vmatmul.mubr.msk.f32.vlgmr.msra.gmra.mrb[0].mxu1 %vm166_vm1, %v107_v20  ;;  %v159_v20 = vld [vmem:[%s28908_s0 + $0x2f1] sm:$0xff] }
 0x313   :  { %21657 = vmatpush3.bf16.msra.mxu1 %v21654_v51  ;;  %v16932_v51 = vld [vmem:[%s28908_s0 + $0x24a] sm:$0xff] }
 0x314   :  { %20056 = vmatmul.mubr.msk.f32.gmra.mrb[2].mxu0 %vm166_vm1, %v24332_v22  ;;  %v108_v22 = vld [vmem:[%s28908_s0 + $0x61] sm:$0xff] }
 0x315   :  { %20058 = vmatprep.mubr.msk.f32.mxu0 %vm166_vm1, %v24337_v23  ;;  %19378 = vmatprep.mubr.msk.f32.mxu1 %vm166_vm1, %v108_v22  ;;  %v109_v23 = vld [vmem:[%s28908_s0 + $0x69] sm:$0xff]  ;;  %v29215_v22 = vld [vmem:[#allocation68_spill] sm:$0xff] }
 0x316   :  { %19379 = vmatmul.mubr.msk.f32.gmra.mrb[2].mxu1 %vm166_vm1, %v109_v23  ;;  %v160_v23 = vld [vmem:[%s28908_s0 + $0x301] sm:$0xff] }
 0x318   :  { %20059 = vmatmul.mubr.msk.f32.gmra.mrb[4].mxu0 %vm166_vm1, %v24346_v24  ;;  %v110_v24 = vld [vmem:[%s28908_s0 + $0x79] sm:$0xff] }
 0x319   :  { %20061 = vmatprep.mubr.msk.f32.mxu0 %vm166_vm1, %v24351_v25  ;;  %19381 = vmatprep.mubr.msk.f32.mxu1 %vm166_vm1, %v110_v24  ;;  %v111_v25 = vld [vmem:[%s28908_s0 + $0x81] sm:$0xff] }
 0x31a   :  { %19382 = vmatmul.mubr.msk.f32.gmra.mrb[4].mxu1 %vm166_vm1, %v111_v25  ;;  %v29216_v24 = vld [vmem:[#allocation69_spill] sm:$0xff] }
 0x31b   :  { %v161_v25 = vld [vmem:[%s28908_s0 + $0x309] sm:$0xff] }
 0x31c   :  { %20062 = vmatmul.mubr.msk.f32.gmra.mrb[6].mxu0 %vm166_vm1, %v24360_v26  ;;  %v112_v26 = vld [vmem:[%s28908_s0 + $0x91] sm:$0xff] }
 0x31d   :  { %20064 = vmatprep.mubr.msk.f32.mxu0 %vm166_vm1, %v24365_v27  ;;  %19384 = vmatprep.mubr.msk.f32.mxu1 %vm166_vm1, %v112_v26  ;;  %v113_v27 = vld [vmem:[%s28908_s0 + $0x99] sm:$0xff]  ;;  %v16823_v26 = vld [vmem:[%s28908_s0 + $0x349] sm:$0xff] }
 0x31e   :  { %19385 = vmatmul.mubr.msk.f32.gmra.mrb[6].mxu1 %vm166_vm1, %v113_v27  ;;  %v29217_v27 = vld [vmem:[#allocation70_spill] sm:$0xff] }
 0x320   :  { %20065 = vmatmul.mubr.msk.f32.gmra.mrb[8].mxu0 %vm166_vm1, %v24374_v28  ;;  %v114_v28 = vld [vmem:[%s28908_s0 + $0xa9] sm:$0xff] }
 0x321   :  { %20067 = vmatprep.mubr.msk.f32.mxu0 %vm166_vm1, %v24379_v29  ;;  %19387 = vmatprep.mubr.msk.f32.mxu1 %vm166_vm1, %v114_v28  ;;  %v115_v29 = vld [vmem:[%s28908_s0 + $0xb1] sm:$0xff]  ;;  %v162_v28 = vld [vmem:[%s28908_s0 + $0x319] sm:$0xff] }
 0x322   :  { %19388 = vmatmul.mubr.msk.f32.gmra.mrb[8].mxu1 %vm166_vm1, %v115_v29  ;;  %v16824_v29 = vld [vmem:[%s28908_s0 + $0x351] sm:$0xff] }
 0x324   :  { %20068 = vmatmul.mubr.msk.f32.gmra.mrb[10].mxu0 %vm166_vm1, %v24388_v30  ;;  %v116_v30 = vld [vmem:[%s28908_s0 + $0xc1] sm:$0xff] }
 0x325   :  { %20070 = vmatprep.mubr.msk.f32.mxu0 %vm166_vm1, %v24393_v31  ;;  %19390 = vmatprep.mubr.msk.f32.mxu1 %vm166_vm1, %v116_v30  ;;  %v117_v31 = vld [vmem:[%s28908_s0 + $0xc9] sm:$0xff]  ;;  %v163_v30 = vld [vmem:[%s28908_s0 + $0x321] sm:$0xff] }
 0x326   :  { %19391 = vmatmul.mubr.msk.f32.gmra.mrb[10].mxu1 %vm166_vm1, %v117_v31  ;;  %v16891_v31 = vld [vmem:[%s28908_s0 + $0x32] sm:$0xff] }
 0x328   :  { %20071 = vmatmul.mubr.msk.f32.gmra.mrb[12].mxu0 %vm166_vm1, %v24402_v32  ;;  %v118_v32 = vld [vmem:[%s28908_s0 + $0xd9] sm:$0xff] }
 0x329   :  { %20073 = vmatprep.mubr.msk.f32.mxu0 %vm166_vm1, %v24407_v33  ;;  %19393 = vmatprep.mubr.msk.f32.mxu1 %vm166_vm1, %v118_v32  ;;  %v119_v33 = vld [vmem:[%s28908_s0 + $0xe1] sm:$0xff]  ;;  %v17024_v32 = vld [vmem:[%s28909_s3 + $0x50] sm:$0xff] }
 0x32a   :  { %19394 = vmatmul.mubr.msk.f32.gmra.mrb[12].mxu1 %vm166_vm1, %v119_v33  ;;  %v17025_v33 = vld [vmem:[%s28909_s3 + $0x58] sm:$0xff] }
 0x32c   :  { %20074 = vmatmul.mubr.msk.f32.gmra.mrb[14].mxu0 %vm166_vm1, %v24416_v34  ;;  %v120_v34 = vld [vmem:[%s28908_s0 + $0xf1] sm:$0xff] }
 0x32d   :  { %20076 = vmatprep.mubr.msk.f32.mxu0 %vm166_vm1, %v24421_v35  ;;  %19396 = vmatprep.mubr.msk.f32.mxu1 %vm166_vm1, %v120_v34  ;;  %v121_v35 = vld [vmem:[%s28908_s0 + $0xf9] sm:$0xff] }
 0x32e   :  { %19397 = vmatmul.mubr.msk.f32.gmra.mrb[14].mxu1 %vm166_vm1, %v121_v35  ;;  %v17026_v34 = vld [vmem:[%s28909_s3 + $0x60] sm:$0xff] }
 0x32f   :  { %v16892_v35 = vld [vmem:[%s28908_s0 + $0x3a] sm:$0xff] }
 0x330   :  { %20077 = vmatmul.mubr.msk.f32.gmra.mrb[16].mxu0 %vm166_vm1, %v24430_v36  ;;  %v122_v36 = vld [vmem:[%s28908_s0 + $0x109] sm:$0xff] }
 0x331   :  { %20079 = vmatprep.mubr.msk.f32.mxu0 %vm166_vm1, %v24435_v37  ;;  %19399 = vmatprep.mubr.msk.f32.mxu1 %vm166_vm1, %v122_v36  ;;  %v123_v37 = vld [vmem:[%s28908_s0 + $0x111] sm:$0xff]  ;;  %v21658_v36 = vpack.c.bf16 %v17025_v33, %v17024_v32  ;;  %v16942_v32 = vld [vmem:[%s28908_s0 + $0x2c2] sm:$0xff] }
 0x332   :  { %19400 = vmatmul.mubr.msk.f32.gmra.mrb[16].mxu1 %vm166_vm1, %v123_v37  ;;  %v17027_v37 = vld [vmem:[%s28909_s3 + $0x68] sm:$0xff]  ;;  %v16943_v33 = vld [vmem:[%s28908_s0 + $0x2d2] sm:$0xff] }
 0x333   :  { %21659 = vmatprep.subr.bf16.mxu1 %v21658_v36 }
 0x334   :  { %20080 = vmatmul.mubr.msk.f32.gmra.mrb[18].mxu0 %vm166_vm1, %v24444_v38  ;;  %v124_v38 = vld [vmem:[%s28908_s0 + $0x121] sm:$0xff]  ;;  %21661 = vmatpush3.bf16.msra.mxu1 %v21658_v36 }
 0x335   :  { %20082 = vmatprep.mubr.msk.f32.mxu0 %vm166_vm1, %v24449_v39  ;;  %19402 = vmatprep.mubr.msk.f32.mxu1 %vm166_vm1, %v124_v38  ;;  %v125_v39 = vld [vmem:[%s28908_s0 + $0x129] sm:$0xff]  ;;  %v16944_v36 = vld [vmem:[%s28908_s0 + $0x2da] sm:$0xff] }
 0x336   :  { %19403 = vmatmul.mubr.msk.f32.gmra.mrb[18].mxu1 %vm166_vm1, %v125_v39  ;;  %v16893_v38 = vld [vmem:[%s28908_s0 + $0x4a] sm:$0xff]  ;;  %v21662_v39 = vpack.c.bf16 %v17027_v37, %v17026_v34 }
 0x337   :  { %v16945_v37 = vld [vmem:[%s28908_s0 + $0x2ea] sm:$0xff] }
 0x338   :  { %20083 = vmatmul.mubr.msk.f32.gmra.mrb[20].mxu0 %vm166_vm1, %v24458_v40  ;;  %v126_v40 = vld [vmem:[%s28908_s0 + $0x139] sm:$0xff]  ;;  %21663 = vmatprep.subr.bf16.mxu1 %v21662_v39 }
 0x339   :  { %20085 = vmatprep.mubr.msk.f32.mxu0 %vm166_vm1, %v24463_v41  ;;  %19405 = vmatprep.mubr.msk.f32.mxu1 %vm166_vm1, %v126_v40  ;;  %v127_v41 = vld [vmem:[%s28908_s0 + $0x141] sm:$0xff]  ;;  %v17028_v40 = vld [vmem:[%s28909_s3 + $0x70] sm:$0xff] }
 0x33a   :  { %19406 = vmatmul.mubr.msk.f32.gmra.mrb[20].mxu1 %vm166_vm1, %v127_v41  ;;  %v17029_v41 = vld [vmem:[%s28909_s3 + $0x78] sm:$0xff] }
 0x33b   :  { %21665 = vmatpush3.bf16.msra.mxu1 %v21662_v39  ;;  %v6709_v39 = vld [vmem:[%s28909_s3] sm:$0xff] }
 0x33c   :  { %20086 = vmatmul.mubr.msk.f32.gmra.mrb[22].mxu0 %vm166_vm1, %v24472_v44  ;;  %v128_v44 = vld [vmem:[%s28908_s0 + $0x151] sm:$0xff] }
 0x33d   :  { %20088 = vmatprep.mubr.msk.f32.mxu0 %vm166_vm1, %v24477_v45  ;;  %19408 = vmatprep.mubr.msk.f32.mxu1 %vm166_vm1, %v128_v44  ;;  %v129_v45 = vld [vmem:[%s28908_s0 + $0x159] sm:$0xff] }
 0x33e   :  { %19409 = vmatmul.mubr.msk.f32.gmra.mrb[22].mxu1 %vm166_vm1, %v129_v45  ;;  %v16894_v44 = vld [vmem:[%s28908_s0 + $0x52] sm:$0xff]  ;;  %v21666_v45 = vpack.c.bf16 %v17029_v41, %v17028_v40  ;;  %v6710_v40 = vld [vmem:[%s28909_s3 + $0x8] sm:$0xff] }
 0x340   :  { %20089 = vmatmul.mubr.msk.f32.gmra.mrb[24].mxu0 %vm166_vm1, %v24486_v46  ;;  %v16791_v46 = vld [vmem:[%s28908_s0 + $0x199] sm:$0xff]  ;;  %21667 = vmatprep.subr.bf16.mxu1 %v21666_v45 }
 0x341   :  { %20091 = vmatprep.mubr.msk.f32.mxu0 %vm166_vm1, %v24491_v47  ;;  %v130_v47 = vld [vmem:[%s28908_s0 + $0x169] sm:$0xff]  ;;  %21669 = vmatpush3.bf16.msra.mxu1 %v21666_v45  ;;  %v16946_v45 = vld [vmem:[%s28908_s0 + $0x2f2] sm:$0xff] }
 0x342   :  { %19411 = vmatprep.mubr.msk.f32.mxu1 %vm166_vm1, %v130_v47  ;;  %v16896_v47 = vld [vmem:[%s28908_s0 + $0x6a] sm:$0xff] }
 0x344   :  { %20092 = vmatmul.mubr.msk.f32.gmra.mrb[26].mxu0 %vm166_vm1, %v24500_v48  ;;  %v16792_v48 = vld [vmem:[%s28908_s0 + $0x1a1] sm:$0xff] }
 0x345   :  { %20094 = vmatprep.mubr.msk.f32.mxu0 %vm166_vm1, %v24505_v49  ;;  %v131_v49 = vld [vmem:[%s28908_s0 + $0x171] sm:$0xff] }
 0x346   :  { %19412 = vmatmul.mubr.msk.f32.gmra.mrb[24].mxu1 %vm166_vm1, %v131_v49  ;;  %v16898_v49 = vld [vmem:[%s28908_s0 + $0x82] sm:$0xff] }
 0x348   :  { %20095 = vmatmul.mubr.msk.f32.gmra.mrb[28].mxu0 %vm166_vm1, %v24514_v50  ;;  %v132_v50 = vld [vmem:[%s28908_s0 + $0x1b1] sm:$0xff] }
 0x349   :  { %20097 = vmatprep.mubr.msk.f32.mxu0 %vm166_vm1, %v16791_v46  ;;  %19414 = vmatprep.mubr.msk.f32.mxu1 %vm166_vm1, %v132_v50  ;;  %v16895_v46 = vld [vmem:[%s28908_s0 + $0x62] sm:$0xff]  ;;  %v16899_v50 = vld [vmem:[%s28908_s0 + $0x92] sm:$0xff] }
 0x34a   :  { %19415 = vmatmul.mubr.msk.f32.gmra.mrb[26].mxu1 %vm166_vm1, %v133_v16  ;;  %v16900_v16 = vld [vmem:[%s28908_s0 + $0x9a] sm:$0xff] }
 0x34b   :  { %19417 = vmatprep.mubr.msk.f32.mxu1 %vm166_vm1, %v134_v21  ;;  %v16901_v21 = vld [vmem:[%s28908_s0 + $0xaa] sm:$0xff] }
 0x34c   :  { %20098 = vmatmul.mubr.msk.f32.gmra.mrb[30].mxu0 %vm166_vm1, %v16792_v48  ;;  %v16897_v48 = vld [vmem:[%s28908_s0 + $0x7a] sm:$0xff] }
 0x34d   :  { %20100 = vmatprep.mubr.msk.f32.mxu0 %vm166_vm1, %v24528_v53  ;;  %v135_v53 = vld [vmem:[%s28908_s0 + $0x1d1] sm:$0xff] }
 0x34e   :  { %19418 = vmatmul.mubr.msk.f32.gmra.mrb[28].mxu1 %vm166_vm1, %v135_v53  ;;  %v16902_v53 = vld [vmem:[%s28908_s0 + $0xb2] sm:$0xff] }
 0x350   :  { %20101 = vmatmul.mubr.msk.f32.gmra.mrb[32].mxu0 %vm166_vm1, %v24536_v54  ;;  %v136_v54 = vld [vmem:[%s28908_s0 + $0x1e1] sm:$0xff] }
 0x351   :  { %20103 = vmatprep.mubr.msk.f32.mxu0 %vm166_vm1, %v24541_v55  ;;  %19420 = vmatprep.mubr.msk.f32.mxu1 %vm166_vm1, %v136_v54  ;;  %v137_v55 = vld [vmem:[%s28908_s0 + $0x1e9] sm:$0xff] }
 0x352   :  { %19421 = vmatmul.mubr.msk.f32.gmra.mrb[30].mxu1 %vm166_vm1, %v137_v55  ;;  %v16903_v54 = vld [vmem:[%s28908_s0 + $0xc2] sm:$0xff]  ;;  %v16904_v55 = vld [vmem:[%s28908_s0 + $0xca] sm:$0xff] }
 0x354   :  { %20104 = vmatmul.mubr.msk.f32.gmra.mrb[34].mxu0 %vm166_vm1, %v24550_v56  ;;  %v138_v56 = vld [vmem:[%s28908_s0 + $0x1f9] sm:$0xff] }
 0x355   :  { %20106 = vmatprep.mubr.msk.f32.mxu0 %vm166_vm1, %v24555_v57  ;;  %19423 = vmatprep.mubr.msk.f32.mxu1 %vm166_vm1, %v138_v56  ;;  %v139_v57 = vld [vmem:[%s28908_s0 + $0x201] sm:$0xff] }
 0x356   :  { %19424 = vmatmul.mubr.msk.f32.gmra.mrb[32].mxu1 %vm166_vm1, %v139_v57  ;;  %v16905_v56 = vld [vmem:[%s28908_s0 + $0xda] sm:$0xff]  ;;  %v16906_v57 = vld [vmem:[%s28908_s0 + $0xe2] sm:$0xff] }
 0x358   :  { %20107 = vmatmul.mubr.msk.f32.gmra.mrb[36].mxu0 %vm166_vm1, %v24564_v58  ;;  %v140_v58 = vld [vmem:[%s28908_s0 + $0x211] sm:$0xff] }
 0x359   :  { %20109 = vmatprep.mubr.msk.f32.mxu0 %vm166_vm1, %v24569_v59  ;;  %19426 = vmatprep.mubr.msk.f32.mxu1 %vm166_vm1, %v140_v58  ;;  %v141_v59 = vld [vmem:[%s28908_s0 + $0x219] sm:$0xff] }
 0x35a   :  { %19427 = vmatmul.mubr.msk.f32.gmra.mrb[34].mxu1 %vm166_vm1, %v141_v59  ;;  %v16907_v58 = vld [vmem:[%s28908_s0 + $0xf2] sm:$0xff]  ;;  %v16908_v59 = vld [vmem:[%s28908_s0 + $0xfa] sm:$0xff] }
 0x35c   :  { %20110 = vmatmul.mubr.msk.f32.gmra.mrb[38].mxu0 %vm166_vm1, %v24578_v60  ;;  %v142_v60 = vld [vmem:[%s28908_s0 + $0x229] sm:$0xff] }
 0x35d   :  { %20112 = vmatprep.mubr.msk.f32.mxu0 %vm166_vm1, %v24583_v61  ;;  %19429 = vmatprep.mubr.msk.f32.mxu1 %vm166_vm1, %v142_v60  ;;  %v143_v61 = vld [vmem:[%s28908_s0 + $0x231] sm:$0xff] }
 0x35e   :  { %19430 = vmatmul.mubr.msk.f32.gmra.mrb[36].mxu1 %vm166_vm1, %v143_v61  ;;  %v16909_v60 = vld [vmem:[%s28908_s0 + $0x10a] sm:$0xff]  ;;  %v16910_v61 = vld [vmem:[%s28908_s0 + $0x112] sm:$0xff] }
 0x360   :  { %20113 = vmatmul.mubr.msk.f32.gmra.mrb[40].mxu0 %vm166_vm1, %v24592_v62  ;;  %v144_v62 = vld [vmem:[%s28908_s0 + $0x241] sm:$0xff] }
 0x361   :  { %20115 = vmatprep.mubr.msk.f32.mxu0 %vm166_vm1, %v24597_v63  ;;  %19432 = vmatprep.mubr.msk.f32.mxu1 %vm166_vm1, %v144_v62  ;;  %v145_v63 = vld [vmem:[%s28908_s0 + $0x249] sm:$0xff] }
 0x362   :  { %19433 = vmatmul.mubr.msk.f32.gmra.mrb[38].mxu1 %vm166_vm1, %v145_v63  ;;  %v16911_v62 = vld [vmem:[%s28908_s0 + $0x122] sm:$0xff]  ;;  %v16912_v63 = vld [vmem:[%s28908_s0 + $0x12a] sm:$0xff] }
 0x364   :  { %20116 = vmatmul.mubr.msk.f32.gmra.mrb[42].mxu0 %vm166_vm1, %v24606_v0  ;;  %v146_v0 = vld [vmem:[%s28908_s0 + $0x259] sm:$0xff] }
 0x365   :  { %20118 = vmatprep.mubr.msk.f32.mxu0 %vm166_vm1, %v24611_v1  ;;  %19435 = vmatprep.mubr.msk.f32.mxu1 %vm166_vm1, %v146_v0  ;;  %v147_v1 = vld [vmem:[%s28908_s0 + $0x261] sm:$0xff] }
 0x366   :  { %19436 = vmatmul.mubr.msk.f32.gmra.mrb[40].mxu1 %vm166_vm1, %v147_v1  ;;  %v16913_v0 = vld [vmem:[%s28908_s0 + $0x13a] sm:$0xff]  ;;  %v16914_v1 = vld [vmem:[%s28908_s0 + $0x142] sm:$0xff] }
 0x368   :  { %20119 = vmatmul.mubr.msk.f32.gmra.mrb[44].mxu0 %vm166_vm1, %v24620_v2  ;;  %v148_v2 = vld [vmem:[%s28908_s0 + $0x271] sm:$0xff] }
 0x369   :  { %20121 = vmatprep.mubr.msk.f32.mxu0 %vm166_vm1, %v24625_v3  ;;  %19438 = vmatprep.mubr.msk.f32.mxu1 %vm166_vm1, %v148_v2  ;;  %v149_v3 = vld [vmem:[%s28908_s0 + $0x279] sm:$0xff] }
 0x36a   :  { %19439 = vmatmul.mubr.msk.f32.gmra.mrb[42].mxu1 %vm166_vm1, %v149_v3  ;;  %v16915_v2 = vld [vmem:[%s28908_s0 + $0x152] sm:$0xff]  ;;  %v16916_v3 = vld [vmem:[%s28908_s0 + $0x15a] sm:$0xff] }
 0x36c   :  { %20122 = vmatmul.mubr.msk.f32.gmra.mrb[46].mxu0 %vm166_vm1, %v24634_v5  ;;  %v150_v5 = vld [vmem:[%s28908_s0 + $0x289] sm:$0xff] }
 0x36d   :  { %20124 = vmatprep.mubr.msk.f32.mxu0 %vm166_vm1, %v24639_v9  ;;  %19441 = vmatprep.mubr.msk.f32.mxu1 %vm166_vm1, %v150_v5  ;;  %v151_v9 = vld [vmem:[%s28908_s0 + $0x291] sm:$0xff] }
 0x36e   :  { %19442 = vmatmul.mubr.msk.f32.gmra.mrb[44].mxu1 %vm166_vm1, %v151_v9  ;;  %v16917_v5 = vld [vmem:[%s28908_s0 + $0x16a] sm:$0xff]  ;;  %v16918_v9 = vld [vmem:[%s28908_s0 + $0x172] sm:$0xff] }
 0x370   :  { %20125 = vmatmul.mubr.msk.f32.gmra.mrb[48].mxu0 %vm166_vm1, %v24648_v10  ;;  %v152_v10 = vld [vmem:[%s28908_s0 + $0x2a1] sm:$0xff] }
 0x371   :  { %20127 = vmatprep.mubr.msk.f32.mxu0 %vm166_vm1, %v24653_v42  ;;  %19444 = vmatprep.mubr.msk.f32.mxu1 %vm166_vm1, %v152_v10  ;;  %v153_v42 = vld [vmem:[%s28908_s0 + $0x2a9] sm:$0xff] }
 0x372   :  { %19445 = vmatmul.mubr.msk.f32.gmra.mrb[46].mxu1 %vm166_vm1, %v153_v42  ;;  %v29218_v10 = vld [vmem:[#allocation9_spill] sm:$0xff]  ;;  %v29219_v42 = vld [vmem:[#allocation10_spill] sm:$0xff] }
 0x374   :  { %20128 = vmatmul.mubr.msk.f32.gmra.mrb[50].mxu0 %vm166_vm1, %v24662_v43  ;;  %v154_v43 = vld [vmem:[%s28908_s0 + $0x2b9] sm:$0xff] }
 0x375   :  { %20130 = vmatprep.mubr.msk.f32.mxu0 %vm166_vm1, %v29208_v4  ;;  %19447 = vmatprep.mubr.msk.f32.mxu1 %vm166_vm1, %v154_v43  ;;  %v16921_v4 = vld [vmem:[%s28908_s0 + $0x19a] sm:$0xff]  ;;  %v16923_v43 = vld [vmem:[%s28908_s0 + $0x1e2] sm:$0xff] }
 0x376   :  { %19448 = vmatmul.mubr.msk.f32.gmra.mrb[48].mxu1 %vm166_vm1, %v155_v13  ;;  %v16925_v13 = vld [vmem:[%s28908_s0 + $0x1fa] sm:$0xff] }
 0x377   :  { %19450 = vmatprep.mubr.msk.f32.mxu1 %vm166_vm1, %v156_v8  ;;  %v16927_v8 = vld [vmem:[%s28908_s0 + $0x212] sm:$0xff] }
 0x378   :  { %20131 = vmatmul.mubr.msk.f32.gmra.mrb[52].mxu0 %vm166_vm1, %v29209_v7  ;;  %v16922_v7 = vld [vmem:[%s28908_s0 + $0x1a2] sm:$0xff] }
 0x379   :  { %20133 = vmatprep.mubr.msk.f32.mxu0 %vm166_vm1, %v29210_v17  ;;  %v16924_v17 = vld [vmem:[%s28908_s0 + $0x1ea] sm:$0xff] }
 0x37a   :  { %19451 = vmatmul.mubr.msk.f32.gmra.mrb[50].mxu1 %vm166_vm1, %v157_v12  ;;  %v16931_v12 = vld [vmem:[%s28908_s0 + $0x242] sm:$0xff] }
 0x37b   :  { %19453 = vmatprep.mubr.msk.f32.mxu1 %vm166_vm1, %v158_v14  ;;  %v16934_v14 = vld [vmem:[%s28908_s0 + $0x262] sm:$0xff] }
 0x37c   :  { %20134 = vmatmul.mubr.msk.f32.gmra.mrb[54].mxu0 %vm166_vm1, %v29211_v52  ;;  %v16926_v52 = vld [vmem:[%s28908_s0 + $0x202] sm:$0xff] }
 0x37d   :  { %20136 = vmatprep.mubr.msk.f32.mxu0 %vm166_vm1, %v29212_v19  ;;  %v16928_v19 = vld [vmem:[%s28908_s0 + $0x21a] sm:$0xff] }
 0x37e   :  { %19454 = vmatmul.mubr.msk.f32.gmra.mrb[52].mxu1 %vm166_vm1, %v159_v20  ;;  %v25721_v20 = vld [vmem:[%s28908_s0 + $0x27a] sm:$0xff] }
 0x37f   :  { %19456 = vmatprep.mubr.msk.f32.mxu1 %vm166_vm1, %v160_v23  ;;  %v16937_v23 = vld [vmem:[%s28908_s0 + $0x28a] sm:$0xff] }
 0x380   :  { %20137 = vmatmul.mubr.msk.f32.gmra.mrb[56].mxu0 %vm166_vm1, %v29213_v6  ;;  %v16933_v6 = vld [vmem:[%s28908_s0 + $0x25a] sm:$0xff] }
 0x381   :  { %20139 = vmatprep.mubr.msk.f32.mxu0 %vm166_vm1, %v29214_v15  ;;  %v16935_v15 = vld [vmem:[%s28908_s0 + $0x272] sm:$0xff] }
 0x382   :  { %19457 = vmatmul.mubr.msk.f32.gmra.mrb[54].mxu1 %vm166_vm1, %v161_v25  ;;  %v16939_v25 = vld [vmem:[%s28908_s0 + $0x2a2] sm:$0xff] }
 0x383   :  { %19459 = vmatprep.mubr.msk.f32.mxu1 %vm166_vm1, %v162_v28 }
 0x384   :  { %20140 = vmatmul.mubr.msk.f32.gmra.mrb[58].mxu0 %vm166_vm1, %v29215_v22  ;;  %v28992_v22 = vmov 0.0  }
 0x385   :  { %20142 = vmatprep.mubr.msk.f32.mxu0 %vm166_vm1, %v29216_v24  ;;  %6442 = vst.msk [vmem:[#allocation2 + $0x30] sm:$0xff] %vm6435_vm2, %v28992_v22  ;;  %6436 = vst.msk [vmem:[#allocation2] sm:$0xff] %vm6435_vm2, %v28992_v22  ;;  %v16938_v24 = vld [vmem:[%s28908_s0 + $0x292] sm:$0xff] }
 0x386   :  { %19460 = vmatmul.mubr.msk.f32.gmra.mrb[56].mxu1 %vm166_vm1, %v163_v30  ;;  %6437 = vst.msk [vmem:[#allocation2 + $0x8] sm:$0xff] %vm6435_vm2, %v28992_v22  ;;  %6438 = vst.msk [vmem:[#allocation2 + $0x10] sm:$0xff] %vm6435_vm2, %v28992_v22 }
 0x387   :  { %6439 = vst.msk [vmem:[#allocation2 + $0x18] sm:$0xff] %vm6435_vm2, %v28992_v22  ;;  %6440 = vst.msk [vmem:[#allocation2 + $0x20] sm:$0xff] %vm6435_vm2, %v28992_v22 }
 0x388   :  { %20143 = vmatmul.mubr.msk.f32.gmra.mrb[60].mxu0 %vm166_vm1, %v29217_v27  ;;  %6441 = vst.msk [vmem:[#allocation2 + $0x28] sm:$0xff] %vm6435_vm2, %v28992_v22  ;;  %6443 = vst.msk [vmem:[#allocation2 + $0x38] sm:$0xff] %vm6435_vm2, %v28992_v22  ;;  %v16940_v27 = vld [vmem:[%s28908_s0 + $0x2aa] sm:$0xff] }
 0x389   :  { %20145 = vmatprep.mubr.msk.f32.mxu0 %vm166_vm1, %v16823_v26  ;;  %6444 = vst.msk [vmem:[#allocation2 + $0x40] sm:$0xff] %vm6435_vm2, %v28992_v22  ;;  %6445 = vst.msk [vmem:[#allocation2 + $0x48] sm:$0xff] %vm6435_vm2, %v28992_v22 }
 0x38a   :  { %6446 = vst.msk [vmem:[#allocation2 + $0x50] sm:$0xff] %vm6435_vm2, %v28992_v22  ;;  %6447 = vst.msk [vmem:[#allocation2 + $0x58] sm:$0xff] %vm6435_vm2, %v28992_v22 }
 0x38b   :  { %6448 = vst.msk [vmem:[#allocation2 + $0x60] sm:$0xff] %vm6435_vm2, %v28992_v22  ;;  %6449 = vst.msk [vmem:[#allocation2 + $0x68] sm:$0xff] %vm6435_vm2, %v28992_v22 }
 0x38c   :  { %20146 = vmatmul.mubr.msk.f32.gmra.mrb[62].mxu0 %vm166_vm1, %v16824_v29  ;;  %6450 = vst.msk [vmem:[#allocation2 + $0x70] sm:$0xff] %vm6435_vm2, %v28992_v22  ;;  %6451 = vst.msk [vmem:[#allocation2 + $0x78] sm:$0xff] %vm6435_vm2, %v28992_v22  ;;  %v16941_v29 = vld [vmem:[%s28908_s0 + $0x2ba] sm:$0xff] }
 0x38d   :  { %20150 = vmatprep.mubr.msk.f32.mxu0 %vm166_vm1, %v16891_v31  ;;  %6452 = vst.msk [vmem:[#allocation2 + $0x80] sm:$0xff] %vm6435_vm2, %v28992_v22  ;;  %6453 = vst.msk [vmem:[#allocation2 + $0x88] sm:$0xff] %vm6435_vm2, %v28992_v22  ;;  %v6717_v26 = vld [vmem:[#allocation2 + $0x8] sm:$0xff]  ;;  %v6718_v28 = vld [vmem:[#allocation2 + $0x10] sm:$0xff] }
 0x38e   :  { %6454 = vst.msk [vmem:[#allocation2 + $0x90] sm:$0xff] %vm6435_vm2, %v28992_v22  ;;  %6455 = vst.msk [vmem:[#allocation2 + $0x98] sm:$0xff] %vm6435_vm2, %v28992_v22  ;;  %20262 = vmatprep.mubr.msk.f32.mxu1 %vm6435_vm2, %v6717_v26 }
 0x38f   :  { %6456 = vst.msk [vmem:[#allocation2 + $0xa0] sm:$0xff] %vm6435_vm2, %v28992_v22  ;;  %6457 = vst.msk [vmem:[#allocation2 + $0xa8] sm:$0xff] %vm6435_vm2, %v28992_v22  ;;  %20263 = vmatmul.mubr.msk.f32.vlgmr.msra.gmra.mrb[58].mxu1 %vm6435_vm2, %v6718_v28 }
 0x390   :  { %20151 = vmatmul.mubr.msk.f32.vlgmr.msra.gmra.mrb[0].mxu0 %vm166_vm1, %v16892_v35  ;;  %6458 = vst.msk [vmem:[#allocation2 + $0xb0] sm:$0xff] %vm6435_vm2, %v28992_v22  ;;  %6459 = vst.msk [vmem:[#allocation2 + $0xb8] sm:$0xff] %vm6435_vm2, %v28992_v22 }
 0x391   :  { %20153 = vmatprep.mubr.msk.f32.mxu0 %vm166_vm1, %v16893_v38  ;;  %6460 = vst.msk [vmem:[#allocation2 + $0xc0] sm:$0xff] %vm6435_vm2, %v28992_v22  ;;  %6461 = vst.msk [vmem:[#allocation2 + $0xc8] sm:$0xff] %vm6435_vm2, %v28992_v22 }
 0x392   :  { %6462 = vst.msk [vmem:[#allocation2 + $0xd0] sm:$0xff] %vm6435_vm2, %v28992_v22  ;;  %6463 = vst.msk [vmem:[#allocation2 + $0xd8] sm:$0xff] %vm6435_vm2, %v28992_v22 }
 0x393   :  { %6464 = vst.msk [vmem:[#allocation2 + $0xe0] sm:$0xff] %vm6435_vm2, %v28992_v22  ;;  %6465 = vst.msk [vmem:[#allocation2 + $0xe8] sm:$0xff] %vm6435_vm2, %v28992_v22 }
 0x394   :  { %20154 = vmatmul.mubr.msk.f32.gmra.mrb[2].mxu0 %vm166_vm1, %v16894_v44  ;;  %6466 = vst.msk [vmem:[#allocation2 + $0xf0] sm:$0xff] %vm6435_vm2, %v28992_v22  ;;  %6467 = vst.msk [vmem:[#allocation2 + $0xf8] sm:$0xff] %vm6435_vm2, %v28992_v22  ;;  %v21670_v44 = vpack.c.bf16 %v6710_v40, %v6709_v39 }
 0x395   :  { %20156 = vmatprep.mubr.msk.f32.mxu0 %vm166_vm1, %v16895_v46  ;;  %6468 = vst.msk [vmem:[#allocation2 + $0x100] sm:$0xff] %vm6435_vm2, %v28992_v22  ;;  %6469 = vst.msk [vmem:[#allocation2 + $0x108] sm:$0xff] %vm6435_vm2, %v28992_v22  ;;  %v16947_v46 = vld [vmem:[%s28908_s0 + $0x302] sm:$0xff] }
 0x396   :  { %6470 = vst.msk [vmem:[#allocation2 + $0x110] sm:$0xff] %vm6435_vm2, %v28992_v22  ;;  %6471 = vst.msk [vmem:[#allocation2 + $0x118] sm:$0xff] %vm6435_vm2, %v28992_v22  ;;  %21671 = vmatprep.subr.bf16.mxu1 %v21670_v44 }
 0x397   :  { %6472 = vst.msk [vmem:[#allocation2 + $0x120] sm:$0xff] %vm6435_vm2, %v28992_v22  ;;  %6473 = vst.msk [vmem:[#allocation2 + $0x128] sm:$0xff] %vm6435_vm2, %v28992_v22  ;;  %21673 = vmatpush3.bf16.msra.mxu1 %v21670_v44 }
 0x398   :  { %20157 = vmatmul.mubr.msk.f32.gmra.mrb[4].mxu0 %vm166_vm1, %v16896_v47  ;;  %6474 = vst.msk [vmem:[#allocation2 + $0x130] sm:$0xff] %vm6435_vm2, %v28992_v22  ;;  %6475 = vst.msk [vmem:[#allocation2 + $0x138] sm:$0xff] %vm6435_vm2, %v28992_v22 }
 0x399   :  { %20159 = vmatprep.mubr.msk.f32.mxu0 %vm166_vm1, %v16897_v48  ;;  %6476 = vst.msk [vmem:[#allocation2 + $0x140] sm:$0xff] %vm6435_vm2, %v28992_v22  ;;  %6477 = vst.msk [vmem:[#allocation2 + $0x148] sm:$0xff] %vm6435_vm2, %v28992_v22 }
 0x39a   :  { %6478 = vst.msk [vmem:[#allocation2 + $0x150] sm:$0xff] %vm6435_vm2, %v28992_v22  ;;  %6479 = vst.msk [vmem:[#allocation2 + $0x158] sm:$0xff] %vm6435_vm2, %v28992_v22 }
 0x39b   :  { %6480 = vst.msk [vmem:[#allocation2 + $0x160] sm:$0xff] %vm6435_vm2, %v28992_v22  ;;  %6481 = vst.msk [vmem:[#allocation2 + $0x168] sm:$0xff] %vm6435_vm2, %v28992_v22 }
 0x39c   :  { %20160 = vmatmul.mubr.msk.f32.gmra.mrb[6].mxu0 %vm166_vm1, %v16898_v49  ;;  %6482 = vst.msk [vmem:[#allocation2 + $0x170] sm:$0xff] %vm6435_vm2, %v28992_v22  ;;  %6483 = vst.msk [vmem:[#allocation2 + $0x178] sm:$0xff] %vm6435_vm2, %v28992_v22  ;;  %v16948_v49 = vld [vmem:[%s28908_s0 + $0x30a] sm:$0xff] }
 0x39d   :  { %20162 = vmatprep.mubr.msk.f32.mxu0 %vm166_vm1, %v16899_v50  ;;  %6484 = vst.msk [vmem:[#allocation2 + $0x180] sm:$0xff] %vm6435_vm2, %v28992_v22  ;;  %6485 = vst.msk [vmem:[#allocation2 + $0x188] sm:$0xff] %vm6435_vm2, %v28992_v22  ;;  %v16949_v50 = vld [vmem:[%s28908_s0 + $0x31a] sm:$0xff] }
 0x39e   :  { %6486 = vst.msk [vmem:[#allocation2 + $0x190] sm:$0xff] %vm6435_vm2, %v28992_v22  ;;  %6487 = vst.msk [vmem:[#allocation2 + $0x198] sm:$0xff] %vm6435_vm2, %v28992_v22 }
 0x39f   :  { %6488 = vst.msk [vmem:[#allocation2 + $0x1a0] sm:$0xff] %vm6435_vm2, %v28992_v22  ;;  %6489 = vst.msk [vmem:[#allocation2 + $0x1a8] sm:$0xff] %vm6435_vm2, %v28992_v22 }
 0x3a0   :  { %20163 = vmatmul.mubr.msk.f32.gmra.mrb[8].mxu0 %vm166_vm1, %v16900_v16  ;;  %6490 = vst.msk [vmem:[#allocation2 + $0x1b0] sm:$0xff] %vm6435_vm2, %v28992_v22  ;;  %6491 = vst.msk [vmem:[#allocation2 + $0x1b8] sm:$0xff] %vm6435_vm2, %v28992_v22 }
 0x3a1   :  { %20165 = vmatprep.mubr.msk.f32.mxu0 %vm166_vm1, %v16901_v21  ;;  %6492 = vst.msk [vmem:[#allocation2 + $0x1c0] sm:$0xff] %vm6435_vm2, %v28992_v22  ;;  %6493 = vst.msk [vmem:[#allocation2 + $0x1c8] sm:$0xff] %vm6435_vm2, %v28992_v22 }
 0x3a2   :  { %6494 = vst.msk [vmem:[#allocation2 + $0x1d0] sm:$0xff] %vm6435_vm2, %v28992_v22  ;;  %6495 = vst.msk [vmem:[#allocation2 + $0x1d8] sm:$0xff] %vm6435_vm2, %v28992_v22 }
 0x3a3   :  { %6496 = vst.msk [vmem:[#allocation2 + $0x1e0] sm:$0xff] %vm6435_vm2, %v28992_v22  ;;  %6497 = vst.msk [vmem:[#allocation2 + $0x1e8] sm:$0xff] %vm6435_vm2, %v28992_v22 }
 0x3a4   :  { %20166 = vmatmul.mubr.msk.f32.gmra.mrb[10].mxu0 %vm166_vm1, %v16902_v53  ;;  %6498 = vst.msk [vmem:[#allocation2 + $0x1f0] sm:$0xff] %vm6435_vm2, %v28992_v22  ;;  %6499 = vst.msk [vmem:[#allocation2 + $0x1f8] sm:$0xff] %vm6435_vm2, %v28992_v22  ;;  %v16950_v53 = vld [vmem:[%s28908_s0 + $0x322] sm:$0xff] }
 0x3a5   :  { %20168 = vmatprep.mubr.msk.f32.mxu0 %vm166_vm1, %v16903_v54  ;;  %6500 = vst.msk [vmem:[#allocation2 + $0x200] sm:$0xff] %vm6435_vm2, %v28992_v22  ;;  %6501 = vst.msk [vmem:[#allocation2 + $0x208] sm:$0xff] %vm6435_vm2, %v28992_v22 }
 0x3a6   :  { %6502 = vst.msk [vmem:[#allocation2 + $0x210] sm:$0xff] %vm6435_vm2, %v28992_v22  ;;  %6503 = vst.msk [vmem:[#allocation2 + $0x218] sm:$0xff] %vm6435_vm2, %v28992_v22 }
 0x3a7   :  { %6504 = vst.msk [vmem:[#allocation2 + $0x220] sm:$0xff] %vm6435_vm2, %v28992_v22  ;;  %6505 = vst.msk [vmem:[#allocation2 + $0x228] sm:$0xff] %vm6435_vm2, %v28992_v22 }
 0x3a8   :  { %20169 = vmatmul.mubr.msk.f32.gmra.mrb[12].mxu0 %vm166_vm1, %v16904_v55  ;;  %6506 = vst.msk [vmem:[#allocation2 + $0x230] sm:$0xff] %vm6435_vm2, %v28992_v22  ;;  %6507 = vst.msk [vmem:[#allocation2 + $0x238] sm:$0xff] %vm6435_vm2, %v28992_v22 }
 0x3a9   :  { %20171 = vmatprep.mubr.msk.f32.mxu0 %vm166_vm1, %v16905_v56  ;;  %6508 = vst.msk [vmem:[#allocation2 + $0x240] sm:$0xff] %vm6435_vm2, %v28992_v22  ;;  %6509 = vst.msk [vmem:[#allocation2 + $0x248] sm:$0xff] %vm6435_vm2, %v28992_v22  ;;  %v23148_v56 = vld [vmem:[%s28908_s0 + $0x332] sm:$0xff] }
 0x3aa   :  { %6510 = vst.msk [vmem:[#allocation2 + $0x250] sm:$0xff] %vm6435_vm2, %v28992_v22  ;;  %6511 = vst.msk [vmem:[#allocation2 + $0x258] sm:$0xff] %vm6435_vm2, %v28992_v22 }
 0x3ab   :  { %6512 = vst.msk [vmem:[#allocation2 + $0x260] sm:$0xff] %vm6435_vm2, %v28992_v22  ;;  %6513 = vst.msk [vmem:[#allocation2 + $0x268] sm:$0xff] %vm6435_vm2, %v28992_v22 }
 0x3ac   :  { %20172 = vmatmul.mubr.msk.f32.gmra.mrb[14].mxu0 %vm166_vm1, %v16906_v57  ;;  %6514 = vst.msk [vmem:[#allocation2 + $0x270] sm:$0xff] %vm6435_vm2, %v28992_v22  ;;  %6515 = vst.msk [vmem:[#allocation2 + $0x278] sm:$0xff] %vm6435_vm2, %v28992_v22  ;;  %v16953_v57 = vld [vmem:[%s28908_s0 + $0x34a] sm:$0xff] }
 0x3ad   :  { %20174 = vmatprep.mubr.msk.f32.mxu0 %vm166_vm1, %v16907_v58  ;;  %6516 = vst.msk [vmem:[#allocation2 + $0x280] sm:$0xff] %vm6435_vm2, %v28992_v22  ;;  %6517 = vst.msk [vmem:[#allocation2 + $0x288] sm:$0xff] %vm6435_vm2, %v28992_v22 }
 0x3ae   :  { %6518 = vst.msk [vmem:[#allocation2 + $0x290] sm:$0xff] %vm6435_vm2, %v28992_v22  ;;  %6519 = vst.msk [vmem:[#allocation2 + $0x298] sm:$0xff] %vm6435_vm2, %v28992_v22 }
 0x3af   :  { %6520 = vst.msk [vmem:[#allocation2 + $0x2a0] sm:$0xff] %vm6435_vm2, %v28992_v22  ;;  %6521 = vst.msk [vmem:[#allocation2 + $0x2a8] sm:$0xff] %vm6435_vm2, %v28992_v22 }
 0x3b0   :  { %20175 = vmatmul.mubr.msk.f32.gmra.mrb[16].mxu0 %vm166_vm1, %v16908_v59  ;;  %6522 = vst.msk [vmem:[#allocation2 + $0x2b0] sm:$0xff] %vm6435_vm2, %v28992_v22  ;;  %6523 = vst.msk [vmem:[#allocation2 + $0x2b8] sm:$0xff] %vm6435_vm2, %v28992_v22 }
 0x3b1   :  { %20177 = vmatprep.mubr.msk.f32.mxu0 %vm166_vm1, %v16909_v60  ;;  %6524 = vst.msk [vmem:[#allocation2 + $0x2c0] sm:$0xff] %vm6435_vm2, %v28992_v22  ;;  %6525 = vst.msk [vmem:[#allocation2 + $0x2c8] sm:$0xff] %vm6435_vm2, %v28992_v22  ;;  %v23149_v60 = vld [vmem:[%s28908_s0 + $0x33a] sm:$0xff] }
 0x3b2   :  { %6526 = vst.msk [vmem:[#allocation2 + $0x2d0] sm:$0xff] %vm6435_vm2, %v28992_v22  ;;  %6527 = vst.msk [vmem:[#allocation2 + $0x2d8] sm:$0xff] %vm6435_vm2, %v28992_v22 }
 0x3b3   :  { %6528 = vst.msk [vmem:[#allocation2 + $0x2e0] sm:$0xff] %vm6435_vm2, %v28992_v22  ;;  %6529 = vst.msk [vmem:[#allocation2 + $0x2e8] sm:$0xff] %vm6435_vm2, %v28992_v22 }
 0x3b4   :  { %20178 = vmatmul.mubr.msk.f32.gmra.mrb[18].mxu0 %vm166_vm1, %v16910_v61  ;;  %6530 = vst.msk [vmem:[#allocation2 + $0x2f0] sm:$0xff] %vm6435_vm2, %v28992_v22  ;;  %6531 = vst.msk [vmem:[#allocation2 + $0x2f8] sm:$0xff] %vm6435_vm2, %v28992_v22  ;;  %v16954_v61 = vld [vmem:[%s28908_s0 + $0x352] sm:$0xff] }
 0x3b5   :  { %20180 = vmatprep.mubr.msk.f32.mxu0 %vm166_vm1, %v16911_v62  ;;  %6532 = vst.msk [vmem:[#allocation2 + $0x300] sm:$0xff] %vm6435_vm2, %v28992_v22  ;;  %6533 = vst.msk [vmem:[#allocation2 + $0x308] sm:$0xff] %vm6435_vm2, %v28992_v22 }
 0x3b6   :  { %6534 = vst.msk [vmem:[#allocation2 + $0x310] sm:$0xff] %vm6435_vm2, %v28992_v22  ;;  %6535 = vst.msk [vmem:[#allocation2 + $0x318] sm:$0xff] %vm6435_vm2, %v28992_v22 }
 0x3b7   :  { %6536 = vst.msk [vmem:[#allocation2 + $0x320] sm:$0xff] %vm6435_vm2, %v28992_v22  ;;  %6537 = vst.msk [vmem:[#allocation2 + $0x328] sm:$0xff] %vm6435_vm2, %v28992_v22 }
 0x3b8   :  { %20181 = vmatmul.mubr.msk.f32.gmra.mrb[20].mxu0 %vm166_vm1, %v16912_v63  ;;  %6538 = vst.msk [vmem:[#allocation2 + $0x330] sm:$0xff] %vm6435_vm2, %v28992_v22  ;;  %6539 = vst.msk [vmem:[#allocation2 + $0x338] sm:$0xff] %vm6435_vm2, %v28992_v22 }
 0x3b9   :  { %20183 = vmatprep.mubr.msk.f32.mxu0 %vm166_vm1, %v16913_v0  ;;  %6540 = vst.msk [vmem:[#allocation2 + $0x340] sm:$0xff] %vm6435_vm2, %v28992_v22  ;;  %6541 = vst.msk [vmem:[#allocation2 + $0x348] sm:$0xff] %vm6435_vm2, %v28992_v22 }
 0x3ba   :  { %6542 = vst.msk [vmem:[#allocation2 + $0x350] sm:$0xff] %vm6435_vm2, %v28992_v22  ;;  %6543 = vst.msk [vmem:[#allocation2 + $0x358] sm:$0xff] %vm6435_vm2, %v28992_v22 }
 0x3bb   :  { %6544 = vst.msk [vmem:[#allocation2 + $0x360] sm:$0xff] %vm6435_vm2, %v28992_v22  ;;  %6545 = vst.msk [vmem:[#allocation2 + $0x368] sm:$0xff] %vm6435_vm2, %v28992_v22 }
 0x3bc   :  { %20184 = vmatmul.mubr.msk.f32.gmra.mrb[22].mxu0 %vm166_vm1, %v16914_v1  ;;  %6546 = vst.msk [vmem:[#allocation2 + $0x370] sm:$0xff] %vm6435_vm2, %v28992_v22  ;;  %6547 = vst.msk [vmem:[#allocation2 + $0x378] sm:$0xff] %vm6435_vm2, %v28992_v22 }
 0x3bd   :  { %20186 = vmatprep.mubr.msk.f32.mxu0 %vm166_vm1, %v16915_v2  ;;  %6548 = vst.msk [vmem:[#allocation2 + $0x380] sm:$0xff] %vm6435_vm2, %v28992_v22  ;;  %6549 = vst.msk [vmem:[#allocation2 + $0x388] sm:$0xff] %vm6435_vm2, %v28992_v22 }
 0x3be   :  { %6550 = vst.msk [vmem:[#allocation2 + $0x390] sm:$0xff] %vm6435_vm2, %v28992_v22  ;;  %6551 = vst.msk [vmem:[#allocation2 + $0x398] sm:$0xff] %vm6435_vm2, %v28992_v22 }
 0x3bf   :  { %6552 = vst.msk [vmem:[#allocation2 + $0x3a0] sm:$0xff] %vm6435_vm2, %v28992_v22  ;;  %6553 = vst.msk [vmem:[#allocation2 + $0x3a8] sm:$0xff] %vm6435_vm2, %v28992_v22 }
 0x3c0   :  { %20187 = vmatmul.mubr.msk.f32.gmra.mrb[24].mxu0 %vm166_vm1, %v16916_v3  ;;  %6554 = vst.msk [vmem:[#allocation2 + $0x3b0] sm:$0xff] %vm6435_vm2, %v28992_v22  ;;  %6555 = vst.msk [vmem:[#allocation2 + $0x3b8] sm:$0xff] %vm6435_vm2, %v28992_v22 }
 0x3c1   :  { %20189 = vmatprep.mubr.msk.f32.mxu0 %vm166_vm1, %v16917_v5  ;;  %6556 = vst.msk [vmem:[#allocation2 + $0x3c0] sm:$0xff] %vm6435_vm2, %v28992_v22  ;;  %6557 = vst.msk [vmem:[#allocation2 + $0x3c8] sm:$0xff] %vm6435_vm2, %v28992_v22 }
 0x3c2   :  { %6558 = vst.msk [vmem:[#allocation2 + $0x3d0] sm:$0xff] %vm6435_vm2, %v28992_v22  ;;  %6559 = vst.msk [vmem:[#allocation2 + $0x3d8] sm:$0xff] %vm6435_vm2, %v28992_v22 }
 0x3c3   :  { %6560 = vst.msk [vmem:[#allocation2 + $0x3e0] sm:$0xff] %vm6435_vm2, %v28992_v22  ;;  %6561 = vst.msk [vmem:[#allocation2 + $0x3e8] sm:$0xff] %vm6435_vm2, %v28992_v22 }
 0x3c4   :  { %20190 = vmatmul.mubr.msk.f32.gmra.mrb[26].mxu0 %vm166_vm1, %v16918_v9  ;;  %6562 = vst.msk [vmem:[#allocation2 + $0x3f0] sm:$0xff] %vm6435_vm2, %v28992_v22  ;;  %6563 = vst.msk [vmem:[#allocation2 + $0x3f8] sm:$0xff] %vm6435_vm2, %v28992_v22  ;;  %v6711_v9 = vld [vmem:[%s28909_s3 + $0x10] sm:$0xff] }
 0x3c5   :  { %20192 = vmatprep.mubr.msk.f32.mxu0 %vm166_vm1, %v29218_v10  ;;  %6564 = vst.msk [vmem:[#allocation2 + $0x400] sm:$0xff] %vm6435_vm2, %v28992_v22  ;;  %6565 = vst.msk [vmem:[#allocation2 + $0x408] sm:$0xff] %vm6435_vm2, %v28992_v22  ;;  %v6712_v10 = vld [vmem:[%s28909_s3 + $0x18] sm:$0xff] }
 0x3c6   :  { %6566 = vst.msk [vmem:[#allocation2 + $0x410] sm:$0xff] %vm6435_vm2, %v28992_v22  ;;  %6567 = vst.msk [vmem:[#allocation2 + $0x418] sm:$0xff] %vm6435_vm2, %v28992_v22 }
 0x3c7   :  { %6568 = vst.msk [vmem:[#allocation2 + $0x420] sm:$0xff] %vm6435_vm2, %v28992_v22  ;;  %6569 = vst.msk [vmem:[#allocation2 + $0x428] sm:$0xff] %vm6435_vm2, %v28992_v22 }
 0x3c8   :  { %20193 = vmatmul.mubr.msk.f32.gmra.mrb[28].mxu0 %vm166_vm1, %v29219_v42  ;;  %6570 = vst.msk [vmem:[#allocation2 + $0x430] sm:$0xff] %vm6435_vm2, %v28992_v22  ;;  %6571 = vst.msk [vmem:[#allocation2 + $0x438] sm:$0xff] %vm6435_vm2, %v28992_v22  ;;  %v21674_v42 = vpack.c.bf16 %v6712_v10, %v6711_v9 }
 0x3c9   :  { %20195 = vmatprep.mubr.msk.f32.mxu0 %vm166_vm1, %v16921_v4  ;;  %6572 = vst.msk [vmem:[#allocation2 + $0x440] sm:$0xff] %vm6435_vm2, %v28992_v22  ;;  %6573 = vst.msk [vmem:[#allocation2 + $0x448] sm:$0xff] %vm6435_vm2, %v28992_v22 }
 0x3ca   :  { %6574 = vst.msk [vmem:[#allocation2 + $0x450] sm:$0xff] %vm6435_vm2, %v28992_v22  ;;  %6575 = vst.msk [vmem:[#allocation2 + $0x458] sm:$0xff] %vm6435_vm2, %v28992_v22  ;;  %21675 = vmatprep.subr.bf16.mxu1 %v21674_v42 }
 0x3cb   :  { %6576 = vst.msk [vmem:[#allocation2 + $0x460] sm:$0xff] %vm6435_vm2, %v28992_v22  ;;  %6577 = vst.msk [vmem:[#allocation2 + $0x468] sm:$0xff] %vm6435_vm2, %v28992_v22  ;;  %21677 = vmatpush3.bf16.msra.mxu1 %v21674_v42 }
 0x3cc   :  { %20196 = vmatmul.mubr.msk.f32.gmra.mrb[30].mxu0 %vm166_vm1, %v16922_v7  ;;  %6578 = vst.msk [vmem:[#allocation2 + $0x470] sm:$0xff] %vm6435_vm2, %v28992_v22  ;;  %6579 = vst.msk [vmem:[#allocation2 + $0x478] sm:$0xff] %vm6435_vm2, %v28992_v22 }
 0x3cd   :  { %20198 = vmatprep.mubr.msk.f32.mxu0 %vm166_vm1, %v16923_v43  ;;  %13318 = vst.msk [vmem:[#allocation3] sm:$0xff] %vm6435_vm2, %v28992_v22  ;;  %13319 = vst.msk [vmem:[#allocation3 + $0x8] sm:$0xff] %vm6435_vm2, %v28992_v22 }
 0x3ce   :  { %13320 = vst.msk [vmem:[#allocation3 + $0x10] sm:$0xff] %vm6435_vm2, %v28992_v22  ;;  %13321 = vst.msk [vmem:[#allocation3 + $0x18] sm:$0xff] %vm6435_vm2, %v28992_v22 }
 0x3cf   :  { %13322 = vst.msk [vmem:[#allocation3 + $0x20] sm:$0xff] %vm6435_vm2, %v28992_v22  ;;  %13323 = vst.msk [vmem:[#allocation3 + $0x28] sm:$0xff] %vm6435_vm2, %v28992_v22 }
 0x3d0   :  { %20199 = vmatmul.mubr.msk.f32.gmra.mrb[32].mxu0 %vm166_vm1, %v16924_v17  ;;  %13324 = vst.msk [vmem:[#allocation3 + $0x30] sm:$0xff] %vm6435_vm2, %v28992_v22  ;;  %13325 = vst.msk [vmem:[#allocation3 + $0x38] sm:$0xff] %vm6435_vm2, %v28992_v22 }
 0x3d1   :  { %20201 = vmatprep.mubr.msk.f32.mxu0 %vm166_vm1, %v16925_v13  ;;  %13326 = vst.msk [vmem:[#allocation3 + $0x40] sm:$0xff] %vm6435_vm2, %v28992_v22  ;;  %13327 = vst.msk [vmem:[#allocation3 + $0x48] sm:$0xff] %vm6435_vm2, %v28992_v22 }
 0x3d2   :  { %13328 = vst.msk [vmem:[#allocation3 + $0x50] sm:$0xff] %vm6435_vm2, %v28992_v22  ;;  %13329 = vst.msk [vmem:[#allocation3 + $0x58] sm:$0xff] %vm6435_vm2, %v28992_v22 }
 0x3d3   :  { %13330 = vst.msk [vmem:[#allocation3 + $0x60] sm:$0xff] %vm6435_vm2, %v28992_v22  ;;  %13331 = vst.msk [vmem:[#allocation3 + $0x68] sm:$0xff] %vm6435_vm2, %v28992_v22 }
 0x3d4   :  { %20202 = vmatmul.mubr.msk.f32.gmra.mrb[34].mxu0 %vm166_vm1, %v16926_v52  ;;  %13332 = vst.msk [vmem:[#allocation3 + $0x70] sm:$0xff] %vm6435_vm2, %v28992_v22  ;;  %13333 = vst.msk [vmem:[#allocation3 + $0x78] sm:$0xff] %vm6435_vm2, %v28992_v22 }
 0x3d5   :  { %20204 = vmatprep.mubr.msk.f32.mxu0 %vm166_vm1, %v16927_v8  ;;  %13334 = vst.msk [vmem:[#allocation3 + $0x80] sm:$0xff] %vm6435_vm2, %v28992_v22  ;;  %13335 = vst.msk [vmem:[#allocation3 + $0x88] sm:$0xff] %vm6435_vm2, %v28992_v22 }
 0x3d6   :  { %13336 = vst.msk [vmem:[#allocation3 + $0x90] sm:$0xff] %vm6435_vm2, %v28992_v22  ;;  %13337 = vst.msk [vmem:[#allocation3 + $0x98] sm:$0xff] %vm6435_vm2, %v28992_v22 }
 0x3d7   :  { %13338 = vst.msk [vmem:[#allocation3 + $0xa0] sm:$0xff] %vm6435_vm2, %v28992_v22  ;;  %13339 = vst.msk [vmem:[#allocation3 + $0xa8] sm:$0xff] %vm6435_vm2, %v28992_v22 }
 0x3d8   :  { %20205 = vmatmul.mubr.msk.f32.gmra.mrb[36].mxu0 %vm166_vm1, %v16928_v19  ;;  %13340 = vst.msk [vmem:[#allocation3 + $0xb0] sm:$0xff] %vm6435_vm2, %v28992_v22  ;;  %13341 = vst.msk [vmem:[#allocation3 + $0xb8] sm:$0xff] %vm6435_vm2, %v28992_v22 }
 0x3d9   :  { %20207 = vmatprep.mubr.msk.f32.mxu0 %vm166_vm1, %v16929_v18  ;;  %13342 = vst.msk [vmem:[#allocation3 + $0xc0] sm:$0xff] %vm6435_vm2, %v28992_v22  ;;  %13343 = vst.msk [vmem:[#allocation3 + $0xc8] sm:$0xff] %vm6435_vm2, %v28992_v22 }
 0x3da   :  { %13344 = vst.msk [vmem:[#allocation3 + $0xd0] sm:$0xff] %vm6435_vm2, %v28992_v22  ;;  %13345 = vst.msk [vmem:[#allocation3 + $0xd8] sm:$0xff] %vm6435_vm2, %v28992_v22 }
 0x3db   :  { %13346 = vst.msk [vmem:[#allocation3 + $0xe0] sm:$0xff] %vm6435_vm2, %v28992_v22  ;;  %13347 = vst.msk [vmem:[#allocation3 + $0xe8] sm:$0xff] %vm6435_vm2, %v28992_v22 }
 0x3dc   :  { %20208 = vmatmul.mubr.msk.f32.gmra.mrb[38].mxu0 %vm166_vm1, %v16930_v11  ;;  %13348 = vst.msk [vmem:[#allocation3 + $0xf0] sm:$0xff] %vm6435_vm2, %v28992_v22  ;;  %13349 = vst.msk [vmem:[#allocation3 + $0xf8] sm:$0xff] %vm6435_vm2, %v28992_v22 }
 0x3dd   :  { %20210 = vmatprep.mubr.msk.f32.mxu0 %vm166_vm1, %v16931_v12  ;;  %13350 = vst.msk [vmem:[#allocation3 + $0x100] sm:$0xff] %vm6435_vm2, %v28992_v22  ;;  %13351 = vst.msk [vmem:[#allocation3 + $0x108] sm:$0xff] %vm6435_vm2, %v28992_v22 }
 0x3de   :  { %13352 = vst.msk [vmem:[#allocation3 + $0x110] sm:$0xff] %vm6435_vm2, %v28992_v22  ;;  %13353 = vst.msk [vmem:[#allocation3 + $0x118] sm:$0xff] %vm6435_vm2, %v28992_v22 }
 0x3df   :  { %13354 = vst.msk [vmem:[#allocation3 + $0x120] sm:$0xff] %vm6435_vm2, %v28992_v22  ;;  %13355 = vst.msk [vmem:[#allocation3 + $0x128] sm:$0xff] %vm6435_vm2, %v28992_v22 }
 0x3e0   :  { %20211 = vmatmul.mubr.msk.f32.gmra.mrb[40].mxu0 %vm166_vm1, %v16932_v51  ;;  %13356 = vst.msk [vmem:[#allocation3 + $0x130] sm:$0xff] %vm6435_vm2, %v28992_v22  ;;  %13357 = vst.msk [vmem:[#allocation3 + $0x138] sm:$0xff] %vm6435_vm2, %v28992_v22 }
 0x3e1   :  { %20213 = vmatprep.mubr.msk.f32.mxu0 %vm166_vm1, %v16933_v6  ;;  %13358 = vst.msk [vmem:[#allocation3 + $0x140] sm:$0xff] %vm6435_vm2, %v28992_v22  ;;  %13359 = vst.msk [vmem:[#allocation3 + $0x148] sm:$0xff] %vm6435_vm2, %v28992_v22 }
 0x3e2   :  { %13360 = vst.msk [vmem:[#allocation3 + $0x150] sm:$0xff] %vm6435_vm2, %v28992_v22  ;;  %13361 = vst.msk [vmem:[#allocation3 + $0x158] sm:$0xff] %vm6435_vm2, %v28992_v22 }
 0x3e3   :  { %13362 = vst.msk [vmem:[#allocation3 + $0x160] sm:$0xff] %vm6435_vm2, %v28992_v22  ;;  %13363 = vst.msk [vmem:[#allocation3 + $0x168] sm:$0xff] %vm6435_vm2, %v28992_v22 }
 0x3e4   :  { %20214 = vmatmul.mubr.msk.f32.gmra.mrb[42].mxu0 %vm166_vm1, %v16934_v14  ;;  %13364 = vst.msk [vmem:[#allocation3 + $0x170] sm:$0xff] %vm6435_vm2, %v28992_v22  ;;  %13365 = vst.msk [vmem:[#allocation3 + $0x178] sm:$0xff] %vm6435_vm2, %v28992_v22 }
 0x3e5   :  { %20216 = vmatprep.mubr.msk.f32.mxu0 %vm166_vm1, %v16935_v15  ;;  %13366 = vst.msk [vmem:[#allocation3 + $0x180] sm:$0xff] %vm6435_vm2, %v28992_v22  ;;  %13367 = vst.msk [vmem:[#allocation3 + $0x188] sm:$0xff] %vm6435_vm2, %v28992_v22  ;;  %v26153_v30 = vpop.f32.mrb[0].mxu1 }
 0x3e6   :  { %13368 = vst.msk [vmem:[#allocation3 + $0x190] sm:$0xff] %vm6435_vm2, %v28992_v22  ;;  %13369 = vst.msk [vmem:[#allocation3 + $0x198] sm:$0xff] %vm6435_vm2, %v28992_v22  ;;  %v26155_v31 = vpop.f32.mrb[1].mxu1 }
 0x3e7   :  { %13370 = vst.msk [vmem:[#allocation3 + $0x1a0] sm:$0xff] %vm6435_vm2, %v28992_v22  ;;  %13371 = vst.msk [vmem:[#allocation3 + $0x1a8] sm:$0xff] %vm6435_vm2, %v28992_v22 }
 0x3e8   :  { %13372 = vst.msk [vmem:[#allocation3 + $0x1b0] sm:$0xff] %vm6435_vm2, %v28992_v22  ;;  %13373 = vst.msk [vmem:[#allocation3 + $0x1b8] sm:$0xff] %vm6435_vm2, %v28992_v22  ;;  %20217 = vmatmul.mubr.msk.f32.gmra.mrb[44].mxu0 %vm166_vm1, %v25721_v20 }
 0x3e9   :  { %13374 = vst.msk [vmem:[#allocation3 + $0x1c0] sm:$0xff] %vm6435_vm2, %v28992_v22  ;;  %13375 = vst.msk [vmem:[#allocation3 + $0x1c8] sm:$0xff] %vm6435_vm2, %v28992_v22  ;;  %20219 = vmatprep.mubr.msk.f32.mxu0 %vm166_vm1, %v16937_v23  ;;  %v26165_v34 = vpop.f32.mrb[2].mxu1  ;;  %v6713_v23 = vld [vmem:[%s28909_s3 + $0x20] sm:$0xff] }
 0x3ea   :  { %13376 = vst.msk [vmem:[#allocation3 + $0x1d0] sm:$0xff] %vm6435_vm2, %v28992_v22  ;;  %13377 = vst.msk [vmem:[#allocation3 + $0x1d8] sm:$0xff] %vm6435_vm2, %v28992_v22  ;;  %v26167_v35 = vpop.f32.mrb[3].mxu1 }
 0x3ec   :  { %20220 = vmatmul.mubr.msk.f32.gmra.mrb[46].mxu0 %vm166_vm1, %v16938_v24  ;;  %v6714_v24 = vld [vmem:[%s28909_s3 + $0x28] sm:$0xff] }
 0x3ed   :  { %20222 = vmatprep.mubr.msk.f32.mxu0 %vm166_vm1, %v16939_v25  ;;  %v26177_v38 = vpop.f32.mrb[4].mxu1  ;;  %v21678_v26 = vpack.c.bf16 %v6714_v24, %v6713_v23  ;;  %v26350_v24 = vld [vmem:[%s28910_s2] ss:$0 sm:$0xff] }
 0x3ee   :  { %v26185_v41 = vpop.f32.mrb[5].mxu1 }
 0x3ef   :  { %21679 = vmatprep.subr.bf16.mxu1 %v21678_v26 }
 0x3f0   :  { %20223 = vmatmul.mubr.msk.f32.gmra.mrb[48].mxu0 %vm166_vm1, %v16940_v27  ;;  %21681 = vmatpush3.bf16.msra.mxu1 %v21678_v26 }
 0x3f1   :  { %20225 = vmatprep.mubr.msk.f32.mxu0 %vm166_vm1, %v16941_v29  ;;  %v26195_v47 = vpop.f32.mrb[6].mxu1 }
 0x3f2   :  { %v26197_v48 = vpop.f32.mrb[7].mxu1 }
 0x3f4   :  { %20226 = vmatmul.mubr.msk.f32.gmra.mrb[50].mxu0 %vm166_vm1, %v16942_v32 }
 0x3f5   :  { %20228 = vmatprep.mubr.msk.f32.mxu0 %vm166_vm1, %v16943_v33  ;;  %v26207_v16 = vpop.f32.mrb[8].mxu1 }
 0x3f6   :  { %v26209_v21 = vpop.f32.mrb[9].mxu1 }
 0x3f8   :  { %20229 = vmatmul.mubr.msk.f32.gmra.mrb[52].mxu0 %vm166_vm1, %v16944_v36 }
 0x3f9   :  { %20231 = vmatprep.mubr.msk.f32.mxu0 %vm166_vm1, %v16945_v37  ;;  %v26216_v54 = vpop.f32.mrb[10].mxu1 }
 0x3fa   :  { %v26218_v55 = vpop.f32.mrb[11].mxu1 }
 0x3fc   :  { %20232 = vmatmul.mubr.msk.f32.gmra.mrb[54].mxu0 %vm166_vm1, %v16946_v45 }
 0x3fd   :  { %20234 = vmatprep.mubr.msk.f32.mxu0 %vm166_vm1, %v16947_v46  ;;  %v26228_v58 = vpop.f32.mrb[12].mxu1 }
 0x3fe   :  { %v26230_v59 = vpop.f32.mrb[13].mxu1 }
 0x400   :  { %20235 = vmatmul.mubr.msk.f32.gmra.mrb[56].mxu0 %vm166_vm1, %v16948_v49 }
 0x401   :  { %20237 = vmatprep.mubr.msk.f32.mxu0 %vm166_vm1, %v16949_v50  ;;  %v26240_v62 = vpop.f32.mrb[14].mxu1 }
 0x402   :  { %v26242_v63 = vpop.f32.mrb[15].mxu1 }
 0x404   :  { %20238 = vmatmul.mubr.msk.f32.gmra.mrb[58].mxu0 %vm166_vm1, %v16950_v53 }
 0x405   :  { %20240 = vmatprep.mubr.msk.f32.mxu0 %vm166_vm1, %v23148_v56  ;;  %v26245_v0 = vpop.f32.mrb[16].mxu1  ;;  %v6715_v56 = vld [vmem:[%s28909_s3 + $0x30] sm:$0xff] }
 0x406   :  { %v26247_v1 = vpop.f32.mrb[17].mxu1 }
 0x408   :  { %20241 = vmatmul.mubr.msk.f32.gmra.mrb[60].mxu0 %vm166_vm1, %v23149_v60 }
 0x409   :  { %20243 = vmatprep.mubr.msk.f32.mxu0 %vm166_vm1, %v16953_v57  ;;  %v26249_v2 = vpop.f32.mrb[18].mxu1  ;;  %v6716_v57 = vld [vmem:[%s28909_s3 + $0x38] sm:$0xff] }
 0x40a   :  { %v26251_v3 = vpop.f32.mrb[19].mxu1 }
 0x40c   :  { %20244 = vmatmul.mubr.msk.f32.gmra.mrb[62].mxu0 %vm166_vm1, %v16954_v61  ;;  %v21682_v61 = vpack.c.bf16 %v6716_v57, %v6715_v56 }
 0x40d   :  { %v26253_v5 = vpop.f32.mrb[20].mxu1 }
 0x40e   :  { %v26261_v4 = vpop.f32.mrb[21].mxu1  ;;  %21683 = vmatprep.subr.bf16.mxu1 %v21682_v61 }
 0x40f   :  { %21685 = vmatpush3.bf16.msra.mxu1 %v21682_v61 }
 0x411   :  { %v26263_v7 = vpop.f32.mrb[22].mxu1 }
 0x412   :  { %v26265_v43 = vpop.f32.mrb[23].mxu1 }
 0x419   :  { %v26267_v17 = vpop.f32.mrb[24].mxu1 }
 0x41a   :  { %v26269_v13 = vpop.f32.mrb[25].mxu1 }
 0x41d   :  { %v26271_v52 = vpop.f32.mrb[26].mxu1 }
 0x41e   :  { %v26273_v8 = vpop.f32.mrb[27].mxu1 }
 0x421   :  { %v26275_v19 = vpop.f32.mrb[28].mxu1 }
 0x422   :  { %v26277_v18 = vpop.f32.mrb[29].mxu1 }
 0x425   :  { %v26279_v11 = vpop.f32.mrb[30].mxu1 }
 0x426   :  { %v26281_v12 = vpop.f32.mrb[31].mxu1 }
 0x429   :  { %v26283_v51 = vpop.f32.mrb[32].mxu1 }
 0x42a   :  { %v26285_v6 = vpop.f32.mrb[33].mxu1 }
 0x42d   :  { %v26287_v14 = vpop.f32.mrb[34].mxu1 }
 0x42e   :  { %v26289_v15 = vpop.f32.mrb[35].mxu1 }
 0x431   :  { %v26291_v20 = vpop.f32.mrb[36].mxu1 }
 0x432   :  { %v26299_v25 = vpop.f32.mrb[37].mxu1 }
 0x435   :  { %v26301_v27 = vpop.f32.mrb[38].mxu1 }
 0x436   :  { %v26303_v28 = vpop.f32.mrb[39].mxu1 }
 0x439   :  { %v26305_v29 = vpop.f32.mrb[40].mxu1 }
 0x43a   :  { %v26307_v32 = vpop.f32.mrb[41].mxu1 }
 0x43d   :  { %v26309_v33 = vpop.f32.mrb[42].mxu1 }
 0x43e   :  { %v26311_v36 = vpop.f32.mrb[43].mxu1 }
 0x441   :  { %v26313_v37 = vpop.f32.mrb[44].mxu1 }
 0x442   :  { %v26315_v39 = vpop.f32.mrb[45].mxu1 }
 0x445   :  { %v26317_v40 = vpop.f32.mrb[46].mxu1 }
 0x446   :  { %v26319_v44 = vpop.f32.mrb[47].mxu1 }
 0x449   :  { %v26321_v45 = vpop.f32.mrb[48].mxu1 }
 0x44a   :  { %v26323_v46 = vpop.f32.mrb[49].mxu1 }
 0x44b   :  { %29220 = vst [vmem:[#allocation11_spill] sm:$0xff] %v26323_v46 }
 0x44d   :  { %v26325_v49 = vpop.f32.mrb[50].mxu1 }
 0x44e   :  { %29221 = vst [vmem:[#allocation12_spill] sm:$0xff] %v26325_v49  ;;  %v26327_v50 = vpop.f32.mrb[51].mxu1 }
 0x44f   :  { %29222 = vst [vmem:[#allocation13_spill] sm:$0xff] %v26327_v50 }
 0x451   :  { %v26329_v53 = vpop.f32.mrb[52].mxu1 }
 0x452   :  { %29223 = vst [vmem:[#allocation14_spill] sm:$0xff] %v26329_v53  ;;  %v26337_v60 = vpop.f32.mrb[53].mxu1 }
 0x453   :  { %29224 = vst [vmem:[#allocation15_spill] sm:$0xff] %v26337_v60 }
 0x455   :  { %v26339_v9 = vpop.f32.mrb[54].mxu1 }
 0x456   :  { %29225 = vst [vmem:[#allocation16_spill] sm:$0xff] %v26339_v9  ;;  %v26341_v10 = vpop.f32.mrb[55].mxu1 }
 0x457   :  { %29226 = vst [vmem:[#allocation17_spill] sm:$0xff] %v26341_v10 }
 0x459   :  { %v26343_v42 = vpop.f32.mrb[56].mxu1 }
 0x45a   :  { %29227 = vst [vmem:[#allocation18_spill] sm:$0xff] %v26343_v42  ;;  %v26345_v23 = vpop.f32.mrb[57].mxu1 }
 0x45b   :  { %29228 = vst [vmem:[#allocation19_spill] sm:$0xff] %v26345_v23 }
 0x463   :  { %v20152_v26 = vpop.f32.mrb[0].mxu0 }
 0x464   :  { %v6308_v22 = vadd.f32 %v20152_v26, %v26350_v24  ;;  %v5917_v60 = vpop.f32.mrb[1].mxu0 }
 0x465   :  { %v6307_v56 = vadd.f32 %v26350_v24, %v5917_v60 }
 0x466   :  { %v6372_v57 = vmax.f32 %v6308_v22, 0.0 }
 0x467   :  { %v6371_v9 = vmax.f32 %v6307_v56, 0.0  ;;  %v20155_v61 = vpop.f32.mrb[2].mxu0 }
 0x468   :  { %6582 = vst.msk [vmem:[#allocation2 + $0x30] sm:$0xff] %vm6435_vm2, %v6372_v57  ;;  %v6310_v42 = vadd.f32 %v20155_v61, %v26350_v24  ;;  %v5927_v10 = vpop.f32.mrb[3].mxu0 }
 0x469   :  { %6581 = vst.msk [vmem:[#allocation2 + $0x28] sm:$0xff] %vm6435_vm2, %v6371_v9  ;;  %v6309_v23 = vadd.f32 %v26350_v24, %v5927_v10 }
 0x46a   :  { %v6374_v53 = vmax.f32 %v6310_v42, 0.0 }
 0x46b   :  { %v6373_v50 = vmax.f32 %v6309_v23, 0.0  ;;  %v20158_v49 = vpop.f32.mrb[4].mxu0 }
 0x46c   :  { %6584 = vst.msk [vmem:[#allocation2 + $0x50] sm:$0xff] %vm6435_vm2, %v6374_v53  ;;  %v6312_v26 = vadd.f32 %v20158_v49, %v26350_v24  ;;  %v5937_v60 = vpop.f32.mrb[5].mxu0  ;;  %v17158_v53 = vld [vmem:[%s28909_s3 + $0x80] sm:$0xff]  ;;  %v17159_v49 = vld [vmem:[%s28909_s3 + $0x88] sm:$0xff] }
 0x46d   :  { %6583 = vst.msk [vmem:[#allocation2 + $0x48] sm:$0xff] %vm6435_vm2, %v6373_v50  ;;  %v6311_v22 = vadd.f32 %v26350_v24, %v5937_v60 }
 0x46e   :  { %v6376_v56 = vmax.f32 %v6312_v26, 0.0  ;;  %v26373_v26 = vpack.c.bf16 %v17159_v49, %v17158_v53 }
 0x46f   :  { %v6375_v57 = vmax.f32 %v6311_v22, 0.0  ;;  %v20161_v61 = vpop.f32.mrb[6].mxu0  ;;  %v6720_v23 = vld [vmem:[#allocation2 + $0x30] sm:$0xff] }
 0x470   :  { %6586 = vst.msk [vmem:[#allocation2 + $0x70] sm:$0xff] %vm6435_vm2, %v6376_v56  ;;  %v21992_v9 = vadd.f32 %v20161_v61, %v26153_v30  ;;  %v5947_v10 = vpop.f32.mrb[7].mxu0  ;;  %v6719_v42 = vld [vmem:[#allocation2 + $0x28] sm:$0xff]  ;;  %21687 = vmatprep.subr.bf16.mxu1 %v26373_v26 }
 0x471   :  { %6585 = vst.msk [vmem:[#allocation2 + $0x68] sm:$0xff] %vm6435_vm2, %v6375_v57  ;;  %v21993_v50 = vadd.f32 %v5947_v10, %v26155_v31  ;;  %20265 = vmatprep.mubr.msk.f32.mxu1 %vm6435_vm2, %v6719_v42 }
 0x472   :  { %v6314_v30 = vadd.f32 %v21992_v9, %v26350_v24  ;;  %20266 = vmatmul.mubr.msk.f32.gmra.mrb[60].mxu1 %vm6435_vm2, %v6720_v23 }
 0x473   :  { %v6313_v60 = vadd.f32 %v21993_v50, %v26350_v24  ;;  %v20164_v22 = vpop.f32.mrb[8].mxu0  ;;  %v6722_v42 = vld [vmem:[#allocation2 + $0x50] sm:$0xff] }
 0x474   :  { %v6378_v56 = vmax.f32 %v6314_v30, 0.0  ;;  %v21994_v61 = vadd.f32 %v20164_v22, %v26165_v34  ;;  %v5957_v57 = vpop.f32.mrb[9].mxu0  ;;  %v6721_v46 = vld [vmem:[#allocation2 + $0x48] sm:$0xff] }
 0x475   :  { %v6377_v31 = vmax.f32 %v6313_v60, 0.0  ;;  %v21995_v10 = vadd.f32 %v5957_v57, %v26167_v35  ;;  %20268 = vmatprep.mubr.msk.f32.mxu1 %vm6435_vm2, %v6721_v46 }
 0x476   :  { %6588 = vst.msk [vmem:[#allocation2 + $0x90] sm:$0xff] %vm6435_vm2, %v6378_v56  ;;  %v6316_v9 = vadd.f32 %v21994_v61, %v26350_v24  ;;  %20269 = vmatmul.mubr.msk.f32.gmra.mrb[62].mxu1 %vm6435_vm2, %v6722_v42 }
 0x477   :  { %6587 = vst.msk [vmem:[#allocation2 + $0x88] sm:$0xff] %vm6435_vm2, %v6377_v31  ;;  %v6315_v53 = vadd.f32 %v21995_v10, %v26350_v24  ;;  %v20167_v49 = vpop.f32.mrb[10].mxu0  ;;  %v6724_v60 = vld [vmem:[#allocation2 + $0x70] sm:$0xff] }
 0x478   :  { %v6380_v34 = vmax.f32 %v6316_v9, 0.0  ;;  %v21996_v50 = vadd.f32 %v20167_v49, %v26177_v38  ;;  %v5967_v23 = vpop.f32.mrb[11].mxu0  ;;  %v6723_v30 = vld [vmem:[#allocation2 + $0x68] sm:$0xff] }
 0x479   :  { %v6379_v35 = vmax.f32 %v6315_v53, 0.0  ;;  %v21997_v46 = vadd.f32 %v5967_v23, %v26185_v41  ;;  %20271 = vmatprep.mubr.msk.f32.mxu1 %vm6435_vm2, %v6723_v30 }
 0x47a   :  { %6590 = vst.msk [vmem:[#allocation2 + $0xb0] sm:$0xff] %vm6435_vm2, %v6380_v34  ;;  %v6318_v22 = vadd.f32 %v21996_v50, %v26350_v24  ;;  %20272 = vmatmul.mubr.msk.f32.gmra.mrb[64].mxu1 %vm6435_vm2, %v6724_v60 }
 0x47b   :  { %6589 = vst.msk [vmem:[#allocation2 + $0xa8] sm:$0xff] %vm6435_vm2, %v6379_v35  ;;  %v6317_v56 = vadd.f32 %v21997_v46, %v26350_v24  ;;  %v20170_v61 = vpop.f32.mrb[12].mxu0 }
 0x47c   :  { %v6382_v38 = vmax.f32 %v6318_v22, 0.0  ;;  %v21998_v57 = vadd.f32 %v20170_v61, %v26195_v47  ;;  %v5977_v31 = vpop.f32.mrb[13].mxu0 }
 0x47d   :  { %v6381_v10 = vmax.f32 %v6317_v56, 0.0  ;;  %v21999_v41 = vadd.f32 %v5977_v31, %v26197_v48  ;;  %v6726_v34 = vld [vmem:[#allocation2 + $0x90] sm:$0xff] }
 0x47e   :  { %6592 = vst.msk [vmem:[#allocation2 + $0xd0] sm:$0xff] %vm6435_vm2, %v6382_v38  ;;  %v6320_v42 = vadd.f32 %v21998_v57, %v26350_v24  ;;  %v6725_v9 = vld [vmem:[#allocation2 + $0x88] sm:$0xff] }
 0x47f   :  { %6591 = vst.msk [vmem:[#allocation2 + $0xc8] sm:$0xff] %vm6435_vm2, %v6381_v10  ;;  %v6319_v53 = vadd.f32 %v21999_v41, %v26350_v24  ;;  %v20173_v49 = vpop.f32.mrb[14].mxu0  ;;  %20274 = vmatprep.mubr.msk.f32.mxu1 %vm6435_vm2, %v6725_v9 }
 0x480   :  { %v6384_v50 = vmax.f32 %v6320_v42, 0.0  ;;  %v22000_v47 = vadd.f32 %v20173_v49, %v26207_v16  ;;  %v5987_v23 = vpop.f32.mrb[15].mxu0  ;;  %20275 = vmatmul.mubr.msk.f32.gmra.mrb[66].mxu1 %vm6435_vm2, %v6726_v34 }
 0x481   :  { %v6383_v48 = vmax.f32 %v6319_v53, 0.0  ;;  %v22001_v30 = vadd.f32 %v5987_v23, %v26209_v21  ;;  %v6728_v56 = vld [vmem:[#allocation2 + $0xb0] sm:$0xff] }
 0x482   :  { %6594 = vst.msk [vmem:[#allocation2 + $0xf0] sm:$0xff] %vm6435_vm2, %v6384_v50  ;;  %v6322_v35 = vadd.f32 %v22000_v47, %v26350_v24  ;;  %v6727_v46 = vld [vmem:[#allocation2 + $0xa8] sm:$0xff] }
 0x483   :  { %6593 = vst.msk [vmem:[#allocation2 + $0xe8] sm:$0xff] %vm6435_vm2, %v6383_v48  ;;  %v6321_v60 = vadd.f32 %v22001_v30, %v26350_v24  ;;  %v20176_v22 = vpop.f32.mrb[16].mxu0  ;;  %20277 = vmatprep.mubr.msk.f32.mxu1 %vm6435_vm2, %v6727_v46 }
 0x484   :  { %v6386_v16 = vmax.f32 %v6322_v35, 0.0  ;;  %v22002_v61 = vadd.f32 %v20176_v22, %v26216_v54  ;;  %v5997_v38 = vpop.f32.mrb[17].mxu0  ;;  %20278 = vmatmul.mubr.msk.f32.gmra.mrb[68].mxu1 %vm6435_vm2, %v6728_v56 }
 0x485   :  { %v6385_v21 = vmax.f32 %v6321_v60, 0.0  ;;  %v22003_v57 = vadd.f32 %v5997_v38, %v26218_v55  ;;  %v6730_v9 = vld [vmem:[#allocation2 + $0xd0] sm:$0xff] }
 0x486   :  { %6596 = vst.msk [vmem:[#allocation2 + $0x110] sm:$0xff] %vm6435_vm2, %v6386_v16  ;;  %v6324_v31 = vadd.f32 %v22002_v61, %v26350_v24  ;;  %v6729_v10 = vld [vmem:[#allocation2 + $0xc8] sm:$0xff] }
 0x487   :  { %6595 = vst.msk [vmem:[#allocation2 + $0x108] sm:$0xff] %vm6435_vm2, %v6385_v21  ;;  %v6323_v41 = vadd.f32 %v22003_v57, %v26350_v24  ;;  %v20179_v42 = vpop.f32.mrb[18].mxu0  ;;  %20280 = vmatprep.mubr.msk.f32.mxu1 %vm6435_vm2, %v6729_v10 }
 0x488   :  { %v6388_v54 = vmax.f32 %v6324_v31, 0.0  ;;  %v22004_v53 = vadd.f32 %v20179_v42, %v26228_v58  ;;  %v6007_v49 = vpop.f32.mrb[19].mxu0  ;;  %20281 = vmatmul.mubr.msk.f32.gmra.mrb[70].mxu1 %vm6435_vm2, %v6730_v9 }
 0x489   :  { %v6387_v55 = vmax.f32 %v6323_v41, 0.0  ;;  %v22005_v34 = vadd.f32 %v6007_v49, %v26230_v59  ;;  %v6732_v30 = vld [vmem:[#allocation2 + $0xf0] sm:$0xff] }
 0x48a   :  { %6598 = vst.msk [vmem:[#allocation2 + $0x130] sm:$0xff] %vm6435_vm2, %v6388_v54  ;;  %v6326_v50 = vadd.f32 %v22004_v53, %v26350_v24  ;;  %v6731_v47 = vld [vmem:[#allocation2 + $0xe8] sm:$0xff] }
 0x48b   :  { %6597 = vst.msk [vmem:[#allocation2 + $0x128] sm:$0xff] %vm6435_vm2, %v6387_v55  ;;  %v6325_v23 = vadd.f32 %v22005_v34, %v26350_v24  ;;  %v20182_v48 = vpop.f32.mrb[20].mxu0  ;;  %20283 = vmatprep.mubr.msk.f32.mxu1 %vm6435_vm2, %v6731_v47 }
 0x48c   :  { %v6390_v58 = vmax.f32 %v6326_v50, 0.0  ;;  %v22006_v35 = vadd.f32 %v20182_v48, %v26240_v62  ;;  %v6017_v46 = vpop.f32.mrb[21].mxu0  ;;  %20284 = vmatmul.mubr.msk.f32.gmra.mrb[72].mxu1 %vm6435_vm2, %v6732_v30 }
 0x48d   :  { %v6389_v59 = vmax.f32 %v6325_v23, 0.0  ;;  %v22007_v60 = vadd.f32 %v6017_v46, %v26242_v63  ;;  %v6734_v38 = vld [vmem:[#allocation2 + $0x110] sm:$0xff] }
 0x48e   :  { %6600 = vst.msk [vmem:[#allocation2 + $0x150] sm:$0xff] %vm6435_vm2, %v6390_v58  ;;  %v6328_v22 = vadd.f32 %v22006_v35, %v26350_v24  ;;  %v6733_v56 = vld [vmem:[#allocation2 + $0x108] sm:$0xff] }
 0x48f   :  { %6599 = vst.msk [vmem:[#allocation2 + $0x148] sm:$0xff] %vm6435_vm2, %v6389_v59  ;;  %v6327_v16 = vadd.f32 %v22007_v60, %v26350_v24  ;;  %v20185_v61 = vpop.f32.mrb[22].mxu0  ;;  %20286 = vmatprep.mubr.msk.f32.mxu1 %vm6435_vm2, %v6733_v56 }
 0x490   :  { %v6392_v62 = vmax.f32 %v6328_v22, 0.0  ;;  %v22008_v21 = vadd.f32 %v20185_v61, %v26245_v0  ;;  %v6027_v57 = vpop.f32.mrb[23].mxu0  ;;  %20287 = vmatmul.mubr.msk.f32.gmra.mrb[74].mxu1 %vm6435_vm2, %v6734_v38 }
 0x491   :  { %v6391_v63 = vmax.f32 %v6327_v16, 0.0  ;;  %v22009_v31 = vadd.f32 %v6027_v57, %v26247_v1  ;;  %v6736_v54 = vld [vmem:[#allocation2 + $0x130] sm:$0xff] }
 0x492   :  { %6602 = vst.msk [vmem:[#allocation2 + $0x170] sm:$0xff] %vm6435_vm2, %v6392_v62  ;;  %v6330_v10 = vadd.f32 %v22008_v21, %v26350_v24  ;;  %v6735_v41 = vld [vmem:[#allocation2 + $0x128] sm:$0xff] }
 0x493   :  { %6601 = vst.msk [vmem:[#allocation2 + $0x168] sm:$0xff] %vm6435_vm2, %v6391_v63  ;;  %v6329_v42 = vadd.f32 %v22009_v31, %v26350_v24  ;;  %v20188_v9 = vpop.f32.mrb[24].mxu0  ;;  %20289 = vmatprep.mubr.msk.f32.mxu1 %vm6435_vm2, %v6735_v41 }
 0x494   :  { %v6394_v0 = vmax.f32 %v6330_v10, 0.0  ;;  %v22010_v53 = vadd.f32 %v20188_v9, %v26249_v2  ;;  %v6037_v49 = vpop.f32.mrb[25].mxu0  ;;  %20290 = vmatmul.mubr.msk.f32.gmra.mrb[76].mxu1 %vm6435_vm2, %v6736_v54 }
 0x495   :  { %v6393_v1 = vmax.f32 %v6329_v42, 0.0  ;;  %v22011_v55 = vadd.f32 %v6037_v49, %v26251_v3  ;;  %v6738_v48 = vld [vmem:[#allocation2 + $0x150] sm:$0xff] }
 0x496   :  { %6604 = vst.msk [vmem:[#allocation2 + $0x190] sm:$0xff] %vm6435_vm2, %v6394_v0  ;;  %v6332_v34 = vadd.f32 %v22010_v53, %v26350_v24  ;;  %v6737_v50 = vld [vmem:[#allocation2 + $0x148] sm:$0xff] }
 0x497   :  { %6603 = vst.msk [vmem:[#allocation2 + $0x188] sm:$0xff] %vm6435_vm2, %v6393_v1  ;;  %v6331_v47 = vadd.f32 %v22011_v55, %v26350_v24  ;;  %v20191_v23 = vpop.f32.mrb[26].mxu0  ;;  %20292 = vmatprep.mubr.msk.f32.mxu1 %vm6435_vm2, %v6737_v50 }
 0x498   :  { %v6396_v2 = vmax.f32 %v6332_v34, 0.0  ;;  %v22012_v30 = vadd.f32 %v20191_v23, %v26253_v5  ;;  %v6047_v58 = vpop.f32.mrb[27].mxu0  ;;  %20293 = vmatmul.mubr.msk.f32.gmra.mrb[78].mxu1 %vm6435_vm2, %v6738_v48 }
 0x499   :  { %v6395_v3 = vmax.f32 %v6331_v47, 0.0  ;;  %v22013_v35 = vadd.f32 %v6047_v58, %v26261_v4  ;;  %v6740_v56 = vld [vmem:[#allocation2 + $0x170] sm:$0xff] }
 0x49a   :  { %6606 = vst.msk [vmem:[#allocation2 + $0x1b0] sm:$0xff] %vm6435_vm2, %v6396_v2  ;;  %v6334_v46 = vadd.f32 %v22012_v30, %v26350_v24  ;;  %v6739_v59 = vld [vmem:[#allocation2 + $0x168] sm:$0xff] }
 0x49b   :  { %6605 = vst.msk [vmem:[#allocation2 + $0x1a8] sm:$0xff] %vm6435_vm2, %v6395_v3  ;;  %v6333_v60 = vadd.f32 %v22013_v35, %v26350_v24  ;;  %v20194_v22 = vpop.f32.mrb[28].mxu0  ;;  %20295 = vmatprep.mubr.msk.f32.mxu1 %vm6435_vm2, %v6739_v59  ;;  %v6749_v59 = vld [vmem:[#allocation2 + $0x248] sm:$0xff] }
 0x49c   :  { %v6398_v5 = vmax.f32 %v6334_v46, 0.0  ;;  %v22014_v16 = vadd.f32 %v20194_v22, %v26263_v7  ;;  %v6057_v61 = vpop.f32.mrb[29].mxu0  ;;  %20296 = vmatmul.mubr.msk.f32.gmra.mrb[80].mxu1 %vm6435_vm2, %v6740_v56 }
 0x49d   :  { %v6397_v4 = vmax.f32 %v6333_v60, 0.0  ;;  %v22015_v38 = vadd.f32 %v6057_v61, %v26265_v43  ;;  %v6742_v31 = vld [vmem:[#allocation2 + $0x190] sm:$0xff] }
 0x49e   :  { %6608 = vst.msk [vmem:[#allocation2 + $0x1d0] sm:$0xff] %vm6435_vm2, %v6398_v5  ;;  %v6336_v62 = vadd.f32 %v22014_v16, %v26350_v24  ;;  %v6741_v21 = vld [vmem:[#allocation2 + $0x188] sm:$0xff] }
 0x49f   :  { %6607 = vst.msk [vmem:[#allocation2 + $0x1c8] sm:$0xff] %vm6435_vm2, %v6397_v4  ;;  %v6335_v57 = vadd.f32 %v22015_v38, %v26350_v24  ;;  %v20197_v63 = vpop.f32.mrb[30].mxu0  ;;  %20298 = vmatprep.mubr.msk.f32.mxu1 %vm6435_vm2, %v6741_v21  ;;  %v6750_v4 = vld [vmem:[#allocation2 + $0x250] sm:$0xff] }
 0x4a0   :  { %v6400_v7 = vmax.f32 %v6336_v62, 0.0  ;;  %v22016_v10 = vadd.f32 %v20197_v63, %v26267_v17  ;;  %v6067_v41 = vpop.f32.mrb[31].mxu0  ;;  %20299 = vmatmul.mubr.msk.f32.gmra.mrb[82].mxu1 %vm6435_vm2, %v6742_v31 }
 0x4a1   :  { %v6399_v43 = vmax.f32 %v6335_v57, 0.0  ;;  %v22017_v42 = vadd.f32 %v6067_v41, %v26269_v13  ;;  %v6744_v49 = vld [vmem:[#allocation2 + $0x1b0] sm:$0xff] }
 0x4a2   :  { %6610 = vst.msk [vmem:[#allocation2 + $0x1f0] sm:$0xff] %vm6435_vm2, %v6400_v7  ;;  %v6338_v9 = vadd.f32 %v22016_v10, %v26350_v24  ;;  %v6743_v54 = vld [vmem:[#allocation2 + $0x1a8] sm:$0xff] }
 0x4a3   :  { %6609 = vst.msk [vmem:[#allocation2 + $0x1e8] sm:$0xff] %vm6435_vm2, %v6399_v43  ;;  %v6337_v0 = vadd.f32 %v22017_v42, %v26350_v24  ;;  %v20200_v53 = vpop.f32.mrb[32].mxu0  ;;  %20301 = vmatprep.mubr.msk.f32.mxu1 %vm6435_vm2, %v6743_v54 }
 0x4a4   :  { %v6402_v17 = vmax.f32 %v6338_v9, 0.0  ;;  %v22018_v1 = vadd.f32 %v20200_v53, %v26271_v52  ;;  %v6077_v55 = vpop.f32.mrb[33].mxu0  ;;  %20302 = vmatmul.mubr.msk.f32.gmra.mrb[84].mxu1 %vm6435_vm2, %v6744_v49 }
 0x4a5   :  { %v6401_v13 = vmax.f32 %v6337_v0, 0.0  ;;  %v22019_v34 = vadd.f32 %v6077_v55, %v26273_v8  ;;  %v6746_v2 = vld [vmem:[#allocation2 + $0x1d0] sm:$0xff] }
 0x4a6   :  { %6612 = vst.msk [vmem:[#allocation2 + $0x210] sm:$0xff] %vm6435_vm2, %v6402_v17  ;;  %v6340_v50 = vadd.f32 %v22018_v1, %v26350_v24  ;;  %v6745_v47 = vld [vmem:[#allocation2 + $0x1c8] sm:$0xff] }
 0x4a7   :  { %6611 = vst.msk [vmem:[#allocation2 + $0x208] sm:$0xff] %vm6435_vm2, %v6401_v13  ;;  %v6339_v23 = vadd.f32 %v22019_v34, %v26350_v24  ;;  %v20203_v48 = vpop.f32.mrb[34].mxu0  ;;  %20304 = vmatprep.mubr.msk.f32.mxu1 %vm6435_vm2, %v6745_v47 }
 0x4a8   :  { %v6404_v52 = vmax.f32 %v6340_v50, 0.0  ;;  %v22020_v30 = vadd.f32 %v20203_v48, %v26275_v19  ;;  %v6087_v58 = vpop.f32.mrb[35].mxu0  ;;  %20305 = vmatmul.mubr.msk.f32.gmra.mrb[86].mxu1 %vm6435_vm2, %v6746_v2 }
 0x4a9   :  { %v6403_v8 = vmax.f32 %v6339_v23, 0.0  ;;  %v22021_v3 = vadd.f32 %v6087_v58, %v26277_v18  ;;  %v6748_v19 = vld [vmem:[#allocation2 + $0x1f0] sm:$0xff] }
 0x4aa   :  { %6614 = vst.msk [vmem:[#allocation2 + $0x270] sm:$0xff] %vm6435_vm2, %v6404_v52  ;;  %v6342_v35 = vadd.f32 %v22020_v30, %v26350_v24  ;;  %v6747_v46 = vld [vmem:[#allocation2 + $0x1e8] sm:$0xff] }
 0x4ab   :  { %6613 = vst.msk [vmem:[#allocation2 + $0x268] sm:$0xff] %vm6435_vm2, %v6403_v8  ;;  %v6341_v60 = vadd.f32 %v22021_v3, %v26350_v24  ;;  %v20206_v22 = vpop.f32.mrb[36].mxu0  ;;  %20307 = vmatprep.mubr.msk.f32.mxu1 %vm6435_vm2, %v6747_v46 }
 0x4ac   :  { %v6406_v56 = vmax.f32 %v6342_v35, 0.0  ;;  %v22022_v5 = vadd.f32 %v20206_v22, %v26279_v11  ;;  %v6097_v16 = vpop.f32.mrb[37].mxu0  ;;  %20308 = vmatmul.mubr.msk.f32.gmra.mrb[88].mxu1 %vm6435_vm2, %v6748_v19 }
 0x4ad   :  { %v6405_v18 = vmax.f32 %v6341_v60, 0.0  ;;  %v22023_v61 = vadd.f32 %v6097_v16, %v26281_v12  ;;  %20310 = vmatprep.mubr.msk.f32.mxu1 %vm6435_vm2, %v6749_v59 }
 0x4ae   :  { %6616 = vst.msk [vmem:[#allocation2 + $0x290] sm:$0xff] %vm6435_vm2, %v6406_v56  ;;  %v6344_v38 = vadd.f32 %v22022_v5, %v26350_v24 }
 0x4af   :  { %6615 = vst.msk [vmem:[#allocation2 + $0x288] sm:$0xff] %vm6435_vm2, %v6405_v18  ;;  %v6343_v62 = vadd.f32 %v22023_v61, %v26350_v24  ;;  %v20209_v21 = vpop.f32.mrb[38].mxu0 }
 0x4b0   :  { %v6408_v57 = vmax.f32 %v6344_v38, 0.0  ;;  %v22024_v11 = vadd.f32 %v20209_v21, %v26283_v51  ;;  %v6107_v63 = vpop.f32.mrb[39].mxu0  ;;  %20311 = vmatmul.mubr.msk.f32.gmra.mrb[90].mxu1 %vm6435_vm2, %v6750_v4 }
 0x4b1   :  { %v6407_v31 = vmax.f32 %v6343_v62, 0.0  ;;  %v22025_v12 = vadd.f32 %v6107_v63, %v26285_v6  ;;  %v6752_v42 = vld [vmem:[#allocation2 + $0x270] sm:$0xff] }
 0x4b2   :  { %6618 = vst.msk [vmem:[#allocation2 + $0x2b0] sm:$0xff] %vm6435_vm2, %v6408_v57  ;;  %v6346_v7 = vadd.f32 %v22024_v11, %v26350_v24  ;;  %v6751_v10 = vld [vmem:[#allocation2 + $0x268] sm:$0xff] }
 0x4b3   :  { %6617 = vst.msk [vmem:[#allocation2 + $0x2a8] sm:$0xff] %vm6435_vm2, %v6407_v31  ;;  %v6345_v41 = vadd.f32 %v22025_v12, %v26350_v24  ;;  %v20212_v43 = vpop.f32.mrb[40].mxu0  ;;  %20313 = vmatprep.mubr.msk.f32.mxu1 %vm6435_vm2, %v6751_v10 }
 0x4b4   :  { %v6410_v51 = vmax.f32 %v6346_v7, 0.0  ;;  %v22026_v9 = vadd.f32 %v20212_v43, %v26287_v14  ;;  %v6117_v54 = vpop.f32.mrb[41].mxu0  ;;  %20314 = vmatmul.mubr.msk.f32.gmra.mrb[92].mxu1 %vm6435_vm2, %v6752_v42 }
 0x4b5   :  { %v6409_v6 = vmax.f32 %v6345_v41, 0.0  ;;  %v22027_v0 = vadd.f32 %v6117_v54, %v26289_v15  ;;  %v6754_v55 = vld [vmem:[#allocation2 + $0x290] sm:$0xff] }
 0x4b6   :  { %6620 = vst.msk [vmem:[#allocation2 + $0x2d0] sm:$0xff] %vm6435_vm2, %v6410_v51  ;;  %v6348_v53 = vadd.f32 %v22026_v9, %v26350_v24  ;;  %v6753_v49 = vld [vmem:[#allocation2 + $0x288] sm:$0xff] }
 0x4b7   :  { %6619 = vst.msk [vmem:[#allocation2 + $0x2c8] sm:$0xff] %vm6435_vm2, %v6409_v6  ;;  %v6347_v17 = vadd.f32 %v22027_v0, %v26350_v24  ;;  %v20215_v1 = vpop.f32.mrb[42].mxu0  ;;  %20316 = vmatprep.mubr.msk.f32.mxu1 %vm6435_vm2, %v6753_v49 }
 0x4b8   :  { %v6412_v14 = vmax.f32 %v6348_v53, 0.0  ;;  %v22028_v13 = vadd.f32 %v20215_v1, %v26291_v20  ;;  %v6127_v34 = vpop.f32.mrb[43].mxu0  ;;  %20317 = vmatmul.mubr.msk.f32.gmra.mrb[94].mxu1 %vm6435_vm2, %v6754_v55 }
 0x4b9   :  { %v6411_v15 = vmax.f32 %v6347_v17, 0.0  ;;  %v22029_v50 = vadd.f32 %v6127_v34, %v26299_v25  ;;  %v6756_v52 = vld [vmem:[#allocation2 + $0x2b0] sm:$0xff] }
 0x4ba   :  { %6622 = vst.msk [vmem:[#allocation2 + $0x2f0] sm:$0xff] %vm6435_vm2, %v6412_v14  ;;  %v6350_v47 = vadd.f32 %v22028_v13, %v26350_v24  ;;  %v6755_v23 = vld [vmem:[#allocation2 + $0x2a8] sm:$0xff] }
 0x4bb   :  { %6621 = vst.msk [vmem:[#allocation2 + $0x2e8] sm:$0xff] %vm6435_vm2, %v6411_v15  ;;  %v6349_v48 = vadd.f32 %v22029_v50, %v26350_v24  ;;  %v20218_v2 = vpop.f32.mrb[44].mxu0  ;;  %20319 = vmatprep.mubr.msk.f32.mxu1 %vm6435_vm2, %v6755_v23  ;;  %v29229_v15 = vld [vmem:[#allocation11_spill] sm:$0xff] }
 0x4bc   :  { %v6414_v20 = vmax.f32 %v6350_v47, 0.0  ;;  %v22030_v30 = vadd.f32 %v20218_v2, %v26301_v27  ;;  %v6137_v58 = vpop.f32.mrb[45].mxu0  ;;  %20320 = vmatmul.mubr.msk.f32.gmra.mrb[96].mxu1 %vm6435_vm2, %v6756_v52 }
 0x4bd   :  { %v6413_v25 = vmax.f32 %v6349_v48, 0.0  ;;  %v22031_v8 = vadd.f32 %v6137_v58, %v26303_v28  ;;  %v6758_v60 = vld [vmem:[#allocation2 + $0x2d0] sm:$0xff] }
 0x4be   :  { %6624 = vst.msk [vmem:[#allocation2 + $0x310] sm:$0xff] %vm6435_vm2, %v6414_v20  ;;  %v6352_v3 = vadd.f32 %v22030_v30, %v26350_v24  ;;  %v6757_v35 = vld [vmem:[#allocation2 + $0x2c8] sm:$0xff]  ;;  %v29230_v20 = vld [vmem:[#allocation12_spill] sm:$0xff] }
 0x4bf   :  { %6623 = vst.msk [vmem:[#allocation2 + $0x308] sm:$0xff] %vm6435_vm2, %v6413_v25  ;;  %v6351_v46 = vadd.f32 %v22031_v8, %v26350_v24  ;;  %v20221_v59 = vpop.f32.mrb[46].mxu0  ;;  %20322 = vmatprep.mubr.msk.f32.mxu1 %vm6435_vm2, %v6757_v35  ;;  %v29231_v8 = vld [vmem:[#allocation13_spill] sm:$0xff] }
 0x4c0   :  { %v6416_v27 = vmax.f32 %v6352_v3, 0.0  ;;  %v22032_v22 = vadd.f32 %v20221_v59, %v26305_v29  ;;  %v6147_v19 = vpop.f32.mrb[47].mxu0  ;;  %20323 = vmatmul.mubr.msk.f32.gmra.mrb[98].mxu1 %vm6435_vm2, %v6758_v60 }
 0x4c1   :  { %v6415_v28 = vmax.f32 %v6351_v46, 0.0  ;;  %v22033_v56 = vadd.f32 %v6147_v19, %v26307_v32  ;;  %v6760_v4 = vld [vmem:[#allocation2 + $0x2f0] sm:$0xff] }
 0x4c2   :  { %6626 = vst.msk [vmem:[#allocation2 + $0x330] sm:$0xff] %vm6435_vm2, %v6416_v27  ;;  %v6354_v5 = vadd.f32 %v22032_v22, %v26350_v24  ;;  %v6759_v16 = vld [vmem:[#allocation2 + $0x2e8] sm:$0xff]  ;;  %v29232_v19 = vld [vmem:[#allocation14_spill] sm:$0xff] }
 0x4c3   :  { %6625 = vst.msk [vmem:[#allocation2 + $0x328] sm:$0xff] %vm6435_vm2, %v6415_v28  ;;  %v6353_v18 = vadd.f32 %v22033_v56, %v26350_v24  ;;  %v20224_v61 = vpop.f32.mrb[48].mxu0  ;;  %20325 = vmatprep.mubr.msk.f32.mxu1 %vm6435_vm2, %v6759_v16  ;;  %v29233_v16 = vld [vmem:[#allocation15_spill] sm:$0xff] }
 0x4c4   :  { %v6418_v29 = vmax.f32 %v6354_v5, 0.0  ;;  %v22034_v38 = vadd.f32 %v20224_v61, %v26309_v33  ;;  %v6157_v62 = vpop.f32.mrb[49].mxu0  ;;  %20326 = vmatmul.mubr.msk.f32.gmra.mrb[100].mxu1 %vm6435_vm2, %v6760_v4 }
 0x4c5   :  { %v6417_v32 = vmax.f32 %v6353_v18, 0.0  ;;  %v22035_v21 = vadd.f32 %v6157_v62, %v26311_v36  ;;  %v6762_v12 = vld [vmem:[#allocation2 + $0x310] sm:$0xff] }
 0x4c6   :  { %6628 = vst.msk [vmem:[#allocation2 + $0x350] sm:$0xff] %vm6435_vm2, %v6418_v29  ;;  %v6356_v57 = vadd.f32 %v22034_v38, %v26350_v24  ;;  %v6761_v11 = vld [vmem:[#allocation2 + $0x308] sm:$0xff] }
 0x4c7   :  { %6627 = vst.msk [vmem:[#allocation2 + $0x348] sm:$0xff] %vm6435_vm2, %v6417_v32  ;;  %v6355_v63 = vadd.f32 %v22035_v21, %v26350_v24  ;;  %v20227_v31 = vpop.f32.mrb[50].mxu0  ;;  %20328 = vmatprep.mubr.msk.f32.mxu1 %vm6435_vm2, %v6761_v11  ;;  %v29234_v21 = vld [vmem:[#allocation16_spill] sm:$0xff] }
 0x4c8   :  { %v6420_v33 = vmax.f32 %v6356_v57, 0.0  ;;  %v22036_v7 = vadd.f32 %v20227_v31, %v26313_v37  ;;  %v6167_v10 = vpop.f32.mrb[51].mxu0  ;;  %20329 = vmatmul.mubr.msk.f32.gmra.mrb[102].mxu1 %vm6435_vm2, %v6762_v12  ;;  %v29235_v31 = vld [vmem:[#allocation17_spill] sm:$0xff] }
 0x4c9   :  { %v6419_v36 = vmax.f32 %v6355_v63, 0.0  ;;  %v22037_v41 = vadd.f32 %v6167_v10, %v26315_v39  ;;  %v6764_v54 = vld [vmem:[#allocation2 + $0x330] sm:$0xff] }
 0x4ca   :  { %6630 = vst.msk [vmem:[#allocation2 + $0x370] sm:$0xff] %vm6435_vm2, %v6420_v33  ;;  %v6358_v43 = vadd.f32 %v22036_v7, %v26350_v24  ;;  %v6763_v42 = vld [vmem:[#allocation2 + $0x328] sm:$0xff] }
 0x4cb   :  { %6629 = vst.msk [vmem:[#allocation2 + $0x368] sm:$0xff] %vm6435_vm2, %v6419_v36  ;;  %v6357_v51 = vadd.f32 %v22037_v41, %v26350_v24  ;;  %v20230_v9 = vpop.f32.mrb[52].mxu0  ;;  %20331 = vmatprep.mubr.msk.f32.mxu1 %vm6435_vm2, %v6763_v42  ;;  %v29236_v42 = vld [vmem:[#allocation18_spill] sm:$0xff] }
 0x4cc   :  { %v6422_v37 = vmax.f32 %v6358_v43, 0.0  ;;  %v22038_v6 = vadd.f32 %v20230_v9, %v26317_v40  ;;  %v6177_v0 = vpop.f32.mrb[53].mxu0  ;;  %20332 = vmatmul.mubr.msk.f32.gmra.mrb[104].mxu1 %vm6435_vm2, %v6764_v54 }
 0x4cd   :  { %v6421_v39 = vmax.f32 %v6357_v51, 0.0  ;;  %v22039_v53 = vadd.f32 %v6177_v0, %v26319_v44  ;;  %v6766_v14 = vld [vmem:[#allocation2 + $0x350] sm:$0xff] }
 0x4ce   :  { %6632 = vst.msk [vmem:[#allocation2 + $0x390] sm:$0xff] %vm6435_vm2, %v6422_v37  ;;  %v6360_v49 = vadd.f32 %v22038_v6, %v26350_v24  ;;  %v6765_v17 = vld [vmem:[#allocation2 + $0x348] sm:$0xff]  ;;  %v29237_v37 = vld [vmem:[#allocation19_spill] sm:$0xff] }
 0x4cf   :  { %6631 = vst.msk [vmem:[#allocation2 + $0x388] sm:$0xff] %vm6435_vm2, %v6421_v39  ;;  %v6359_v1 = vadd.f32 %v22039_v53, %v26350_v24  ;;  %v20233_v55 = vpop.f32.mrb[54].mxu0  ;;  %20334 = vmatprep.mubr.msk.f32.mxu1 %vm6435_vm2, %v6765_v17 }
 0x4d0   :  { %v6424_v40 = vmax.f32 %v6360_v49, 0.0  ;;  %v22040_v13 = vadd.f32 %v20233_v55, %v26321_v45  ;;  %v6187_v34 = vpop.f32.mrb[55].mxu0  ;;  %20335 = vmatmul.mubr.msk.f32.gmra.mrb[106].mxu1 %vm6435_vm2, %v6766_v14 }
 0x4d1   :  { %v6423_v44 = vmax.f32 %v6359_v1, 0.0  ;;  %v22041_v50 = vadd.f32 %v6187_v34, %v29229_v15  ;;  %v6768_v52 = vld [vmem:[#allocation2 + $0x370] sm:$0xff] }
 0x4d2   :  { %6634 = vst.msk [vmem:[#allocation2 + $0x3b0] sm:$0xff] %vm6435_vm2, %v6424_v40  ;;  %v6362_v47 = vadd.f32 %v22040_v13, %v26350_v24  ;;  %v6767_v23 = vld [vmem:[#allocation2 + $0x368] sm:$0xff]  ;;  %v17160_v34 = vld [vmem:[%s28909_s3 + $0x90] sm:$0xff] }
 0x4d3   :  { %6633 = vst.msk [vmem:[#allocation2 + $0x3a8] sm:$0xff] %vm6435_vm2, %v6423_v44  ;;  %v6361_v48 = vadd.f32 %v22041_v50, %v26350_v24  ;;  %v20236_v2 = vpop.f32.mrb[56].mxu0  ;;  %20337 = vmatprep.mubr.msk.f32.mxu1 %vm6435_vm2, %v6767_v23  ;;  %v6645_v13 = vld [vmem:[#allocation2 + $0x7] sm:$0xff]  ;;  %v17161_v44 = vld [vmem:[%s28909_s3 + $0x98] sm:$0xff]  ;;  %v6646_v15 = vld [vmem:[#allocation2 + $0xf] sm:$0xff] }
 0x4d4   :  { %v6426_v45 = vmax.f32 %v6362_v47, 0.0  ;;  %v22042_v30 = vadd.f32 %v20236_v2, %v29230_v20  ;;  %v6197_v58 = vpop.f32.mrb[57].mxu0  ;;  %20338 = vmatmul.mubr.msk.f32.gmra.mrb[108].mxu1 %vm6435_vm2, %v6768_v52  ;;  %v21690_v50 = vpack.c.bf16 %v17161_v44, %v17160_v34  ;;  %v17162_v47 = vld [vmem:[%s28909_s3 + $0xa0] sm:$0xff]  ;;  %v17163_v23 = vld [vmem:[%s28909_s3 + $0xa8] sm:$0xff]  ;;  %v17165_v20 = vld [vmem:[%s28909_s3 + $0xb8] sm:$0xff] }
 0x4d5   :  { %v6425_v25 = vmax.f32 %v6361_v48, 0.0  ;;  %v22043_v3 = vadd.f32 %v6197_v58, %v29231_v8  ;;  %v6770_v27 = vld [vmem:[#allocation2 + $0x390] sm:$0xff]  ;;  %v26623_v48 = vld [vmem:[#allocation2 + $0x27] sm:$0xff]  ;;  %v21694_v2 = vpack.c.bf16 %v17163_v23, %v17162_v47 }
 0x4d6   :  { %6636 = vst.msk [vmem:[#allocation2 + $0x3d0] sm:$0xff] %vm6435_vm2, %v6426_v45  ;;  %v6364_v35 = vadd.f32 %v22042_v30, %v26350_v24  ;;  %v6769_v46 = vld [vmem:[#allocation2 + $0x388] sm:$0xff]  ;;  %v17164_v45 = vld [vmem:[%s28909_s3 + $0xb0] sm:$0xff] }
 0x4d7   :  { %6635 = vst.msk [vmem:[#allocation2 + $0x3c8] sm:$0xff] %vm6435_vm2, %v6425_v25  ;;  %v6363_v59 = vadd.f32 %v22043_v3, %v26350_v24  ;;  %v20239_v60 = vpop.f32.mrb[58].mxu0  ;;  %20340 = vmatprep.mubr.msk.f32.mxu1 %vm6435_vm2, %v6769_v46  ;;  %v26628_v52 = vld [vmem:[#allocation2 + $0x2f] sm:$0xff]  ;;  %v26638_v30 = vld [vmem:[#allocation2 + $0x47] sm:$0xff] }
 0x4d8   :  { %v6428_v22 = vmax.f32 %v6364_v35, 0.0  ;;  %v22044_v28 = vadd.f32 %v20239_v60, %v29232_v19  ;;  %v6207_v56 = vpop.f32.mrb[59].mxu0  ;;  %20341 = vmatmul.mubr.msk.f32.gmra.mrb[110].mxu1 %vm6435_vm2, %v6770_v27  ;;  %v26642_v58 = vld [vmem:[#allocation2 + $0x4f] sm:$0xff]  ;;  %v17230_v25 = vld [vmem:[%s28909_s3 + $0xc0] sm:$0xff] }
 0x4d9   :  { %v6427_v5 = vmax.f32 %v6363_v59, 0.0  ;;  %v22045_v18 = vadd.f32 %v6207_v56, %v29233_v16  ;;  %v6772_v62 = vld [vmem:[#allocation2 + $0x3b0] sm:$0xff]  ;;  %v17231_v8 = vld [vmem:[%s28909_s3 + $0xc8] sm:$0xff] }
 0x4da   :  { %6638 = vst.msk [vmem:[#allocation2 + $0x3f0] sm:$0xff] %vm6435_vm2, %v6428_v22  ;;  %v6366_v61 = vadd.f32 %v22044_v28, %v26350_v24  ;;  %v6771_v4 = vld [vmem:[#allocation2 + $0x3a8] sm:$0xff]  ;;  %v26656_v35 = vpack.c.bf16 %v17231_v8, %v17230_v25 }
 0x4db   :  { %6637 = vst.msk [vmem:[#allocation2 + $0x3e8] sm:$0xff] %vm6435_vm2, %v6427_v5  ;;  %v6365_v29 = vadd.f32 %v22045_v18, %v26350_v24  ;;  %v20242_v38 = vpop.f32.mrb[60].mxu0  ;;  %20343 = vmatprep.mubr.msk.f32.mxu1 %vm6435_vm2, %v6771_v4  ;;  %v26652_v3 = vld [vmem:[#allocation2 + $0x67] sm:$0xff]  ;;  %v26658_v46 = vld [vmem:[#allocation2 + $0x6f] sm:$0xff] }
 0x4dc   :  { %v6430_v32 = vmax.f32 %v6366_v61, 0.0  ;;  %v22046_v57 = vadd.f32 %v20242_v38, %v29234_v21  ;;  %v6217_v11 = vpop.f32.mrb[61].mxu0  ;;  %20344 = vmatmul.mubr.msk.f32.gmra.mrb[112].mxu1 %vm6435_vm2, %v6772_v62  ;;  %v26662_v59 = vld [vmem:[#allocation2 + $0x87] sm:$0xff]  ;;  %v26667_v60 = vld [vmem:[#allocation2 + $0x8f] sm:$0xff] }
 0x4dd   :  { %v6429_v63 = vmax.f32 %v6365_v29, 0.0  ;;  %v22047_v12 = vadd.f32 %v6217_v11, %v29235_v31  ;;  %v6774_v41 = vld [vmem:[#allocation2 + $0x3d0] sm:$0xff]  ;;  %v26671_v27 = vld [vmem:[#allocation2 + $0xa7] sm:$0xff] }
 0x4de   :  { %6640 = vst.msk [vmem:[#allocation2 + $0x410] sm:$0xff] %vm6435_vm2, %v6430_v32  ;;  %v6368_v33 = vadd.f32 %v22046_v57, %v26350_v24  ;;  %v6773_v7 = vld [vmem:[#allocation2 + $0x3c8] sm:$0xff] }
 0x4df   :  { %6639 = vst.msk [vmem:[#allocation2 + $0x408] sm:$0xff] %vm6435_vm2, %v6429_v63  ;;  %v6367_v10 = vadd.f32 %v22047_v12, %v26350_v24  ;;  %v20245_v36 = vpop.f32.mrb[62].mxu0  ;;  %20346 = vmatprep.mubr.msk.f32.mxu1 %vm6435_vm2, %v6773_v7  ;;  %v26675_v22 = vld [vmem:[#allocation2 + $0xaf] sm:$0xff]  ;;  %v26679_v19 = vld [vmem:[#allocation2 + $0xc7] sm:$0xff] }
 0x4e0   :  { %v6432_v43 = vmax.f32 %v6368_v33, 0.0  ;;  %v22048_v51 = vadd.f32 %v20245_v36, %v29236_v42  ;;  %v6227_v9 = vpop.f32.mrb[63].mxu0  ;;  %20347 = vmatmul.mubr.msk.f32.gmra.mrb[114].mxu1 %vm6435_vm2, %v6774_v41  ;;  %v26683_v28 = vld [vmem:[#allocation2 + $0xcf] sm:$0xff]  ;;  %v26687_v56 = vld [vmem:[#allocation2 + $0xe7] sm:$0xff] }
 0x4e1   :  { %v6431_v54 = vmax.f32 %v6367_v10, 0.0  ;;  %v22049_v6 = vadd.f32 %v6227_v9, %v29237_v37  ;;  %v6776_v49 = vld [vmem:[#allocation2 + $0x3f0] sm:$0xff]  ;;  %v26695_v16 = vld [vmem:[#allocation2 + $0x107] sm:$0xff] }
 0x4e2   :  { %6642 = vst.msk [vmem:[#allocation2 + $0x430] sm:$0xff] %vm6435_vm2, %v6432_v43  ;;  %v6370_v0 = vadd.f32 %v22048_v51, %v26350_v24  ;;  %v6775_v39 = vld [vmem:[#allocation2 + $0x3e8] sm:$0xff] }
 0x4e3   :  { %6641 = vst.msk [vmem:[#allocation2 + $0x428] sm:$0xff] %vm6435_vm2, %v6431_v54  ;;  %v6369_v53 = vadd.f32 %v22049_v6, %v26350_v24  ;;  %20349 = vmatprep.mubr.msk.f32.mxu1 %vm6435_vm2, %v6775_v39  ;;  %v26691_v5 = vld [vmem:[#allocation2 + $0xef] sm:$0xff]  ;;  %v26703_v61 = vld [vmem:[#allocation2 + $0x127] sm:$0xff] }
 0x4e4   :  { %v6434_v17 = vmax.f32 %v6370_v0, 0.0  ;;  %20350 = vmatmul.mubr.msk.f32.gmra.mrb[116].mxu1 %vm6435_vm2, %v6776_v49  ;;  %v26699_v18 = vld [vmem:[#allocation2 + $0x10f] sm:$0xff]  ;;  %v26711_v29 = vld [vmem:[#allocation2 + $0x147] sm:$0xff] }
 0x4e5   :  { %v6433_v1 = vmax.f32 %v6369_v53, 0.0  ;;  %v6778_v14 = vld [vmem:[#allocation2 + $0x410] sm:$0xff]  ;;  %v26719_v62 = vld [vmem:[#allocation2 + $0x167] sm:$0xff] }
 0x4e6   :  { %6644 = vst.msk [vmem:[#allocation2 + $0x450] sm:$0xff] %vm6435_vm2, %v6434_v17  ;;  %v6777_v55 = vld [vmem:[#allocation2 + $0x408] sm:$0xff] }
 0x4e7   :  { %6643 = vst.msk [vmem:[#allocation2 + $0x448] sm:$0xff] %vm6435_vm2, %v6433_v1  ;;  %20352 = vmatprep.mubr.msk.f32.mxu1 %vm6435_vm2, %v6777_v55  ;;  %v26707_v4 = vld [vmem:[#allocation2 + $0x12f] sm:$0xff]  ;;  %v26727_v21 = vld [vmem:[#allocation2 + $0x187] sm:$0xff] }
 0x4e8   :  { %20353 = vmatmul.mubr.msk.f32.gmra.mrb[118].mxu1 %vm6435_vm2, %v6778_v14  ;;  %v26715_v38 = vld [vmem:[#allocation2 + $0x14f] sm:$0xff]  ;;  %v26735_v11 = vld [vmem:[#allocation2 + $0x1a7] sm:$0xff] }
 0x4e9   :  { %v6780_v24 = vld [vmem:[#allocation2 + $0x430] sm:$0xff]  ;;  %v26743_v31 = vld [vmem:[#allocation2 + $0x1c7] sm:$0xff] }
 0x4ea   :  { %v6779_v40 = vld [vmem:[#allocation2 + $0x428] sm:$0xff] }
 0x4eb   :  { %20355 = vmatprep.mubr.msk.f32.mxu1 %vm6435_vm2, %v6779_v40  ;;  %v26723_v32 = vld [vmem:[#allocation2 + $0x16f] sm:$0xff]  ;;  %v26751_v33 = vld [vmem:[#allocation2 + $0x1e7] sm:$0xff] }
 0x4ec   :  { %20356 = vmatmul.mubr.msk.f32.gmra.mrb[120].mxu1 %vm6435_vm2, %v6780_v24  ;;  %v26731_v57 = vld [vmem:[#allocation2 + $0x18f] sm:$0xff]  ;;  %v6677_v7 = vld [vmem:[#allocation2 + $0x247] sm:$0xff] }
 0x4ed   :  { %20374 = vmatprep.mubr.msk.f32.mxu1 %vm6435_vm2, %v6645_v13  ;;  %v26739_v63 = vld [vmem:[#allocation2 + $0x1af] sm:$0xff]  ;;  %v26761_v41 = vld [vmem:[#allocation2 + $0x267] sm:$0xff] }
 0x4ee   :  { %v26747_v12 = vld [vmem:[#allocation2 + $0x1cf] sm:$0xff]  ;;  %v26769_v42 = vld [vmem:[#allocation2 + $0x287] sm:$0xff] }
 0x4ef   :  { %v26755_v10 = vld [vmem:[#allocation2 + $0x1ef] sm:$0xff]  ;;  %v26777_v9 = vld [vmem:[#allocation2 + $0x2a7] sm:$0xff] }
 0x4f0   :  { %20375 = vmatmul.mubr.msk.f32.vlgmr.msra.gmra.mrb[58].mxu1 %vm6435_vm2, %v6646_v15  ;;  %v6678_v36 = vld [vmem:[#allocation2 + $0x24f] sm:$0xff]  ;;  %v26785_v37 = vld [vmem:[#allocation2 + $0x2c7] sm:$0xff] }
 0x4f1   :  { %20377 = vmatprep.mubr.msk.f32.mxu1 %vm6435_vm2, %v26623_v48  ;;  %21689 = vmatpush3.bf16.msra.mxu1 %v26373_v26  ;;  %v21698_v26 = vpack.c.bf16 %v17165_v20, %v17164_v45  ;;  %v26765_v43 = vld [vmem:[#allocation2 + $0x26f] sm:$0xff]  ;;  %v26793_v0 = vld [vmem:[#allocation2 + $0x2e7] sm:$0xff] }
 0x4f2   :  { %21691 = vmatprep.subr.bf16.mxu1 %v21690_v50  ;;  %v26773_v51 = vld [vmem:[#allocation2 + $0x28f] sm:$0xff]  ;;  %v26801_v53 = vld [vmem:[#allocation2 + $0x307] sm:$0xff] }
 0x4f3   :  { %v26781_v54 = vld [vmem:[#allocation2 + $0x2af] sm:$0xff]  ;;  %v26809_v17 = vld [vmem:[#allocation2 + $0x327] sm:$0xff] }
 0x4f4   :  { %20378 = vmatmul.mubr.msk.f32.gmra.mrb[60].mxu1 %vm6435_vm2, %v26628_v52  ;;  %v26789_v6 = vld [vmem:[#allocation2 + $0x2cf] sm:$0xff]  ;;  %v26817_v55 = vld [vmem:[#allocation2 + $0x347] sm:$0xff] }
 0x4f5   :  { %20380 = vmatprep.mubr.msk.f32.mxu1 %vm6435_vm2, %v26638_v30  ;;  %21693 = vmatpush3.bf16.msra.mxu1 %v21690_v50  ;;  %v26797_v39 = vld [vmem:[#allocation2 + $0x2ef] sm:$0xff]  ;;  %v26825_v40 = vld [vmem:[#allocation2 + $0x367] sm:$0xff] }
 0x4f6   :  { %21695 = vmatprep.subr.bf16.mxu1 %v21694_v2  ;;  %v26805_v49 = vld [vmem:[#allocation2 + $0x30f] sm:$0xff]  ;;  %v26833_v24 = vld [vmem:[#allocation2 + $0x387] sm:$0xff] }
 0x4f7   :  { %v26813_v1 = vld [vmem:[#allocation2 + $0x32f] sm:$0xff]  ;;  %v26841_v44 = vld [vmem:[#allocation2 + $0x3a7] sm:$0xff] }
 0x4f8   :  { %20381 = vmatmul.mubr.msk.f32.gmra.mrb[62].mxu1 %vm6435_vm2, %v26642_v58  ;;  %v26821_v14 = vld [vmem:[#allocation2 + $0x34f] sm:$0xff]  ;;  %v26849_v50 = vld [vmem:[#allocation2 + $0x3c7] sm:$0xff] }
 0x4f9   :  { %20383 = vmatprep.mubr.msk.f32.mxu1 %vm6435_vm2, %v26652_v3  ;;  %21697 = vmatpush3.bf16.msra.mxu1 %v21694_v2  ;;  %v26829_v13 = vld [vmem:[#allocation2 + $0x36f] sm:$0xff]  ;;  %v26857_v23 = vld [vmem:[#allocation2 + $0x3e7] sm:$0xff] }
 0x4fa   :  { %21699 = vmatprep.subr.bf16.mxu1 %v21698_v26  ;;  %v26837_v34 = vld [vmem:[#allocation2 + $0x38f] sm:$0xff]  ;;  %29238 = vst [vmem:[#allocation20_spill] sm:$0xff] %v26857_v23  ;;  %v26865_v45 = vld [vmem:[#allocation2 + $0x407] sm:$0xff] }
 0x4fb   :  { %v26845_v15 = vld [vmem:[#allocation2 + $0x3af] sm:$0xff]  ;;  %29240 = vst [vmem:[#allocation22_spill] sm:$0xff] %v26865_v45 }
 0x4fc   :  { %20384 = vmatmul.mubr.msk.f32.gmra.mrb[64].mxu1 %vm6435_vm2, %v26658_v46  ;;  %v26853_v47 = vld [vmem:[#allocation2 + $0x3cf] sm:$0xff] }
 0x4fd   :  { %20386 = vmatprep.mubr.msk.f32.mxu1 %vm6435_vm2, %v26662_v59  ;;  %21701 = vmatpush3.bf16.msra.mxu1 %v21698_v26  ;;  %v26861_v2 = vld [vmem:[#allocation2 + $0x3ef] sm:$0xff]  ;;  %v26873_v26 = vld [vmem:[#allocation2 + $0x427] sm:$0xff] }
 0x4fe   :  { %21703 = vmatprep.subr.bf16.mxu1 %v26656_v35  ;;  %29239 = vst [vmem:[#allocation21_spill] sm:$0xff] %v26861_v2  ;;  %v26869_v20 = vld [vmem:[#allocation2 + $0x40f] sm:$0xff]  ;;  %29242 = vst [vmem:[#allocation24_spill] sm:$0xff] %v26873_v26 }
 0x4ff   :  { %29241 = vst [vmem:[#allocation23_spill] sm:$0xff] %v26869_v20  ;;  %v7944_v25 = vld [vmem:[#allocation2 + $0x9] sm:$0xff] }
 0x500   :  { %20387 = vmatmul.mubr.msk.f32.gmra.mrb[66].mxu1 %vm6435_vm2, %v26667_v60  ;;  %v26877_v8 = vld [vmem:[#allocation2 + $0x42f] sm:$0xff] }
 0x501   :  { %20389 = vmatprep.mubr.msk.f32.mxu1 %vm6435_vm2, %v26671_v27  ;;  %29243 = vst [vmem:[#allocation25_spill] sm:$0xff] %v26877_v8 }
 0x504   :  { %20390 = vmatmul.mubr.msk.f32.gmra.mrb[68].mxu1 %vm6435_vm2, %v26675_v22 }
 0x505   :  { %20392 = vmatprep.mubr.msk.f32.mxu1 %vm6435_vm2, %v26679_v19 }
 0x508   :  { %20393 = vmatmul.mubr.msk.f32.gmra.mrb[70].mxu1 %vm6435_vm2, %v26683_v28 }
 0x509   :  { %20395 = vmatprep.mubr.msk.f32.mxu1 %vm6435_vm2, %v26687_v56 }
 0x50c   :  { %20396 = vmatmul.mubr.msk.f32.gmra.mrb[72].mxu1 %vm6435_vm2, %v26691_v5 }
 0x50d   :  { %20398 = vmatprep.mubr.msk.f32.mxu1 %vm6435_vm2, %v26695_v16 }
 0x510   :  { %20399 = vmatmul.mubr.msk.f32.gmra.mrb[74].mxu1 %vm6435_vm2, %v26699_v18 }
 0x511   :  { %20401 = vmatprep.mubr.msk.f32.mxu1 %vm6435_vm2, %v26703_v61 }
 0x514   :  { %20402 = vmatmul.mubr.msk.f32.gmra.mrb[76].mxu1 %vm6435_vm2, %v26707_v4 }
 0x515   :  { %20404 = vmatprep.mubr.msk.f32.mxu1 %vm6435_vm2, %v26711_v29 }
 0x518   :  { %20405 = vmatmul.mubr.msk.f32.gmra.mrb[78].mxu1 %vm6435_vm2, %v26715_v38 }
 0x519   :  { %20407 = vmatprep.mubr.msk.f32.mxu1 %vm6435_vm2, %v26719_v62 }
 0x51c   :  { %20408 = vmatmul.mubr.msk.f32.gmra.mrb[80].mxu1 %vm6435_vm2, %v26723_v32 }
 0x51d   :  { %20410 = vmatprep.mubr.msk.f32.mxu1 %vm6435_vm2, %v26727_v21 }
 0x520   :  { %20411 = vmatmul.mubr.msk.f32.gmra.mrb[82].mxu1 %vm6435_vm2, %v26731_v57 }
 0x521   :  { %20413 = vmatprep.mubr.msk.f32.mxu1 %vm6435_vm2, %v26735_v11 }
 0x524   :  { %20414 = vmatmul.mubr.msk.f32.gmra.mrb[84].mxu1 %vm6435_vm2, %v26739_v63 }
 0x525   :  { %20416 = vmatprep.mubr.msk.f32.mxu1 %vm6435_vm2, %v26743_v31 }
 0x528   :  { %20417 = vmatmul.mubr.msk.f32.gmra.mrb[86].mxu1 %vm6435_vm2, %v26747_v12 }
 0x529   :  { %20419 = vmatprep.mubr.msk.f32.mxu1 %vm6435_vm2, %v26751_v33 }
 0x52c   :  { %20420 = vmatmul.mubr.msk.f32.gmra.mrb[88].mxu1 %vm6435_vm2, %v26755_v10 }
 0x52d   :  { %20422 = vmatprep.mubr.msk.f32.mxu1 %vm6435_vm2, %v6677_v7  ;;  %v17232_v7 = vld [vmem:[%s28909_s3 + $0xd0] sm:$0xff] }
 0x530   :  { %20423 = vmatmul.mubr.msk.f32.gmra.mrb[90].mxu1 %vm6435_vm2, %v6678_v36  ;;  %v17233_v36 = vld [vmem:[%s28909_s3 + $0xd8] sm:$0xff] }
 0x531   :  { %20425 = vmatprep.mubr.msk.f32.mxu1 %vm6435_vm2, %v26761_v41 }
 0x534   :  { %20426 = vmatmul.mubr.msk.f32.gmra.mrb[92].mxu1 %vm6435_vm2, %v26765_v43 }
 0x535   :  { %20428 = vmatprep.mubr.msk.f32.mxu1 %vm6435_vm2, %v26769_v42 }
 0x538   :  { %20429 = vmatmul.mubr.msk.f32.gmra.mrb[94].mxu1 %vm6435_vm2, %v26773_v51 }
 0x539   :  { %20431 = vmatprep.mubr.msk.f32.mxu1 %vm6435_vm2, %v26777_v9 }
 0x53c   :  { %20432 = vmatmul.mubr.msk.f32.gmra.mrb[96].mxu1 %vm6435_vm2, %v26781_v54 }
 0x53d   :  { %20434 = vmatprep.mubr.msk.f32.mxu1 %vm6435_vm2, %v26785_v37 }
 0x540   :  { %20435 = vmatmul.mubr.msk.f32.gmra.mrb[98].mxu1 %vm6435_vm2, %v26789_v6 }
 0x541   :  { %20437 = vmatprep.mubr.msk.f32.mxu1 %vm6435_vm2, %v26793_v0 }
 0x544   :  { %20438 = vmatmul.mubr.msk.f32.gmra.mrb[100].mxu1 %vm6435_vm2, %v26797_v39 }
 0x545   :  { %20440 = vmatprep.mubr.msk.f32.mxu1 %vm6435_vm2, %v26801_v53 }
 0x548   :  { %20441 = vmatmul.mubr.msk.f32.gmra.mrb[102].mxu1 %vm6435_vm2, %v26805_v49 }
 0x549   :  { %20443 = vmatprep.mubr.msk.f32.mxu1 %vm6435_vm2, %v26809_v17 }
 0x54c   :  { %20444 = vmatmul.mubr.msk.f32.gmra.mrb[104].mxu1 %vm6435_vm2, %v26813_v1 }
 0x54d   :  { %20446 = vmatprep.mubr.msk.f32.mxu1 %vm6435_vm2, %v26817_v55 }
 0x550   :  { %20447 = vmatmul.mubr.msk.f32.gmra.mrb[106].mxu1 %vm6435_vm2, %v26821_v14 }
 0x551   :  { %20449 = vmatprep.mubr.msk.f32.mxu1 %vm6435_vm2, %v26825_v40 }
 0x554   :  { %20450 = vmatmul.mubr.msk.f32.gmra.mrb[108].mxu1 %vm6435_vm2, %v26829_v13 }
 0x555   :  { %20452 = vmatprep.mubr.msk.f32.mxu1 %vm6435_vm2, %v26833_v24 }
 0x558   :  { %20453 = vmatmul.mubr.msk.f32.gmra.mrb[110].mxu1 %vm6435_vm2, %v26837_v34 }
 0x559   :  { %20455 = vmatprep.mubr.msk.f32.mxu1 %vm6435_vm2, %v26841_v44 }
 0x55c   :  { %20456 = vmatmul.mubr.msk.f32.gmra.mrb[112].mxu1 %vm6435_vm2, %v26845_v15 }
 0x55d   :  { %20458 = vmatprep.mubr.msk.f32.mxu1 %vm6435_vm2, %v26849_v50 }
 0x560   :  { %20459 = vmatmul.mubr.msk.f32.gmra.mrb[114].mxu1 %vm6435_vm2, %v26853_v47 }
 0x561   :  { %20461 = vmatprep.mubr.msk.f32.mxu1 %vm6435_vm2, %v26857_v23  ;;  %v26895_v23 = vld [vmem:[#allocation2 + $0x29] sm:$0xff] }
 0x562   :  { %29244 = vst [vmem:[#allocation26_spill] sm:$0xff] %v26895_v23 }
 0x564   :  { %20462 = vmatmul.mubr.msk.f32.gmra.mrb[116].mxu1 %vm6435_vm2, %v26861_v2  ;;  %v17235_v2 = vld [vmem:[%s28909_s3 + $0xe8] sm:$0xff] }
 0x565   :  { %20464 = vmatprep.mubr.msk.f32.mxu1 %vm6435_vm2, %v26865_v45  ;;  %v21706_v45 = vpack.c.bf16 %v17233_v36, %v17232_v7  ;;  %v26900_v7 = vld [vmem:[#allocation2 + $0x31] sm:$0xff] }
 0x566   :  { %29245 = vst [vmem:[#allocation27_spill] sm:$0xff] %v26900_v7  ;;  %v17236_v36 = vld [vmem:[%s28909_s3 + $0xf0] sm:$0xff] }
 0x568   :  { %20465 = vmatmul.mubr.msk.f32.gmra.mrb[118].mxu1 %vm6435_vm2, %v26869_v20  ;;  %v7945_v20 = vld [vmem:[#allocation2 + $0x11] sm:$0xff] }
 0x569   :  { %20467 = vmatprep.mubr.msk.f32.mxu1 %vm6435_vm2, %v26873_v26  ;;  %v17234_v26 = vld [vmem:[%s28909_s3 + $0xe0] sm:$0xff] }
 0x56c   :  { %20468 = vmatmul.mubr.msk.f32.gmra.mrb[120].mxu1 %vm6435_vm2, %v26877_v8  ;;  %v17237_v8 = vld [vmem:[%s28909_s3 + $0xf8] sm:$0xff] }
 0x56d   :  { %20486 = vmatprep.mubr.msk.f32.mxu1 %vm6435_vm2, %v7944_v25  ;;  %v21710_v25 = vpack.c.bf16 %v17235_v2, %v17234_v26  ;;  %v26914_v2 = vld [vmem:[#allocation2 + $0x51] sm:$0xff]  ;;  %v17302_v26 = vld [vmem:[%s28909_s3 + $0x100] sm:$0xff] }
 0x56e   :  { %29246 = vst [vmem:[#allocation28_spill] sm:$0xff] %v26914_v2 }
 0x570   :  { %20487 = vmatmul.mubr.msk.f32.vlgmr.msra.gmra.mrb[58].mxu1 %vm6435_vm2, %v7945_v20  ;;  %v26910_v20 = vld [vmem:[#allocation2 + $0x49] sm:$0xff] }
 0x571   :  { %20489 = vmatprep.mubr.msk.f32.mxu1 %vm6435_vm2, %v26895_v23  ;;  %21705 = vmatpush3.bf16.msra.mxu1 %v26656_v35  ;;  %v21714_v35 = vpack.c.bf16 %v17237_v8, %v17236_v36  ;;  %v17303_v23 = vld [vmem:[%s28909_s3 + $0x108] sm:$0xff]  ;;  %v26930_v8 = vld [vmem:[#allocation2 + $0x71] sm:$0xff] }
 0x572   :  { %21707 = vmatprep.subr.bf16.mxu1 %v21706_v45  ;;  %v26934_v36 = vld [vmem:[#allocation2 + $0x89] sm:$0xff] }
 0x573   :  { %29247 = vst [vmem:[#allocation29_spill] sm:$0xff] %v26934_v36 }
 0x574   :  { %20490 = vmatmul.mubr.msk.f32.gmra.mrb[60].mxu1 %vm6435_vm2, %v26900_v7  ;;  %v26924_v7 = vld [vmem:[#allocation2 + $0x69] sm:$0xff] }
 0x575   :  { %20492 = vmatprep.mubr.msk.f32.mxu1 %vm6435_vm2, %v26910_v20  ;;  %21709 = vmatpush3.bf16.msra.mxu1 %v21706_v45  ;;  %v26928_v45 = vpack.c.bf16 %v17303_v23, %v17302_v26  ;;  %v26943_v23 = vld [vmem:[#allocation2 + $0xa9] sm:$0xff] }
 0x576   :  { %21711 = vmatprep.subr.bf16.mxu1 %v21710_v25  ;;  %29249 = vst [vmem:[#allocation31_spill] sm:$0xff] %v26943_v23  ;;  %v26951_v26 = vld [vmem:[#allocation2 + $0xc9] sm:$0xff] }
 0x577   :  { %29251 = vst [vmem:[#allocation33_spill] sm:$0xff] %v26951_v26 }
 0x578   :  { %20493 = vmatmul.mubr.msk.f32.gmra.mrb[62].mxu1 %vm6435_vm2, %v26914_v2  ;;  %v26939_v2 = vld [vmem:[#allocation2 + $0x91] sm:$0xff] }
 0x579   :  { %20495 = vmatprep.mubr.msk.f32.mxu1 %vm6435_vm2, %v26924_v7  ;;  %21713 = vmatpush3.bf16.msra.mxu1 %v21710_v25  ;;  %29248 = vst [vmem:[#allocation30_spill] sm:$0xff] %v26939_v2  ;;  %v26947_v25 = vld [vmem:[#allocation2 + $0xb1] sm:$0xff] }
 0x57a   :  { %21715 = vmatprep.subr.bf16.mxu1 %v21714_v35  ;;  %29250 = vst [vmem:[#allocation32_spill] sm:$0xff] %v26947_v25 }
 0x57c   :  { %20496 = vmatmul.mubr.msk.f32.gmra.mrb[64].mxu1 %vm6435_vm2, %v26930_v8 }
 0x57d   :  { %20498 = vmatprep.mubr.msk.f32.mxu1 %vm6435_vm2, %v26934_v36  ;;  %21717 = vmatpush3.bf16.msra.mxu1 %v21714_v35  ;;  %v26955_v35 = vld [vmem:[#allocation2 + $0xd1] sm:$0xff] }
 0x57e   :  { %21719 = vmatprep.subr.bf16.mxu1 %v26928_v45  ;;  %29252 = vst [vmem:[#allocation34_spill] sm:$0xff] %v26955_v35  ;;  %v27027_v36 = vld [vmem:[#allocation2 + $0x1f1] sm:$0xff] }
 0x57f   :  { %29270 = vst [vmem:[#allocation52_spill] sm:$0xff] %v27027_v36 }
 0x580   :  { %20499 = vmatmul.mubr.msk.f32.gmra.mrb[66].mxu1 %vm6435_vm2, %v26939_v2  ;;  %v26959_v2 = vld [vmem:[#allocation2 + $0xe9] sm:$0xff] }
 0x581   :  { %20501 = vmatprep.mubr.msk.f32.mxu1 %vm6435_vm2, %v26943_v23  ;;  %29253 = vst [vmem:[#allocation35_spill] sm:$0xff] %v26959_v2  ;;  %v26963_v23 = vld [vmem:[#allocation2 + $0xf1] sm:$0xff] }
 0x582   :  { %29254 = vst [vmem:[#allocation36_spill] sm:$0xff] %v26963_v23 }
 0x584   :  { %20502 = vmatmul.mubr.msk.f32.gmra.mrb[68].mxu1 %vm6435_vm2, %v26947_v25  ;;  %v26967_v25 = vld [vmem:[#allocation2 + $0x109] sm:$0xff] }
 0x585   :  { %20504 = vmatprep.mubr.msk.f32.mxu1 %vm6435_vm2, %v26951_v26  ;;  %29255 = vst [vmem:[#allocation37_spill] sm:$0xff] %v26967_v25  ;;  %v26971_v26 = vld [vmem:[#allocation2 + $0x111] sm:$0xff] }
 0x586   :  { %29256 = vst [vmem:[#allocation38_spill] sm:$0xff] %v26971_v26 }
 0x588   :  { %20505 = vmatmul.mubr.msk.f32.gmra.mrb[70].mxu1 %vm6435_vm2, %v26955_v35  ;;  %v26975_v35 = vld [vmem:[#allocation2 + $0x129] sm:$0xff] }
 0x589   :  { %20507 = vmatprep.mubr.msk.f32.mxu1 %vm6435_vm2, %v26959_v2  ;;  %29257 = vst [vmem:[#allocation39_spill] sm:$0xff] %v26975_v35  ;;  %v26979_v2 = vld [vmem:[#allocation2 + $0x131] sm:$0xff] }
 0x58a   :  { %29258 = vst [vmem:[#allocation40_spill] sm:$0xff] %v26979_v2 }
 0x58c   :  { %20508 = vmatmul.mubr.msk.f32.gmra.mrb[72].mxu1 %vm6435_vm2, %v26963_v23  ;;  %v26983_v23 = vld [vmem:[#allocation2 + $0x149] sm:$0xff] }
 0x58d   :  { %20510 = vmatprep.mubr.msk.f32.mxu1 %vm6435_vm2, %v26967_v25  ;;  %29259 = vst [vmem:[#allocation41_spill] sm:$0xff] %v26983_v23  ;;  %v26987_v25 = vld [vmem:[#allocation2 + $0x151] sm:$0xff] }
 0x58e   :  { %29260 = vst [vmem:[#allocation42_spill] sm:$0xff] %v26987_v25 }
 0x590   :  { %20511 = vmatmul.mubr.msk.f32.gmra.mrb[74].mxu1 %vm6435_vm2, %v26971_v26  ;;  %v26991_v26 = vld [vmem:[#allocation2 + $0x169] sm:$0xff] }
 0x591   :  { %20513 = vmatprep.mubr.msk.f32.mxu1 %vm6435_vm2, %v26975_v35  ;;  %29261 = vst [vmem:[#allocation43_spill] sm:$0xff] %v26991_v26  ;;  %v26995_v35 = vld [vmem:[#allocation2 + $0x171] sm:$0xff] }
 0x592   :  { %29262 = vst [vmem:[#allocation44_spill] sm:$0xff] %v26995_v35 }
 0x594   :  { %20514 = vmatmul.mubr.msk.f32.gmra.mrb[76].mxu1 %vm6435_vm2, %v26979_v2  ;;  %v26999_v2 = vld [vmem:[#allocation2 + $0x189] sm:$0xff] }
 0x595   :  { %20516 = vmatprep.mubr.msk.f32.mxu1 %vm6435_vm2, %v26983_v23  ;;  %29263 = vst [vmem:[#allocation45_spill] sm:$0xff] %v26999_v2  ;;  %v27003_v23 = vld [vmem:[#allocation2 + $0x191] sm:$0xff] }
 0x596   :  { %29264 = vst [vmem:[#allocation46_spill] sm:$0xff] %v27003_v23 }
 0x598   :  { %20517 = vmatmul.mubr.msk.f32.gmra.mrb[78].mxu1 %vm6435_vm2, %v26987_v25  ;;  %v27007_v25 = vld [vmem:[#allocation2 + $0x1a9] sm:$0xff] }
 0x599   :  { %20519 = vmatprep.mubr.msk.f32.mxu1 %vm6435_vm2, %v26991_v26  ;;  %29265 = vst [vmem:[#allocation47_spill] sm:$0xff] %v27007_v25  ;;  %v27011_v26 = vld [vmem:[#allocation2 + $0x1b1] sm:$0xff] }
 0x59a   :  { %29266 = vst [vmem:[#allocation48_spill] sm:$0xff] %v27011_v26 }
 0x59c   :  { %20520 = vmatmul.mubr.msk.f32.gmra.mrb[80].mxu1 %vm6435_vm2, %v26995_v35  ;;  %v27015_v35 = vld [vmem:[#allocation2 + $0x1c9] sm:$0xff] }
 0x59d   :  { %20522 = vmatprep.mubr.msk.f32.mxu1 %vm6435_vm2, %v26999_v2  ;;  %29267 = vst [vmem:[#allocation49_spill] sm:$0xff] %v27015_v35  ;;  %v27019_v2 = vld [vmem:[#allocation2 + $0x1d1] sm:$0xff] }
 0x59e   :  { %29268 = vst [vmem:[#allocation50_spill] sm:$0xff] %v27019_v2 }
 0x5a0   :  { %20523 = vmatmul.mubr.msk.f32.gmra.mrb[82].mxu1 %vm6435_vm2, %v27003_v23  ;;  %v27023_v23 = vld [vmem:[#allocation2 + $0x1e9] sm:$0xff] }
 0x5a1   :  { %20525 = vmatprep.mubr.msk.f32.mxu1 %vm6435_vm2, %v27007_v25  ;;  %29269 = vst [vmem:[#allocation51_spill] sm:$0xff] %v27023_v23  ;;  %v7976_v25 = vld [vmem:[#allocation2 + $0x249] sm:$0xff] }
 0x5a4   :  { %20526 = vmatmul.mubr.msk.f32.gmra.mrb[84].mxu1 %vm6435_vm2, %v27011_v26  ;;  %v7977_v26 = vld [vmem:[#allocation2 + $0x251] sm:$0xff] }
 0x5a5   :  { %20528 = vmatprep.mubr.msk.f32.mxu1 %vm6435_vm2, %v27015_v35  ;;  %v27033_v35 = vld [vmem:[#allocation2 + $0x269] sm:$0xff] }
 0x5a6   :  { %29271 = vst [vmem:[#allocation53_spill] sm:$0xff] %v27033_v35 }
 0x5a8   :  { %20529 = vmatmul.mubr.msk.f32.gmra.mrb[86].mxu1 %vm6435_vm2, %v27019_v2  ;;  %v27037_v2 = vld [vmem:[#allocation2 + $0x271] sm:$0xff] }
 0x5a9   :  { %20531 = vmatprep.mubr.msk.f32.mxu1 %vm6435_vm2, %v27023_v23  ;;  %29272 = vst [vmem:[#allocation54_spill] sm:$0xff] %v27037_v2  ;;  %v27041_v23 = vld [vmem:[#allocation2 + $0x289] sm:$0xff] }
 0x5aa   :  { %29273 = vst [vmem:[#allocation55_spill] sm:$0xff] %v27041_v23 }
 0x5ac   :  { %20532 = vmatmul.mubr.msk.f32.gmra.mrb[88].mxu1 %vm6435_vm2, %v27027_v36  ;;  %v27045_v36 = vld [vmem:[#allocation2 + $0x291] sm:$0xff] }
 0x5ad   :  { %20534 = vmatprep.mubr.msk.f32.mxu1 %vm6435_vm2, %v7976_v25  ;;  %29274 = vst [vmem:[#allocation56_spill] sm:$0xff] %v27045_v36  ;;  %v27049_v25 = vld [vmem:[#allocation2 + $0x2a9] sm:$0xff] }
 0x5ae   :  { %29275 = vst [vmem:[#allocation57_spill] sm:$0xff] %v27049_v25 }
 0x5b0   :  { %20535 = vmatmul.mubr.msk.f32.gmra.mrb[90].mxu1 %vm6435_vm2, %v7977_v26  ;;  %v27053_v26 = vld [vmem:[#allocation2 + $0x2b1] sm:$0xff] }
 0x5b1   :  { %20537 = vmatprep.mubr.msk.f32.mxu1 %vm6435_vm2, %v27033_v35  ;;  %29276 = vst [vmem:[#allocation58_spill] sm:$0xff] %v27053_v26  ;;  %v17307_v35 = vld [vmem:[%s28909_s3 + $0x128] sm:$0xff] }
 0x5b4   :  { %20538 = vmatmul.mubr.msk.f32.gmra.mrb[92].mxu1 %vm6435_vm2, %v27037_v2  ;;  %v27057_v2 = vld [vmem:[#allocation2 + $0x2c9] sm:$0xff] }
 0x5b5   :  { %20540 = vmatprep.mubr.msk.f32.mxu1 %vm6435_vm2, %v27041_v23  ;;  %29277 = vst [vmem:[#allocation59_spill] sm:$0xff] %v27057_v2  ;;  %v27061_v23 = vld [vmem:[#allocation2 + $0x2d1] sm:$0xff] }
 0x5b6   :  { %29278 = vst [vmem:[#allocation60_spill] sm:$0xff] %v27061_v23 }
 0x5b8   :  { %20541 = vmatmul.mubr.msk.f32.gmra.mrb[94].mxu1 %vm6435_vm2, %v27045_v36  ;;  %v27065_v36 = vld [vmem:[#allocation2 + $0x2e9] sm:$0xff] }
 0x5b9   :  { %20543 = vmatprep.mubr.msk.f32.mxu1 %vm6435_vm2, %v27049_v25  ;;  %29279 = vst [vmem:[#allocation61_spill] sm:$0xff] %v27065_v36  ;;  %v27069_v25 = vld [vmem:[#allocation2 + $0x2f1] sm:$0xff] }
 0x5ba   :  { %29280 = vst [vmem:[#allocation62_spill] sm:$0xff] %v27069_v25 }
 0x5bc   :  { %20544 = vmatmul.mubr.msk.f32.gmra.mrb[96].mxu1 %vm6435_vm2, %v27053_v26  ;;  %v27073_v26 = vld [vmem:[#allocation2 + $0x309] sm:$0xff] }
 0x5bd   :  { %20546 = vmatprep.mubr.msk.f32.mxu1 %vm6435_vm2, %v27057_v2  ;;  %29281 = vst [vmem:[#allocation63_spill] sm:$0xff] %v27073_v26  ;;  %v27077_v2 = vld [vmem:[#allocation2 + $0x311] sm:$0xff] }
 0x5be   :  { %29282 = vst [vmem:[#allocation64_spill] sm:$0xff] %v27077_v2 }
 0x5c0   :  { %20547 = vmatmul.mubr.msk.f32.gmra.mrb[98].mxu1 %vm6435_vm2, %v27061_v23  ;;  %v27081_v23 = vld [vmem:[#allocation2 + $0x329] sm:$0xff] }
 0x5c1   :  { %20549 = vmatprep.mubr.msk.f32.mxu1 %vm6435_vm2, %v27065_v36  ;;  %29283 = vst [vmem:[#allocation65_spill] sm:$0xff] %v27081_v23  ;;  %v27085_v36 = vld [vmem:[#allocation2 + $0x331] sm:$0xff] }
 0x5c2   :  { %29284 = vst [vmem:[#allocation8_spill] sm:$0xff] %v27085_v36 }
 0x5c4   :  { %20550 = vmatmul.mubr.msk.f32.gmra.mrb[100].mxu1 %vm6435_vm2, %v27069_v25  ;;  %v27089_v25 = vld [vmem:[#allocation2 + $0x349] sm:$0xff] }
 0x5c5   :  { %20552 = vmatprep.mubr.msk.f32.mxu1 %vm6435_vm2, %v27073_v26  ;;  %29285 = vst [vmem:[#allocation4_spill] sm:$0xff] %v27089_v25  ;;  %v27093_v26 = vld [vmem:[#allocation2 + $0x351] sm:$0xff] }
 0x5c6   :  { %29286 = vst [vmem:[#allocation5_spill] sm:$0xff] %v27093_v26 }
 0x5c8   :  { %20553 = vmatmul.mubr.msk.f32.gmra.mrb[102].mxu1 %vm6435_vm2, %v27077_v2  ;;  %v27097_v2 = vld [vmem:[#allocation2 + $0x369] sm:$0xff] }
 0x5c9   :  { %20555 = vmatprep.mubr.msk.f32.mxu1 %vm6435_vm2, %v27081_v23  ;;  %29287 = vst [vmem:[#allocation6_spill] sm:$0xff] %v27097_v2  ;;  %v27101_v23 = vld [vmem:[#allocation2 + $0x371] sm:$0xff] }
 0x5ca   :  { %29288 = vst [vmem:[#allocation7_spill] sm:$0xff] %v27101_v23 }
 0x5cc   :  { %20556 = vmatmul.mubr.msk.f32.gmra.mrb[104].mxu1 %vm6435_vm2, %v27085_v36  ;;  %v27105_v36 = vld [vmem:[#allocation2 + $0x389] sm:$0xff] }
 0x5cd   :  { %20558 = vmatprep.mubr.msk.f32.mxu1 %vm6435_vm2, %v27089_v25  ;;  %29289 = vst [vmem:[#allocation66_spill] sm:$0xff] %v27105_v36  ;;  %v27109_v25 = vld [vmem:[#allocation2 + $0x391] sm:$0xff] }
 0x5ce   :  { %29290 = vst [vmem:[#allocation67_spill] sm:$0xff] %v27109_v25 }
 0x5d0   :  { %20559 = vmatmul.mubr.msk.f32.gmra.mrb[106].mxu1 %vm6435_vm2, %v27093_v26  ;;  %v27113_v26 = vld [vmem:[#allocation2 + $0x3a9] sm:$0xff] }
 0x5d1   :  { %20561 = vmatprep.mubr.msk.f32.mxu1 %vm6435_vm2, %v27097_v2  ;;  %29291 = vst [vmem:[#allocation68_spill] sm:$0xff] %v27113_v26  ;;  %v27117_v2 = vld [vmem:[#allocation2 + $0x3b1] sm:$0xff] }
 0x5d2   :  { %29292 = vst [vmem:[#allocation69_spill] sm:$0xff] %v27117_v2 }
 0x5d4   :  { %20562 = vmatmul.mubr.msk.f32.gmra.mrb[108].mxu1 %vm6435_vm2, %v27101_v23  ;;  %v27121_v23 = vld [vmem:[#allocation2 + $0x3c9] sm:$0xff] }
 0x5d5   :  { %20564 = vmatprep.mubr.msk.f32.mxu1 %vm6435_vm2, %v27105_v36  ;;  %29293 = vst [vmem:[#allocation70_spill] sm:$0xff] %v27121_v23  ;;  %v27125_v36 = vld [vmem:[#allocation2 + $0x3d1] sm:$0xff] }
 0x5d6   :  { %29294 = vst [vmem:[#allocation9_spill] sm:$0xff] %v27125_v36 }
 0x5d8   :  { %20565 = vmatmul.mubr.msk.f32.gmra.mrb[110].mxu1 %vm6435_vm2, %v27109_v25  ;;  %v27129_v25 = vld [vmem:[#allocation2 + $0x3e9] sm:$0xff] }
 0x5d9   :  { %20567 = vmatprep.mubr.msk.f32.mxu1 %vm6435_vm2, %v27113_v26  ;;  %29295 = vst [vmem:[#allocation10_spill] sm:$0xff] %v27129_v25  ;;  %v27133_v26 = vld [vmem:[#allocation2 + $0x3f1] sm:$0xff] }
 0x5da   :  { %29296 = vst [vmem:[#allocation11_spill] sm:$0xff] %v27133_v26 }
 0x5dc   :  { %20568 = vmatmul.mubr.msk.f32.gmra.mrb[112].mxu1 %vm6435_vm2, %v27117_v2  ;;  %v27137_v2 = vld [vmem:[#allocation2 + $0x409] sm:$0xff] }
 0x5dd   :  { %20570 = vmatprep.mubr.msk.f32.mxu1 %vm6435_vm2, %v27121_v23  ;;  %29297 = vst [vmem:[#allocation12_spill] sm:$0xff] %v27137_v2  ;;  %v27141_v23 = vld [vmem:[#allocation2 + $0x411] sm:$0xff] }
 0x5de   :  { %29298 = vst [vmem:[#allocation13_spill] sm:$0xff] %v27141_v23 }
 0x5e0   :  { %20571 = vmatmul.mubr.msk.f32.gmra.mrb[114].mxu1 %vm6435_vm2, %v27125_v36  ;;  %v27145_v36 = vld [vmem:[#allocation2 + $0x429] sm:$0xff] }
 0x5e1   :  { %20573 = vmatprep.mubr.msk.f32.mxu1 %vm6435_vm2, %v27129_v25  ;;  %29299 = vst [vmem:[#allocation14_spill] sm:$0xff] %v27145_v36  ;;  %v27149_v25 = vld [vmem:[#allocation2 + $0x431] sm:$0xff] }
 0x5e2   :  { %29300 = vst [vmem:[#allocation15_spill] sm:$0xff] %v27149_v25 }
 0x5e4   :  { %20574 = vmatmul.mubr.msk.f32.gmra.mrb[116].mxu1 %vm6435_vm2, %v27133_v26  ;;  %v17304_v26 = vld [vmem:[%s28909_s3 + $0x110] sm:$0xff] }
 0x5e5   :  { %20576 = vmatprep.mubr.msk.f32.mxu1 %vm6435_vm2, %v27137_v2  ;;  %v17305_v2 = vld [vmem:[%s28909_s3 + $0x118] sm:$0xff] }
 0x5e8   :  { %20577 = vmatmul.mubr.msk.f32.gmra.mrb[118].mxu1 %vm6435_vm2, %v27141_v23  ;;  %v21722_v23 = vpack.c.bf16 %v17305_v2, %v17304_v26  ;;  %v17309_v2 = vld [vmem:[%s28909_s3 + $0x138] sm:$0xff]  ;;  %v9404_v26 = vld [vmem:[#allocation2 + $0x268] sm:$0xff] }
 0x5e9   :  { %20579 = vmatprep.mubr.msk.f32.mxu1 %vm6435_vm2, %v27145_v36  ;;  %v17306_v36 = vld [vmem:[%s28909_s3 + $0x120] sm:$0xff] }
 0x5ec   :  { %20580 = vmatmul.mubr.msk.f32.gmra.mrb[120].mxu1 %vm6435_vm2, %v27149_v25  ;;  %v21726_v25 = vpack.c.bf16 %v17307_v35, %v17306_v36  ;;  %v27451_v36 = vld [vmem:[#allocation2 + $0x1e8] sm:$0xff] }
 0x5ed   :  { %20598 = vmatprep.mubr.msk.f32.mxu1 %vm6435_vm2, %v26623_v48  ;;  %v17308_v48 = vld [vmem:[%s28909_s3 + $0x130] sm:$0xff]  ;;  %v27459_v35 = vld [vmem:[#allocation2 + $0x208] sm:$0xff] }
 0x5f0   :  { %20599 = vmatmul.mubr.msk.f32.vlgmr.msra.gmra.mrb[58].mxu1 %vm6435_vm2, %v26628_v52  ;;  %v21730_v52 = vpack.c.bf16 %v17309_v2, %v17308_v48  ;;  %v9405_v48 = vld [vmem:[#allocation2 + $0x270] sm:$0xff]  ;;  %v27469_v2 = vld [vmem:[#allocation2 + $0x288] sm:$0xff] }
 0x5f1   :  { %20601 = vmatprep.mubr.msk.f32.mxu1 %vm6435_vm2, %v26638_v30  ;;  %21721 = vmatpush3.bf16.msra.mxu1 %v26928_v45  ;;  %v17374_v30 = vld [vmem:[%s28909_s3 + $0x140] sm:$0xff]  ;;  %v17375_v45 = vld [vmem:[%s28909_s3 + $0x148] sm:$0xff] }
 0x5f2   :  { %21723 = vmatprep.subr.bf16.mxu1 %v21722_v23 }
 0x5f4   :  { %20602 = vmatmul.mubr.msk.f32.gmra.mrb[60].mxu1 %vm6435_vm2, %v26642_v58  ;;  %v27192_v58 = vpack.c.bf16 %v17375_v45, %v17374_v30  ;;  %v27477_v30 = vld [vmem:[#allocation2 + $0x2a8] sm:$0xff]  ;;  %v27481_v45 = vld [vmem:[#allocation2 + $0x2b0] sm:$0xff] }
 0x5f5   :  { %20604 = vmatprep.mubr.msk.f32.mxu1 %vm6435_vm2, %v26652_v3  ;;  %21725 = vmatpush3.bf16.msra.mxu1 %v21722_v23  ;;  %v27241_v3 = vld [vmem:[#allocation2 + $0x207] sm:$0xff]  ;;  %v27455_v23 = vld [vmem:[#allocation2 + $0x1f0] sm:$0xff] }
 0x5f6   :  { %21727 = vmatprep.subr.bf16.mxu1 %v21726_v25 }
 0x5f8   :  { %20605 = vmatmul.mubr.msk.f32.gmra.mrb[62].mxu1 %vm6435_vm2, %v26658_v46  ;;  %v27245_v46 = vld [vmem:[#allocation2 + $0x20f] sm:$0xff] }
 0x5f9   :  { %20607 = vmatprep.mubr.msk.f32.mxu1 %vm6435_vm2, %v26662_v59  ;;  %21729 = vmatpush3.bf16.msra.mxu1 %v21726_v25  ;;  %v29301_v59 = vld [vmem:[#allocation20_spill] sm:$0xff]  ;;  %v27463_v25 = vld [vmem:[#allocation2 + $0x210] sm:$0xff] }
 0x5fa   :  { %21731 = vmatprep.subr.bf16.mxu1 %v21730_v52 }
 0x5fc   :  { %20608 = vmatmul.mubr.msk.f32.gmra.mrb[64].mxu1 %vm6435_vm2, %v26667_v60  ;;  %v29302_v60 = vld [vmem:[#allocation21_spill] sm:$0xff] }
 0x5fd   :  { %20610 = vmatprep.mubr.msk.f32.mxu1 %vm6435_vm2, %v26671_v27  ;;  %21733 = vmatpush3.bf16.msra.mxu1 %v21730_v52  ;;  %v29303_v27 = vld [vmem:[#allocation22_spill] sm:$0xff] }
 0x5fe   :  { %21735 = vmatprep.subr.bf16.mxu1 %v27192_v58  ;;  %v27473_v52 = vld [vmem:[#allocation2 + $0x290] sm:$0xff] }
 0x600   :  { %20611 = vmatmul.mubr.msk.f32.gmra.mrb[66].mxu1 %vm6435_vm2, %v26675_v22  ;;  %v29304_v22 = vld [vmem:[#allocation23_spill] sm:$0xff] }
 0x601   :  { %20613 = vmatprep.mubr.msk.f32.mxu1 %vm6435_vm2, %v26679_v19  ;;  %v29305_v19 = vld [vmem:[#allocation24_spill] sm:$0xff] }
 0x604   :  { %20614 = vmatmul.mubr.msk.f32.gmra.mrb[68].mxu1 %vm6435_vm2, %v26683_v28  ;;  %v29306_v28 = vld [vmem:[#allocation25_spill] sm:$0xff] }
 0x605   :  { %20616 = vmatprep.mubr.msk.f32.mxu1 %vm6435_vm2, %v26687_v56  ;;  %v27309_v56 = vld [vmem:[#allocation2 + $0x447] sm:$0xff] }
 0x608   :  { %20617 = vmatmul.mubr.msk.f32.gmra.mrb[70].mxu1 %vm6435_vm2, %v26691_v5  ;;  %v27313_v5 = vld [vmem:[#allocation2 + $0x44f] sm:$0xff] }
 0x609   :  { %20619 = vmatprep.mubr.msk.f32.mxu1 %vm6435_vm2, %v26695_v16  ;;  %v17376_v16 = vld [vmem:[%s28909_s3 + $0x150] sm:$0xff] }
 0x60c   :  { %20620 = vmatmul.mubr.msk.f32.gmra.mrb[72].mxu1 %vm6435_vm2, %v26699_v18  ;;  %v17377_v18 = vld [vmem:[%s28909_s3 + $0x158] sm:$0xff] }
 0x60d   :  { %20622 = vmatprep.mubr.msk.f32.mxu1 %vm6435_vm2, %v26703_v61  ;;  %v9372_v61 = vld [vmem:[#allocation2 + $0x28] sm:$0xff] }
 0x610   :  { %20623 = vmatmul.mubr.msk.f32.gmra.mrb[74].mxu1 %vm6435_vm2, %v26707_v4  ;;  %v21738_v4 = vpack.c.bf16 %v17377_v18, %v17376_v16  ;;  %v27513_v16 = vld [vmem:[#allocation2 + $0x330] sm:$0xff]  ;;  %v27517_v18 = vld [vmem:[#allocation2 + $0x348] sm:$0xff] }
 0x611   :  { %20625 = vmatprep.mubr.msk.f32.mxu1 %vm6435_vm2, %v26711_v29  ;;  %v9373_v29 = vld [vmem:[#allocation2 + $0x30] sm:$0xff] }
 0x614   :  { %20626 = vmatmul.mubr.msk.f32.gmra.mrb[76].mxu1 %vm6435_vm2, %v26715_v38  ;;  %v17378_v38 = vld [vmem:[%s28909_s3 + $0x160] sm:$0xff] }
 0x615   :  { %20628 = vmatprep.mubr.msk.f32.mxu1 %vm6435_vm2, %v26719_v62  ;;  %v17379_v62 = vld [vmem:[%s28909_s3 + $0x168] sm:$0xff] }
 0x618   :  { %20629 = vmatmul.mubr.msk.f32.gmra.mrb[78].mxu1 %vm6435_vm2, %v26723_v32  ;;  %v27331_v32 = vld [vmem:[#allocation2 + $0x48] sm:$0xff] }
 0x619   :  { %20631 = vmatprep.mubr.msk.f32.mxu1 %vm6435_vm2, %v26727_v21  ;;  %v21742_v21 = vpack.c.bf16 %v17379_v62, %v17378_v38  ;;  %v27533_v38 = vld [vmem:[#allocation2 + $0x388] sm:$0xff]  ;;  %v27537_v62 = vld [vmem:[#allocation2 + $0x390] sm:$0xff] }
 0x61c   :  { %20632 = vmatmul.mubr.msk.f32.gmra.mrb[80].mxu1 %vm6435_vm2, %v26731_v57  ;;  %v27336_v57 = vld [vmem:[#allocation2 + $0x50] sm:$0xff] }
 0x61d   :  { %20634 = vmatprep.mubr.msk.f32.mxu1 %vm6435_vm2, %v26735_v11  ;;  %v17380_v11 = vld [vmem:[%s28909_s3 + $0x170] sm:$0xff] }
 0x620   :  { %20635 = vmatmul.mubr.msk.f32.gmra.mrb[82].mxu1 %vm6435_vm2, %v26739_v63  ;;  %v17381_v63 = vld [vmem:[%s28909_s3 + $0x178] sm:$0xff] }
 0x621   :  { %20637 = vmatprep.mubr.msk.f32.mxu1 %vm6435_vm2, %v26743_v31  ;;  %v27346_v31 = vld [vmem:[#allocation2 + $0x68] sm:$0xff] }
 0x624   :  { %20638 = vmatmul.mubr.msk.f32.gmra.mrb[84].mxu1 %vm6435_vm2, %v26747_v12  ;;  %v21746_v12 = vpack.c.bf16 %v17381_v63, %v17380_v11  ;;  %v27545_v11 = vld [vmem:[#allocation2 + $0x3b0] sm:$0xff]  ;;  %v27549_v63 = vld [vmem:[#allocation2 + $0x3c8] sm:$0xff] }
 0x625   :  { %20640 = vmatprep.mubr.msk.f32.mxu1 %vm6435_vm2, %v26751_v33  ;;  %v27350_v33 = vld [vmem:[#allocation2 + $0x70] sm:$0xff]  ;;  %29308 = vst [vmem:[#allocation17_spill] sm:$0xff] %v27545_v11  ;;  %29309 = vst [vmem:[#allocation18_spill] sm:$0xff] %v27549_v63 }
 0x628   :  { %20641 = vmatmul.mubr.msk.f32.gmra.mrb[86].mxu1 %vm6435_vm2, %v26755_v10  ;;  %v17446_v10 = vld [vmem:[%s28909_s3 + $0x180] sm:$0xff] }
 0x629   :  { %20643 = vmatprep.mubr.msk.f32.mxu1 %vm6435_vm2, %v27241_v3 }
 0x62c   :  { %20644 = vmatmul.mubr.msk.f32.gmra.mrb[88].mxu1 %vm6435_vm2, %v27245_v46 }
 0x62d   :  { %20646 = vmatprep.mubr.msk.f32.mxu1 %vm6435_vm2, %v26761_v41  ;;  %v17447_v41 = vld [vmem:[%s28909_s3 + $0x188] sm:$0xff] }
 0x630   :  { %20647 = vmatmul.mubr.msk.f32.gmra.mrb[90].mxu1 %vm6435_vm2, %v26765_v43  ;;  %v27360_v43 = vld [vmem:[#allocation2 + $0x88] sm:$0xff] }
 0x631   :  { %20649 = vmatprep.mubr.msk.f32.mxu1 %vm6435_vm2, %v26769_v42  ;;  %v27364_v42 = vpack.c.bf16 %v17447_v41, %v17446_v10  ;;  %v27557_v10 = vld [vmem:[#allocation2 + $0x3e8] sm:$0xff]  ;;  %v27561_v41 = vld [vmem:[#allocation2 + $0x3f0] sm:$0xff] }
 0x632   :  { %29311 = vst [vmem:[#allocation20_spill] sm:$0xff] %v27557_v10  ;;  %29312 = vst [vmem:[#allocation21_spill] sm:$0xff] %v27561_v41 }
 0x634   :  { %20650 = vmatmul.mubr.msk.f32.gmra.mrb[92].mxu1 %vm6435_vm2, %v26773_v51  ;;  %v27366_v51 = vld [vmem:[#allocation2 + $0x90] sm:$0xff] }
 0x635   :  { %20652 = vmatprep.mubr.msk.f32.mxu1 %vm6435_vm2, %v26777_v9  ;;  %v27370_v9 = vld [vmem:[#allocation2 + $0xa8] sm:$0xff] }
 0x638   :  { %20653 = vmatmul.mubr.msk.f32.gmra.mrb[94].mxu1 %vm6435_vm2, %v26781_v54  ;;  %v27375_v54 = vld [vmem:[#allocation2 + $0xb0] sm:$0xff] }
 0x639   :  { %20655 = vmatprep.mubr.msk.f32.mxu1 %vm6435_vm2, %v26785_v37  ;;  %v27379_v37 = vld [vmem:[#allocation2 + $0xc8] sm:$0xff] }
 0x63c   :  { %20656 = vmatmul.mubr.msk.f32.gmra.mrb[96].mxu1 %vm6435_vm2, %v26789_v6  ;;  %v27383_v6 = vld [vmem:[#allocation2 + $0xd0] sm:$0xff] }
 0x63d   :  { %20658 = vmatprep.mubr.msk.f32.mxu1 %vm6435_vm2, %v26793_v0  ;;  %v27387_v0 = vld [vmem:[#allocation2 + $0xe8] sm:$0xff] }
 0x640   :  { %20659 = vmatmul.mubr.msk.f32.gmra.mrb[98].mxu1 %vm6435_vm2, %v26797_v39  ;;  %v27391_v39 = vld [vmem:[#allocation2 + $0xf0] sm:$0xff] }
 0x641   :  { %20661 = vmatprep.mubr.msk.f32.mxu1 %vm6435_vm2, %v26801_v53  ;;  %v27395_v53 = vld [vmem:[#allocation2 + $0x108] sm:$0xff] }
 0x644   :  { %20662 = vmatmul.mubr.msk.f32.gmra.mrb[100].mxu1 %vm6435_vm2, %v26805_v49  ;;  %v27399_v49 = vld [vmem:[#allocation2 + $0x110] sm:$0xff] }
 0x645   :  { %20664 = vmatprep.mubr.msk.f32.mxu1 %vm6435_vm2, %v26809_v17  ;;  %v27403_v17 = vld [vmem:[#allocation2 + $0x128] sm:$0xff] }
 0x648   :  { %20665 = vmatmul.mubr.msk.f32.gmra.mrb[102].mxu1 %vm6435_vm2, %v26813_v1  ;;  %v27407_v1 = vld [vmem:[#allocation2 + $0x130] sm:$0xff] }
 0x649   :  { %20667 = vmatprep.mubr.msk.f32.mxu1 %vm6435_vm2, %v26817_v55  ;;  %v27411_v55 = vld [vmem:[#allocation2 + $0x148] sm:$0xff] }
 0x64c   :  { %20668 = vmatmul.mubr.msk.f32.gmra.mrb[104].mxu1 %vm6435_vm2, %v26821_v14  ;;  %v27415_v14 = vld [vmem:[#allocation2 + $0x150] sm:$0xff] }
 0x64d   :  { %20670 = vmatprep.mubr.msk.f32.mxu1 %vm6435_vm2, %v26825_v40  ;;  %v27419_v40 = vld [vmem:[#allocation2 + $0x168] sm:$0xff] }
 0x650   :  { %20671 = vmatmul.mubr.msk.f32.gmra.mrb[106].mxu1 %vm6435_vm2, %v26829_v13  ;;  %v27423_v13 = vld [vmem:[#allocation2 + $0x170] sm:$0xff] }
 0x651   :  { %20673 = vmatprep.mubr.msk.f32.mxu1 %vm6435_vm2, %v26833_v24  ;;  %v27427_v24 = vld [vmem:[#allocation2 + $0x188] sm:$0xff] }
 0x654   :  { %20674 = vmatmul.mubr.msk.f32.gmra.mrb[108].mxu1 %vm6435_vm2, %v26837_v34  ;;  %v27431_v34 = vld [vmem:[#allocation2 + $0x190] sm:$0xff] }
 0x655   :  { %20676 = vmatprep.mubr.msk.f32.mxu1 %vm6435_vm2, %v26841_v44  ;;  %v27435_v44 = vld [vmem:[#allocation2 + $0x1a8] sm:$0xff] }
 0x658   :  { %20677 = vmatmul.mubr.msk.f32.gmra.mrb[110].mxu1 %vm6435_vm2, %v26845_v15  ;;  %v27439_v15 = vld [vmem:[#allocation2 + $0x1b0] sm:$0xff] }
 0x659   :  { %20679 = vmatprep.mubr.msk.f32.mxu1 %vm6435_vm2, %v26849_v50  ;;  %v27443_v50 = vld [vmem:[#allocation2 + $0x1c8] sm:$0xff] }
 0x65c   :  { %20680 = vmatmul.mubr.msk.f32.gmra.mrb[112].mxu1 %vm6435_vm2, %v26853_v47  ;;  %v27447_v47 = vld [vmem:[#allocation2 + $0x1d0] sm:$0xff] }
 0x65d   :  { %20682 = vmatprep.mubr.msk.f32.mxu1 %vm6435_vm2, %v29301_v59  ;;  %v27489_v59 = vld [vmem:[#allocation2 + $0x2d0] sm:$0xff] }
 0x660   :  { %20683 = vmatmul.mubr.msk.f32.gmra.mrb[114].mxu1 %vm6435_vm2, %v29302_v60  ;;  %v27493_v60 = vld [vmem:[#allocation2 + $0x2e8] sm:$0xff] }
 0x661   :  { %20685 = vmatprep.mubr.msk.f32.mxu1 %vm6435_vm2, %v29303_v27  ;;  %v27497_v27 = vld [vmem:[#allocation2 + $0x2f0] sm:$0xff] }
 0x664   :  { %20686 = vmatmul.mubr.msk.f32.gmra.mrb[116].mxu1 %vm6435_vm2, %v29304_v22  ;;  %v27501_v22 = vld [vmem:[#allocation2 + $0x308] sm:$0xff] }
 0x665   :  { %20688 = vmatprep.mubr.msk.f32.mxu1 %vm6435_vm2, %v29305_v19  ;;  %v27505_v19 = vld [vmem:[#allocation2 + $0x310] sm:$0xff] }
 0x668   :  { %20689 = vmatmul.mubr.msk.f32.gmra.mrb[118].mxu1 %vm6435_vm2, %v29306_v28  ;;  %v27509_v28 = vld [vmem:[#allocation2 + $0x328] sm:$0xff] }
 0x669   :  { %20691 = vmatprep.mubr.msk.f32.mxu1 %vm6435_vm2, %v27309_v56 }
 0x66c   :  { %20692 = vmatmul.mubr.msk.f32.gmra.mrb[120].mxu1 %vm6435_vm2, %v27313_v5 }
 0x66d   :  { %20710 = vmatprep.mubr.msk.f32.mxu1 %vm6435_vm2, %v9372_v61  ;;  %v27521_v61 = vld [vmem:[#allocation2 + $0x350] sm:$0xff] }
 0x670   :  { %20711 = vmatmul.mubr.msk.f32.vlgmr.msra.gmra.mrb[58].mxu1 %vm6435_vm2, %v9373_v29  ;;  %v27529_v29 = vld [vmem:[#allocation2 + $0x370] sm:$0xff] }
 0x671   :  { %20713 = vmatprep.mubr.msk.f32.mxu1 %vm6435_vm2, %v27331_v32  ;;  %21737 = vmatpush3.bf16.msra.mxu1 %v27192_v58  ;;  %v27485_v58 = vld [vmem:[#allocation2 + $0x2c8] sm:$0xff] }
 0x672   :  { %21739 = vmatprep.subr.bf16.mxu1 %v21738_v4 }
 0x674   :  { %20714 = vmatmul.mubr.msk.f32.gmra.mrb[60].mxu1 %vm6435_vm2, %v27336_v57 }
 0x675   :  { %20716 = vmatprep.mubr.msk.f32.mxu1 %vm6435_vm2, %v27346_v31  ;;  %21741 = vmatpush3.bf16.msra.mxu1 %v21738_v4  ;;  %v27525_v4 = vld [vmem:[#allocation2 + $0x368] sm:$0xff] }
 0x676   :  { %21743 = vmatprep.subr.bf16.mxu1 %v21742_v21 }
 0x678   :  { %20717 = vmatmul.mubr.msk.f32.gmra.mrb[62].mxu1 %vm6435_vm2, %v27350_v33 }
 0x679   :  { %20719 = vmatprep.mubr.msk.f32.mxu1 %vm6435_vm2, %v27360_v43  ;;  %21745 = vmatpush3.bf16.msra.mxu1 %v21742_v21  ;;  %v27541_v21 = vld [vmem:[#allocation2 + $0x3a8] sm:$0xff] }
 0x67a   :  { %21747 = vmatprep.subr.bf16.mxu1 %v21746_v12  ;;  %29307 = vst [vmem:[#allocation16_spill] sm:$0xff] %v27541_v21 }
 0x67c   :  { %20720 = vmatmul.mubr.msk.f32.gmra.mrb[64].mxu1 %vm6435_vm2, %v27366_v51 }
 0x67d   :  { %20722 = vmatprep.mubr.msk.f32.mxu1 %vm6435_vm2, %v27370_v9  ;;  %21749 = vmatpush3.bf16.msra.mxu1 %v21746_v12  ;;  %v27553_v12 = vld [vmem:[#allocation2 + $0x3d0] sm:$0xff] }
 0x67e   :  { %21751 = vmatprep.subr.bf16.mxu1 %v27364_v42  ;;  %29310 = vst [vmem:[#allocation19_spill] sm:$0xff] %v27553_v12 }
 0x680   :  { %20723 = vmatmul.mubr.msk.f32.gmra.mrb[66].mxu1 %vm6435_vm2, %v27375_v54 }
 0x681   :  { %20725 = vmatprep.mubr.msk.f32.mxu1 %vm6435_vm2, %v27379_v37 }
 0x684   :  { %20726 = vmatmul.mubr.msk.f32.gmra.mrb[68].mxu1 %vm6435_vm2, %v27383_v6 }
 0x685   :  { %20728 = vmatprep.mubr.msk.f32.mxu1 %vm6435_vm2, %v27387_v0 }
 0x688   :  { %20729 = vmatmul.mubr.msk.f32.gmra.mrb[70].mxu1 %vm6435_vm2, %v27391_v39 }
 0x689   :  { %20731 = vmatprep.mubr.msk.f32.mxu1 %vm6435_vm2, %v27395_v53 }
 0x68c   :  { %20732 = vmatmul.mubr.msk.f32.gmra.mrb[72].mxu1 %vm6435_vm2, %v27399_v49 }
 0x68d   :  { %20734 = vmatprep.mubr.msk.f32.mxu1 %vm6435_vm2, %v27403_v17 }
 0x690   :  { %20735 = vmatmul.mubr.msk.f32.gmra.mrb[74].mxu1 %vm6435_vm2, %v27407_v1 }
 0x691   :  { %20737 = vmatprep.mubr.msk.f32.mxu1 %vm6435_vm2, %v27411_v55 }
 0x694   :  { %20738 = vmatmul.mubr.msk.f32.gmra.mrb[76].mxu1 %vm6435_vm2, %v27415_v14 }
 0x695   :  { %20740 = vmatprep.mubr.msk.f32.mxu1 %vm6435_vm2, %v27419_v40 }
 0x698   :  { %20741 = vmatmul.mubr.msk.f32.gmra.mrb[78].mxu1 %vm6435_vm2, %v27423_v13 }
 0x699   :  { %20743 = vmatprep.mubr.msk.f32.mxu1 %vm6435_vm2, %v27427_v24 }
 0x69c   :  { %20744 = vmatmul.mubr.msk.f32.gmra.mrb[80].mxu1 %vm6435_vm2, %v27431_v34 }
 0x69d   :  { %20746 = vmatprep.mubr.msk.f32.mxu1 %vm6435_vm2, %v27435_v44 }
 0x6a0   :  { %20747 = vmatmul.mubr.msk.f32.gmra.mrb[82].mxu1 %vm6435_vm2, %v27439_v15 }
 0x6a1   :  { %20749 = vmatprep.mubr.msk.f32.mxu1 %vm6435_vm2, %v27443_v50 }
 0x6a4   :  { %20750 = vmatmul.mubr.msk.f32.gmra.mrb[84].mxu1 %vm6435_vm2, %v27447_v47 }
 0x6a5   :  { %20752 = vmatprep.mubr.msk.f32.mxu1 %vm6435_vm2, %v27451_v36 }
 0x6a8   :  { %20753 = vmatmul.mubr.msk.f32.gmra.mrb[86].mxu1 %vm6435_vm2, %v27455_v23 }
 0x6a9   :  { %20755 = vmatprep.mubr.msk.f32.mxu1 %vm6435_vm2, %v27459_v35 }
 0x6ac   :  { %20756 = vmatmul.mubr.msk.f32.gmra.mrb[88].mxu1 %vm6435_vm2, %v27463_v25 }
 0x6ad   :  { %20758 = vmatprep.mubr.msk.f32.mxu1 %vm6435_vm2, %v9404_v26  ;;  %v27565_v26 = vld [vmem:[#allocation2 + $0x408] sm:$0xff] }
 0x6ae   :  { %29313 = vst [vmem:[#allocation22_spill] sm:$0xff] %v27565_v26 }
 0x6b0   :  { %20759 = vmatmul.mubr.msk.f32.gmra.mrb[90].mxu1 %vm6435_vm2, %v9405_v48  ;;  %v27569_v48 = vld [vmem:[#allocation2 + $0x410] sm:$0xff] }
 0x6b1   :  { %20761 = vmatprep.mubr.msk.f32.mxu1 %vm6435_vm2, %v27469_v2  ;;  %29314 = vst [vmem:[#allocation23_spill] sm:$0xff] %v27569_v48 }
 0x6b4   :  { %20762 = vmatmul.mubr.msk.f32.gmra.mrb[92].mxu1 %vm6435_vm2, %v27473_v52 }
 0x6b5   :  { %20764 = vmatprep.mubr.msk.f32.mxu1 %vm6435_vm2, %v27477_v30 }
 0x6b8   :  { %20765 = vmatmul.mubr.msk.f32.gmra.mrb[94].mxu1 %vm6435_vm2, %v27481_v45 }
 0x6b9   :  { %20767 = vmatprep.mubr.msk.f32.mxu1 %vm6435_vm2, %v27485_v58 }
 0x6bc   :  { %20768 = vmatmul.mubr.msk.f32.gmra.mrb[96].mxu1 %vm6435_vm2, %v27489_v59 }
 0x6bd   :  { %20770 = vmatprep.mubr.msk.f32.mxu1 %vm6435_vm2, %v27493_v60 }
 0x6c0   :  { %20771 = vmatmul.mubr.msk.f32.gmra.mrb[98].mxu1 %vm6435_vm2, %v27497_v27 }
 0x6c1   :  { %20773 = vmatprep.mubr.msk.f32.mxu1 %vm6435_vm2, %v27501_v22 }
 0x6c4   :  { %20774 = vmatmul.mubr.msk.f32.gmra.mrb[100].mxu1 %vm6435_vm2, %v27505_v19 }
 0x6c5   :  { %20776 = vmatprep.mubr.msk.f32.mxu1 %vm6435_vm2, %v27509_v28 }
 0x6c8   :  { %20777 = vmatmul.mubr.msk.f32.gmra.mrb[102].mxu1 %vm6435_vm2, %v27513_v16 }
 0x6c9   :  { %20779 = vmatprep.mubr.msk.f32.mxu1 %vm6435_vm2, %v27517_v18 }
 0x6cc   :  { %20780 = vmatmul.mubr.msk.f32.gmra.mrb[104].mxu1 %vm6435_vm2, %v27521_v61 }
 0x6cd   :  { %20782 = vmatprep.mubr.msk.f32.mxu1 %vm6435_vm2, %v27525_v4 }
 0x6d0   :  { %20783 = vmatmul.mubr.msk.f32.gmra.mrb[106].mxu1 %vm6435_vm2, %v27529_v29 }
 0x6d1   :  { %20785 = vmatprep.mubr.msk.f32.mxu1 %vm6435_vm2, %v27533_v38 }
 0x6d4   :  { %20786 = vmatmul.mubr.msk.f32.gmra.mrb[108].mxu1 %vm6435_vm2, %v27537_v62 }
 0x6d5   :  { %20788 = vmatprep.mubr.msk.f32.mxu1 %vm6435_vm2, %v27541_v21  ;;  %v29320_v21 = vld [vmem:[#allocation27_spill] sm:$0xff] }
 0x6d8   :  { %20789 = vmatmul.mubr.msk.f32.gmra.mrb[110].mxu1 %vm6435_vm2, %v27545_v11  ;;  %v17451_v11 = vld [vmem:[%s28909_s3 + $0x1a8] sm:$0xff] }
 0x6d9   :  { %20791 = vmatprep.mubr.msk.f32.mxu1 %vm6435_vm2, %v27549_v63  ;;  %v29319_v63 = vld [vmem:[#allocation26_spill] sm:$0xff] }
 0x6dc   :  { %20792 = vmatmul.mubr.msk.f32.gmra.mrb[112].mxu1 %vm6435_vm2, %v27553_v12  ;;  %v27573_v12 = vld [vmem:[#allocation2 + $0x428] sm:$0xff] }
 0x6dd   :  { %20794 = vmatprep.mubr.msk.f32.mxu1 %vm6435_vm2, %v27557_v10  ;;  %29315 = vst [vmem:[#allocation24_spill] sm:$0xff] %v27573_v12  ;;  %v27577_v10 = vld [vmem:[#allocation2 + $0x430] sm:$0xff] }
 0x6de   :  { %29316 = vst [vmem:[#allocation25_spill] sm:$0xff] %v27577_v10 }
 0x6e0   :  { %20795 = vmatmul.mubr.msk.f32.gmra.mrb[114].mxu1 %vm6435_vm2, %v27561_v41  ;;  %v27581_v41 = vld [vmem:[#allocation2 + $0x448] sm:$0xff] }
 0x6e1   :  { %20797 = vmatprep.mubr.msk.f32.mxu1 %vm6435_vm2, %v27565_v26  ;;  %29317 = vst [vmem:[#allocation71_spill] sm:$0xff] %v27581_v41  ;;  %v27585_v26 = vld [vmem:[#allocation2 + $0x450] sm:$0xff] }
 0x6e2   :  { %29318 = vst [vmem:[#allocation72_spill] sm:$0xff] %v27585_v26 }
 0x6e4   :  { %20798 = vmatmul.mubr.msk.f32.gmra.mrb[116].mxu1 %vm6435_vm2, %v27569_v48  ;;  %v17448_v48 = vld [vmem:[%s28909_s3 + $0x190] sm:$0xff] }
 0x6e5   :  { %20800 = vmatprep.mubr.msk.f32.mxu1 %vm6435_vm2, %v27573_v12  ;;  %v17449_v12 = vld [vmem:[%s28909_s3 + $0x198] sm:$0xff] }
 0x6e8   :  { %20801 = vmatmul.mubr.msk.f32.gmra.mrb[118].mxu1 %vm6435_vm2, %v27577_v10  ;;  %v21754_v10 = vpack.c.bf16 %v17449_v12, %v17448_v48  ;;  %v17453_v12 = vld [vmem:[%s28909_s3 + $0x1b8] sm:$0xff]  ;;  %v29321_v48 = vld [vmem:[#allocation28_spill] sm:$0xff] }
 0x6e9   :  { %20803 = vmatprep.mubr.msk.f32.mxu1 %vm6435_vm2, %v27581_v41  ;;  %v17450_v41 = vld [vmem:[%s28909_s3 + $0x1a0] sm:$0xff] }
 0x6ec   :  { %20804 = vmatmul.mubr.msk.f32.gmra.mrb[120].mxu1 %vm6435_vm2, %v27585_v26  ;;  %v21758_v26 = vpack.c.bf16 %v17451_v11, %v17450_v41  ;;  %v29322_v11 = vld [vmem:[#allocation29_spill] sm:$0xff]  ;;  %v29324_v41 = vld [vmem:[#allocation31_spill] sm:$0xff] }
 0x6ed   :  { %20822 = vmatprep.mubr.msk.f32.mxu1 %vm6435_vm2, %v29319_v63  ;;  %v17452_v63 = vld [vmem:[%s28909_s3 + $0x1b0] sm:$0xff] }
 0x6f0   :  { %20823 = vmatmul.mubr.msk.f32.vlgmr.msra.gmra.mrb[58].mxu1 %vm6435_vm2, %v29320_v21  ;;  %v17519_v21 = vld [vmem:[%s28909_s3 + $0x1c8] sm:$0xff] }
 0x6f1   :  { %20825 = vmatprep.mubr.msk.f32.mxu1 %vm6435_vm2, %v26910_v20  ;;  %21753 = vmatpush3.bf16.msra.mxu1 %v27364_v42  ;;  %v21762_v20 = vpack.c.bf16 %v17453_v12, %v17452_v63  ;;  %v17518_v42 = vld [vmem:[%s28909_s3 + $0x1c0] sm:$0xff]  ;;  %v29327_v12 = vld [vmem:[#allocation34_spill] sm:$0xff] }
 0x6f2   :  { %21755 = vmatprep.subr.bf16.mxu1 %v21754_v10  ;;  %v29325_v63 = vld [vmem:[#allocation32_spill] sm:$0xff] }
 0x6f4   :  { %20826 = vmatmul.mubr.msk.f32.gmra.mrb[60].mxu1 %vm6435_vm2, %v29321_v48  ;;  %v29329_v48 = vld [vmem:[#allocation36_spill] sm:$0xff] }
 0x6f5   :  { %20828 = vmatprep.mubr.msk.f32.mxu1 %vm6435_vm2, %v26924_v7  ;;  %21757 = vmatpush3.bf16.msra.mxu1 %v21754_v10  ;;  %v27628_v7 = vpack.c.bf16 %v17519_v21, %v17518_v42  ;;  %v29323_v10 = vld [vmem:[#allocation30_spill] sm:$0xff]  ;;  %v29330_v42 = vld [vmem:[#allocation37_spill] sm:$0xff]  ;;  %v29332_v21 = vld [vmem:[#allocation39_spill] sm:$0xff] }
 0x6f6   :  { %21759 = vmatprep.subr.bf16.mxu1 %v21758_v26 }
 0x6f8   :  { %20829 = vmatmul.mubr.msk.f32.gmra.mrb[62].mxu1 %vm6435_vm2, %v26930_v8  ;;  %v29326_v8 = vld [vmem:[#allocation33_spill] sm:$0xff] }
 0x6f9   :  { %20831 = vmatprep.mubr.msk.f32.mxu1 %vm6435_vm2, %v29322_v11  ;;  %21761 = vmatpush3.bf16.msra.mxu1 %v21758_v26  ;;  %v29328_v26 = vld [vmem:[#allocation35_spill] sm:$0xff]  ;;  %v29333_v11 = vld [vmem:[#allocation40_spill] sm:$0xff] }
 0x6fa   :  { %21763 = vmatprep.subr.bf16.mxu1 %v21762_v20 }
 0x6fc   :  { %20832 = vmatmul.mubr.msk.f32.gmra.mrb[64].mxu1 %vm6435_vm2, %v29323_v10  ;;  %v29334_v10 = vld [vmem:[#allocation41_spill] sm:$0xff] }
 0x6fd   :  { %20834 = vmatprep.mubr.msk.f32.mxu1 %vm6435_vm2, %v29324_v41  ;;  %21765 = vmatpush3.bf16.msra.mxu1 %v21762_v20  ;;  %v29331_v20 = vld [vmem:[#allocation38_spill] sm:$0xff] }
 0x6fe   :  { %21767 = vmatprep.subr.bf16.mxu1 %v27628_v7  ;;  %v29335_v41 = vld [vmem:[#allocation42_spill] sm:$0xff] }
 0x700   :  { %20835 = vmatmul.mubr.msk.f32.gmra.mrb[66].mxu1 %vm6435_vm2, %v29325_v63  ;;  %v29336_v63 = vld [vmem:[#allocation43_spill] sm:$0xff] }
 0x701   :  { %20837 = vmatprep.mubr.msk.f32.mxu1 %vm6435_vm2, %v29326_v8  ;;  %v29337_v8 = vld [vmem:[#allocation44_spill] sm:$0xff] }
 0x704   :  { %20838 = vmatmul.mubr.msk.f32.gmra.mrb[68].mxu1 %vm6435_vm2, %v29327_v12  ;;  %v29338_v12 = vld [vmem:[#allocation45_spill] sm:$0xff] }
 0x705   :  { %20840 = vmatprep.mubr.msk.f32.mxu1 %vm6435_vm2, %v29328_v26  ;;  %v29339_v26 = vld [vmem:[#allocation46_spill] sm:$0xff] }
 0x708   :  { %20841 = vmatmul.mubr.msk.f32.gmra.mrb[70].mxu1 %vm6435_vm2, %v29329_v48  ;;  %v29340_v48 = vld [vmem:[#allocation47_spill] sm:$0xff] }
 0x709   :  { %20843 = vmatprep.mubr.msk.f32.mxu1 %vm6435_vm2, %v29330_v42  ;;  %v29341_v42 = vld [vmem:[#allocation48_spill] sm:$0xff] }
 0x70c   :  { %20844 = vmatmul.mubr.msk.f32.gmra.mrb[72].mxu1 %vm6435_vm2, %v29331_v20  ;;  %v29342_v20 = vld [vmem:[#allocation49_spill] sm:$0xff] }
 0x70d   :  { %20846 = vmatprep.mubr.msk.f32.mxu1 %vm6435_vm2, %v29332_v21  ;;  %v29343_v21 = vld [vmem:[#allocation50_spill] sm:$0xff] }
 0x710   :  { %20847 = vmatmul.mubr.msk.f32.gmra.mrb[74].mxu1 %vm6435_vm2, %v29333_v11  ;;  %v29344_v11 = vld [vmem:[#allocation51_spill] sm:$0xff] }
 0x711   :  { %20849 = vmatprep.mubr.msk.f32.mxu1 %vm6435_vm2, %v29334_v10  ;;  %v29345_v10 = vld [vmem:[#allocation52_spill] sm:$0xff] }
 0x714   :  { %20850 = vmatmul.mubr.msk.f32.gmra.mrb[76].mxu1 %vm6435_vm2, %v29335_v41  ;;  %v27677_v41 = vld [vmem:[#allocation2 + $0x209] sm:$0xff] }
 0x715   :  { %20852 = vmatprep.mubr.msk.f32.mxu1 %vm6435_vm2, %v29336_v63  ;;  %v27681_v63 = vld [vmem:[#allocation2 + $0x211] sm:$0xff] }
 0x716   :  { %29346 = vst [vmem:[#allocation26_spill] sm:$0xff] %v27681_v63 }
 0x718   :  { %20853 = vmatmul.mubr.msk.f32.gmra.mrb[78].mxu1 %vm6435_vm2, %v29337_v8  ;;  %v29347_v8 = vld [vmem:[#allocation53_spill] sm:$0xff] }
 0x719   :  { %20855 = vmatprep.mubr.msk.f32.mxu1 %vm6435_vm2, %v29338_v12  ;;  %v29348_v12 = vld [vmem:[#allocation54_spill] sm:$0xff] }
 0x71c   :  { %20856 = vmatmul.mubr.msk.f32.gmra.mrb[80].mxu1 %vm6435_vm2, %v29339_v26  ;;  %v29349_v26 = vld [vmem:[#allocation55_spill] sm:$0xff] }
 0x71d   :  { %20858 = vmatprep.mubr.msk.f32.mxu1 %vm6435_vm2, %v29340_v48  ;;  %v29350_v48 = vld [vmem:[#allocation56_spill] sm:$0xff] }
 0x720   :  { %20859 = vmatmul.mubr.msk.f32.gmra.mrb[82].mxu1 %vm6435_vm2, %v29341_v42  ;;  %v29351_v42 = vld [vmem:[#allocation57_spill] sm:$0xff] }
 0x721   :  { %20861 = vmatprep.mubr.msk.f32.mxu1 %vm6435_vm2, %v29342_v20  ;;  %v29352_v20 = vld [vmem:[#allocation58_spill] sm:$0xff] }
 0x724   :  { %20862 = vmatmul.mubr.msk.f32.gmra.mrb[84].mxu1 %vm6435_vm2, %v29343_v21  ;;  %v29353_v21 = vld [vmem:[#allocation59_spill] sm:$0xff] }
 0x725   :  { %20864 = vmatprep.mubr.msk.f32.mxu1 %vm6435_vm2, %v29344_v11  ;;  %v29354_v11 = vld [vmem:[#allocation60_spill] sm:$0xff] }
 0x728   :  { %20865 = vmatmul.mubr.msk.f32.gmra.mrb[86].mxu1 %vm6435_vm2, %v29345_v10  ;;  %v29355_v10 = vld [vmem:[#allocation61_spill] sm:$0xff] }
 0x729   :  { %20867 = vmatprep.mubr.msk.f32.mxu1 %vm6435_vm2, %v27677_v41 }
 0x72c   :  { %20868 = vmatmul.mubr.msk.f32.gmra.mrb[88].mxu1 %vm6435_vm2, %v27681_v63  ;;  %v10805_v63 = vld [vmem:[#allocation2 + $0x87] sm:$0xff] }
 0x72d   :  { %20870 = vmatprep.mubr.msk.f32.mxu1 %vm6435_vm2, %v29347_v8  ;;  %v29356_v8 = vld [vmem:[#allocation62_spill] sm:$0xff] }
 0x730   :  { %20871 = vmatmul.mubr.msk.f32.gmra.mrb[90].mxu1 %vm6435_vm2, %v29348_v12  ;;  %v29357_v12 = vld [vmem:[#allocation63_spill] sm:$0xff] }
 0x731   :  { %20873 = vmatprep.mubr.msk.f32.mxu1 %vm6435_vm2, %v29349_v26  ;;  %v29358_v26 = vld [vmem:[#allocation64_spill] sm:$0xff] }
 0x734   :  { %20874 = vmatmul.mubr.msk.f32.gmra.mrb[92].mxu1 %vm6435_vm2, %v29350_v48  ;;  %v29359_v48 = vld [vmem:[#allocation65_spill] sm:$0xff] }
 0x735   :  { %20876 = vmatprep.mubr.msk.f32.mxu1 %vm6435_vm2, %v29351_v42  ;;  %v29360_v42 = vld [vmem:[#allocation8_spill] sm:$0xff] }
 0x738   :  { %20877 = vmatmul.mubr.msk.f32.gmra.mrb[94].mxu1 %vm6435_vm2, %v29352_v20  ;;  %v29361_v20 = vld [vmem:[#allocation4_spill] sm:$0xff] }
 0x739   :  { %20879 = vmatprep.mubr.msk.f32.mxu1 %vm6435_vm2, %v29353_v21  ;;  %v29362_v21 = vld [vmem:[#allocation5_spill] sm:$0xff] }
 0x73c   :  { %20880 = vmatmul.mubr.msk.f32.gmra.mrb[96].mxu1 %vm6435_vm2, %v29354_v11  ;;  %v29363_v11 = vld [vmem:[#allocation6_spill] sm:$0xff] }
 0x73d   :  { %20882 = vmatprep.mubr.msk.f32.mxu1 %vm6435_vm2, %v29355_v10  ;;  %v29364_v10 = vld [vmem:[#allocation7_spill] sm:$0xff] }
 0x740   :  { %20883 = vmatmul.mubr.msk.f32.gmra.mrb[98].mxu1 %vm6435_vm2, %v29356_v8  ;;  %v29365_v8 = vld [vmem:[#allocation66_spill] sm:$0xff] }
 0x741   :  { %20885 = vmatprep.mubr.msk.f32.mxu1 %vm6435_vm2, %v29357_v12  ;;  %v29366_v12 = vld [vmem:[#allocation67_spill] sm:$0xff] }
 0x744   :  { %20886 = vmatmul.mubr.msk.f32.gmra.mrb[100].mxu1 %vm6435_vm2, %v29358_v26  ;;  %v29367_v26 = vld [vmem:[#allocation68_spill] sm:$0xff] }
 0x745   :  { %20888 = vmatprep.mubr.msk.f32.mxu1 %vm6435_vm2, %v29359_v48  ;;  %v29368_v48 = vld [vmem:[#allocation69_spill] sm:$0xff] }
 0x748   :  { %20889 = vmatmul.mubr.msk.f32.gmra.mrb[102].mxu1 %vm6435_vm2, %v29360_v42  ;;  %v29369_v42 = vld [vmem:[#allocation70_spill] sm:$0xff] }
 0x749   :  { %20891 = vmatprep.mubr.msk.f32.mxu1 %vm6435_vm2, %v29361_v20  ;;  %v29370_v20 = vld [vmem:[#allocation9_spill] sm:$0xff] }
 0x74c   :  { %20892 = vmatmul.mubr.msk.f32.gmra.mrb[104].mxu1 %vm6435_vm2, %v29362_v21  ;;  %v29371_v21 = vld [vmem:[#allocation10_spill] sm:$0xff] }
 0x74d   :  { %20894 = vmatprep.mubr.msk.f32.mxu1 %vm6435_vm2, %v29363_v11  ;;  %v29372_v11 = vld [vmem:[#allocation11_spill] sm:$0xff] }
 0x750   :  { %20895 = vmatmul.mubr.msk.f32.gmra.mrb[106].mxu1 %vm6435_vm2, %v29364_v10  ;;  %v29373_v10 = vld [vmem:[#allocation12_spill] sm:$0xff] }
 0x751   :  { %20897 = vmatprep.mubr.msk.f32.mxu1 %vm6435_vm2, %v29365_v8  ;;  %v29374_v8 = vld [vmem:[#allocation13_spill] sm:$0xff] }
 0x754   :  { %20898 = vmatmul.mubr.msk.f32.gmra.mrb[108].mxu1 %vm6435_vm2, %v29366_v12  ;;  %v29375_v12 = vld [vmem:[#allocation14_spill] sm:$0xff] }
 0x755   :  { %20900 = vmatprep.mubr.msk.f32.mxu1 %vm6435_vm2, %v29367_v26  ;;  %v29376_v26 = vld [vmem:[#allocation15_spill] sm:$0xff] }
 0x758   :  { %20901 = vmatmul.mubr.msk.f32.gmra.mrb[110].mxu1 %vm6435_vm2, %v29368_v48  ;;  %v27745_v48 = vld [vmem:[#allocation2 + $0x449] sm:$0xff] }
 0x759   :  { %20903 = vmatprep.mubr.msk.f32.mxu1 %vm6435_vm2, %v29369_v42  ;;  %29377 = vst [vmem:[#allocation27_spill] sm:$0xff] %v27745_v48  ;;  %v27749_v42 = vld [vmem:[#allocation2 + $0x451] sm:$0xff] }
 0x75a   :  { %29378 = vst [vmem:[#allocation28_spill] sm:$0xff] %v27749_v42 }
 0x75c   :  { %20904 = vmatmul.mubr.msk.f32.gmra.mrb[112].mxu1 %vm6435_vm2, %v29370_v20  ;;  %v17520_v20 = vld [vmem:[%s28909_s3 + $0x1d0] sm:$0xff] }
 0x75d   :  { %20906 = vmatprep.mubr.msk.f32.mxu1 %vm6435_vm2, %v29371_v21  ;;  %v17521_v21 = vld [vmem:[%s28909_s3 + $0x1d8] sm:$0xff] }
 0x760   :  { %20907 = vmatmul.mubr.msk.f32.gmra.mrb[114].mxu1 %vm6435_vm2, %v29372_v11  ;;  %v10801_v11 = vld [vmem:[#allocation2 + $0x47] sm:$0xff] }
 0x761   :  { %20909 = vmatprep.mubr.msk.f32.mxu1 %vm6435_vm2, %v29373_v10  ;;  %v21770_v10 = vpack.c.bf16 %v17521_v21, %v17520_v20  ;;  %v17524_v20 = vld [vmem:[%s28909_s3 + $0x1f0] sm:$0xff]  ;;  %v17525_v21 = vld [vmem:[%s28909_s3 + $0x1f8] sm:$0xff] }
 0x764   :  { %20910 = vmatmul.mubr.msk.f32.gmra.mrb[116].mxu1 %vm6435_vm2, %v29374_v8  ;;  %v10802_v8 = vld [vmem:[#allocation2 + $0x4f] sm:$0xff] }
 0x765   :  { %20912 = vmatprep.mubr.msk.f32.mxu1 %vm6435_vm2, %v29375_v12  ;;  %v17522_v12 = vld [vmem:[%s28909_s3 + $0x1e0] sm:$0xff] }
 0x768   :  { %20913 = vmatmul.mubr.msk.f32.gmra.mrb[118].mxu1 %vm6435_vm2, %v29376_v26  ;;  %v17523_v26 = vld [vmem:[%s28909_s3 + $0x1e8] sm:$0xff] }
 0x769   :  { %20915 = vmatprep.mubr.msk.f32.mxu1 %vm6435_vm2, %v27745_v48  ;;  %v10803_v48 = vld [vmem:[#allocation2 + $0x67] sm:$0xff] }
 0x76c   :  { %20916 = vmatmul.mubr.msk.f32.gmra.mrb[120].mxu1 %vm6435_vm2, %v27749_v42  ;;  %v21774_v42 = vpack.c.bf16 %v17523_v26, %v17522_v12  ;;  %v17591_v12 = vld [vmem:[%s28909_s3 + $0x208] sm:$0xff] }
 0x76d   :  { %20934 = vmatprep.mubr.msk.f32.mxu1 %vm6435_vm2, %v10801_v11  ;;  %v10804_v11 = vld [vmem:[#allocation2 + $0x6f] sm:$0xff]  ;;  %v10807_v26 = vld [vmem:[#allocation2 + $0xa7] sm:$0xff] }
 0x770   :  { %20935 = vmatmul.mubr.msk.f32.vlgmr.msra.gmra.mrb[58].mxu1 %vm6435_vm2, %v10802_v8  ;;  %v17590_v8 = vld [vmem:[%s28909_s3 + $0x200] sm:$0xff] }
 0x771   :  { %20937 = vmatprep.mubr.msk.f32.mxu1 %vm6435_vm2, %v10803_v48  ;;  %21769 = vmatpush3.bf16.msra.mxu1 %v27628_v7  ;;  %v21778_v48 = vpack.c.bf16 %v17525_v21, %v17524_v20  ;;  %v10806_v7 = vld [vmem:[#allocation2 + $0x8f] sm:$0xff]  ;;  %v10811_v21 = vld [vmem:[#allocation2 + $0xe7] sm:$0xff] }
 0x772   :  { %21771 = vmatprep.subr.bf16.mxu1 %v21770_v10  ;;  %v10810_v20 = vld [vmem:[#allocation2 + $0xcf] sm:$0xff] }
 0x774   :  { %20938 = vmatmul.mubr.msk.f32.gmra.mrb[60].mxu1 %vm6435_vm2, %v10804_v11  ;;  %v10809_v11 = vld [vmem:[#allocation2 + $0xc7] sm:$0xff] }
 0x775   :  { %20940 = vmatprep.mubr.msk.f32.mxu1 %vm6435_vm2, %v10805_v63  ;;  %21773 = vmatpush3.bf16.msra.mxu1 %v21770_v10  ;;  %v27785_v63 = vpack.c.bf16 %v17591_v12, %v17590_v8  ;;  %v10808_v10 = vld [vmem:[#allocation2 + $0xaf] sm:$0xff]  ;;  %v10815_v12 = vld [vmem:[#allocation2 + $0x127] sm:$0xff] }
 0x776   :  { %21775 = vmatprep.subr.bf16.mxu1 %v21774_v42  ;;  %v10814_v8 = vld [vmem:[#allocation2 + $0x10f] sm:$0xff] }
 0x778   :  { %20941 = vmatmul.mubr.msk.f32.gmra.mrb[62].mxu1 %vm6435_vm2, %v10806_v7  ;;  %v10812_v7 = vld [vmem:[#allocation2 + $0xef] sm:$0xff] }
 0x779   :  { %20943 = vmatprep.mubr.msk.f32.mxu1 %vm6435_vm2, %v10807_v26  ;;  %21777 = vmatpush3.bf16.msra.mxu1 %v21774_v42  ;;  %v10813_v42 = vld [vmem:[#allocation2 + $0x107] sm:$0xff] }
 0x77a   :  { %21779 = vmatprep.subr.bf16.mxu1 %v21778_v48  ;;  %v10817_v26 = vld [vmem:[#allocation2 + $0x147] sm:$0xff] }
 0x77c   :  { %20944 = vmatmul.mubr.msk.f32.gmra.mrb[64].mxu1 %vm6435_vm2, %v10808_v10  ;;  %v10818_v10 = vld [vmem:[#allocation2 + $0x14f] sm:$0xff] }
 0x77d   :  { %20946 = vmatprep.mubr.msk.f32.mxu1 %vm6435_vm2, %v10809_v11  ;;  %21781 = vmatpush3.bf16.msra.mxu1 %v21778_v48  ;;  %v10816_v48 = vld [vmem:[#allocation2 + $0x12f] sm:$0xff]  ;;  %v10819_v11 = vld [vmem:[#allocation2 + $0x167] sm:$0xff] }
 0x77e   :  { %21783 = vmatprep.subr.bf16.mxu1 %v27785_v63 }
 0x780   :  { %20947 = vmatmul.mubr.msk.f32.gmra.mrb[66].mxu1 %vm6435_vm2, %v10810_v20  ;;  %v10820_v20 = vld [vmem:[#allocation2 + $0x16f] sm:$0xff] }
 0x781   :  { %20949 = vmatprep.mubr.msk.f32.mxu1 %vm6435_vm2, %v10811_v21  ;;  %v10821_v21 = vld [vmem:[#allocation2 + $0x187] sm:$0xff] }
 0x784   :  { %20950 = vmatmul.mubr.msk.f32.gmra.mrb[68].mxu1 %vm6435_vm2, %v10812_v7  ;;  %v10822_v7 = vld [vmem:[#allocation2 + $0x18f] sm:$0xff] }
 0x785   :  { %20952 = vmatprep.mubr.msk.f32.mxu1 %vm6435_vm2, %v10813_v42  ;;  %v10823_v42 = vld [vmem:[#allocation2 + $0x1a7] sm:$0xff] }
 0x788   :  { %20953 = vmatmul.mubr.msk.f32.gmra.mrb[70].mxu1 %vm6435_vm2, %v10814_v8  ;;  %v10824_v8 = vld [vmem:[#allocation2 + $0x1af] sm:$0xff] }
 0x789   :  { %20955 = vmatprep.mubr.msk.f32.mxu1 %vm6435_vm2, %v10815_v12  ;;  %v10825_v12 = vld [vmem:[#allocation2 + $0x1c7] sm:$0xff] }
 0x78c   :  { %20956 = vmatmul.mubr.msk.f32.gmra.mrb[72].mxu1 %vm6435_vm2, %v10816_v48  ;;  %v10826_v48 = vld [vmem:[#allocation2 + $0x1cf] sm:$0xff] }
 0x78d   :  { %20958 = vmatprep.mubr.msk.f32.mxu1 %vm6435_vm2, %v10817_v26  ;;  %v10827_v26 = vld [vmem:[#allocation2 + $0x1e7] sm:$0xff] }
 0x790   :  { %20959 = vmatmul.mubr.msk.f32.gmra.mrb[74].mxu1 %vm6435_vm2, %v10818_v10  ;;  %v10828_v10 = vld [vmem:[#allocation2 + $0x1ef] sm:$0xff] }
 0x791   :  { %20961 = vmatprep.mubr.msk.f32.mxu1 %vm6435_vm2, %v10819_v11  ;;  %v10831_v11 = vld [vmem:[#allocation2 + $0x227] sm:$0xff] }
 0x794   :  { %20962 = vmatmul.mubr.msk.f32.gmra.mrb[76].mxu1 %vm6435_vm2, %v10820_v20  ;;  %v10832_v20 = vld [vmem:[#allocation2 + $0x22f] sm:$0xff] }
 0x795   :  { %20964 = vmatprep.mubr.msk.f32.mxu1 %vm6435_vm2, %v10821_v21  ;;  %v10833_v21 = vld [vmem:[#allocation2 + $0x287] sm:$0xff] }
 0x798   :  { %20965 = vmatmul.mubr.msk.f32.gmra.mrb[78].mxu1 %vm6435_vm2, %v10822_v7  ;;  %v10834_v7 = vld [vmem:[#allocation2 + $0x28f] sm:$0xff] }
 0x799   :  { %20967 = vmatprep.mubr.msk.f32.mxu1 %vm6435_vm2, %v10823_v42  ;;  %v10835_v42 = vld [vmem:[#allocation2 + $0x2a7] sm:$0xff] }
 0x79c   :  { %20968 = vmatmul.mubr.msk.f32.gmra.mrb[80].mxu1 %vm6435_vm2, %v10824_v8  ;;  %v10836_v8 = vld [vmem:[#allocation2 + $0x2af] sm:$0xff] }
 0x79d   :  { %20970 = vmatprep.mubr.msk.f32.mxu1 %vm6435_vm2, %v10825_v12  ;;  %v10839_v12 = vld [vmem:[#allocation2 + $0x2e7] sm:$0xff] }
 0x7a0   :  { %20971 = vmatmul.mubr.msk.f32.gmra.mrb[82].mxu1 %vm6435_vm2, %v10826_v48  ;;  %v10840_v48 = vld [vmem:[#allocation2 + $0x2ef] sm:$0xff] }
 0x7a1   :  { %20973 = vmatprep.mubr.msk.f32.mxu1 %vm6435_vm2, %v10827_v26  ;;  %v10841_v26 = vld [vmem:[#allocation2 + $0x307] sm:$0xff] }
 0x7a4   :  { %20974 = vmatmul.mubr.msk.f32.gmra.mrb[84].mxu1 %vm6435_vm2, %v10828_v10  ;;  %v10842_v10 = vld [vmem:[#allocation2 + $0x30f] sm:$0xff] }
 0x7a5   :  { %20976 = vmatprep.mubr.msk.f32.mxu1 %vm6435_vm2, %v27241_v3  ;;  %v10837_v3 = vld [vmem:[#allocation2 + $0x2c7] sm:$0xff] }
 0x7a8   :  { %20977 = vmatmul.mubr.msk.f32.gmra.mrb[86].mxu1 %vm6435_vm2, %v27245_v46  ;;  %v10838_v46 = vld [vmem:[#allocation2 + $0x2cf] sm:$0xff] }
 0x7a9   :  { %20979 = vmatprep.mubr.msk.f32.mxu1 %vm6435_vm2, %v10831_v11  ;;  %v10843_v11 = vld [vmem:[#allocation2 + $0x327] sm:$0xff] }
 0x7ac   :  { %20980 = vmatmul.mubr.msk.f32.gmra.mrb[88].mxu1 %vm6435_vm2, %v10832_v20  ;;  %v10844_v20 = vld [vmem:[#allocation2 + $0x32f] sm:$0xff] }
 0x7ad   :  { %20982 = vmatprep.mubr.msk.f32.mxu1 %vm6435_vm2, %v10833_v21  ;;  %v10845_v21 = vld [vmem:[#allocation2 + $0x347] sm:$0xff] }
 0x7b0   :  { %20983 = vmatmul.mubr.msk.f32.gmra.mrb[90].mxu1 %vm6435_vm2, %v10834_v7  ;;  %v10846_v7 = vld [vmem:[#allocation2 + $0x34f] sm:$0xff] }
 0x7b1   :  { %20985 = vmatprep.mubr.msk.f32.mxu1 %vm6435_vm2, %v10835_v42  ;;  %v10847_v42 = vld [vmem:[#allocation2 + $0x367] sm:$0xff] }
 0x7b4   :  { %20986 = vmatmul.mubr.msk.f32.gmra.mrb[92].mxu1 %vm6435_vm2, %v10836_v8  ;;  %v10848_v8 = vld [vmem:[#allocation2 + $0x36f] sm:$0xff] }
 0x7b5   :  { %20988 = vmatprep.mubr.msk.f32.mxu1 %vm6435_vm2, %v10837_v3  ;;  %v10849_v3 = vld [vmem:[#allocation2 + $0x387] sm:$0xff] }
 0x7b8   :  { %20989 = vmatmul.mubr.msk.f32.gmra.mrb[94].mxu1 %vm6435_vm2, %v10838_v46  ;;  %v10850_v46 = vld [vmem:[#allocation2 + $0x38f] sm:$0xff] }
 0x7b9   :  { %20991 = vmatprep.mubr.msk.f32.mxu1 %vm6435_vm2, %v10839_v12  ;;  %v10851_v12 = vld [vmem:[#allocation2 + $0x3a7] sm:$0xff] }
 0x7bc   :  { %20992 = vmatmul.mubr.msk.f32.gmra.mrb[96].mxu1 %vm6435_vm2, %v10840_v48  ;;  %v10852_v48 = vld [vmem:[#allocation2 + $0x3af] sm:$0xff] }
 0x7bd   :  { %20994 = vmatprep.mubr.msk.f32.mxu1 %vm6435_vm2, %v10841_v26  ;;  %v10853_v26 = vld [vmem:[#allocation2 + $0x3c7] sm:$0xff] }
 0x7c0   :  { %20995 = vmatmul.mubr.msk.f32.gmra.mrb[98].mxu1 %vm6435_vm2, %v10842_v10  ;;  %v10854_v10 = vld [vmem:[#allocation2 + $0x3cf] sm:$0xff] }
 0x7c1   :  { %20997 = vmatprep.mubr.msk.f32.mxu1 %vm6435_vm2, %v10843_v11  ;;  %v10855_v11 = vld [vmem:[#allocation2 + $0x3e7] sm:$0xff] }
 0x7c4   :  { %20998 = vmatmul.mubr.msk.f32.gmra.mrb[100].mxu1 %vm6435_vm2, %v10844_v20  ;;  %v10856_v20 = vld [vmem:[#allocation2 + $0x3ef] sm:$0xff] }
 0x7c5   :  { %21000 = vmatprep.mubr.msk.f32.mxu1 %vm6435_vm2, %v10845_v21  ;;  %v10857_v21 = vld [vmem:[#allocation2 + $0x407] sm:$0xff] }
 0x7c8   :  { %21001 = vmatmul.mubr.msk.f32.gmra.mrb[102].mxu1 %vm6435_vm2, %v10846_v7  ;;  %v10858_v7 = vld [vmem:[#allocation2 + $0x40f] sm:$0xff] }
 0x7c9   :  { %21003 = vmatprep.mubr.msk.f32.mxu1 %vm6435_vm2, %v10847_v42  ;;  %v10859_v42 = vld [vmem:[#allocation2 + $0x427] sm:$0xff] }
 0x7cc   :  { %21004 = vmatmul.mubr.msk.f32.gmra.mrb[104].mxu1 %vm6435_vm2, %v10848_v8  ;;  %v10860_v8 = vld [vmem:[#allocation2 + $0x42f] sm:$0xff] }
 0x7cd   :  { %21006 = vmatprep.mubr.msk.f32.mxu1 %vm6435_vm2, %v10849_v3  ;;  %v10863_v3 = vld [vmem:[#allocation2 + $0x467] sm:$0xff] }
 0x7d0   :  { %21007 = vmatmul.mubr.msk.f32.gmra.mrb[106].mxu1 %vm6435_vm2, %v10850_v46  ;;  %v10864_v46 = vld [vmem:[#allocation2 + $0x46f] sm:$0xff] }
 0x7d1   :  { %21009 = vmatprep.mubr.msk.f32.mxu1 %vm6435_vm2, %v10851_v12  ;;  %v17592_v12 = vld [vmem:[%s28909_s3 + $0x210] sm:$0xff] }
 0x7d4   :  { %21010 = vmatmul.mubr.msk.f32.gmra.mrb[108].mxu1 %vm6435_vm2, %v10852_v48  ;;  %v17593_v48 = vld [vmem:[%s28909_s3 + $0x218] sm:$0xff] }
 0x7d5   :  { %21012 = vmatprep.mubr.msk.f32.mxu1 %vm6435_vm2, %v10853_v26  ;;  %v17595_v26 = vld [vmem:[%s28909_s3 + $0x228] sm:$0xff] }
 0x7d8   :  { %21013 = vmatmul.mubr.msk.f32.gmra.mrb[110].mxu1 %vm6435_vm2, %v10854_v10 }
 0x7d9   :  { %21015 = vmatprep.mubr.msk.f32.mxu1 %vm6435_vm2, %v10855_v11  ;;  %v17597_v11 = vld [vmem:[%s28909_s3 + $0x238] sm:$0xff] }
 0x7dc   :  { %21016 = vmatmul.mubr.msk.f32.gmra.mrb[112].mxu1 %vm6435_vm2, %v10856_v20  ;;  %v12259_v20 = vld [vmem:[#allocation2 + $0x229] sm:$0xff] }
 0x7dd   :  { %21018 = vmatprep.mubr.msk.f32.mxu1 %vm6435_vm2, %v10857_v21  ;;  %v29391_v21 = vld [vmem:[#allocation26_spill] sm:$0xff] }
 0x7e0   :  { %21019 = vmatmul.mubr.msk.f32.gmra.mrb[114].mxu1 %vm6435_vm2, %v10858_v7  ;;  %v12260_v7 = vld [vmem:[#allocation2 + $0x231] sm:$0xff] }
 0x7e1   :  { %21021 = vmatprep.mubr.msk.f32.mxu1 %vm6435_vm2, %v10859_v42  ;;  %v12261_v42 = vld [vmem:[#allocation2 + $0x289] sm:$0xff] }
 0x7e4   :  { %21022 = vmatmul.mubr.msk.f32.gmra.mrb[116].mxu1 %vm6435_vm2, %v10860_v8  ;;  %v12262_v8 = vld [vmem:[#allocation2 + $0x291] sm:$0xff] }
 0x7e5   :  { %21024 = vmatprep.mubr.msk.f32.mxu1 %vm6435_vm2, %v27309_v56  ;;  %v21786_v56 = vpack.c.bf16 %v17593_v48, %v17592_v12  ;;  %v12266_v12 = vld [vmem:[#allocation2 + $0x2d1] sm:$0xff]  ;;  %v12267_v48 = vld [vmem:[#allocation2 + $0x2e9] sm:$0xff] }
 0x7e8   :  { %21025 = vmatmul.mubr.msk.f32.gmra.mrb[118].mxu1 %vm6435_vm2, %v27313_v5  ;;  %v17594_v5 = vld [vmem:[%s28909_s3 + $0x220] sm:$0xff] }
 0x7e9   :  { %21027 = vmatprep.mubr.msk.f32.mxu1 %vm6435_vm2, %v10863_v3  ;;  %v21790_v10 = vpack.c.bf16 %v17595_v26, %v17594_v5  ;;  %v12263_v3 = vld [vmem:[#allocation2 + $0x2a9] sm:$0xff]  ;;  %v12270_v26 = vld [vmem:[#allocation2 + $0x311] sm:$0xff] }
 0x7ea   :  { %v12269_v5 = vld [vmem:[#allocation2 + $0x309] sm:$0xff] }
 0x7ec   :  { %21028 = vmatmul.mubr.msk.f32.gmra.mrb[120].mxu1 %vm6435_vm2, %v10864_v46  ;;  %v12264_v46 = vld [vmem:[#allocation2 + $0x2b1] sm:$0xff] }
 0x7ed   :  { %21046 = vmatprep.mubr.msk.f32.mxu1 %vm6435_vm2, %v27331_v32  ;;  %v17596_v32 = vld [vmem:[%s28909_s3 + $0x230] sm:$0xff] }
 0x7f0   :  { %21047 = vmatmul.mubr.msk.f32.vlgmr.msra.gmra.mrb[58].mxu1 %vm6435_vm2, %v27336_v57  ;;  %v21794_v57 = vpack.c.bf16 %v17597_v11, %v17596_v32  ;;  %v12272_v32 = vld [vmem:[#allocation2 + $0x331] sm:$0xff]  ;;  %v12273_v11 = vld [vmem:[#allocation2 + $0x349] sm:$0xff] }
 0x7f1   :  { %21049 = vmatprep.mubr.msk.f32.mxu1 %vm6435_vm2, %v27346_v31  ;;  %21785 = vmatpush3.bf16.msra.mxu1 %v27785_v63  ;;  %v11545_v31 = vld [vmem:[#allocation2 + $0x228] sm:$0xff]  ;;  %v12256_v63 = vld [vmem:[#allocation2 + $0x1f1] sm:$0xff] }
 0x7f2   :  { %21787 = vmatprep.subr.bf16.mxu1 %v21786_v56 }
 0x7f4   :  { %21050 = vmatmul.mubr.msk.f32.gmra.mrb[60].mxu1 %vm6435_vm2, %v27350_v33  ;;  %v11546_v33 = vld [vmem:[#allocation2 + $0x230] sm:$0xff] }
 0x7f5   :  { %21052 = vmatprep.mubr.msk.f32.mxu1 %vm6435_vm2, %v27360_v43  ;;  %21789 = vmatpush3.bf16.msra.mxu1 %v21786_v56  ;;  %v29379_v43 = vld [vmem:[#allocation16_spill] sm:$0xff]  ;;  %v12268_v56 = vld [vmem:[#allocation2 + $0x2f1] sm:$0xff] }
 0x7f6   :  { %21791 = vmatprep.subr.bf16.mxu1 %v21790_v10 }
 0x7f8   :  { %21053 = vmatmul.mubr.msk.f32.gmra.mrb[62].mxu1 %vm6435_vm2, %v27366_v51  ;;  %v29380_v51 = vld [vmem:[#allocation17_spill] sm:$0xff] }
 0x7f9   :  { %21055 = vmatprep.mubr.msk.f32.mxu1 %vm6435_vm2, %v27370_v9  ;;  %21793 = vmatpush3.bf16.msra.mxu1 %v21790_v10  ;;  %v29381_v9 = vld [vmem:[#allocation18_spill] sm:$0xff] }
 0x7fa   :  { %21795 = vmatprep.subr.bf16.mxu1 %v21794_v57  ;;  %v12271_v10 = vld [vmem:[#allocation2 + $0x329] sm:$0xff] }
 0x7fc   :  { %21056 = vmatmul.mubr.msk.f32.gmra.mrb[64].mxu1 %vm6435_vm2, %v27375_v54  ;;  %v29382_v54 = vld [vmem:[#allocation19_spill] sm:$0xff] }
 0x7fd   :  { %21058 = vmatprep.mubr.msk.f32.mxu1 %vm6435_vm2, %v27379_v37  ;;  %21797 = vmatpush3.bf16.msra.mxu1 %v21794_v57  ;;  %v29383_v37 = vld [vmem:[#allocation20_spill] sm:$0xff]  ;;  %v12274_v57 = vld [vmem:[#allocation2 + $0x351] sm:$0xff] }
 0x800   :  { %21059 = vmatmul.mubr.msk.f32.gmra.mrb[66].mxu1 %vm6435_vm2, %v27383_v6  ;;  %v29384_v6 = vld [vmem:[#allocation21_spill] sm:$0xff] }
 0x801   :  { %21061 = vmatprep.mubr.msk.f32.mxu1 %vm6435_vm2, %v27387_v0  ;;  %v29385_v0 = vld [vmem:[#allocation22_spill] sm:$0xff] }
 0x804   :  { %21062 = vmatmul.mubr.msk.f32.gmra.mrb[68].mxu1 %vm6435_vm2, %v27391_v39  ;;  %v29386_v39 = vld [vmem:[#allocation23_spill] sm:$0xff] }
 0x805   :  { %21064 = vmatprep.mubr.msk.f32.mxu1 %vm6435_vm2, %v27395_v53  ;;  %v29387_v53 = vld [vmem:[#allocation24_spill] sm:$0xff] }
 0x808   :  { %21065 = vmatmul.mubr.msk.f32.gmra.mrb[70].mxu1 %vm6435_vm2, %v27399_v49  ;;  %v29388_v49 = vld [vmem:[#allocation25_spill] sm:$0xff] }
 0x809   :  { %21067 = vmatprep.mubr.msk.f32.mxu1 %vm6435_vm2, %v27403_v17  ;;  %v29389_v17 = vld [vmem:[#allocation71_spill] sm:$0xff] }
 0x80c   :  { %21068 = vmatmul.mubr.msk.f32.gmra.mrb[72].mxu1 %vm6435_vm2, %v27407_v1  ;;  %v11577_v1 = vld [vmem:[#allocation2 + $0x468] sm:$0xff] }
 0x80d   :  { %21070 = vmatprep.mubr.msk.f32.mxu1 %vm6435_vm2, %v27411_v55  ;;  %v29390_v55 = vld [vmem:[#allocation72_spill] sm:$0xff] }
 0x810   :  { %21071 = vmatmul.mubr.msk.f32.gmra.mrb[74].mxu1 %vm6435_vm2, %v27415_v14  ;;  %v11578_v14 = vld [vmem:[#allocation2 + $0x470] sm:$0xff] }
 0x811   :  { %21073 = vmatprep.mubr.msk.f32.mxu1 %vm6435_vm2, %v27419_v40  ;;  %v12229_v40 = vld [vmem:[#allocation2 + $0x49] sm:$0xff] }
 0x814   :  { %21074 = vmatmul.mubr.msk.f32.gmra.mrb[76].mxu1 %vm6435_vm2, %v27423_v13  ;;  %v17663_v13 = vld [vmem:[%s28911_s5 + $0x40] sm:$0xff] }
 0x815   :  { %21076 = vmatprep.mubr.msk.f32.mxu1 %vm6435_vm2, %v27427_v24  ;;  %v17664_v24 = vld [vmem:[%s28911_s5 + $0x48] sm:$0xff] }
 0x818   :  { %21077 = vmatmul.mubr.msk.f32.gmra.mrb[78].mxu1 %vm6435_vm2, %v27431_v34  ;;  %v21798_v34 = vpack.c.bf16 %v17664_v24, %v17663_v13  ;;  %v12286_v13 = vld [vmem:[#allocation2 + $0x411] sm:$0xff]  ;;  %v12287_v24 = vld [vmem:[#allocation2 + $0x429] sm:$0xff] }
 0x819   :  { %21079 = vmatprep.mubr.msk.f32.mxu1 %vm6435_vm2, %v27435_v44  ;;  %v12230_v44 = vld [vmem:[#allocation2 + $0x51] sm:$0xff] }
 0x81a   :  { %21799 = vmatprep.subr.bf16.mxu0 %v21798_v34 }
 0x81b   :  { %21801 = vmatpush3.bf16.msra.mxu0 %v21798_v34  ;;  %v17669_v34 = vld [vmem:[%s28911_s5 + $0x70] sm:$0xff] }
 0x81c   :  { %21080 = vmatmul.mubr.msk.f32.gmra.mrb[80].mxu1 %vm6435_vm2, %v27439_v15  ;;  %v12231_v15 = vld [vmem:[#allocation2 + $0x69] sm:$0xff] }
 0x81d   :  { %21082 = vmatprep.mubr.msk.f32.mxu1 %vm6435_vm2, %v27443_v50  ;;  %v12232_v50 = vld [vmem:[#allocation2 + $0x71] sm:$0xff] }
 0x820   :  { %21083 = vmatmul.mubr.msk.f32.gmra.mrb[82].mxu1 %vm6435_vm2, %v27447_v47  ;;  %v12233_v47 = vld [vmem:[#allocation2 + $0x89] sm:$0xff] }
 0x821   :  { %21085 = vmatprep.mubr.msk.f32.mxu1 %vm6435_vm2, %v27451_v36  ;;  %v12234_v36 = vld [vmem:[#allocation2 + $0x91] sm:$0xff] }
 0x824   :  { %21086 = vmatmul.mubr.msk.f32.gmra.mrb[84].mxu1 %vm6435_vm2, %v27455_v23  ;;  %v12235_v23 = vld [vmem:[#allocation2 + $0xa9] sm:$0xff] }
 0x825   :  { %21088 = vmatprep.mubr.msk.f32.mxu1 %vm6435_vm2, %v27459_v35  ;;  %v12236_v35 = vld [vmem:[#allocation2 + $0xb1] sm:$0xff] }
 0x828   :  { %21089 = vmatmul.mubr.msk.f32.gmra.mrb[86].mxu1 %vm6435_vm2, %v27463_v25  ;;  %v12237_v25 = vld [vmem:[#allocation2 + $0xc9] sm:$0xff] }
 0x829   :  { %21091 = vmatprep.mubr.msk.f32.mxu1 %vm6435_vm2, %v11545_v31  ;;  %v12275_v31 = vld [vmem:[#allocation2 + $0x369] sm:$0xff] }
 0x82c   :  { %21092 = vmatmul.mubr.msk.f32.gmra.mrb[88].mxu1 %vm6435_vm2, %v11546_v33  ;;  %v12276_v33 = vld [vmem:[#allocation2 + $0x371] sm:$0xff] }
 0x82d   :  { %21094 = vmatprep.mubr.msk.f32.mxu1 %vm6435_vm2, %v27469_v2  ;;  %v12238_v2 = vld [vmem:[#allocation2 + $0xd1] sm:$0xff] }
 0x830   :  { %21095 = vmatmul.mubr.msk.f32.gmra.mrb[90].mxu1 %vm6435_vm2, %v27473_v52  ;;  %v12239_v52 = vld [vmem:[#allocation2 + $0xe9] sm:$0xff] }
 0x831   :  { %21097 = vmatprep.mubr.msk.f32.mxu1 %vm6435_vm2, %v27477_v30  ;;  %v12240_v30 = vld [vmem:[#allocation2 + $0xf1] sm:$0xff] }
 0x834   :  { %21098 = vmatmul.mubr.msk.f32.gmra.mrb[92].mxu1 %vm6435_vm2, %v27481_v45  ;;  %v12241_v45 = vld [vmem:[#allocation2 + $0x109] sm:$0xff] }
 0x835   :  { %21100 = vmatprep.mubr.msk.f32.mxu1 %vm6435_vm2, %v27485_v58  ;;  %v12242_v58 = vld [vmem:[#allocation2 + $0x111] sm:$0xff] }
 0x838   :  { %21101 = vmatmul.mubr.msk.f32.gmra.mrb[94].mxu1 %vm6435_vm2, %v27489_v59  ;;  %v12243_v59 = vld [vmem:[#allocation2 + $0x129] sm:$0xff] }
 0x839   :  { %21103 = vmatprep.mubr.msk.f32.mxu1 %vm6435_vm2, %v27493_v60  ;;  %v12244_v60 = vld [vmem:[#allocation2 + $0x131] sm:$0xff] }
 0x83c   :  { %21104 = vmatmul.mubr.msk.f32.gmra.mrb[96].mxu1 %vm6435_vm2, %v27497_v27  ;;  %v12245_v27 = vld [vmem:[#allocation2 + $0x149] sm:$0xff] }
 0x83d   :  { %21106 = vmatprep.mubr.msk.f32.mxu1 %vm6435_vm2, %v27501_v22  ;;  %v12246_v22 = vld [vmem:[#allocation2 + $0x151] sm:$0xff] }
 0x840   :  { %21107 = vmatmul.mubr.msk.f32.gmra.mrb[98].mxu1 %vm6435_vm2, %v27505_v19  ;;  %v12247_v19 = vld [vmem:[#allocation2 + $0x169] sm:$0xff] }
 0x841   :  { %21109 = vmatprep.mubr.msk.f32.mxu1 %vm6435_vm2, %v27509_v28  ;;  %v12248_v28 = vld [vmem:[#allocation2 + $0x171] sm:$0xff] }
 0x844   :  { %21110 = vmatmul.mubr.msk.f32.gmra.mrb[100].mxu1 %vm6435_vm2, %v27513_v16  ;;  %v12249_v16 = vld [vmem:[#allocation2 + $0x189] sm:$0xff] }
 0x845   :  { %21112 = vmatprep.mubr.msk.f32.mxu1 %vm6435_vm2, %v27517_v18  ;;  %v12250_v18 = vld [vmem:[#allocation2 + $0x191] sm:$0xff] }
 0x848   :  { %21113 = vmatmul.mubr.msk.f32.gmra.mrb[102].mxu1 %vm6435_vm2, %v27521_v61  ;;  %v12251_v61 = vld [vmem:[#allocation2 + $0x1a9] sm:$0xff] }
 0x849   :  { %21115 = vmatprep.mubr.msk.f32.mxu1 %vm6435_vm2, %v27525_v4  ;;  %v12252_v4 = vld [vmem:[#allocation2 + $0x1b1] sm:$0xff] }
 0x84c   :  { %21116 = vmatmul.mubr.msk.f32.gmra.mrb[104].mxu1 %vm6435_vm2, %v27529_v29  ;;  %v12253_v29 = vld [vmem:[#allocation2 + $0x1c9] sm:$0xff] }
 0x84d   :  { %21118 = vmatprep.mubr.msk.f32.mxu1 %vm6435_vm2, %v27533_v38  ;;  %v12254_v38 = vld [vmem:[#allocation2 + $0x1d1] sm:$0xff] }
 0x850   :  { %21119 = vmatmul.mubr.msk.f32.gmra.mrb[106].mxu1 %vm6435_vm2, %v27537_v62  ;;  %v12255_v62 = vld [vmem:[#allocation2 + $0x1e9] sm:$0xff] }
 0x851   :  { %21121 = vmatprep.mubr.msk.f32.mxu1 %vm6435_vm2, %v29379_v43  ;;  %v12277_v43 = vld [vmem:[#allocation2 + $0x389] sm:$0xff] }
 0x854   :  { %21122 = vmatmul.mubr.msk.f32.gmra.mrb[108].mxu1 %vm6435_vm2, %v29380_v51  ;;  %v12278_v51 = vld [vmem:[#allocation2 + $0x391] sm:$0xff] }
 0x855   :  { %21124 = vmatprep.mubr.msk.f32.mxu1 %vm6435_vm2, %v29381_v9  ;;  %v12279_v9 = vld [vmem:[#allocation2 + $0x3a9] sm:$0xff] }
 0x858   :  { %21125 = vmatmul.mubr.msk.f32.gmra.mrb[110].mxu1 %vm6435_vm2, %v29382_v54  ;;  %v12280_v54 = vld [vmem:[#allocation2 + $0x3b1] sm:$0xff] }
 0x859   :  { %21127 = vmatprep.mubr.msk.f32.mxu1 %vm6435_vm2, %v29383_v37  ;;  %v12281_v37 = vld [vmem:[#allocation2 + $0x3c9] sm:$0xff] }
 0x85c   :  { %21128 = vmatmul.mubr.msk.f32.gmra.mrb[112].mxu1 %vm6435_vm2, %v29384_v6  ;;  %v12282_v6 = vld [vmem:[#allocation2 + $0x3d1] sm:$0xff] }
 0x85d   :  { %21130 = vmatprep.mubr.msk.f32.mxu1 %vm6435_vm2, %v29385_v0  ;;  %v12283_v0 = vld [vmem:[#allocation2 + $0x3e9] sm:$0xff] }
 0x860   :  { %21131 = vmatmul.mubr.msk.f32.gmra.mrb[114].mxu1 %vm6435_vm2, %v29386_v39  ;;  %v17665_v39 = vld [vmem:[%s28911_s5 + $0x50] sm:$0xff] }
 0x861   :  { %21133 = vmatprep.mubr.msk.f32.mxu1 %vm6435_vm2, %v29387_v53  ;;  %v17666_v53 = vld [vmem:[%s28911_s5 + $0x58] sm:$0xff] }
 0x864   :  { %21134 = vmatmul.mubr.msk.f32.gmra.mrb[116].mxu1 %vm6435_vm2, %v29388_v49  ;;  %v21802_v49 = vpack.c.bf16 %v17666_v53, %v17665_v39 }
 0x865   :  { %21136 = vmatprep.mubr.msk.f32.mxu1 %vm6435_vm2, %v29389_v17  ;;  %v12284_v17 = vld [vmem:[#allocation2 + $0x3f1] sm:$0xff] }
 0x866   :  { %21803 = vmatprep.subr.bf16.mxu0 %v21802_v49 }
 0x867   :  { %21805 = vmatpush3.bf16.msra.mxu0 %v21802_v49 }
 0x868   :  { %21137 = vmatmul.mubr.msk.f32.gmra.mrb[118].mxu1 %vm6435_vm2, %v29390_v55  ;;  %v17667_v55 = vld [vmem:[%s28911_s5 + $0x60] sm:$0xff] }
 0x869   :  { %21139 = vmatprep.mubr.msk.f32.mxu1 %vm6435_vm2, %v11577_v1  ;;  %v12285_v1 = vld [vmem:[#allocation2 + $0x409] sm:$0xff] }
 0x86c   :  { %21140 = vmatmul.mubr.msk.f32.gmra.mrb[120].mxu1 %vm6435_vm2, %v11578_v14  ;;  %v17668_v14 = vld [vmem:[%s28911_s5 + $0x68] sm:$0xff] }
 0x86d   :  { %21158 = vmatprep.mubr.msk.f32.mxu1 %vm6435_vm2, %v12229_v40  ;;  %v21806_v40 = vpack.c.bf16 %v17668_v14, %v17667_v55 }
 0x86f   :  { %21807 = vmatprep.subr.bf16.mxu0 %v21806_v40 }
 0x870   :  { %21159 = vmatmul.mubr.msk.f32.vlgmr.msra.gmra.mrb[58].mxu1 %vm6435_vm2, %v12230_v44  ;;  %21809 = vmatpush3.bf16.msra.mxu0 %v21806_v40  ;;  %v17670_v44 = vld [vmem:[%s28911_s5 + $0x78] sm:$0xff] }
 0x871   :  { %21161 = vmatprep.mubr.msk.f32.mxu1 %vm6435_vm2, %v12231_v15  ;;  %v21810_v15 = vpack.c.bf16 %v17670_v44, %v17669_v34  ;;  %v13414_v34 = vld [vmem:[%s28911_s5 + $0x18] sm:$0xff] }
 0x873   :  { %21811 = vmatprep.subr.bf16.mxu0 %v21810_v15 }
 0x874   :  { %21162 = vmatmul.mubr.msk.f32.gmra.mrb[60].mxu1 %vm6435_vm2, %v12232_v50  ;;  %v12288_v50 = vld [vmem:[#allocation2 + $0x431] sm:$0xff]  ;;  %21813 = vmatpush3.bf16.msra.mxu0 %v21810_v15 }
 0x875   :  { %21164 = vmatprep.mubr.msk.f32.mxu1 %vm6435_vm2, %v12233_v47  ;;  %v29392_v47 = vld [vmem:[#allocation27_spill] sm:$0xff] }
 0x878   :  { %21165 = vmatmul.mubr.msk.f32.gmra.mrb[62].mxu1 %vm6435_vm2, %v12234_v36  ;;  %v13419_v36 = vld [vmem:[#allocation3 + $0x8] sm:$0xff] }
 0x879   :  { %21167 = vmatprep.mubr.msk.f32.mxu1 %vm6435_vm2, %v12235_v23  ;;  %v12291_v23 = vld [vmem:[#allocation2 + $0x469] sm:$0xff]  ;;  %21270 = vmatprep.mubr.msk.f32.mxu0 %vm6435_vm2, %v13419_v36 }
 0x87c   :  { %21168 = vmatmul.mubr.msk.f32.gmra.mrb[64].mxu1 %vm6435_vm2, %v12236_v35  ;;  %v29393_v35 = vld [vmem:[#allocation28_spill] sm:$0xff] }
 0x87d   :  { %21170 = vmatprep.mubr.msk.f32.mxu1 %vm6435_vm2, %v12237_v25  ;;  %v12292_v25 = vld [vmem:[#allocation2 + $0x471] sm:$0xff] }
 0x880   :  { %21171 = vmatmul.mubr.msk.f32.gmra.mrb[66].mxu1 %vm6435_vm2, %v12238_v2  ;;  %v13411_v2 = vld [vmem:[%s28911_s5] sm:$0xff] }
 0x881   :  { %21173 = vmatprep.mubr.msk.f32.mxu1 %vm6435_vm2, %v12239_v52  ;;  %v13412_v52 = vld [vmem:[%s28911_s5 + $0x8] sm:$0xff] }
 0x884   :  { %21174 = vmatmul.mubr.msk.f32.gmra.mrb[68].mxu1 %vm6435_vm2, %v12240_v30  ;;  %v28091_v30 = vpack.c.bf16 %v13412_v52, %v13411_v2  ;;  %v13415_v2 = vld [vmem:[%s28911_s5 + $0x20] sm:$0xff]  ;;  %v13416_v52 = vld [vmem:[%s28911_s5 + $0x28] sm:$0xff] }
 0x885   :  { %21176 = vmatprep.mubr.msk.f32.mxu1 %vm6435_vm2, %v12241_v45  ;;  %v28097_v45 = vld [vmem:[%s28912_s4] ss:$0 sm:$0xff] }
 0x886   :  { %21815 = vmatprep.subr.bf16.mxu0 %v28091_v30 }
 0x888   :  { %21177 = vmatmul.mubr.msk.f32.gmra.mrb[70].mxu1 %vm6435_vm2, %v12242_v58 }
 0x889   :  { %21179 = vmatprep.mubr.msk.f32.mxu1 %vm6435_vm2, %v12243_v59 }
 0x88c   :  { %21180 = vmatmul.mubr.msk.f32.gmra.mrb[72].mxu1 %vm6435_vm2, %v12244_v60 }
 0x88d   :  { %21182 = vmatprep.mubr.msk.f32.mxu1 %vm6435_vm2, %v12245_v27 }
 0x890   :  { %21183 = vmatmul.mubr.msk.f32.gmra.mrb[74].mxu1 %vm6435_vm2, %v12246_v22 }
 0x891   :  { %21185 = vmatprep.mubr.msk.f32.mxu1 %vm6435_vm2, %v12247_v19 }
 0x894   :  { %21186 = vmatmul.mubr.msk.f32.gmra.mrb[76].mxu1 %vm6435_vm2, %v12248_v28 }
 0x895   :  { %21188 = vmatprep.mubr.msk.f32.mxu1 %vm6435_vm2, %v12249_v16 }
 0x898   :  { %21189 = vmatmul.mubr.msk.f32.gmra.mrb[78].mxu1 %vm6435_vm2, %v12250_v18 }
 0x899   :  { %21191 = vmatprep.mubr.msk.f32.mxu1 %vm6435_vm2, %v12251_v61 }
 0x89c   :  { %21192 = vmatmul.mubr.msk.f32.gmra.mrb[80].mxu1 %vm6435_vm2, %v12252_v4 }
 0x89d   :  { %21194 = vmatprep.mubr.msk.f32.mxu1 %vm6435_vm2, %v12253_v29 }
 0x8a0   :  { %21195 = vmatmul.mubr.msk.f32.gmra.mrb[82].mxu1 %vm6435_vm2, %v12254_v38 }
 0x8a1   :  { %21197 = vmatprep.mubr.msk.f32.mxu1 %vm6435_vm2, %v12255_v62 }
 0x8a4   :  { %21198 = vmatmul.mubr.msk.f32.gmra.mrb[84].mxu1 %vm6435_vm2, %v12256_v63 }
 0x8a5   :  { %21200 = vmatprep.mubr.msk.f32.mxu1 %vm6435_vm2, %v27677_v41  ;;  %v12265_v41 = vld [vmem:[#allocation2 + $0x2c9] sm:$0xff] }
 0x8a8   :  { %21201 = vmatmul.mubr.msk.f32.gmra.mrb[86].mxu1 %vm6435_vm2, %v29391_v21 }
 0x8a9   :  { %21203 = vmatprep.mubr.msk.f32.mxu1 %vm6435_vm2, %v12259_v20 }
 0x8ac   :  { %21204 = vmatmul.mubr.msk.f32.gmra.mrb[88].mxu1 %vm6435_vm2, %v12260_v7 }
 0x8ad   :  { %21206 = vmatprep.mubr.msk.f32.mxu1 %vm6435_vm2, %v12261_v42 }
 0x8b0   :  { %21207 = vmatmul.mubr.msk.f32.gmra.mrb[90].mxu1 %vm6435_vm2, %v12262_v8 }
 0x8b1   :  { %21209 = vmatprep.mubr.msk.f32.mxu1 %vm6435_vm2, %v12263_v3 }
 0x8b4   :  { %21210 = vmatmul.mubr.msk.f32.gmra.mrb[92].mxu1 %vm6435_vm2, %v12264_v46 }
 0x8b5   :  { %21212 = vmatprep.mubr.msk.f32.mxu1 %vm6435_vm2, %v12265_v41 }
 0x8b8   :  { %21213 = vmatmul.mubr.msk.f32.gmra.mrb[94].mxu1 %vm6435_vm2, %v12266_v12 }
 0x8b9   :  { %21215 = vmatprep.mubr.msk.f32.mxu1 %vm6435_vm2, %v12267_v48 }
 0x8bc   :  { %21216 = vmatmul.mubr.msk.f32.gmra.mrb[96].mxu1 %vm6435_vm2, %v12268_v56 }
 0x8bd   :  { %21218 = vmatprep.mubr.msk.f32.mxu1 %vm6435_vm2, %v12269_v5 }
 0x8c0   :  { %21219 = vmatmul.mubr.msk.f32.gmra.mrb[98].mxu1 %vm6435_vm2, %v12270_v26 }
 0x8c1   :  { %21221 = vmatprep.mubr.msk.f32.mxu1 %vm6435_vm2, %v12271_v10 }
 0x8c4   :  { %21222 = vmatmul.mubr.msk.f32.gmra.mrb[100].mxu1 %vm6435_vm2, %v12272_v32 }
 0x8c5   :  { %21224 = vmatprep.mubr.msk.f32.mxu1 %vm6435_vm2, %v12273_v11 }
 0x8c8   :  { %21225 = vmatmul.mubr.msk.f32.gmra.mrb[102].mxu1 %vm6435_vm2, %v12274_v57 }
 0x8c9   :  { %21227 = vmatprep.mubr.msk.f32.mxu1 %vm6435_vm2, %v12275_v31 }
 0x8cc   :  { %21228 = vmatmul.mubr.msk.f32.gmra.mrb[104].mxu1 %vm6435_vm2, %v12276_v33 }
 0x8cd   :  { %21230 = vmatprep.mubr.msk.f32.mxu1 %vm6435_vm2, %v12277_v43 }
 0x8d0   :  { %21231 = vmatmul.mubr.msk.f32.gmra.mrb[106].mxu1 %vm6435_vm2, %v12278_v51 }
 0x8d1   :  { %21233 = vmatprep.mubr.msk.f32.mxu1 %vm6435_vm2, %v12279_v9 }
 0x8d4   :  { %21234 = vmatmul.mubr.msk.f32.gmra.mrb[108].mxu1 %vm6435_vm2, %v12280_v54 }
 0x8d5   :  { %21236 = vmatprep.mubr.msk.f32.mxu1 %vm6435_vm2, %v12281_v37 }
 0x8d8   :  { %21237 = vmatmul.mubr.msk.f32.gmra.mrb[110].mxu1 %vm6435_vm2, %v12282_v6 }
 0x8d9   :  { %21239 = vmatprep.mubr.msk.f32.mxu1 %vm6435_vm2, %v12283_v0 }
 0x8dc   :  { %21240 = vmatmul.mubr.msk.f32.gmra.mrb[112].mxu1 %vm6435_vm2, %v12284_v17 }
 0x8dd   :  { %21242 = vmatprep.mubr.msk.f32.mxu1 %vm6435_vm2, %v12285_v1 }
 0x8e0   :  { %21243 = vmatmul.mubr.msk.f32.gmra.mrb[114].mxu1 %vm6435_vm2, %v12286_v13 }
 0x8e1   :  { %21245 = vmatprep.mubr.msk.f32.mxu1 %vm6435_vm2, %v12287_v24  ;;  %v13413_v24 = vld [vmem:[%s28911_s5 + $0x10] sm:$0xff] }
 0x8e4   :  { %21246 = vmatmul.mubr.msk.f32.gmra.mrb[116].mxu1 %vm6435_vm2, %v12288_v50 }
 0x8e5   :  { %21248 = vmatprep.mubr.msk.f32.mxu1 %vm6435_vm2, %v29392_v47 }
 0x8e8   :  { %21249 = vmatmul.mubr.msk.f32.gmra.mrb[118].mxu1 %vm6435_vm2, %v29393_v35 }
 0x8e9   :  { %21251 = vmatprep.mubr.msk.f32.mxu1 %vm6435_vm2, %v12291_v23 }
 0x8ec   :  { %21252 = vmatmul.mubr.msk.f32.gmra.mrb[120].mxu1 %vm6435_vm2, %v12292_v25  ;;  %v21818_v25 = vpack.c.bf16 %v13414_v34, %v13413_v24 }
 0x943   :  { %v21160_v58 = vpop.f32.mrb[58].mxu1 }
 0x944   :  { %v12951_v59 = vadd.f32 %v21160_v58, %v28097_v45  ;;  %v12560_v60 = vpop.f32.mrb[59].mxu1 }
 0x945   :  { %v12950_v27 = vadd.f32 %v28097_v45, %v12560_v60 }
 0x946   :  { %v13015_v22 = vmax.f32 %v12951_v59, 0.0 }
 0x947   :  { %v13014_v19 = vmax.f32 %v12950_v27, 0.0  ;;  %v21163_v28 = vpop.f32.mrb[60].mxu1 }
 0x948   :  { %13079 = vst.msk [vmem:[#allocation2 + $0x30] sm:$0xff] %vm6435_vm2, %v13015_v22  ;;  %v12953_v16 = vadd.f32 %v21163_v28, %v28097_v45  ;;  %v12570_v18 = vpop.f32.mrb[61].mxu1 }
 0x949   :  { %13078 = vst.msk [vmem:[#allocation2 + $0x28] sm:$0xff] %vm6435_vm2, %v13014_v19  ;;  %v12952_v61 = vadd.f32 %v28097_v45, %v12570_v18 }
 0x94a   :  { %v13017_v4 = vmax.f32 %v12953_v16, 0.0 }
 0x94b   :  { %v13016_v29 = vmax.f32 %v12952_v61, 0.0  ;;  %v21166_v38 = vpop.f32.mrb[62].mxu1 }
 0x94c   :  { %13081 = vst.msk [vmem:[#allocation2 + $0x50] sm:$0xff] %vm6435_vm2, %v13017_v4  ;;  %v12955_v62 = vadd.f32 %v21166_v38, %v28097_v45  ;;  %v12580_v63 = vpop.f32.mrb[63].mxu1  ;;  %v21822_v4 = vpack.c.bf16 %v13416_v52, %v13415_v2 }
 0x94d   :  { %13080 = vst.msk [vmem:[#allocation2 + $0x48] sm:$0xff] %vm6435_vm2, %v13016_v29  ;;  %v12954_v20 = vadd.f32 %v28097_v45, %v12580_v63  ;;  %v13417_v63 = vld [vmem:[%s28911_s5 + $0x30] sm:$0xff] }
 0x94e   :  { %v13019_v21 = vmax.f32 %v12955_v62, 0.0 }
 0x94f   :  { %v13018_v7 = vmax.f32 %v12954_v20, 0.0  ;;  %v21169_v42 = vpop.f32.mrb[64].mxu1  ;;  %v13418_v20 = vld [vmem:[%s28911_s5 + $0x38] sm:$0xff] }
 0x950   :  { %13083 = vst.msk [vmem:[#allocation2 + $0x70] sm:$0xff] %vm6435_vm2, %v13019_v21  ;;  %v12957_v8 = vadd.f32 %v21169_v42, %v28097_v45  ;;  %v12590_v3 = vpop.f32.mrb[65].mxu1  ;;  %v13143_v46 = vld [vmem:[#allocation2 + $0x28] ss:$2 sm:$0xff]  ;;  %v13175_v41 = vld [vmem:[#allocation2 + $0x29] ss:$2 sm:$0xff] }
 0x951   :  { %13082 = vst.msk [vmem:[#allocation2 + $0x68] sm:$0xff] %vm6435_vm2, %v13018_v7  ;;  %v12956_v12 = vadd.f32 %v28097_v45, %v12590_v3  ;;  %v13206_v26 = vmax.f32 %v13143_v46, %v13175_v41  ;;  %v21826_v41 = vpack.c.bf16 %v13418_v20, %v13417_v63 }
 0x952   :  { %v13021_v48 = vmax.f32 %v12957_v8, 0.0 }
 0x953   :  { %v13020_v56 = vmax.f32 %v12956_v12, 0.0  ;;  %v21172_v5 = vpop.f32.mrb[66].mxu1  ;;  %v17703_v12 = vld [vmem:[%s28911_s5 + $0x80] sm:$0xff] }
 0x954   :  { %13085 = vst.msk [vmem:[#allocation2 + $0x90] sm:$0xff] %vm6435_vm2, %v13021_v48  ;;  %v12959_v10 = vadd.f32 %v21172_v5, %v28097_v45  ;;  %v12600_v32 = vpop.f32.mrb[67].mxu1  ;;  %v13223_v11 = vld [vmem:[#allocation2 + $0x48] ss:$2 sm:$0xff]  ;;  %v13271_v43 = vld [vmem:[#allocation2 + $0x49] ss:$2 sm:$0xff] }
 0x955   :  { %13084 = vst.msk [vmem:[#allocation2 + $0x88] sm:$0xff] %vm6435_vm2, %v13020_v56  ;;  %v12958_v57 = vadd.f32 %v28097_v45, %v12600_v32  ;;  %v13254_v31 = vmax.f32 %v13206_v26, %v13223_v11  ;;  %v17704_v48 = vld [vmem:[%s28911_s5 + $0x88] sm:$0xff] }
 0x956   :  { %v13023_v33 = vmax.f32 %v12959_v10, 0.0 }
 0x957   :  { %v13022_v51 = vmax.f32 %v12958_v57, 0.0  ;;  %v21175_v9 = vpop.f32.mrb[68].mxu1  ;;  %v13302_v54 = vmax.f32 %v13254_v31, %v13271_v43 }
 0x958   :  { %13087 = vst.msk [vmem:[#allocation2 + $0xb0] sm:$0xff] %vm6435_vm2, %v13023_v33  ;;  %v12961_v37 = vadd.f32 %v21175_v9, %v28097_v45  ;;  %v12610_v6 = vpop.f32.mrb[69].mxu1  ;;  %v13145_v0 = vld [vmem:[#allocation2 + $0x68] ss:$2 sm:$0xff]  ;;  %v13177_v39 = vld [vmem:[#allocation2 + $0x69] ss:$2 sm:$0xff] }
 0x959   :  { %13086 = vst.msk [vmem:[#allocation2 + $0xa8] sm:$0xff] %vm6435_vm2, %v13022_v51  ;;  %v12960_v53 = vadd.f32 %v28097_v45, %v12610_v6  ;;  %13379 = vst.msk [vmem:[#allocation3 + $0x20] sm:$0xff] %vm6435_vm2, %v13302_v54  ;;  %v13207_v55 = vmax.f32 %v13145_v0, %v13177_v39  ;;  %v28170_v51 = vpack.c.bf16 %v17704_v48, %v17703_v12 }
 0x95a   :  { %v13025_v49 = vmax.f32 %v12961_v37, 0.0 }
 0x95b   :  { %v13024_v17 = vmax.f32 %v12960_v53, 0.0  ;;  %v21178_v1 = vpop.f32.mrb[70].mxu1 }
 0x95c   :  { %13089 = vst.msk [vmem:[#allocation2 + $0xd0] sm:$0xff] %vm6435_vm2, %v13025_v49  ;;  %v12963_v14 = vadd.f32 %v21178_v1, %v28097_v45  ;;  %v12620_v40 = vpop.f32.mrb[71].mxu1  ;;  %v13225_v13 = vld [vmem:[#allocation2 + $0x88] ss:$2 sm:$0xff]  ;;  %v13273_v47 = vld [vmem:[#allocation2 + $0x89] ss:$2 sm:$0xff] }
 0x95d   :  { %13088 = vst.msk [vmem:[#allocation2 + $0xc8] sm:$0xff] %vm6435_vm2, %v13024_v17  ;;  %v12962_v44 = vadd.f32 %v28097_v45, %v12620_v40  ;;  %v13255_v15 = vmax.f32 %v13207_v55, %v13225_v13 }
 0x95e   :  { %v13027_v50 = vmax.f32 %v12963_v14, 0.0 }
 0x95f   :  { %v13026_v36 = vmax.f32 %v12962_v44, 0.0  ;;  %v21181_v23 = vpop.f32.mrb[72].mxu1  ;;  %v13303_v35 = vmax.f32 %v13255_v15, %v13273_v47 }
 0x960   :  { %13091 = vst.msk [vmem:[#allocation2 + $0xf0] sm:$0xff] %vm6435_vm2, %v13027_v50  ;;  %v12965_v58 = vadd.f32 %v21181_v23, %v28097_v45  ;;  %v12630_v59 = vpop.f32.mrb[73].mxu1  ;;  %v13420_v60 = vld [vmem:[#allocation3 + $0x20] sm:$0xff]  ;;  %v13147_v27 = vld [vmem:[#allocation2 + $0xa8] ss:$2 sm:$0xff] }
 0x961   :  { %v13179_v22 = vld [vmem:[#allocation2 + $0xa9] ss:$2 sm:$0xff]  ;;  %13090 = vst.msk [vmem:[#allocation2 + $0xe8] sm:$0xff] %vm6435_vm2, %v13026_v36  ;;  %v12964_v19 = vadd.f32 %v28097_v45, %v12630_v59  ;;  %21271 = vmatmul.mubr.msk.f32.vlgmr.msra.gmra.mrb[64].mxu0 %vm6435_vm2, %v13420_v60  ;;  %13380 = vst.msk [vmem:[#allocation3 + $0x38] sm:$0xff] %vm6435_vm2, %v13303_v35 }
 0x962   :  { %v13029_v28 = vmax.f32 %v12965_v58, 0.0  ;;  %21817 = vmatpush3.bf16.msra.mxu0 %v28091_v30  ;;  %v13208_v61 = vmax.f32 %v13147_v27, %v13179_v22 }
 0x963   :  { %v13028_v16 = vmax.f32 %v12964_v19, 0.0  ;;  %v21184_v18 = vpop.f32.mrb[74].mxu1  ;;  %21819 = vmatprep.subr.bf16.mxu0 %v21818_v25 }
 0x964   :  { %13093 = vst.msk [vmem:[#allocation2 + $0x110] sm:$0xff] %vm6435_vm2, %v13029_v28  ;;  %v12967_v29 = vadd.f32 %v21184_v18, %v28097_v45  ;;  %v12640_v38 = vpop.f32.mrb[75].mxu1  ;;  %v13227_v62 = vld [vmem:[#allocation2 + $0xc8] ss:$2 sm:$0xff]  ;;  %v13275_v42 = vld [vmem:[#allocation2 + $0xc9] ss:$2 sm:$0xff] }
 0x965   :  { %13092 = vst.msk [vmem:[#allocation2 + $0x108] sm:$0xff] %vm6435_vm2, %v13028_v16  ;;  %v12966_v30 = vadd.f32 %v28097_v45, %v12640_v38  ;;  %v13256_v21 = vmax.f32 %v13208_v61, %v13227_v62 }
 0x966   :  { %v13031_v7 = vmax.f32 %v12967_v29, 0.0  ;;  %21821 = vmatpush3.bf16.msra.mxu0 %v21818_v25 }
 0x967   :  { %v13030_v8 = vmax.f32 %v12966_v30, 0.0  ;;  %v21187_v3 = vpop.f32.mrb[76].mxu1  ;;  %v13304_v46 = vmax.f32 %v13256_v21, %v13275_v42  ;;  %21823 = vmatprep.subr.bf16.mxu0 %v21822_v4 }
 0x968   :  { %13095 = vst.msk [vmem:[#allocation2 + $0x130] sm:$0xff] %vm6435_vm2, %v13031_v7  ;;  %v12969_v56 = vadd.f32 %v21187_v3, %v28097_v45  ;;  %v12650_v5 = vpop.f32.mrb[77].mxu1  ;;  %v28163_v26 = vld [vmem:[#allocation3 + $0x38] sm:$0xff]  ;;  %v13149_v10 = vld [vmem:[#allocation2 + $0xe8] ss:$2 sm:$0xff] }
 0x969   :  { %v13181_v32 = vld [vmem:[#allocation2 + $0xe9] ss:$2 sm:$0xff]  ;;  %13094 = vst.msk [vmem:[#allocation2 + $0x128] sm:$0xff] %vm6435_vm2, %v13030_v8  ;;  %v12968_v11 = vadd.f32 %v28097_v45, %v12650_v5  ;;  %21273 = vmatprep.mubr.msk.f32.mxu0 %vm6435_vm2, %v28163_v26  ;;  %13381 = vst.msk [vmem:[#allocation3 + $0x50] sm:$0xff] %vm6435_vm2, %v13304_v46 }
 0x96a   :  { %v13033_v57 = vmax.f32 %v12969_v56, 0.0  ;;  %21825 = vmatpush3.bf16.msra.mxu0 %v21822_v4  ;;  %v13209_v43 = vmax.f32 %v13149_v10, %v13181_v32 }
 0x96b   :  { %v13032_v31 = vmax.f32 %v12968_v11, 0.0  ;;  %v21190_v33 = vpop.f32.mrb[78].mxu1  ;;  %21827 = vmatprep.subr.bf16.mxu0 %v21826_v41 }
 0x96c   :  { %13097 = vst.msk [vmem:[#allocation2 + $0x150] sm:$0xff] %vm6435_vm2, %v13033_v57  ;;  %v12971_v9 = vadd.f32 %v21190_v33, %v28097_v45  ;;  %v12660_v54 = vpop.f32.mrb[79].mxu1  ;;  %v13229_v37 = vld [vmem:[#allocation2 + $0x108] ss:$2 sm:$0xff]  ;;  %v13277_v53 = vld [vmem:[#allocation2 + $0x109] ss:$2 sm:$0xff] }
 0x96d   :  { %13096 = vst.msk [vmem:[#allocation2 + $0x148] sm:$0xff] %vm6435_vm2, %v13032_v31  ;;  %v12970_v6 = vadd.f32 %v28097_v45, %v12660_v54  ;;  %v13257_v0 = vmax.f32 %v13209_v43, %v13229_v37 }
 0x96e   :  { %v13035_v39 = vmax.f32 %v12971_v9, 0.0  ;;  %21829 = vmatpush3.bf16.msra.mxu0 %v21826_v41 }
 0x96f   :  { %v13034_v49 = vmax.f32 %v12970_v6, 0.0  ;;  %v21193_v17 = vpop.f32.mrb[80].mxu1  ;;  %v13305_v1 = vmax.f32 %v13257_v0, %v13277_v53  ;;  %21831 = vmatprep.subr.bf16.mxu0 %v28170_v51 }
 0x970   :  { %13099 = vst.msk [vmem:[#allocation2 + $0x170] sm:$0xff] %vm6435_vm2, %v13035_v39  ;;  %v12973_v55 = vadd.f32 %v21193_v17, %v28097_v45  ;;  %v12670_v14 = vpop.f32.mrb[81].mxu1  ;;  %v28179_v40 = vld [vmem:[#allocation3 + $0x50] sm:$0xff] }
 0x971   :  { %v13151_v13 = vld [vmem:[#allocation2 + $0x128] ss:$2 sm:$0xff]  ;;  %v13183_v24 = vld [vmem:[#allocation2 + $0x129] ss:$2 sm:$0xff]  ;;  %13098 = vst.msk [vmem:[#allocation2 + $0x168] sm:$0xff] %vm6435_vm2, %v13034_v49  ;;  %v12972_v34 = vadd.f32 %v28097_v45, %v12670_v14  ;;  %21274 = vmatmul.mubr.msk.f32.gmra.mrb[66].mxu0 %vm6435_vm2, %v28179_v40  ;;  %13382 = vst.msk [vmem:[#allocation3 + $0x68] sm:$0xff] %vm6435_vm2, %v13305_v1 }
 0x972   :  { %v13037_v44 = vmax.f32 %v12973_v55, 0.0  ;;  %v13210_v47 = vmax.f32 %v13151_v13, %v13183_v24 }
 0x973   :  { %v13036_v15 = vmax.f32 %v12972_v34, 0.0  ;;  %v21196_v50 = vpop.f32.mrb[82].mxu1 }
 0x974   :  { %13101 = vst.msk [vmem:[#allocation2 + $0x190] sm:$0xff] %vm6435_vm2, %v13037_v44  ;;  %v12975_v36 = vadd.f32 %v21196_v50, %v28097_v45  ;;  %v12680_v23 = vpop.f32.mrb[83].mxu1  ;;  %v13231_v35 = vld [vmem:[#allocation2 + $0x148] ss:$2 sm:$0xff]  ;;  %v13279_v58 = vld [vmem:[#allocation2 + $0x149] ss:$2 sm:$0xff] }
 0x975   :  { %13100 = vst.msk [vmem:[#allocation2 + $0x188] sm:$0xff] %vm6435_vm2, %v13036_v15  ;;  %v12974_v25 = vadd.f32 %v28097_v45, %v12680_v23  ;;  %v13258_v2 = vmax.f32 %v13210_v47, %v13231_v35 }
 0x976   :  { %v13039_v52 = vmax.f32 %v12975_v36, 0.0 }
 0x977   :  { %v13038_v59 = vmax.f32 %v12974_v25, 0.0  ;;  %v21199_v60 = vpop.f32.mrb[84].mxu1  ;;  %v13306_v27 = vmax.f32 %v13258_v2, %v13279_v58 }
 0x978   :  { %13103 = vst.msk [vmem:[#allocation2 + $0x1b0] sm:$0xff] %vm6435_vm2, %v13039_v52  ;;  %v12977_v22 = vadd.f32 %v21199_v60, %v28097_v45  ;;  %v12690_v19 = vpop.f32.mrb[85].mxu1  ;;  %v28192_v28 = vld [vmem:[#allocation3 + $0x68] sm:$0xff] }
 0x979   :  { %v13153_v16 = vld [vmem:[#allocation2 + $0x168] ss:$2 sm:$0xff]  ;;  %v13185_v18 = vld [vmem:[#allocation2 + $0x169] ss:$2 sm:$0xff]  ;;  %13102 = vst.msk [vmem:[#allocation2 + $0x1a8] sm:$0xff] %vm6435_vm2, %v13038_v59  ;;  %v12976_v61 = vadd.f32 %v28097_v45, %v12690_v19  ;;  %21276 = vmatprep.mubr.msk.f32.mxu0 %vm6435_vm2, %v28192_v28  ;;  %13383 = vst.msk [vmem:[#allocation3 + $0x80] sm:$0xff] %vm6435_vm2, %v13306_v27 }
 0x97a   :  { %v13041_v4 = vmax.f32 %v12977_v22, 0.0  ;;  %v13211_v62 = vmax.f32 %v13153_v16, %v13185_v18  ;;  %v13427_v27 = vld [vmem:[#allocation3 + $0xf8] sm:$0xff] }
 0x97b   :  { %v13040_v29 = vmax.f32 %v12976_v61, 0.0  ;;  %v21202_v38 = vpop.f32.mrb[86].mxu1 }
 0x97c   :  { %13105 = vst.msk [vmem:[#allocation2 + $0x1d0] sm:$0xff] %vm6435_vm2, %v13041_v4  ;;  %v12979_v63 = vadd.f32 %v21202_v38, %v28097_v45  ;;  %v12700_v20 = vpop.f32.mrb[87].mxu1  ;;  %v13233_v30 = vld [vmem:[#allocation2 + $0x188] ss:$2 sm:$0xff]  ;;  %v13281_v8 = vld [vmem:[#allocation2 + $0x189] ss:$2 sm:$0xff] }
 0x97d   :  { %13104 = vst.msk [vmem:[#allocation2 + $0x1c8] sm:$0xff] %vm6435_vm2, %v13040_v29  ;;  %v12978_v21 = vadd.f32 %v28097_v45, %v12700_v20  ;;  %v13259_v7 = vmax.f32 %v13211_v62, %v13233_v30 }
 0x97e   :  { %v13043_v42 = vmax.f32 %v12979_v63, 0.0 }
 0x97f   :  { %v13042_v3 = vmax.f32 %v12978_v21, 0.0  ;;  %v21205_v46 = vpop.f32.mrb[88].mxu1  ;;  %v13307_v41 = vmax.f32 %v13259_v7, %v13281_v8 }
 0x980   :  { %13107 = vst.msk [vmem:[#allocation2 + $0x1f0] sm:$0xff] %vm6435_vm2, %v13043_v42  ;;  %v12981_v12 = vadd.f32 %v21205_v46, %v28097_v45  ;;  %v12710_v48 = vpop.f32.mrb[89].mxu1  ;;  %v28205_v56 = vld [vmem:[#allocation3 + $0x80] sm:$0xff]  ;;  %v13155_v5 = vld [vmem:[#allocation2 + $0x1a8] ss:$2 sm:$0xff] }
 0x981   :  { %v13187_v10 = vld [vmem:[#allocation2 + $0x1a9] ss:$2 sm:$0xff]  ;;  %13106 = vst.msk [vmem:[#allocation2 + $0x1e8] sm:$0xff] %vm6435_vm2, %v13042_v3  ;;  %v12980_v32 = vadd.f32 %v28097_v45, %v12710_v48  ;;  %21277 = vmatmul.mubr.msk.f32.gmra.mrb[68].mxu0 %vm6435_vm2, %v28205_v56  ;;  %13384 = vst.msk [vmem:[#allocation3 + $0x98] sm:$0xff] %vm6435_vm2, %v13307_v41 }
 0x982   :  { %v13045_v11 = vmax.f32 %v12981_v12, 0.0  ;;  %v13212_v33 = vmax.f32 %v13155_v5, %v13187_v10 }
 0x983   :  { %v13044_v57 = vmax.f32 %v12980_v32, 0.0  ;;  %v21208_v31 = vpop.f32.mrb[90].mxu1 }
 0x984   :  { %13109 = vst.msk [vmem:[#allocation2 + $0x210] sm:$0xff] %vm6435_vm2, %v13045_v11  ;;  %v12983_v43 = vadd.f32 %v21208_v31, %v28097_v45  ;;  %v12720_v9 = vpop.f32.mrb[91].mxu1  ;;  %v13235_v54 = vld [vmem:[#allocation2 + $0x1c8] ss:$2 sm:$0xff]  ;;  %v13283_v39 = vld [vmem:[#allocation2 + $0x1c9] ss:$2 sm:$0xff] }
 0x985   :  { %13108 = vst.msk [vmem:[#allocation2 + $0x208] sm:$0xff] %vm6435_vm2, %v13044_v57  ;;  %v12982_v37 = vadd.f32 %v28097_v45, %v12720_v9  ;;  %v13260_v6 = vmax.f32 %v13212_v33, %v13235_v54 }
 0x986   :  { %v13047_v0 = vmax.f32 %v12983_v43, 0.0 }
 0x987   :  { %v13046_v53 = vmax.f32 %v12982_v37, 0.0  ;;  %v21211_v49 = vpop.f32.mrb[92].mxu1  ;;  %v13308_v17 = vmax.f32 %v13260_v6, %v13283_v39 }
 0x988   :  { %13111 = vst.msk [vmem:[#allocation2 + $0x270] sm:$0xff] %vm6435_vm2, %v13047_v0  ;;  %v12985_v1 = vadd.f32 %v21211_v49, %v28097_v45  ;;  %v12730_v55 = vpop.f32.mrb[93].mxu1  ;;  %v28218_v14 = vld [vmem:[#allocation3 + $0x98] sm:$0xff]  ;;  %v13157_v24 = vld [vmem:[#allocation2 + $0x1e8] ss:$2 sm:$0xff] }
 0x989   :  { %13110 = vst.msk [vmem:[#allocation2 + $0x268] sm:$0xff] %vm6435_vm2, %v13046_v53  ;;  %v12984_v13 = vadd.f32 %v28097_v45, %v12730_v55  ;;  %21279 = vmatprep.mubr.msk.f32.mxu0 %vm6435_vm2, %v28218_v14  ;;  %13385 = vst.msk [vmem:[#allocation3 + $0xb0] sm:$0xff] %vm6435_vm2, %v13308_v17  ;;  %v13189_v34 = vld [vmem:[#allocation2 + $0x1e9] ss:$2 sm:$0xff] }
 0x98a   :  { %v13049_v44 = vmax.f32 %v12985_v1, 0.0  ;;  %v13213_v47 = vmax.f32 %v13157_v24, %v13189_v34 }
 0x98b   :  { %v13048_v15 = vmax.f32 %v12984_v13, 0.0  ;;  %v21214_v50 = vpop.f32.mrb[94].mxu1 }
 0x98c   :  { %13113 = vst.msk [vmem:[#allocation2 + $0x290] sm:$0xff] %vm6435_vm2, %v13049_v44  ;;  %v12987_v36 = vadd.f32 %v21214_v50, %v28097_v45  ;;  %v12740_v23 = vpop.f32.mrb[95].mxu1  ;;  %v13237_v35 = vld [vmem:[#allocation2 + $0x208] ss:$2 sm:$0xff]  ;;  %v13285_v58 = vld [vmem:[#allocation2 + $0x209] ss:$2 sm:$0xff] }
 0x98d   :  { %13112 = vst.msk [vmem:[#allocation2 + $0x288] sm:$0xff] %vm6435_vm2, %v13048_v15  ;;  %v12986_v25 = vadd.f32 %v28097_v45, %v12740_v23  ;;  %v13261_v2 = vmax.f32 %v13213_v47, %v13237_v35 }
 0x98e   :  { %v13051_v52 = vmax.f32 %v12987_v36, 0.0 }
 0x98f   :  { %v13050_v59 = vmax.f32 %v12986_v25, 0.0  ;;  %v21217_v60 = vpop.f32.mrb[96].mxu1  ;;  %v13309_v22 = vmax.f32 %v13261_v2, %v13285_v58 }
 0x990   :  { %13115 = vst.msk [vmem:[#allocation2 + $0x2b0] sm:$0xff] %vm6435_vm2, %v13051_v52  ;;  %v12989_v19 = vadd.f32 %v21217_v60, %v28097_v45  ;;  %v12750_v16 = vpop.f32.mrb[97].mxu1  ;;  %v28231_v18 = vld [vmem:[#allocation3 + $0xb0] sm:$0xff] }
 0x991   :  { %v13159_v61 = vld [vmem:[#allocation2 + $0x268] ss:$2 sm:$0xff]  ;;  %v13191_v4 = vld [vmem:[#allocation2 + $0x269] ss:$2 sm:$0xff]  ;;  %13114 = vst.msk [vmem:[#allocation2 + $0x2a8] sm:$0xff] %vm6435_vm2, %v13050_v59  ;;  %v12988_v29 = vadd.f32 %v28097_v45, %v12750_v16  ;;  %21280 = vmatmul.mubr.msk.f32.gmra.mrb[70].mxu0 %vm6435_vm2, %v28231_v18  ;;  %13386 = vst.msk [vmem:[#allocation3 + $0xc8] sm:$0xff] %vm6435_vm2, %v13309_v22 }
 0x992   :  { %v13053_v38 = vmax.f32 %v12989_v19, 0.0  ;;  %21282 = vmatprep.mubr.msk.f32.mxu0 %vm6435_vm2, %v13427_v27  ;;  %v13214_v20 = vmax.f32 %v13159_v61, %v13191_v4 }
 0x993   :  { %v13052_v62 = vmax.f32 %v12988_v29, 0.0  ;;  %v21220_v63 = vpop.f32.mrb[98].mxu1 }
 0x994   :  { %13117 = vst.msk [vmem:[#allocation2 + $0x2d0] sm:$0xff] %vm6435_vm2, %v13053_v38  ;;  %v12991_v30 = vadd.f32 %v21220_v63, %v28097_v45  ;;  %v12760_v21 = vpop.f32.mrb[99].mxu1  ;;  %v13239_v7 = vld [vmem:[#allocation2 + $0x288] ss:$2 sm:$0xff]  ;;  %v13287_v46 = vld [vmem:[#allocation2 + $0x289] ss:$2 sm:$0xff] }
 0x995   :  { %13116 = vst.msk [vmem:[#allocation2 + $0x2c8] sm:$0xff] %vm6435_vm2, %v13052_v62  ;;  %v12990_v42 = vadd.f32 %v28097_v45, %v12760_v21  ;;  %v13262_v8 = vmax.f32 %v13214_v20, %v13239_v7 }
 0x996   :  { %v13055_v3 = vmax.f32 %v12991_v30, 0.0 }
 0x997   :  { %v13054_v41 = vmax.f32 %v12990_v42, 0.0  ;;  %v21223_v12 = vpop.f32.mrb[100].mxu1  ;;  %v13310_v48 = vmax.f32 %v13262_v8, %v13287_v46 }
 0x998   :  { %13119 = vst.msk [vmem:[#allocation2 + $0x2f0] sm:$0xff] %vm6435_vm2, %v13055_v3  ;;  %v12993_v5 = vadd.f32 %v21223_v12, %v28097_v45  ;;  %v12770_v10 = vpop.f32.mrb[101].mxu1  ;;  %v13161_v32 = vld [vmem:[#allocation2 + $0x2a8] ss:$2 sm:$0xff]  ;;  %v13193_v11 = vld [vmem:[#allocation2 + $0x2a9] ss:$2 sm:$0xff] }
 0x999   :  { %13118 = vst.msk [vmem:[#allocation2 + $0x2e8] sm:$0xff] %vm6435_vm2, %v13054_v41  ;;  %v12992_v57 = vadd.f32 %v28097_v45, %v12770_v10  ;;  %13387 = vst.msk [vmem:[#allocation3 + $0x110] sm:$0xff] %vm6435_vm2, %v13310_v48  ;;  %v13215_v9 = vmax.f32 %v13161_v32, %v13193_v11 }
 0x99a   :  { %v13057_v31 = vmax.f32 %v12993_v5, 0.0 }
 0x99b   :  { %v13056_v33 = vmax.f32 %v12992_v57, 0.0  ;;  %v21226_v43 = vpop.f32.mrb[102].mxu1 }
 0x99c   :  { %13121 = vst.msk [vmem:[#allocation2 + $0x310] sm:$0xff] %vm6435_vm2, %v13057_v31  ;;  %v12995_v54 = vadd.f32 %v21226_v43, %v28097_v45  ;;  %v12780_v37 = vpop.f32.mrb[103].mxu1  ;;  %v13241_v6 = vld [vmem:[#allocation2 + $0x2c8] ss:$2 sm:$0xff]  ;;  %v13289_v49 = vld [vmem:[#allocation2 + $0x2c9] ss:$2 sm:$0xff] }
 0x99d   :  { %13120 = vst.msk [vmem:[#allocation2 + $0x308] sm:$0xff] %vm6435_vm2, %v13056_v33  ;;  %v12994_v0 = vadd.f32 %v28097_v45, %v12780_v37  ;;  %v13263_v39 = vmax.f32 %v13215_v9, %v13241_v6 }
 0x99e   :  { %v13059_v53 = vmax.f32 %v12995_v54, 0.0 }
 0x99f   :  { %v13058_v17 = vmax.f32 %v12994_v0, 0.0  ;;  %v21229_v1 = vpop.f32.mrb[104].mxu1  ;;  %v13311_v55 = vmax.f32 %v13263_v39, %v13289_v49 }
 0x9a0   :  { %13123 = vst.msk [vmem:[#allocation2 + $0x330] sm:$0xff] %vm6435_vm2, %v13059_v53  ;;  %v12997_v13 = vadd.f32 %v21229_v1, %v28097_v45  ;;  %v12790_v24 = vpop.f32.mrb[105].mxu1  ;;  %v28254_v34 = vld [vmem:[#allocation3 + $0x110] sm:$0xff] }
 0x9a1   :  { %v13163_v44 = vld [vmem:[#allocation2 + $0x2e8] ss:$2 sm:$0xff]  ;;  %v13195_v15 = vld [vmem:[#allocation2 + $0x2e9] ss:$2 sm:$0xff]  ;;  %13122 = vst.msk [vmem:[#allocation2 + $0x328] sm:$0xff] %vm6435_vm2, %v13058_v17  ;;  %v12996_v50 = vadd.f32 %v28097_v45, %v12790_v24  ;;  %21283 = vmatmul.mubr.msk.f32.gmra.mrb[72].mxu0 %vm6435_vm2, %v28254_v34  ;;  %13388 = vst.msk [vmem:[#allocation3 + $0x128] sm:$0xff] %vm6435_vm2, %v13311_v55 }
 0x9a2   :  { %v13061_v47 = vmax.f32 %v12997_v13, 0.0  ;;  %v13216_v35 = vmax.f32 %v13163_v44, %v13195_v15 }
 0x9a3   :  { %v13060_v36 = vmax.f32 %v12996_v50, 0.0  ;;  %v21232_v23 = vpop.f32.mrb[106].mxu1 }
 0x9a4   :  { %13125 = vst.msk [vmem:[#allocation2 + $0x350] sm:$0xff] %vm6435_vm2, %v13061_v47  ;;  %v12999_v25 = vadd.f32 %v21232_v23, %v28097_v45  ;;  %v12800_v2 = vpop.f32.mrb[107].mxu1  ;;  %v13243_v52 = vld [vmem:[#allocation2 + $0x308] ss:$2 sm:$0xff]  ;;  %v13291_v27 = vld [vmem:[#allocation2 + $0x309] ss:$2 sm:$0xff] }
 0x9a5   :  { %13124 = vst.msk [vmem:[#allocation2 + $0x348] sm:$0xff] %vm6435_vm2, %v13060_v36  ;;  %v12998_v58 = vadd.f32 %v28097_v45, %v12800_v2  ;;  %v13264_v59 = vmax.f32 %v13216_v35, %v13243_v52 }
 0x9a6   :  { %v13063_v60 = vmax.f32 %v12999_v25, 0.0 }
 0x9a7   :  { %v13062_v22 = vmax.f32 %v12998_v58, 0.0  ;;  %v21235_v19 = vpop.f32.mrb[108].mxu1  ;;  %v13312_v16 = vmax.f32 %v13264_v59, %v13291_v27 }
 0x9a8   :  { %13127 = vst.msk [vmem:[#allocation2 + $0x370] sm:$0xff] %vm6435_vm2, %v13063_v60  ;;  %v13001_v61 = vadd.f32 %v21235_v19, %v28097_v45  ;;  %v12810_v4 = vpop.f32.mrb[109].mxu1  ;;  %v28267_v29 = vld [vmem:[#allocation3 + $0x128] sm:$0xff] }
 0x9a9   :  { %v13165_v38 = vld [vmem:[#allocation2 + $0x328] ss:$2 sm:$0xff]  ;;  %v13197_v62 = vld [vmem:[#allocation2 + $0x329] ss:$2 sm:$0xff]  ;;  %13126 = vst.msk [vmem:[#allocation2 + $0x368] sm:$0xff] %vm6435_vm2, %v13062_v22  ;;  %v13000_v63 = vadd.f32 %v28097_v45, %v12810_v4  ;;  %21285 = vmatprep.mubr.msk.f32.mxu0 %vm6435_vm2, %v28267_v29  ;;  %13389 = vst.msk [vmem:[#allocation3 + $0x140] sm:$0xff] %vm6435_vm2, %v13312_v16 }
 0x9aa   :  { %v13065_v20 = vmax.f32 %v13001_v61, 0.0  ;;  %v13217_v7 = vmax.f32 %v13165_v38, %v13197_v62 }
 0x9ab   :  { %v13064_v30 = vmax.f32 %v13000_v63, 0.0  ;;  %v21238_v21 = vpop.f32.mrb[110].mxu1 }
 0x9ac   :  { %13129 = vst.msk [vmem:[#allocation2 + $0x390] sm:$0xff] %vm6435_vm2, %v13065_v20  ;;  %v13003_v42 = vadd.f32 %v21238_v21, %v28097_v45  ;;  %v12820_v8 = vpop.f32.mrb[111].mxu1  ;;  %v13245_v3 = vld [vmem:[#allocation2 + $0x348] ss:$2 sm:$0xff]  ;;  %v13293_v48 = vld [vmem:[#allocation2 + $0x349] ss:$2 sm:$0xff] }
 0x9ad   :  { %13128 = vst.msk [vmem:[#allocation2 + $0x388] sm:$0xff] %vm6435_vm2, %v13064_v30  ;;  %v13002_v46 = vadd.f32 %v28097_v45, %v12820_v8  ;;  %v13265_v41 = vmax.f32 %v13217_v7, %v13245_v3 }
 0x9ae   :  { %v13067_v12 = vmax.f32 %v13003_v42, 0.0 }
 0x9af   :  { %v13066_v5 = vmax.f32 %v13002_v46, 0.0  ;;  %v21241_v10 = vpop.f32.mrb[112].mxu1  ;;  %v13313_v32 = vmax.f32 %v13265_v41, %v13293_v48 }
 0x9b0   :  { %13131 = vst.msk [vmem:[#allocation2 + $0x3b0] sm:$0xff] %vm6435_vm2, %v13067_v12  ;;  %v13005_v11 = vadd.f32 %v21241_v10, %v28097_v45  ;;  %v12830_v57 = vpop.f32.mrb[113].mxu1  ;;  %v28280_v31 = vld [vmem:[#allocation3 + $0x140] sm:$0xff]  ;;  %v13167_v33 = vld [vmem:[#allocation2 + $0x368] ss:$2 sm:$0xff] }
 0x9b1   :  { %v13199_v43 = vld [vmem:[#allocation2 + $0x369] ss:$2 sm:$0xff]  ;;  %13130 = vst.msk [vmem:[#allocation2 + $0x3a8] sm:$0xff] %vm6435_vm2, %v13066_v5  ;;  %v13004_v9 = vadd.f32 %v28097_v45, %v12830_v57  ;;  %21286 = vmatmul.mubr.msk.f32.gmra.mrb[74].mxu0 %vm6435_vm2, %v28280_v31  ;;  %13390 = vst.msk [vmem:[#allocation3 + $0x158] sm:$0xff] %vm6435_vm2, %v13313_v32 }
 0x9b2   :  { %v13069_v54 = vmax.f32 %v13005_v11, 0.0  ;;  %v13218_v0 = vmax.f32 %v13167_v33, %v13199_v43 }
 0x9b3   :  { %v13068_v37 = vmax.f32 %v13004_v9, 0.0  ;;  %v21244_v6 = vpop.f32.mrb[114].mxu1 }
 0x9b4   :  { %13133 = vst.msk [vmem:[#allocation2 + $0x3d0] sm:$0xff] %vm6435_vm2, %v13069_v54  ;;  %v13007_v39 = vadd.f32 %v21244_v6, %v28097_v45  ;;  %v12840_v53 = vpop.f32.mrb[115].mxu1  ;;  %v13247_v49 = vld [vmem:[#allocation2 + $0x388] ss:$2 sm:$0xff]  ;;  %v13295_v13 = vld [vmem:[#allocation2 + $0x389] ss:$2 sm:$0xff] }
 0x9b5   :  { %13132 = vst.msk [vmem:[#allocation2 + $0x3c8] sm:$0xff] %vm6435_vm2, %v13068_v37  ;;  %v13006_v17 = vadd.f32 %v28097_v45, %v12840_v53  ;;  %v13266_v1 = vmax.f32 %v13218_v0, %v13247_v49  ;;  %v13395_v54 = vld [vmem:[#allocation3 + $0x7] sm:$0xff]  ;;  %v17705_v0 = vld [vmem:[%s28911_s5 + $0x90] sm:$0xff]  ;;  %v28332_v49 = vld [vmem:[#allocation3 + $0x1f] sm:$0xff] }
 0x9b6   :  { %v13071_v55 = vmax.f32 %v13007_v39, 0.0  ;;  %v17706_v39 = vld [vmem:[%s28911_s5 + $0x98] sm:$0xff] }
 0x9b7   :  { %v13070_v24 = vmax.f32 %v13006_v17, 0.0  ;;  %v21247_v44 = vpop.f32.mrb[116].mxu1  ;;  %v13314_v15 = vmax.f32 %v13266_v1, %v13295_v13  ;;  %v21834_v53 = vpack.c.bf16 %v17706_v39, %v17705_v0  ;;  %v17707_v17 = vld [vmem:[%s28911_s5 + $0xa0] sm:$0xff]  ;;  %v17708_v1 = vld [vmem:[%s28911_s5 + $0xa8] sm:$0xff] }
 0x9b8   :  { %13135 = vst.msk [vmem:[#allocation2 + $0x3f0] sm:$0xff] %vm6435_vm2, %v13071_v55  ;;  %v13009_v50 = vadd.f32 %v21247_v44, %v28097_v45  ;;  %v12850_v47 = vpop.f32.mrb[117].mxu1  ;;  %v28293_v36 = vld [vmem:[#allocation3 + $0x158] sm:$0xff]  ;;  %v13169_v23 = vld [vmem:[#allocation2 + $0x3a8] ss:$2 sm:$0xff]  ;;  %v21838_v13 = vpack.c.bf16 %v17708_v1, %v17707_v17 }
 0x9b9   :  { %v13201_v35 = vld [vmem:[#allocation2 + $0x3a9] ss:$2 sm:$0xff]  ;;  %13134 = vst.msk [vmem:[#allocation2 + $0x3e8] sm:$0xff] %vm6435_vm2, %v13070_v24  ;;  %v13008_v25 = vadd.f32 %v28097_v45, %v12850_v47  ;;  %21288 = vmatprep.mubr.msk.f32.mxu0 %vm6435_vm2, %v28293_v36  ;;  %13391 = vst.msk [vmem:[#allocation3 + $0x170] sm:$0xff] %vm6435_vm2, %v13314_v15  ;;  %v17710_v15 = vld [vmem:[%s28911_s5 + $0xb8] sm:$0xff] }
 0x9ba   :  { %v13073_v2 = vmax.f32 %v13009_v50, 0.0  ;;  %v13219_v59 = vmax.f32 %v13169_v23, %v13201_v35  ;;  %v28342_v55 = vld [vmem:[#allocation3 + $0x37] sm:$0xff]  ;;  %v28347_v24 = vld [vmem:[#allocation3 + $0x4f] sm:$0xff]  ;;  %v28357_v50 = vld [vmem:[#allocation3 + $0x67] sm:$0xff] }
 0x9bb   :  { %v13072_v52 = vmax.f32 %v13008_v25, 0.0  ;;  %v21250_v58 = vpop.f32.mrb[118].mxu1  ;;  %v17709_v44 = vld [vmem:[%s28911_s5 + $0xb0] sm:$0xff]  ;;  %v28361_v47 = vld [vmem:[#allocation3 + $0x7f] sm:$0xff]  ;;  %v17728_v35 = vld [vmem:[%s28911_s5 + $0xc8] sm:$0xff] }
 0x9bc   :  { %13137 = vst.msk [vmem:[#allocation2 + $0x410] sm:$0xff] %vm6435_vm2, %v13073_v2  ;;  %v13011_v60 = vadd.f32 %v21250_v58, %v28097_v45  ;;  %v12860_v27 = vpop.f32.mrb[119].mxu1  ;;  %v13249_v22 = vld [vmem:[#allocation2 + $0x3c8] ss:$2 sm:$0xff]  ;;  %v13297_v4 = vld [vmem:[#allocation2 + $0x3c9] ss:$2 sm:$0xff] }
 0x9bd   :  { %13136 = vst.msk [vmem:[#allocation2 + $0x408] sm:$0xff] %vm6435_vm2, %v13072_v52  ;;  %v13010_v19 = vadd.f32 %v28097_v45, %v12860_v27  ;;  %v13267_v16 = vmax.f32 %v13219_v59, %v13249_v22  ;;  %v17727_v23 = vld [vmem:[%s28911_s5 + $0xc0] sm:$0xff]  ;;  %v28371_v25 = vld [vmem:[#allocation3 + $0x97] sm:$0xff]  ;;  %v28375_v58 = vld [vmem:[#allocation3 + $0xaf] sm:$0xff] }
 0x9be   :  { %v13075_v61 = vmax.f32 %v13011_v60, 0.0  ;;  %v13403_v2 = vld [vmem:[#allocation3 + $0xf7] sm:$0xff]  ;;  %v21846_v52 = vpack.c.bf16 %v17728_v35, %v17727_v23  ;;  %v28380_v59 = vld [vmem:[#allocation3 + $0x10f] sm:$0xff]  ;;  %v28384_v60 = vld [vmem:[#allocation3 + $0x127] sm:$0xff] }
 0x9bf   :  { %v13074_v38 = vmax.f32 %v13010_v19, 0.0  ;;  %v21253_v62 = vpop.f32.mrb[120].mxu1  ;;  %v13315_v63 = vmax.f32 %v13267_v16, %v13297_v4  ;;  %v28388_v27 = vld [vmem:[#allocation3 + $0x13f] sm:$0xff]  ;;  %v28392_v22 = vld [vmem:[#allocation3 + $0x157] sm:$0xff] }
 0x9c0   :  { %13139 = vst.msk [vmem:[#allocation2 + $0x430] sm:$0xff] %vm6435_vm2, %v13075_v61  ;;  %v13013_v20 = vadd.f32 %v21253_v62, %v28097_v45  ;;  %v12870_v30 = vpop.f32.mrb[121].mxu1  ;;  %v28306_v21 = vld [vmem:[#allocation3 + $0x170] sm:$0xff]  ;;  %v17730_v62 = vld [vmem:[%s28911_s5 + $0xd8] sm:$0xff] }
 0x9c1   :  { %v13171_v7 = vld [vmem:[#allocation2 + $0x3e8] ss:$2 sm:$0xff]  ;;  %v13203_v42 = vld [vmem:[#allocation2 + $0x3e9] ss:$2 sm:$0xff]  ;;  %13138 = vst.msk [vmem:[#allocation2 + $0x428] sm:$0xff] %vm6435_vm2, %v13074_v38  ;;  %v13012_v8 = vadd.f32 %v28097_v45, %v12870_v30  ;;  %21289 = vmatmul.mubr.msk.f32.gmra.mrb[76].mxu0 %vm6435_vm2, %v28306_v21  ;;  %13392 = vst.msk [vmem:[#allocation3 + $0x188] sm:$0xff] %vm6435_vm2, %v13315_v63 }
 0x9c2   :  { %v13077_v3 = vmax.f32 %v13013_v20, 0.0  ;;  %v13220_v41 = vmax.f32 %v13171_v7, %v13203_v42  ;;  %v28396_v19 = vld [vmem:[#allocation3 + $0x16f] sm:$0xff]  ;;  %v28415_v20 = vld [vmem:[#allocation3 + $0x21] sm:$0xff]  ;;  %v28425_v42 = vld [vmem:[#allocation3 + $0x39] sm:$0xff] }
 0x9c3   :  { %v13076_v46 = vmax.f32 %v13012_v8, 0.0  ;;  %v13830_v61 = vld [vmem:[#allocation3 + $0x9] sm:$0xff]  ;;  %v17731_v30 = vld [vmem:[%s28911_s5 + $0xe0] sm:$0xff]  ;;  %v28478_v39 = vld [vmem:[#allocation3 + $0x171] sm:$0xff] }
 0x9c4   :  { %13141 = vst.msk [vmem:[#allocation2 + $0x450] sm:$0xff] %vm6435_vm2, %v13077_v3  ;;  %v13251_v12 = vld [vmem:[#allocation2 + $0x408] ss:$2 sm:$0xff]  ;;  %v13299_v5 = vld [vmem:[#allocation2 + $0x409] ss:$2 sm:$0xff]  ;;  %v28474_v0 = vld [vmem:[#allocation3 + $0x159] sm:$0xff] }
 0x9c5   :  { %13140 = vst.msk [vmem:[#allocation2 + $0x448] sm:$0xff] %vm6435_vm2, %v13076_v46  ;;  %v13268_v48 = vmax.f32 %v13220_v41, %v13251_v12  ;;  %v17729_v38 = vld [vmem:[%s28911_s5 + $0xd0] sm:$0xff]  ;;  %v17732_v7 = vld [vmem:[%s28911_s5 + $0xe8] sm:$0xff]  ;;  %v17734_v41 = vld [vmem:[%s28911_s5 + $0xf8] sm:$0xff] }
 0x9c6   :  { %v21850_v63 = vpack.c.bf16 %v17730_v62, %v17729_v38  ;;  %v21854_v8 = vpack.c.bf16 %v17732_v7, %v17731_v30  ;;  %v28429_v3 = vld [vmem:[#allocation3 + $0x51] sm:$0xff]  ;;  %v28439_v12 = vld [vmem:[#allocation3 + $0x69] sm:$0xff]  ;;  %v14298_v7 = vld [vmem:[#allocation3 + $0x20] sm:$0xff] }
 0x9c7   :  { %v13316_v10 = vmax.f32 %v13268_v48, %v13299_v5  ;;  %v17733_v46 = vld [vmem:[%s28911_s5 + $0xf0] sm:$0xff]  ;;  %v28443_v5 = vld [vmem:[#allocation3 + $0x81] sm:$0xff]  ;;  %v17758_v35 = vld [vmem:[%s28911_s5 + $0x138] sm:$0xff] }
 0x9c8   :  { %v28315_v32 = vld [vmem:[#allocation3 + $0x188] sm:$0xff]  ;;  %v21858_v48 = vpack.c.bf16 %v17734_v41, %v17733_v46  ;;  %v17753_v1 = vld [vmem:[%s28911_s5 + $0x110] sm:$0xff]  ;;  %v17778_v30 = vld [vmem:[%s28911_s5 + $0x158] sm:$0xff] }
 0x9c9   :  { %21291 = vmatprep.mubr.msk.f32.mxu0 %vm6435_vm2, %v28315_v32  ;;  %13393 = vst.msk [vmem:[#allocation3 + $0x1a0] sm:$0xff] %vm6435_vm2, %v13316_v10  ;;  %v13173_v45 = vld [vmem:[#allocation2 + $0x428] ss:$2 sm:$0xff]  ;;  %v13205_v11 = vld [vmem:[#allocation2 + $0x429] ss:$2 sm:$0xff]  ;;  %v17751_v10 = vld [vmem:[%s28911_s5 + $0x100] sm:$0xff] }
 0x9ca   :  { %v13221_v57 = vmax.f32 %v13173_v45, %v13205_v11  ;;  %v28400_v16 = vld [vmem:[#allocation3 + $0x187] sm:$0xff]  ;;  %v28453_v11 = vld [vmem:[#allocation3 + $0x99] sm:$0xff] }
 0x9cb   :  { %v17752_v45 = vld [vmem:[%s28911_s5 + $0x108] sm:$0xff]  ;;  %v17779_v46 = vld [vmem:[%s28911_s5 + $0x160] sm:$0xff] }
 0x9cc   :  { %v13253_v33 = vld [vmem:[#allocation2 + $0x448] ss:$2 sm:$0xff]  ;;  %v13301_v9 = vld [vmem:[#allocation2 + $0x449] ss:$2 sm:$0xff] }
 0x9cd   :  { %v13269_v43 = vmax.f32 %v13221_v57, %v13253_v33  ;;  %v13838_v57 = vld [vmem:[#allocation3 + $0xf9] sm:$0xff]  ;;  %v21862_v33 = vpack.c.bf16 %v17752_v45, %v17751_v10  ;;  %v28528_v62 = vld [vmem:[#allocation3 + $0xc7] sm:$0xff]  ;;  %v17781_v10 = vld [vmem:[%s28911_s5 + $0x170] sm:$0xff] }
 0x9ce   :  { %v17780_v41 = vld [vmem:[%s28911_s5 + $0x168] sm:$0xff]  ;;  %v17782_v45 = vld [vmem:[%s28911_s5 + $0x178] sm:$0xff] }
 0x9cf   :  { %v13317_v37 = vmax.f32 %v13269_v43, %v13301_v9  ;;  %v28457_v43 = vld [vmem:[#allocation3 + $0xb1] sm:$0xff] }
 0x9d0   :  { %v28320_v6 = vld [vmem:[#allocation3 + $0x1a0] sm:$0xff]  ;;  %v28462_v9 = vld [vmem:[#allocation3 + $0x111] sm:$0xff] }
 0x9d1   :  { %21292 = vmatmul.mubr.msk.f32.gmra.mrb[78].mxu0 %vm6435_vm2, %v28320_v6  ;;  %13394 = vst.msk [vmem:[#allocation3 + $0x1b8] sm:$0xff] %vm6435_vm2, %v13317_v37  ;;  %v28404_v4 = vld [vmem:[#allocation3 + $0x19f] sm:$0xff] }
 0x9d2   :  { %21310 = vmatprep.mubr.msk.f32.mxu0 %vm6435_vm2, %v13395_v54  ;;  %v28466_v54 = vld [vmem:[#allocation3 + $0x129] sm:$0xff]  ;;  %v28470_v37 = vld [vmem:[#allocation3 + $0x141] sm:$0xff] }
 0x9d3   :  { %v28486_v17 = vld [vmem:[#allocation3 + $0x1a1] sm:$0xff] }
 0x9d5   :  { %21311 = vmatmul.mubr.msk.f32.vlgmr.msra.gmra.mrb[64].mxu0 %vm6435_vm2, %v28332_v49 }
 0x9d6   :  { %21313 = vmatprep.mubr.msk.f32.mxu0 %vm6435_vm2, %v28342_v55  ;;  %21833 = vmatpush3.bf16.msra.mxu0 %v28170_v51  ;;  %v21842_v51 = vpack.c.bf16 %v17710_v15, %v17709_v44  ;;  %v17755_v15 = vld [vmem:[%s28911_s5 + $0x120] sm:$0xff] }
 0x9d7   :  { %21835 = vmatprep.subr.bf16.mxu0 %v21834_v53 }
 0x9d9   :  { %21314 = vmatmul.mubr.msk.f32.gmra.mrb[66].mxu0 %vm6435_vm2, %v28347_v24 }
 0x9da   :  { %21316 = vmatprep.mubr.msk.f32.mxu0 %vm6435_vm2, %v28357_v50  ;;  %21837 = vmatpush3.bf16.msra.mxu0 %v21834_v53  ;;  %v28482_v53 = vld [vmem:[#allocation3 + $0x189] sm:$0xff] }
 0x9db   :  { %21839 = vmatprep.subr.bf16.mxu0 %v21838_v13 }
 0x9dd   :  { %21317 = vmatmul.mubr.msk.f32.gmra.mrb[68].mxu0 %vm6435_vm2, %v28361_v47 }
 0x9de   :  { %21319 = vmatprep.mubr.msk.f32.mxu0 %vm6435_vm2, %v28371_v25  ;;  %21841 = vmatpush3.bf16.msra.mxu0 %v21838_v13  ;;  %v17754_v13 = vld [vmem:[%s28911_s5 + $0x118] sm:$0xff] }
 0x9df   :  { %21843 = vmatprep.subr.bf16.mxu0 %v21842_v51  ;;  %v21866_v44 = vpack.c.bf16 %v17754_v13, %v17753_v1  ;;  %v15509_v1 = vld [vmem:[%s28913_s8 + $0x8] sm:$0xff]  ;;  %v15510_v13 = vld [vmem:[%s28913_s8 + $0x10] sm:$0xff] }
 0x9e1   :  { %21320 = vmatmul.mubr.msk.f32.gmra.mrb[70].mxu0 %vm6435_vm2, %v28375_v58 }
 0x9e2   :  { %21322 = vmatprep.mubr.msk.f32.mxu0 %vm6435_vm2, %v13403_v2  ;;  %21845 = vmatpush3.bf16.msra.mxu0 %v21842_v51  ;;  %v17756_v51 = vld [vmem:[%s28911_s5 + $0x128] sm:$0xff] }
 0x9e3   :  { %21847 = vmatprep.subr.bf16.mxu0 %v21846_v52  ;;  %v21870_v23 = vpack.c.bf16 %v17756_v51, %v17755_v15  ;;  %v15511_v51 = vld [vmem:[%s28913_s8 + $0x18] sm:$0xff] }
 0x9e5   :  { %21323 = vmatmul.mubr.msk.f32.gmra.mrb[72].mxu0 %vm6435_vm2, %v28380_v59 }
 0x9e6   :  { %21325 = vmatprep.mubr.msk.f32.mxu0 %vm6435_vm2, %v28384_v60 }
 0x9e9   :  { %21326 = vmatmul.mubr.msk.f32.gmra.mrb[74].mxu0 %vm6435_vm2, %v28388_v27 }
 0x9ea   :  { %21328 = vmatprep.mubr.msk.f32.mxu0 %vm6435_vm2, %v28392_v22 }
 0x9ed   :  { %21329 = vmatmul.mubr.msk.f32.gmra.mrb[76].mxu0 %vm6435_vm2, %v28396_v19 }
 0x9ee   :  { %21331 = vmatprep.mubr.msk.f32.mxu0 %vm6435_vm2, %v28400_v16 }
 0x9f1   :  { %21332 = vmatmul.mubr.msk.f32.gmra.mrb[78].mxu0 %vm6435_vm2, %v28404_v4 }
 0x9f2   :  { %21350 = vmatprep.mubr.msk.f32.mxu0 %vm6435_vm2, %v13830_v61  ;;  %v17776_v61 = vld [vmem:[%s28911_s5 + $0x148] sm:$0xff] }
 0x9f5   :  { %21351 = vmatmul.mubr.msk.f32.vlgmr.msra.gmra.mrb[64].mxu0 %vm6435_vm2, %v28415_v20 }
 0x9f6   :  { %21353 = vmatprep.mubr.msk.f32.mxu0 %vm6435_vm2, %v28425_v42  ;;  %21849 = vmatpush3.bf16.msra.mxu0 %v21846_v52  ;;  %v17775_v52 = vld [vmem:[%s28911_s5 + $0x140] sm:$0xff] }
 0x9f7   :  { %21851 = vmatprep.subr.bf16.mxu0 %v21850_v63  ;;  %v21878_v38 = vpack.c.bf16 %v17776_v61, %v17775_v52  ;;  %v17805_v61 = vld [vmem:[%s28911_s5 + $0x1b0] sm:$0xff] }
 0x9f9   :  { %21354 = vmatmul.mubr.msk.f32.gmra.mrb[66].mxu0 %vm6435_vm2, %v28429_v3 }
 0x9fa   :  { %21356 = vmatprep.mubr.msk.f32.mxu0 %vm6435_vm2, %v28439_v12  ;;  %21853 = vmatpush3.bf16.msra.mxu0 %v21850_v63  ;;  %v17777_v63 = vld [vmem:[%s28911_s5 + $0x150] sm:$0xff] }
 0x9fb   :  { %21855 = vmatprep.subr.bf16.mxu0 %v21854_v8 }
 0x9fd   :  { %21357 = vmatmul.mubr.msk.f32.gmra.mrb[68].mxu0 %vm6435_vm2, %v28443_v5 }
 0x9fe   :  { %21359 = vmatprep.mubr.msk.f32.mxu0 %vm6435_vm2, %v28453_v11  ;;  %21857 = vmatpush3.bf16.msra.mxu0 %v21854_v8  ;;  %v21882_v8 = vpack.c.bf16 %v17778_v30, %v17777_v63  ;;  %v15514_v30 = vld [vmem:[%s28913_s8 + $0x30] sm:$0xff] }
 0x9ff   :  { %21859 = vmatprep.subr.bf16.mxu0 %v21858_v48 }
 0xa01   :  { %21360 = vmatmul.mubr.msk.f32.gmra.mrb[70].mxu0 %vm6435_vm2, %v28457_v43 }
 0xa02   :  { %21362 = vmatprep.mubr.msk.f32.mxu0 %vm6435_vm2, %v13838_v57  ;;  %21861 = vmatpush3.bf16.msra.mxu0 %v21858_v48  ;;  %v21886_v48 = vpack.c.bf16 %v17780_v41, %v17779_v46  ;;  %v17800_v57 = vld [vmem:[%s28911_s5 + $0x188] sm:$0xff]  ;;  %v17823_v46 = vld [vmem:[%s28911_s5 + $0x1c0] sm:$0xff] }
 0xa03   :  { %21863 = vmatprep.subr.bf16.mxu0 %v21862_v33  ;;  %v17824_v41 = vld [vmem:[%s28911_s5 + $0x1c8] sm:$0xff] }
 0xa05   :  { %21363 = vmatmul.mubr.msk.f32.gmra.mrb[72].mxu0 %vm6435_vm2, %v28462_v9 }
 0xa06   :  { %21365 = vmatprep.mubr.msk.f32.mxu0 %vm6435_vm2, %v28466_v54 }
 0xa09   :  { %21366 = vmatmul.mubr.msk.f32.gmra.mrb[74].mxu0 %vm6435_vm2, %v28470_v37 }
 0xa0a   :  { %21368 = vmatprep.mubr.msk.f32.mxu0 %vm6435_vm2, %v28474_v0 }
 0xa0d   :  { %21369 = vmatmul.mubr.msk.f32.gmra.mrb[76].mxu0 %vm6435_vm2, %v28478_v39 }
 0xa0e   :  { %21371 = vmatprep.mubr.msk.f32.mxu0 %vm6435_vm2, %v28482_v53 }
 0xa11   :  { %21372 = vmatmul.mubr.msk.f32.gmra.mrb[78].mxu0 %vm6435_vm2, %v28486_v17 }
 0xa12   :  { %21390 = vmatprep.mubr.msk.f32.mxu0 %vm6435_vm2, %v28332_v49  ;;  %v17757_v49 = vld [vmem:[%s28911_s5 + $0x130] sm:$0xff] }
 0xa13   :  { %v21874_v2 = vpack.c.bf16 %v17758_v35, %v17757_v49  ;;  %v21946_v49 = vpack.c.bf16 %v15511_v51, %v15510_v13  ;;  %v15512_v35 = vld [vmem:[%s28913_s8 + $0x20] sm:$0xff]  ;;  %v17854_v51 = vld [vmem:[%s28911_s5 + $0x238] sm:$0xff] }
 0xa15   :  { %21391 = vmatmul.mubr.msk.f32.vlgmr.msra.gmra.mrb[64].mxu0 %vm6435_vm2, %v28342_v55 }
 0xa16   :  { %21393 = vmatprep.mubr.msk.f32.mxu0 %vm6435_vm2, %v28347_v24  ;;  %21865 = vmatpush3.bf16.msra.mxu0 %v21862_v33  ;;  %v15508_v33 = vld [vmem:[%s28913_s8] sm:$0xff] }
 0xa17   :  { %21867 = vmatprep.subr.bf16.mxu0 %v21866_v44  ;;  %v21942_v15 = vpack.c.bf16 %v15509_v1, %v15508_v33  ;;  %v17830_v33 = vld [vmem:[%s28911_s5 + $0x1f8] sm:$0xff]  ;;  %v17848_v1 = vld [vmem:[%s28911_s5 + $0x208] sm:$0xff] }
 0xa19   :  { %21394 = vmatmul.mubr.msk.f32.gmra.mrb[66].mxu0 %vm6435_vm2, %v28357_v50  ;;  %21943 = vmatprep.subr.bf16.mxu1 %v21942_v15 }
 0xa1a   :  { %21396 = vmatprep.mubr.msk.f32.mxu0 %vm6435_vm2, %v28361_v47  ;;  %21869 = vmatpush3.bf16.msra.mxu0 %v21866_v44 }
 0xa1b   :  { %21871 = vmatprep.subr.bf16.mxu0 %v21870_v23  ;;  %21945 = vmatpush3.bf16.msra.mxu1 %v21942_v15  ;;  %v17853_v15 = vld [vmem:[%s28911_s5 + $0x230] sm:$0xff] }
 0xa1c   :  { %21947 = vmatprep.subr.bf16.mxu1 %v21946_v49 }
 0xa1d   :  { %21397 = vmatmul.mubr.msk.f32.gmra.mrb[68].mxu0 %vm6435_vm2, %v28371_v25 }
 0xa1e   :  { %21399 = vmatprep.mubr.msk.f32.mxu0 %vm6435_vm2, %v28375_v58  ;;  %21873 = vmatpush3.bf16.msra.mxu0 %v21870_v23  ;;  %v17804_v23 = vld [vmem:[%s28911_s5 + $0x1a8] sm:$0xff] }
 0xa1f   :  { %21875 = vmatprep.subr.bf16.mxu0 %v21874_v2  ;;  %21949 = vmatpush3.bf16.msra.mxu1 %v21946_v49  ;;  %v15006_v49 = vld [vmem:[#allocation3 + $0xb0] sm:$0xff] }
 0xa21   :  { %21400 = vmatmul.mubr.msk.f32.gmra.mrb[70].mxu0 %vm6435_vm2, %v28528_v62 }
 0xa22   :  { %21402 = vmatprep.mubr.msk.f32.mxu0 %vm6435_vm2, %v28380_v59  ;;  %21877 = vmatpush3.bf16.msra.mxu0 %v21874_v2  ;;  %v28546_v59 = vld [vmem:[#allocation3 + $0x1b7] sm:$0xff]  ;;  %v15513_v2 = vld [vmem:[%s28913_s8 + $0x28] sm:$0xff] }
 0xa23   :  { %21879 = vmatprep.subr.bf16.mxu0 %v21878_v38  ;;  %v21950_v63 = vpack.c.bf16 %v15513_v2, %v15512_v35  ;;  %v15008_v35 = vld [vmem:[#allocation3 + $0xe0] sm:$0xff] }
 0xa25   :  { %21403 = vmatmul.mubr.msk.f32.gmra.mrb[72].mxu0 %vm6435_vm2, %v28384_v60  ;;  %21951 = vmatprep.subr.bf16.mxu1 %v21950_v63 }
 0xa26   :  { %21405 = vmatprep.mubr.msk.f32.mxu0 %vm6435_vm2, %v28388_v27  ;;  %21953 = vmatpush3.bf16.msra.mxu1 %v21950_v63 }
 0xa29   :  { %21406 = vmatmul.mubr.msk.f32.gmra.mrb[74].mxu0 %vm6435_vm2, %v28392_v22 }
 0xa2a   :  { %21408 = vmatprep.mubr.msk.f32.mxu0 %vm6435_vm2, %v28396_v19 }
 0xa2d   :  { %21409 = vmatmul.mubr.msk.f32.gmra.mrb[76].mxu0 %vm6435_vm2, %v28400_v16 }
 0xa2e   :  { %21411 = vmatprep.mubr.msk.f32.mxu0 %vm6435_vm2, %v28404_v4 }
 0xa31   :  { %21412 = vmatmul.mubr.msk.f32.gmra.mrb[78].mxu0 %vm6435_vm2, %v28546_v59 }
 0xa32   :  { %21430 = vmatprep.mubr.msk.f32.mxu0 %vm6435_vm2, %v14298_v7  ;;  %v15515_v7 = vld [vmem:[%s28913_s8 + $0x38] sm:$0xff] }
 0xa35   :  { %21431 = vmatmul.mubr.msk.f32.vlgmr.msra.gmra.mrb[64].mxu0 %vm6435_vm2, %v28163_v26  ;;  %v21890_v26 = vpack.c.bf16 %v17782_v45, %v17781_v10  ;;  %v21910_v10 = vpack.c.bf16 %v17824_v41, %v17823_v46  ;;  %v28671_v45 = vld [vmem:[#allocation3 + $0xc9] sm:$0xff] }
 0xa36   :  { %21433 = vmatprep.mubr.msk.f32.mxu0 %vm6435_vm2, %v28179_v40  ;;  %21881 = vmatpush3.bf16.msra.mxu0 %v21878_v38  ;;  %v17799_v40 = vld [vmem:[%s28911_s5 + $0x180] sm:$0xff]  ;;  %v17806_v38 = vld [vmem:[%s28911_s5 + $0x1b8] sm:$0xff] }
 0xa37   :  { %21883 = vmatprep.subr.bf16.mxu0 %v21882_v8 }
 0xa39   :  { %21434 = vmatmul.mubr.msk.f32.gmra.mrb[66].mxu0 %vm6435_vm2, %v28192_v28  ;;  %v21894_v28 = vpack.c.bf16 %v17800_v57, %v17799_v40  ;;  %v17826_v40 = vld [vmem:[%s28911_s5 + $0x1d8] sm:$0xff] }
 0xa3a   :  { %21436 = vmatprep.mubr.msk.f32.mxu0 %vm6435_vm2, %v28205_v56  ;;  %21885 = vmatpush3.bf16.msra.mxu0 %v21882_v8  ;;  %v28587_v56 = vld [vmem:[#allocation3 + $0xc8] sm:$0xff]  ;;  %v21906_v8 = vpack.c.bf16 %v17806_v38, %v17805_v61 }
 0xa3b   :  { %21887 = vmatprep.subr.bf16.mxu0 %v21886_v48 }
 0xa3d   :  { %21437 = vmatmul.mubr.msk.f32.gmra.mrb[68].mxu0 %vm6435_vm2, %v28218_v14  ;;  %v28605_v14 = vld [vmem:[#allocation3 + $0x1b8] sm:$0xff] }
 0xa3e   :  { %21439 = vmatprep.mubr.msk.f32.mxu0 %vm6435_vm2, %v28231_v18  ;;  %21889 = vmatpush3.bf16.msra.mxu0 %v21886_v48  ;;  %v17801_v18 = vld [vmem:[%s28911_s5 + $0x190] sm:$0xff]  ;;  %v21954_v48 = vpack.c.bf16 %v15515_v7, %v15514_v30 }
 0xa3f   :  { %21891 = vmatprep.subr.bf16.mxu0 %v21890_v26 }
 0xa40   :  { %21955 = vmatprep.subr.bf16.mxu1 %v21954_v48 }
 0xa41   :  { %21440 = vmatmul.mubr.msk.f32.gmra.mrb[70].mxu0 %vm6435_vm2, %v28587_v56  ;;  %21957 = vmatpush3.bf16.msra.mxu1 %v21954_v48 }
 0xa42   :  { %21442 = vmatprep.mubr.msk.f32.mxu0 %vm6435_vm2, %v28254_v34  ;;  %21893 = vmatpush3.bf16.msra.mxu0 %v21890_v26  ;;  %v17802_v34 = vld [vmem:[%s28911_s5 + $0x198] sm:$0xff]  ;;  %v17825_v26 = vld [vmem:[%s28911_s5 + $0x1d0] sm:$0xff] }
 0xa43   :  { %21895 = vmatprep.subr.bf16.mxu0 %v21894_v28  ;;  %v21898_v44 = vpack.c.bf16 %v17802_v34, %v17801_v18  ;;  %v21914_v57 = vpack.c.bf16 %v17826_v40, %v17825_v26  ;;  %v17828_v18 = vld [vmem:[%s28911_s5 + $0x1e8] sm:$0xff] }
 0xa45   :  { %21443 = vmatmul.mubr.msk.f32.gmra.mrb[72].mxu0 %vm6435_vm2, %v28267_v29 }
 0xa46   :  { %21445 = vmatprep.mubr.msk.f32.mxu0 %vm6435_vm2, %v28280_v31 }
 0xa49   :  { %21446 = vmatmul.mubr.msk.f32.gmra.mrb[74].mxu0 %vm6435_vm2, %v28293_v36 }
 0xa4a   :  { %21448 = vmatprep.mubr.msk.f32.mxu0 %vm6435_vm2, %v28306_v21 }
 0xa4d   :  { %21449 = vmatmul.mubr.msk.f32.gmra.mrb[76].mxu0 %vm6435_vm2, %v28315_v32 }
 0xa4e   :  { %21451 = vmatprep.mubr.msk.f32.mxu0 %vm6435_vm2, %v28320_v6 }
 0xa51   :  { %21452 = vmatmul.mubr.msk.f32.gmra.mrb[78].mxu0 %vm6435_vm2, %v28605_v14 }
 0xa52   :  { %21470 = vmatprep.mubr.msk.f32.mxu0 %vm6435_vm2, %v28415_v20  ;;  %v17803_v20 = vld [vmem:[%s28911_s5 + $0x1a0] sm:$0xff] }
 0xa53   :  { %v21902_v52 = vpack.c.bf16 %v17804_v23, %v17803_v20  ;;  %v15005_v20 = vld [vmem:[#allocation3 + $0x98] sm:$0xff]  ;;  %v21938_v23 = vpack.c.bf16 %v17854_v51, %v17853_v15  ;;  %v15746_v15 = vld [vmem:[%s28915_s7 + $0x28] sm:$0xff] }
 0xa54   :  { %v15748_v51 = vld [vmem:[%s28915_s7 + $0x38] sm:$0xff] }
 0xa55   :  { %21471 = vmatmul.mubr.msk.f32.vlgmr.msra.gmra.mrb[64].mxu0 %vm6435_vm2, %v28425_v42 }
 0xa56   :  { %21473 = vmatprep.mubr.msk.f32.mxu0 %vm6435_vm2, %v28429_v3  ;;  %21897 = vmatpush3.bf16.msra.mxu0 %v21894_v28  ;;  %v17827_v28 = vld [vmem:[%s28911_s5 + $0x1e0] sm:$0xff] }
 0xa57   :  { %21899 = vmatprep.subr.bf16.mxu0 %v21898_v44  ;;  %v21918_v34 = vpack.c.bf16 %v17828_v18, %v17827_v28 }
 0xa59   :  { %21474 = vmatmul.mubr.msk.f32.gmra.mrb[66].mxu0 %vm6435_vm2, %v28439_v12 }
 0xa5a   :  { %21476 = vmatprep.mubr.msk.f32.mxu0 %vm6435_vm2, %v28443_v5  ;;  %21901 = vmatpush3.bf16.msra.mxu0 %v21898_v44  ;;  %v15004_v44 = vld [vmem:[#allocation3 + $0x80] sm:$0xff] }
 0xa5b   :  { %21903 = vmatprep.subr.bf16.mxu0 %v21902_v52 }
 0xa5d   :  { %21477 = vmatmul.mubr.msk.f32.gmra.mrb[68].mxu0 %vm6435_vm2, %v28453_v11 }
 0xa5e   :  { %21479 = vmatprep.mubr.msk.f32.mxu0 %vm6435_vm2, %v28457_v43  ;;  %21905 = vmatpush3.bf16.msra.mxu0 %v21902_v52 }
 0xa5f   :  { %21907 = vmatprep.subr.bf16.mxu0 %v21906_v8 }
 0xa61   :  { %21480 = vmatmul.mubr.msk.f32.gmra.mrb[70].mxu0 %vm6435_vm2, %v28671_v45 }
 0xa62   :  { %21482 = vmatprep.mubr.msk.f32.mxu0 %vm6435_vm2, %v28462_v9  ;;  %21909 = vmatpush3.bf16.msra.mxu0 %v21906_v8  ;;  %v28689_v9 = vld [vmem:[#allocation3 + $0x1b9] sm:$0xff] }
 0xa63   :  { %21911 = vmatprep.subr.bf16.mxu0 %v21910_v10 }
 0xa65   :  { %21483 = vmatmul.mubr.msk.f32.gmra.mrb[72].mxu0 %vm6435_vm2, %v28466_v54 }
 0xa66   :  { %21485 = vmatprep.mubr.msk.f32.mxu0 %vm6435_vm2, %v28470_v37 }
 0xa69   :  { %21486 = vmatmul.mubr.msk.f32.gmra.mrb[74].mxu0 %vm6435_vm2, %v28474_v0 }
 0xa6a   :  { %21488 = vmatprep.mubr.msk.f32.mxu0 %vm6435_vm2, %v28478_v39 }
 0xa6d   :  { %21489 = vmatmul.mubr.msk.f32.gmra.mrb[76].mxu0 %vm6435_vm2, %v28482_v53 }
 0xa6e   :  { %21491 = vmatprep.mubr.msk.f32.mxu0 %vm6435_vm2, %v28486_v17 }
 0xa71   :  { %21492 = vmatmul.mubr.msk.f32.gmra.mrb[78].mxu0 %vm6435_vm2, %v28689_v9 }
 0xa72   :  { %21510 = vmatprep.mubr.msk.f32.mxu0 %vm6435_vm2, %v28342_v55  ;;  %v17829_v55 = vld [vmem:[%s28911_s5 + $0x1f0] sm:$0xff] }
 0xa75   :  { %21511 = vmatmul.mubr.msk.f32.vlgmr.msra.gmra.mrb[64].mxu0 %vm6435_vm2, %v28347_v24  ;;  %v21922_v24 = vpack.c.bf16 %v17830_v33, %v17829_v55 }
 0xa76   :  { %21513 = vmatprep.mubr.msk.f32.mxu0 %vm6435_vm2, %v28357_v50  ;;  %21913 = vmatpush3.bf16.msra.mxu0 %v21910_v10  ;;  %v17847_v50 = vld [vmem:[%s28911_s5 + $0x200] sm:$0xff] }
 0xa77   :  { %21915 = vmatprep.subr.bf16.mxu0 %v21914_v57 }
 0xa79   :  { %21514 = vmatmul.mubr.msk.f32.gmra.mrb[66].mxu0 %vm6435_vm2, %v28361_v47  ;;  %v14774_v47 = vld [vmem:[#allocation3 + $0xdf] sm:$0xff] }
 0xa7a   :  { %21516 = vmatprep.mubr.msk.f32.mxu0 %vm6435_vm2, %v28371_v25  ;;  %21917 = vmatpush3.bf16.msra.mxu0 %v21914_v57  ;;  %v21926_v25 = vpack.c.bf16 %v17848_v1, %v17847_v50 }
 0xa7b   :  { %21919 = vmatprep.subr.bf16.mxu0 %v21918_v34 }
 0xa7d   :  { %21517 = vmatmul.mubr.msk.f32.gmra.mrb[68].mxu0 %vm6435_vm2, %v28375_v58  ;;  %v14782_v58 = vld [vmem:[#allocation3 + $0x1cf] sm:$0xff] }
 0xa7e   :  { %21519 = vmatprep.mubr.msk.f32.mxu0 %vm6435_vm2, %v28528_v62  ;;  %21921 = vmatpush3.bf16.msra.mxu0 %v21918_v34  ;;  %v17852_v62 = vld [vmem:[%s28911_s5 + $0x228] sm:$0xff] }
 0xa7f   :  { %21923 = vmatprep.subr.bf16.mxu0 %v21922_v24 }
 0xa81   :  { %21520 = vmatmul.mubr.msk.f32.gmra.mrb[70].mxu0 %vm6435_vm2, %v14774_v47 }
 0xa82   :  { %21522 = vmatprep.mubr.msk.f32.mxu0 %vm6435_vm2, %v28384_v60  ;;  %21925 = vmatpush3.bf16.msra.mxu0 %v21922_v24  ;;  %v17849_v60 = vld [vmem:[%s28911_s5 + $0x210] sm:$0xff] }
 0xa83   :  { %21927 = vmatprep.subr.bf16.mxu0 %v21926_v25 }
 0xa85   :  { %21523 = vmatmul.mubr.msk.f32.gmra.mrb[72].mxu0 %vm6435_vm2, %v28388_v27  ;;  %v17850_v27 = vld [vmem:[%s28911_s5 + $0x218] sm:$0xff] }
 0xa86   :  { %21525 = vmatprep.mubr.msk.f32.mxu0 %vm6435_vm2, %v28392_v22  ;;  %v15001_v22 = vld [vmem:[#allocation3 + $0x38] sm:$0xff] }
 0xa89   :  { %21526 = vmatmul.mubr.msk.f32.gmra.mrb[74].mxu0 %vm6435_vm2, %v28396_v19  ;;  %v21930_v19 = vpack.c.bf16 %v17850_v27, %v17849_v60 }
 0xa8a   :  { %21528 = vmatprep.mubr.msk.f32.mxu0 %vm6435_vm2, %v28400_v16  ;;  %v15002_v16 = vld [vmem:[#allocation3 + $0x50] sm:$0xff] }
 0xa8d   :  { %21529 = vmatmul.mubr.msk.f32.gmra.mrb[76].mxu0 %vm6435_vm2, %v28404_v4  ;;  %v17851_v4 = vld [vmem:[%s28911_s5 + $0x220] sm:$0xff] }
 0xa8e   :  { %21531 = vmatprep.mubr.msk.f32.mxu0 %vm6435_vm2, %v28546_v59  ;;  %v15003_v59 = vld [vmem:[#allocation3 + $0x68] sm:$0xff]  ;;  %v21934_v13 = vpack.c.bf16 %v17852_v62, %v17851_v4  ;;  %v15744_v62 = vld [vmem:[%s28915_s7 + $0x18] sm:$0xff] }
 0xa8f   :  { %v15742_v4 = vld [vmem:[%s28915_s7 + $0x8] sm:$0xff] }
 0xa91   :  { %21532 = vmatmul.mubr.msk.f32.gmra.mrb[78].mxu0 %vm6435_vm2, %v14782_v58 }
 0xa92   :  { %21550 = vmatprep.mubr.msk.f32.mxu0 %vm6435_vm2, %v15001_v22 }
 0xa95   :  { %21551 = vmatmul.mubr.msk.f32.vlgmr.msra.gmra.mrb[64].mxu0 %vm6435_vm2, %v15002_v16  ;;  %v29394_v16 = vmov 0.0  }
 0xa96   :  { %21553 = vmatprep.mubr.msk.f32.mxu0 %vm6435_vm2, %v15003_v59  ;;  %21929 = vmatpush3.bf16.msra.mxu0 %v21926_v25  ;;  %v15741_v59 = vld [vmem:[%s28915_s7] sm:$0xff] }
 0xa97   :  { %21931 = vmatprep.subr.bf16.mxu0 %v21930_v19 }
 0xa99   :  { %21554 = vmatmul.mubr.msk.f32.gmra.mrb[66].mxu0 %vm6435_vm2, %v15004_v44  ;;  %v15743_v44 = vld [vmem:[%s28915_s7 + $0x10] sm:$0xff] }
 0xa9a   :  { %21556 = vmatprep.mubr.msk.f32.mxu0 %vm6435_vm2, %v15005_v20  ;;  %21933 = vmatpush3.bf16.msra.mxu0 %v21930_v19  ;;  %v28857_v20 = vpack.c.bf16 %v15743_v44, %v15741_v59 }
 0xa9b   :  { %21935 = vmatprep.subr.bf16.mxu0 %v21934_v13 }
 0xa9d   :  { %21557 = vmatmul.mubr.msk.f32.gmra.mrb[68].mxu0 %vm6435_vm2, %v15006_v49  ;;  %v15745_v49 = vld [vmem:[%s28915_s7 + $0x20] sm:$0xff] }
 0xa9e   :  { %21559 = vmatprep.mubr.msk.f32.mxu0 %vm6435_vm2, %v28587_v56  ;;  %21937 = vmatpush3.bf16.msra.mxu0 %v21934_v13  ;;  %v21958_v13 = vpack.c.bf16 %v15744_v62, %v15742_v4 }
 0xa9f   :  { %21939 = vmatprep.subr.bf16.mxu0 %v21938_v23 }
 0xaa0   :  { %21959 = vmatprep.subr.bf16.mxu1 %v21958_v13 }
 0xaa1   :  { %21560 = vmatmul.mubr.msk.f32.gmra.mrb[70].mxu0 %vm6435_vm2, %v15008_v35  ;;  %v15747_v35 = vld [vmem:[%s28915_s7 + $0x30] sm:$0xff] }
 0xaa2   :  { %21562 = vmatprep.mubr.msk.f32.mxu0 %vm6435_vm2, %v28267_v29  ;;  %21941 = vmatpush3.bf16.msra.mxu0 %v21938_v23  ;;  %v15016_v29 = vld [vmem:[#allocation3 + $0x1d0] sm:$0xff]  ;;  %v28859_v23 = vpack.c.bf16 %v15748_v51, %v15746_v15 }
 0xaa5   :  { %21563 = vmatmul.mubr.msk.f32.gmra.mrb[72].mxu0 %vm6435_vm2, %v28280_v31  ;;  %v15242_v31 = vld [vmem:[#allocation3 + $0xe1] sm:$0xff] }
 0xaa6   :  { %21565 = vmatprep.mubr.msk.f32.mxu0 %vm6435_vm2, %v28293_v36  ;;  %v15250_v36 = vld [vmem:[#allocation3 + $0x1d1] sm:$0xff] }
 0xaa9   :  { %21566 = vmatmul.mubr.msk.f32.gmra.mrb[74].mxu0 %vm6435_vm2, %v28306_v21  ;;  %v17871_v21 = vld [vmem:[%s28914_s6] ss:$0 sm:$0xff] }
 0xaaa   :  { %21568 = vmatprep.mubr.msk.f32.mxu0 %vm6435_vm2, %v28315_v32 }
 0xaad   :  { %21569 = vmatmul.mubr.msk.f32.gmra.mrb[76].mxu0 %vm6435_vm2, %v28320_v6 }
 0xaae   :  { %21571 = vmatprep.mubr.msk.f32.mxu0 %vm6435_vm2, %v28605_v14 }
 0xab1   :  { %21572 = vmatmul.mubr.msk.f32.gmra.mrb[78].mxu0 %vm6435_vm2, %v15016_v29  ;;  %v15750_v29 = vld [vmem:[%s28915_s7 + $0x48] sm:$0xff] }
 0xab2   :  { %21590 = vmatprep.mubr.msk.f32.mxu0 %vm6435_vm2, %v28425_v42 }
 0xab5   :  { %21591 = vmatmul.mubr.msk.f32.vlgmr.msra.gmra.mrb[64].mxu0 %vm6435_vm2, %v28429_v3 }
 0xab6   :  { %21593 = vmatprep.mubr.msk.f32.mxu0 %vm6435_vm2, %v28439_v12 }
 0xab9   :  { %21594 = vmatmul.mubr.msk.f32.gmra.mrb[66].mxu0 %vm6435_vm2, %v28443_v5 }
 0xaba   :  { %21596 = vmatprep.mubr.msk.f32.mxu0 %vm6435_vm2, %v28453_v11 }
 0xabd   :  { %21597 = vmatmul.mubr.msk.f32.gmra.mrb[68].mxu0 %vm6435_vm2, %v28457_v43 }
 0xabe   :  { %21599 = vmatprep.mubr.msk.f32.mxu0 %vm6435_vm2, %v28671_v45 }
 0xac1   :  { %21600 = vmatmul.mubr.msk.f32.gmra.mrb[70].mxu0 %vm6435_vm2, %v15242_v31  ;;  %v15752_v31 = vld [vmem:[%s28915_s7 + $0x58] sm:$0xff] }
 0xac2   :  { %21602 = vmatprep.mubr.msk.f32.mxu0 %vm6435_vm2, %v28466_v54 }
 0xac5   :  { %21603 = vmatmul.mubr.msk.f32.gmra.mrb[72].mxu0 %vm6435_vm2, %v28470_v37 }
 0xac6   :  { %21605 = vmatprep.mubr.msk.f32.mxu0 %vm6435_vm2, %v28474_v0 }
 0xac9   :  { %21606 = vmatmul.mubr.msk.f32.gmra.mrb[74].mxu0 %vm6435_vm2, %v28478_v39 }
 0xaca   :  { %21608 = vmatprep.mubr.msk.f32.mxu0 %vm6435_vm2, %v28482_v53 }
 0xacd   :  { %21609 = vmatmul.mubr.msk.f32.gmra.mrb[76].mxu0 %vm6435_vm2, %v28486_v17 }
 0xace   :  { %21611 = vmatprep.mubr.msk.f32.mxu0 %vm6435_vm2, %v28689_v9 }
 0xad1   :  { %21612 = vmatmul.mubr.msk.f32.gmra.mrb[78].mxu0 %vm6435_vm2, %v15250_v36  ;;  %v21964_v36 = vpack.c.bf16 %v15747_v35, %v15745_v49 }
 0xb88   :  { %v21592_v32 = vpop.f32.mrb[64].mxu0 }
 0xb89   :  { %v15477_v6 = vadd.f32 %v21592_v32, %v17871_v21  ;;  %v15374_v42 = vpop.f32.mrb[65].mxu0  ;;  %v15749_v32 = vld [vmem:[%s28915_s7 + $0x40] sm:$0xff] }
 0xb8a   :  { %v15476_v3 = vadd.f32 %v17871_v21, %v15374_v42  ;;  %v15754_v42 = vld [vmem:[%s28915_s7 + $0x68] sm:$0xff] }
 0xb8b   :  { %v15493_v11 = vmax.f32 %v15477_v6, 0.0  ;;  %v15751_v6 = vld [vmem:[%s28915_s7 + $0x50] sm:$0xff] }
 0xb8c   :  { %v15492_v12 = vmax.f32 %v15476_v3, 0.0  ;;  %v21595_v5 = vpop.f32.mrb[66].mxu0  ;;  %v15756_v3 = vld [vmem:[%s28915_s7 + $0x78] sm:$0xff] }
 0xb8d   :  { %v15479_v43 = vadd.f32 %v21595_v5, %v17871_v21  ;;  %v15384_v54 = vpop.f32.mrb[67].mxu0  ;;  %v21970_v5 = vpack.c.bf16 %v15756_v3, %v15754_v42 }
 0xb8e   :  { %v15478_v37 = vadd.f32 %v17871_v21, %v15384_v54  ;;  %21630 = vmatprep.mubr.msk.f32.mxu1 %vm6435_vm2, %v15492_v12  ;;  %v21968_v12 = vpack.c.bf16 %v15751_v6, %v15749_v32 }
 0xb8f   :  { %21631 = vmatmul.mubr.msk.f32.vlgmr.msra.gmra.mrb[122].mxu1 %vm6435_vm2, %v15493_v11  ;;  %v15495_v53 = vmax.f32 %v15479_v43, 0.0  ;;  %v15753_v11 = vld [vmem:[%s28915_s7 + $0x60] sm:$0xff]  ;;  %v15755_v43 = vld [vmem:[%s28915_s7 + $0x70] sm:$0xff] }
 0xb90   :  { %v15494_v0 = vmax.f32 %v15478_v37, 0.0  ;;  %v21598_v39 = vpop.f32.mrb[68].mxu0  ;;  %21961 = vmatpush1.bf16.msra.mxu1 %v28857_v20  ;;  %v21972_v54 = vpack.c.bf16 %v15755_v43, %v15753_v11 }
 0xb91   :  { %v15481_v17 = vadd.f32 %v21598_v39, %v17871_v21  ;;  %v15394_v56 = vpop.f32.mrb[69].mxu0  ;;  %21963 = vmatprep.subr.bf16.mxu1 %v28859_v23 }
 0xb92   :  { %v15480_v14 = vadd.f32 %v17871_v21, %v15394_v56  ;;  %21633 = vmatprep.mubr.msk.f32.mxu1 %vm6435_vm2, %v15494_v0 }
 0xb93   :  { %21634 = vmatmul.mubr.msk.f32.gmra.mrb[124].mxu1 %vm6435_vm2, %v15495_v53  ;;  %v15497_v61 = vmax.f32 %v15481_v17, 0.0 }
 0xb94   :  { %v15496_v2 = vmax.f32 %v15480_v14, 0.0  ;;  %v21601_v52 = vpop.f32.mrb[70].mxu0  ;;  %21965 = vmatpush1.bf16.msra.mxu1 %v21964_v36 }
 0xb95   :  { %v15483_v38 = vadd.f32 %v21601_v52, %v17871_v21  ;;  %v15404_v63 = vpop.f32.mrb[71].mxu0 }
 0xb96   :  { %v15482_v30 = vadd.f32 %v17871_v21, %v15404_v63  ;;  %21636 = vmatprep.mubr.msk.f32.mxu1 %vm6435_vm2, %v15496_v2 }
 0xb97   :  { %21637 = vmatmul.mubr.msk.f32.gmra.mrb[126].mxu1 %vm6435_vm2, %v15497_v61  ;;  %v15499_v46 = vmax.f32 %v15483_v38, 0.0 }
 0xb98   :  { %v15498_v7 = vmax.f32 %v15482_v30, 0.0  ;;  %v21604_v8 = vpop.f32.mrb[72].mxu0 }
 0xb99   :  { %v15485_v41 = vadd.f32 %v21604_v8, %v17871_v21  ;;  %v15414_v48 = vpop.f32.mrb[73].mxu0 }
 0xb9a   :  { %v15484_v10 = vadd.f32 %v17871_v21, %v15414_v48  ;;  %21639 = vmatprep.mubr.msk.f32.mxu1 %vm6435_vm2, %v15498_v7  ;;  %v23151_v48 = vmov 0  }
 0xb9b   :  { %21640 = vmatmul.mubr.msk.f32.gmra.mrb[128].mxu1 %vm6435_vm2, %v15499_v46  ;;  %v15501_v26 = vmax.f32 %v15485_v41, 0.0  ;;  %v15757_v41 = vld [vmem:[%s28916_s9] sm:$0xff] }
 0xb9c   :  { %v15500_v45 = vmax.f32 %v15484_v10, 0.0  ;;  %v21607_v9 = vpop.f32.mrb[74].mxu0 }
 0xb9d   :  { %v15487_v40 = vadd.f32 %v21607_v9, %v17871_v21  ;;  %v15424_v57 = vpop.f32.mrb[75].mxu0 }
 0xb9e   :  { %v15486_v28 = vadd.f32 %v17871_v21, %v15424_v57  ;;  %21642 = vmatprep.mubr.msk.f32.mxu1 %vm6435_vm2, %v15500_v45 }
 0xb9f   :  { %21643 = vmatmul.mubr.msk.f32.gmra.mrb[130].mxu1 %vm6435_vm2, %v15501_v26  ;;  %v15503_v55 = vmax.f32 %v15487_v40, 0.0 }
 0xba0   :  { %v15502_v18 = vmax.f32 %v15486_v28, 0.0  ;;  %v21610_v34 = vpop.f32.mrb[76].mxu0 }
 0xba1   :  { %v15489_v33 = vadd.f32 %v21610_v34, %v17871_v21  ;;  %v15434_v24 = vpop.f32.mrb[77].mxu0 }
 0xba2   :  { %v15488_v50 = vadd.f32 %v17871_v21, %v15434_v24  ;;  %21645 = vmatprep.mubr.msk.f32.mxu1 %vm6435_vm2, %v15502_v18 }
 0xba3   :  { %21646 = vmatmul.mubr.msk.f32.gmra.mrb[132].mxu1 %vm6435_vm2, %v15503_v55  ;;  %v15505_v25 = vmax.f32 %v15489_v33, 0.0 }
 0xba4   :  { %v15504_v1 = vmax.f32 %v15488_v50, 0.0  ;;  %v21613_v47 = vpop.f32.mrb[78].mxu0 }
 0xba5   :  { %v15491_v58 = vadd.f32 %v21613_v47, %v17871_v21  ;;  %v15444_v60 = vpop.f32.mrb[79].mxu0 }
 0xba6   :  { %v15490_v27 = vadd.f32 %v17871_v21, %v15444_v60  ;;  %21648 = vmatprep.mubr.msk.f32.mxu1 %vm6435_vm2, %v15504_v1  ;;  %v21966_v21 = vpack.c.bf16 %v15752_v31, %v15750_v29 }
 0xba7   :  { %21649 = vmatmul.mubr.msk.f32.gmra.mrb[134].mxu1 %vm6435_vm2, %v15505_v25  ;;  %v15507_v19 = vmax.f32 %v15491_v58, 0.0 }
 0xba8   :  { %v15506_v22 = vmax.f32 %v15490_v27, 0.0  ;;  %21967 = vmatprep.subr.bf16.mxu1 %v21966_v21 }
 0xba9   :  { %21969 = vmatpush1.bf16.msra.mxu1 %v21968_v12 }
 0xbaa   :  { %21651 = vmatprep.mubr.msk.f32.mxu1 %vm6435_vm2, %v15506_v22  ;;  %21971 = vmatprep.subr.bf16.mxu1 %v21970_v5 }
 0xbab   :  { %21652 = vmatmul.mubr.msk.f32.gmra.mrb[136].mxu1 %vm6435_vm2, %v15507_v19 }
 0xbac   :  { %15830 = vmatprep.mubr.f32.mxu1 %v29394_v16 }
 0xbad   :  { %21973 = vmatpush1.bf16.msra.mxu1 %v21972_v54 }
 0xbae   :  { %21975 = vmatprep.subr.bf16.mxu1 %v21958_v13 }
 0xc62   :  { %v21632_v37 = vpop.f32.mrb[122].mxu1 }
 0xc63   :  { %v15630_v0 = vpop.f32.mrb[123].mxu1 }
 0xc64   :  { %15709 = vxpose.xlu0.b32.start [1/8] (short) (narrow) %v15630_v0, 8 }
 0xc66   :  { %v21635_v39 = vpop.f32.mrb[124].mxu1 }
 0xc67   :  { %v15640_v53 = vpop.f32.mrb[125].mxu1 }
 0xc68   :  { %15710 = vxpose.xlu0.b32.cont [2/8] (short) (narrow) %v21632_v37, 8 }
 0xc6a   :  { %v21638_v17 = vpop.f32.mrb[126].mxu1 }
 0xc6b   :  { %v15650_v56 = vpop.f32.mrb[127].mxu1 }
 0xc6c   :  { %15711 = vxpose.xlu0.b32.cont [3/8] (short) (narrow) %v15640_v53, 8 }
 0xc6e   :  { %v21641_v14 = vpop.f32.mrb[128].mxu1 }
 0xc6f   :  { %v15660_v2 = vpop.f32.mrb[129].mxu1 }
 0xc70   :  { %15712 = vxpose.xlu0.b32.cont [4/8] (short) (narrow) %v21635_v39, 8 }
 0xc72   :  { %v21644_v52 = vpop.f32.mrb[130].mxu1 }
 0xc73   :  { %v15670_v61 = vpop.f32.mrb[131].mxu1 }
 0xc74   :  { %15713 = vxpose.xlu0.b32.cont [5/8] (short) (narrow) %v15650_v56, 8  ;;  %15842 = vxpose.xlu1.b32.start [1/8] (short) (narrow) %v15670_v61, 8 }
 0xc76   :  { %v21647_v38 = vpop.f32.mrb[132].mxu1 }
 0xc77   :  { %v15680_v63 = vpop.f32.mrb[133].mxu1 }
 0xc78   :  { %15714 = vxpose.xlu0.b32.cont [6/8] (short) (narrow) %v21638_v17, 8  ;;  %15843 = vxpose.xlu1.b32.cont [2/8] (short) (narrow) %v21644_v52, 8 }
 0xc7a   :  { %v21650_v30 = vpop.f32.mrb[134].mxu1 }
 0xc7b   :  { %v15690_v7 = vpop.f32.mrb[135].mxu1 }
 0xc7c   :  { %15715 = vxpose.xlu0.b32.cont [7/8] (short) (narrow) %v15660_v2, 8  ;;  %15844 = vxpose.xlu1.b32.cont [3/8] (short) (narrow) %v15680_v63, 8 }
 0xc7e   :  { %v21653_v8 = vpop.f32.mrb[136].mxu1 }
 0xc7f   :  { %v15700_v46 = vpop.f32.mrb[137].mxu1 }
 0xc80   :  { %15716 = vxpose.xlu0.b32.end [8/8] (short) (narrow) %v21641_v14, 8  ;;  %15845 = vxpose.xlu1.b32.cont [4/8] (short) (narrow) %v21647_v38, 8 }
 0xc84   :  { %15846 = vxpose.xlu1.b32.cont [5/8] (short) (narrow) %v15690_v7, 8 }
 0xc88   :  { %15847 = vxpose.xlu1.b32.cont [6/8] (short) (narrow) %v21650_v30, 8 }
 0xc8c   :  { %15848 = vxpose.xlu1.b32.cont [7/8] (short) (narrow) %v15700_v46, 8 }
 0xc90   :  { %15849 = vxpose.xlu1.b32.end [8/8] (short) (narrow) %v21653_v8, 8 }
 0xca9   :  { %23146 = vset.pattern.permute.xlu0 %v23151_v48 }
 0xcaa   :  { %15760 = vperm.xlu0 %23146, %v15757_v41  }
 0xcae   :  { %23147 = vset.pattern.permute.xlu1 %v23151_v48 }
 0xcaf   :  { %15893 = vperm.xlu1 %23147, %v15757_v41  }
 0xce4   :  { %v15725_v10 = vpop.trf.xlu0 }
 0xce5   :  { %17888 = vmatmul.mubr.msk.f32.vlgmr.msra.gmra.mrb[138].mxu1 %vm6435_vm2, %v15725_v10 }
 0xce6   :  { %21977 = vmatpush1.bf16.msra.mxu1 %v28857_v20  ;;  %15963 = vmatprep.mubr.f32.mxu1 %v29394_v16 }
 0xce7   :  { %21979 = vmatprep.subr.bf16.mxu1 %v28859_v23 }
 0xcea   :  { %21981 = vmatpush1.bf16.msra.mxu1 %v21964_v36 }
 0xceb   :  { %21983 = vmatprep.subr.bf16.mxu1 %v21966_v21 }
 0xcee   :  { %21985 = vmatpush1.bf16.msra.mxu1 %v21968_v12 }
 0xcef   :  { %21987 = vmatprep.subr.bf16.mxu1 %v21970_v5 }
 0xcf2   :  { %21989 = vmatpush1.bf16.msra.mxu1 %v21972_v54 }
 0xcf4   :  { %v15858_v45 = vpop.trf.xlu1 }
 0xcf5   :  { %17889 = vmatmul.mubr.msk.f32.vlgmr.msra.gmra.mrb[140].mxu1 %vm6435_vm2, %v15858_v45 }
 0xd29   :  { %v15761_v9 = vpop.permute.xlu0 %15760 }
 0xd2e   :  { %v15894_v34 = vpop.permute.xlu1 %15893 }
 0xdb8   :  { %v15832_v26 = vpop.f32.mrb[138].mxu1 }
 0xdb9   :  { %v15833_v40 = vadd.f32 %v15832_v26, %v15761_v9  ;;  %v15834_v57 = vpop.f32.mrb[139].mxu1 }
 0xdba   :  { %v15835_v28 = vadd.f32 %v15834_v57, %v15761_v9 }
 0xdbc   :  { %v15839_v18 = vcombine.low %v15833_v40, %v15835_v28 }
 0xdbe   :  { %15841 = vst [vmem:[%s28917_s10] sm:$0x77] %v15839_v18 }
 0xdc8   :  { %v15965_v55 = vpop.f32.mrb[140].mxu1 }
 0xdc9   :  { %v15966_v33 = vadd.f32 %v15965_v55, %v15894_v34  ;;  %v15967_v24 = vpop.f32.mrb[141].mxu1 }
 0xdca   :  { %v15968_v50 = vadd.f32 %v15967_v24, %v15894_v34 }
 0xdcc   :  { %v15972_v1 = vcombine.low %v15966_v33, %v15968_v50 }
 0xdce   :  { %17890 = vst [vmem:[%s28917_s10 + $0x8] sm:$0x77] %v15972_v1 }

</bundles_post_ra>
